<compile_context>
chip_gen: v5e
topology: v5e:2x2
jax: 0.10.0
libtpu: 0.0.40
codegen_flags: <defaults>
</compile_context>

<pallas_src>
import jax
import jax.numpy as jnp
from jax.experimental import pallas as pl
from jax.experimental.pallas import tpu as pltpu

IN_FEATURES = 1280   # efficientnet_v2_s final backbone width
OUT_FEATURES = 1000  # ImageNet classes
OUT_PADDED = 1024    # next multiple of 128 -> lane-dense output stores


def _n_tiles_for_device():
    """2 N-tiles on v7x (one per TensorCore); 1 on single-TC chips (v5e/v6e)."""
    try:
        kind = jax.devices()[0].device_kind.lower()
    except Exception:
        kind = ""
    return 2 if ("v7" in kind or "7x" in kind) else 1


def prepare_head_params(w_t, b, n_tiles=None):
    """One-time (model-load-time) classifier-weight preparation.

    w_t: (1280, 1000) f32 — PyTorch Linear weight, already transposed (in, out)
    b:   (1000,)      f32 — Linear bias
    Returns:
      w_tiled: (n_tiles, 1280, TN) bf16 — padded, bf16, contiguous per N-tile
      b_tiled: (n_tiles, 1, TN)    f32  — padded bias, tiled to match
    """
    if n_tiles is None:
        n_tiles = _n_tiles_for_device()
    tn = OUT_PADDED // n_tiles
    pad_n = OUT_PADDED - OUT_FEATURES
    w_p = jnp.pad(w_t, ((0, 0), (0, pad_n))).astype(jnp.bfloat16)       # (1280, 1024)
    w_tiled = w_p.reshape(IN_FEATURES, n_tiles, tn).transpose(1, 0, 2)  # (nt, 1280, tn)
    b_p = jnp.pad(b.astype(jnp.float32), (0, pad_n))                    # (1024,)
    b_tiled = b_p.reshape(n_tiles, 1, tn)                               # (nt, 1, tn)
    return w_tiled, b_tiled


def _head_kernel(x_ref, w_ref, b_ref, o_ref):
    """AdaptiveAvgPool2d(1) + Flatten + Linear for one N-tile.

    x_ref: (B, C, S)  f32   backbone features, spatial flattened to the last
                            axis (S == H*W, or S == 1 if pre-pooled for v7x)
    w_ref: (C, TN)    bf16  padded Linear weight tile (squeezed leading dim)
    b_ref: (1, TN)    f32   padded Linear bias tile
    o_ref: (B, TN)    f32   logits tile
    """
    # Global average pool over the spatial axis (== AdaptiveAvgPool2d(1) +
    # Flatten). Dropout is identity in eval mode. Compute is negligible vs.
    # the weight DMA.
    pooled = jnp.mean(x_ref[...], axis=-1)                               # (B, C) f32
    # Linear: bf16 operands on the MXU, f32 accumulation, f32 bias add.
    acc = jnp.dot(pooled.astype(w_ref.dtype), w_ref[...],
                  preferred_element_type=jnp.float32)                    # (B, TN)
    o_ref[...] = (acc + b_ref[...]).astype(o_ref.dtype)


def efficientnet_conv6_head(x_nchw, w_tiled, b_tiled):
    """y = Linear(mean_{H,W}(x))  — pool + flatten + eval-dropout + Linear.

    x_nchw:  (B, 1280, H, W) f32 — backbone features (output of features[7])
    w_tiled: (n_tiles, 1280, TN) bf16 — from prepare_head_params
    b_tiled: (n_tiles, 1, TN)    f32  — from prepare_head_params
    returns  (B, 1000) f32 logits
    """
    B, C, H, W = x_nchw.shape
    assert C == IN_FEATURES, C
    n_tiles, _, tn = w_tiled.shape

    if n_tiles > 1:
        # v7x megacore: with the N axis sharded across the 2 TensorCores the
        # (constant-index) activation block is fetched by each core — pre-pool
        # so that shared block is only ~B*1280*4 bytes.
        x = jnp.mean(x_nchw, axis=(2, 3)).reshape(B, C, 1)               # (B, C, 1)
    else:
        # Single TC: free reshape (no transpose), pool fused into the kernel.
        x = x_nchw.reshape(B, C, H * W)                                  # (B, C, S)
    s_eff = x.shape[-1]

    y_p = pl.pallas_call(
        _head_kernel,
        out_shape=jax.ShapeDtypeStruct((B, OUT_PADDED), jnp.float32),
        grid_spec=pltpu.PrefetchScalarGridSpec(
            num_scalar_prefetch=0,
            grid=(n_tiles,),
            in_specs=[
                pl.BlockSpec((B, C, s_eff), lambda j: (0, 0, 0)),         # x (whole)
                pl.BlockSpec((None, IN_FEATURES, tn), lambda j: (j, 0, 0)),  # weight tile
                pl.BlockSpec((None, 1, tn), lambda j: (j, 0, 0)),            # bias tile
            ],
            out_specs=pl.BlockSpec((B, tn), lambda j: (0, j)),
        ),
        compiler_params=pltpu.CompilerParams(
            dimension_semantics=("parallel",),   # shard N-tiles across v7x's 2 TCs
        ),
    )(x, w_tiled, b_tiled)

    return y_p[:, :OUT_FEATURES]


if __name__ == "__main__":
    key = jax.random.PRNGKey(0)
    kx, kw, kb = jax.random.split(key, 3)

    # Small, module-consistent shapes: 1280-channel backbone map, 8x8 spatial.
    batch, spatial = 2, 8
    x = jax.random.normal(kx, (batch, IN_FEATURES, spatial, spatial), dtype=jnp.float32)
    # PyTorch stores Linear weight as (out, in); we keep the transposed (in, out).
    w_t = jax.random.normal(kw, (IN_FEATURES, OUT_FEATURES), dtype=jnp.float32) * 0.02
    b = jax.random.normal(kb, (OUT_FEATURES,), dtype=jnp.float32) * 0.02

    # One-time (model-load-time) weight preparation — NOT in the per-call path.
    w_tiled, b_tiled = prepare_head_params(w_t, b)

    y = efficientnet_conv6_head(x, w_tiled, b_tiled)
    y = jax.block_until_ready(y)
    assert y.shape == (batch, OUT_FEATURES), y.shape

    # References.
    pooled = jnp.mean(x.reshape(batch, IN_FEATURES, -1), axis=-1)        # (B, 1280)
    # (a) bf16-consistent reference (same operand quantization as the kernel).
    y_ref_bf16 = (pooled.astype(jnp.bfloat16).astype(jnp.float32)
                  @ w_t.astype(jnp.bfloat16).astype(jnp.float32)) + b
    # (b) full-f32 reference (loosened tolerance: expected bf16 quantization error).
    y_ref_f32 = pooled @ w_t + b

    err_bf16 = float(jnp.max(jnp.abs(y - y_ref_bf16)))
    err_f32 = float(jnp.max(jnp.abs(y - y_ref_f32)))
    assert jnp.allclose(y, y_ref_bf16, atol=2e-3, rtol=2e-3), err_bf16
    assert jnp.allclose(y, y_ref_f32, atol=3e-2, rtol=3e-2), err_f32
    assert bool(jnp.all(jnp.isfinite(y)))

    print("KERNEL_OK")
</pallas_src>

<mosaic_0001>
module attributes {stable_mosaic.version = 11 : i64} {
  func.func @_head_kernel(%arg0: i32, %arg1: memref<2x1280x64xf32, #tpu.memory_space<vmem>>, %arg2: memref<1x1280x1024xbf16, #tpu.memory_space<vmem>>, %arg3: memref<1x1x1024xf32, #tpu.memory_space<vmem>>, %arg4: memref<2x1024xf32, #tpu.memory_space<vmem>>) attributes {dimension_semantics = [#tpu.dimension_semantics<parallel>], iteration_bounds = array<i64: 1>, scalar_prefetch = 0 : i64, scratch_operands = 0 : i64, tpu.core_type = #tpu.core_type<tc>, window_params = [{pipeline_mode = #tpu.pipeline_mode<synchronous>, transform_indices = @transform_0, window_bounds = array<i64: 2, 1280, 64>}, {transform_indices = @transform_1, window_bounds = array<i64: 1, 1280, 1024>}, {transform_indices = @transform_2, window_bounds = array<i64: 1, 1, 1024>}, {transform_indices = @transform_3, window_bounds = array<i64: 2, 1024>}]} {
    %c0 = arith.constant 0 : index
    %c0_0 = arith.constant 0 : index
    %c0_1 = arith.constant 0 : index
    %0 = vector.load %arg1[%c0, %c0_0, %c0_1] : memref<2x1280x64xf32, #tpu.memory_space<vmem>>, vector<2x1280x64xf32>
    %cst = arith.constant dense<0.000000e+00> : vector<2x1280xf32>
    %1 = vector.multi_reduction <add>, %0, %cst [2] : vector<2x1280x64xf32> to vector<2x1280xf32>
    %cst_2 = arith.constant 6.400000e+01 : f32
    %2 = vector.broadcast %cst_2 : f32 to vector<2x1280xf32>
    %3 = arith.divf %1, %2 : vector<2x1280xf32>
    %4 = arith.truncf %3 : vector<2x1280xf32> to vector<2x1280xbf16>
    %c0_3 = arith.constant 0 : index
    %c0_4 = arith.constant 0 : index
    %c0_5 = arith.constant 0 : index
    %5 = vector.load %arg2[%c0_3, %c0_4, %c0_5] : memref<1x1280x1024xbf16, #tpu.memory_space<vmem>>, vector<1x1280x1024xbf16>
    %6 = vector.shape_cast %5 : vector<1x1280x1024xbf16> to vector<1280x1024xbf16>
    %cst_6 = arith.constant dense<0.000000e+00> : vector<2x1024xf32>
    %7 = tpu.matmul %4, %6, %cst_6 {dimension_numbers = #tpu.dot_dimension_numbers<[1], [0], [0], [1], [0, 0, 1, 1], [], []>} : vector<2x1280xbf16>, vector<1280x1024xbf16>, vector<2x1024xf32> -> vector<2x1024xf32>
    %c0_7 = arith.constant 0 : index
    %c0_8 = arith.constant 0 : index
    %c0_9 = arith.constant 0 : index
    %8 = vector.load %arg3[%c0_7, %c0_8, %c0_9] : memref<1x1x1024xf32, #tpu.memory_space<vmem>>, vector<1x1x1024xf32>
    %9 = vector.shape_cast %8 : vector<1x1x1024xf32> to vector<1x1024xf32>
    %10 = vector.broadcast %9 : vector<1x1024xf32> to vector<2x1024xf32>
    %11 = arith.addf %7, %10 : vector<2x1024xf32>
    %c0_10 = arith.constant 0 : index
    %c0_11 = arith.constant 0 : index
    %12 = vector.load %arg4[%c0_10, %c0_11] : memref<2x1024xf32, #tpu.memory_space<vmem>>, vector<2x1024xf32>
    tpu.vector_store %arg4[%c0_10, %c0_11], %11 {strides = array<i32>} : memref<2x1024xf32, #tpu.memory_space<vmem>>, vector<2x1024xf32>,
    return
  }
  func.func @transform_0(%arg0: i32) -> (i32, i32, i32) {
    %c0_i32 = arith.constant 0 : i32
    %c0_i32_0 = arith.constant 0 : i32
    %c0_i32_1 = arith.constant 0 : i32
    %c0_i32_2 = arith.constant 0 : i32
    return %c0_i32, %c0_i32_0, %c0_i32_1 : i32, i32, i32
  }
  func.func @transform_1(%arg0: i32) -> (i32, i32, i32) {
    %c0_i32 = arith.constant 0 : i32
    %c0_i32_0 = arith.constant 0 : i32
    %c0_i32_1 = arith.constant 0 : i32
    return %arg0, %c0_i32, %c0_i32_0 : i32, i32, i32
  }
  func.func @transform_2(%arg0: i32) -> (i32, i32, i32) {
    %c0_i32 = arith.constant 0 : i32
    %c0_i32_0 = arith.constant 0 : i32
    %c0_i32_1 = arith.constant 0 : i32
    return %arg0, %c0_i32, %c0_i32_0 : i32, i32, i32
  }
  func.func @transform_3(%arg0: i32) -> (i32, i32) {
    %c0_i32 = arith.constant 0 : i32
    %c0_i32_0 = arith.constant 0 : i32
    return %c0_i32, %arg0 : i32, i32
  }
}

</mosaic_0001>

<bundles_post_ra>
// kernel: tpu_custom_call.1
= control target key start
LH: loop header
LB: loop body
LE: loop exit
PB: predicated region body
PF: predicated region fallthrough
CT: control target
= control target key end

     0   :  { %8 = vsyncpa [#allocation3], 0  ;;  %s15022_s0 = inlined_call_operand.vmem [shape: f32[2,1280,64], index: 0, kind: input, shape index: {}]   ;;  %s15023_s1 = inlined_call_operand.hbm [shape: bf16[1,1280,1024], index: 1, kind: input, shape index: {}]   ;;  %s15024_s2 = inlined_call_operand.hbm [shape: f32[1,1,1024], index: 2, kind: input, shape index: {}]   ;;  %s15025_s3 = inlined_call_operand.hbm [shape: f32[2,1024], index: 3, kind: output, shape index: {}]  }
   0x1   :  { %9 = vsyncpa [#allocation6], 0 }
   0x2   :  { %10 = vsyncpa [#allocation4], 0  ;;  %s17_s14 = sshll.u32 %s15023_s1, 4  ;;  %s11209_s15 = smov [#allocation2]   ;;  %s18_s14 = int_to_ptr.hbm [resolvable:$true] %s17_s14 }
   0x3   :  { %s19_s16 = sshll.u32 %s11209_s15, 4  ;;  %s31_s19 = sshll.u32 %s15024_s2, 4  ;;  %s20_s16 = int_to_ptr.vmem [resolvable:$true] %s19_s16  ;;  %s32_s19 = int_to_ptr.hbm [resolvable:$true] %s31_s19 }
   0x4   :  { %s11210_s20 = smov 512   ;;  %s11211_s21 = smov 32  }
   0x5   :  { %25 = dma.hbm_to_vmem [thread:$0]  %s18_s14, 81920, %s20_s16, [#allocation3], %s11210_s20, %s11210_s20, %s11211_s21  }
   0x6   :  { %s11212_s22 = smov [#allocation5]  }
   0x7   :  { %s33_s23 = sshll.u32 %s11212_s22, 4  ;;  %s34_s23 = int_to_ptr.vmem [resolvable:$true] %s33_s23 }
   0x8   :  { %36 = dma.hbm_to_vmem [thread:$0]  %s32_s19, 128, %s34_s23, [#allocation6]  }
   0x9   :  { %11203 = dma.done.wait [#allocation3], 81920  }
   0xa   :  { %11204 = vsyncadd [#allocation3], 4294885376 }
   0xb   :  { %11205 = dma.done.wait [#allocation6], 128  }
   0xc   :  { %11206 = vsyncadd [#allocation6], 4294967168  ;;  %vm365_vm0 = vcmask 523264   ;;  %v49_v0 = vld [vmem:[%s15022_s0 + $0x20] sm:$0xff]  ;;  %v47_v1 = vld [vmem:[%s15022_s0 + $0x10] sm:$0xff]  ;;  %vm2956_vm2 = vcmask 130112  }
   0xd   :  { %v45_v2 = vld [vmem:[%s15022_s0] sm:$0xff]  ;;  %v378_v3 = vsel %vm365_vm0, %v49_v0, 0.0  ;;  %v372_v4 = vsel %vm365_vm0, %v47_v1, 0.0  ;;  %v50_v6 = vld [vmem:[%s15022_s0 + $0x28] sm:$0xff]  ;;  %v48_v7 = vld [vmem:[%s15022_s0 + $0x18] sm:$0xff]  ;;  %vm2960_vm3 = vcmask 195712  }
   0xe   :  { %v366_v5 = vsel %vm365_vm0, %v45_v2, 0.0  ;;  %379 = vadd.xlane.f32.xlu2 %v378_v3  ;;  %373 = vadd.xlane.f32.xlu1 %v372_v4  ;;  %v46_v8 = vld [vmem:[%s15022_s0 + $0x8] sm:$0xff]  ;;  %v381_v9 = vsel %vm365_vm0, %v50_v6, 0.0  ;;  %v375_v10 = vsel %vm365_vm0, %v48_v7, 0.0  ;;  %v53_v12 = vld [vmem:[%s15022_s0 + $0x40] sm:$0xff]  ;;  %v52_v13 = vld [vmem:[%s15022_s0 + $0x38] sm:$0xff] }
   0xf   :  { %367 = vadd.xlane.f32.xlu0 %v366_v5  ;;  %v369_v11 = vsel %vm365_vm0, %v46_v8, 0.0  ;;  %v51_v14 = vld [vmem:[%s15022_s0 + $0x30] sm:$0xff]  ;;  %v390_v15 = vsel %vm365_vm0, %v53_v12, 0.0  ;;  %v387_v16 = vsel %vm365_vm0, %v52_v13, 0.0  ;;  %v56_v18 = vld [vmem:[%s15022_s0 + $0x58] sm:$0xff]  ;;  %v54_v20 = vld [vmem:[%s15022_s0 + $0x48] sm:$0xff] }
  0x10   :  { %v384_v17 = vsel %vm365_vm0, %v51_v14, 0.0  ;;  %v55_v19 = vld [vmem:[%s15022_s0 + $0x50] sm:$0xff]  ;;  %v399_v21 = vsel %vm365_vm0, %v56_v18, 0.0  ;;  %v393_v23 = vsel %vm365_vm0, %v54_v20, 0.0  ;;  %v58_v25 = vld [vmem:[%s15022_s0 + $0x68] sm:$0xff]  ;;  %v57_v26 = vld [vmem:[%s15022_s0 + $0x60] sm:$0xff] }
  0x11   :  { %v396_v22 = vsel %vm365_vm0, %v55_v19, 0.0  ;;  %v59_v24 = vld [vmem:[%s15022_s0 + $0x70] sm:$0xff]  ;;  %v405_v28 = vsel %vm365_vm0, %v58_v25, 0.0  ;;  %v402_v29 = vsel %vm365_vm0, %v57_v26, 0.0  ;;  %v62_v30 = vld [vmem:[%s15022_s0 + $0x88] sm:$0xff]  ;;  %v61_v31 = vld [vmem:[%s15022_s0 + $0x80] sm:$0xff] }
  0x12   :  { %v408_v27 = vsel %vm365_vm0, %v59_v24, 0.0  ;;  %v60_v32 = vld [vmem:[%s15022_s0 + $0x78] sm:$0xff]  ;;  %v417_v33 = vsel %vm365_vm0, %v62_v30, 0.0  ;;  %v414_v34 = vsel %vm365_vm0, %v61_v31, 0.0  ;;  %v65_v36 = vld [vmem:[%s15022_s0 + $0xa0] sm:$0xff]  ;;  %v63_v38 = vld [vmem:[%s15022_s0 + $0x90] sm:$0xff] }
  0x13   :  { %v411_v35 = vsel %vm365_vm0, %v60_v32, 0.0  ;;  %v64_v37 = vld [vmem:[%s15022_s0 + $0x98] sm:$0xff]  ;;  %v426_v39 = vsel %vm365_vm0, %v65_v36, 0.0  ;;  %v420_v41 = vsel %vm365_vm0, %v63_v38, 0.0  ;;  %v67_v43 = vld [vmem:[%s15022_s0 + $0xb0] sm:$0xff]  ;;  %v66_v44 = vld [vmem:[%s15022_s0 + $0xa8] sm:$0xff] }
  0x14   :  { %v423_v40 = vsel %vm365_vm0, %v64_v37, 0.0  ;;  %v68_v42 = vld [vmem:[%s15022_s0 + $0xb8] sm:$0xff]  ;;  %v432_v46 = vsel %vm365_vm0, %v67_v43, 0.0  ;;  %v429_v47 = vsel %vm365_vm0, %v66_v44, 0.0  ;;  %v71_v48 = vld [vmem:[%s15022_s0 + $0xd0] sm:$0xff]  ;;  %v70_v49 = vld [vmem:[%s15022_s0 + $0xc8] sm:$0xff] }
  0x15   :  { %v435_v45 = vsel %vm365_vm0, %v68_v42, 0.0  ;;  %v69_v50 = vld [vmem:[%s15022_s0 + $0xc0] sm:$0xff]  ;;  %v444_v51 = vsel %vm365_vm0, %v71_v48, 0.0  ;;  %v441_v52 = vsel %vm365_vm0, %v70_v49, 0.0  ;;  %v74_v54 = vld [vmem:[%s15022_s0 + $0xe8] sm:$0xff]  ;;  %v72_v56 = vld [vmem:[%s15022_s0 + $0xd8] sm:$0xff] }
  0x16   :  { %382 = vadd.xlane.f32.xlu2 %v381_v9  ;;  %376 = vadd.xlane.f32.xlu1 %v375_v10  ;;  %v438_v53 = vsel %vm365_vm0, %v69_v50, 0.0  ;;  %v73_v55 = vld [vmem:[%s15022_s0 + $0xe0] sm:$0xff]  ;;  %v453_v57 = vsel %vm365_vm0, %v74_v54, 0.0  ;;  %v447_v59 = vsel %vm365_vm0, %v72_v56, 0.0  ;;  %v76_v61 = vld [vmem:[%s15022_s0 + $0xf8] sm:$0xff]  ;;  %v75_v62 = vld [vmem:[%s15022_s0 + $0xf0] sm:$0xff] }
  0x17   :  { %370 = vadd.xlane.f32.xlu0 %v369_v11  ;;  %v450_v58 = vsel %vm365_vm0, %v73_v55, 0.0  ;;  %v77_v60 = vld [vmem:[%s15022_s0 + $0x100] sm:$0xff]  ;;  %v459_v0 = vsel %vm365_vm0, %v76_v61, 0.0  ;;  %v456_v1 = vsel %vm365_vm0, %v75_v62, 0.0  ;;  %v80_v2 = vld [vmem:[%s15022_s0 + $0x118] sm:$0xff]  ;;  %v79_v3 = vld [vmem:[%s15022_s0 + $0x110] sm:$0xff] }
  0x18   :  { %v462_v63 = vsel %vm365_vm0, %v77_v60, 0.0  ;;  %v78_v4 = vld [vmem:[%s15022_s0 + $0x108] sm:$0xff]  ;;  %v471_v5 = vsel %vm365_vm0, %v80_v2, 0.0  ;;  %v468_v6 = vsel %vm365_vm0, %v79_v3, 0.0  ;;  %v83_v8 = vld [vmem:[%s15022_s0 + $0x130] sm:$0xff]  ;;  %v81_v10 = vld [vmem:[%s15022_s0 + $0x120] sm:$0xff] }
  0x19   :  { %v465_v7 = vsel %vm365_vm0, %v78_v4, 0.0  ;;  %v82_v9 = vld [vmem:[%s15022_s0 + $0x128] sm:$0xff]  ;;  %v480_v11 = vsel %vm365_vm0, %v83_v8, 0.0  ;;  %v474_v13 = vsel %vm365_vm0, %v81_v10, 0.0  ;;  %v89_v20 = vld [vmem:[%s15022_s0 + $0x160] sm:$0xff]  ;;  %v92_v26 = vld [vmem:[%s15022_s0 + $0x178] sm:$0xff] }
  0x1a   :  { %v477_v12 = vsel %vm365_vm0, %v82_v9, 0.0  ;;  %v86_v14 = vld [vmem:[%s15022_s0 + $0x148] sm:$0xff]  ;;  %v507_v32 = vsel %vm365_vm0, %v92_v26, 0.0  ;;  %v96_v48 = vld [vmem:[%s15022_s0 + $0x198] sm:$0xff]  ;;  %vm15030_vm4 = vcmask 261312   ;;  %vm2968_vm5 = vcmask 326912  }
  0x1b   :  { %v90_v30 = vld [vmem:[%s15022_s0 + $0x168] sm:$0xff]  ;;  %v100_v54 = vld [vmem:[%s15022_s0 + $0x1b8] sm:$0xff]  ;;  %vm2972_vm6 = vcmask 392512   ;;  %vm2976_vm7 = vcmask 458112   ;;  %vm2980_vm8 = vcmask 523712   ;;  %vm2984_vm9 = vcmask 589312  }
  0x1c   :  { %v94_v36 = vld [vmem:[%s15022_s0 + $0x188] sm:$0xff]  ;;  %v531_v60 = vsel %vm365_vm0, %v100_v54, 0.0  ;;  %v104_v62 = vld [vmem:[%s15022_s0 + $0x1d8] sm:$0xff]  ;;  %vm2988_vm10 = vcmask 654912   ;;  %vm2992_vm11 = vcmask 720512   ;;  %vm2996_vm12 = vcmask 786112  }
  0x1d   :  { %v513_v42 = vsel %vm365_vm0, %v94_v36, 0.0  ;;  %v98_v44 = vld [vmem:[%s15022_s0 + $0x1a8] sm:$0xff]  ;;  %v543_v4 = vsel %vm365_vm0, %v104_v62, 0.0  ;;  %v112_v26 = vld [vmem:[%s15022_s0 + $0x218] sm:$0xff]  ;;  %vm3000_vm13 = vcmask 851712   ;;  %vm3004_vm14 = vcmask 917312  }
  0x1e   :  { %391 = vadd.xlane.f32.xlu2 %v390_v15  ;;  %388 = vadd.xlane.f32.xlu1 %v387_v16  ;;  %v85_v15 = vld [vmem:[%s15022_s0 + $0x140] sm:$0xff]  ;;  %v84_v16 = vld [vmem:[%s15022_s0 + $0x138] sm:$0xff]  ;;  %v525_v50 = vsel %vm365_vm0, %v98_v44, 0.0  ;;  %v102_v2 = vld [vmem:[%s15022_s0 + $0x1c8] sm:$0xff]  ;;  %vm3008_vm15 = vcmask 982912   ;;  %s7908_s27 = sshll.u32 %s15025_s3, 4  ;;  %s7909_s27 = int_to_ptr.hbm [resolvable:$true] %s7908_s27 }
  0x1f   :  { %385 = vadd.xlane.f32.xlu0 %v384_v17  ;;  %v489_v17 = vsel %vm365_vm0, %v86_v14, 0.0  ;;  %v486_v18 = vsel %vm365_vm0, %v85_v15, 0.0  ;;  %v483_v19 = vsel %vm365_vm0, %v84_v16, 0.0  ;;  %v106_v8 = vld [vmem:[%s15022_s0 + $0x1e8] sm:$0xff] }
  0x20   :  { %v549_v14 = vsel %vm365_vm0, %v106_v8, 0.0  ;;  %v110_v16 = vld [vmem:[%s15022_s0 + $0x208] sm:$0xff] }
  0x21   :  { %v114_v44 = vld [vmem:[%s15022_s0 + $0x228] sm:$0xff] }
  0x26   :  { %400 = vadd.xlane.f32.xlu2 %v399_v21  ;;  %397 = vadd.xlane.f32.xlu1 %v396_v22  ;;  %v88_v21 = vld [vmem:[%s15022_s0 + $0x158] sm:$0xff]  ;;  %v87_v22 = vld [vmem:[%s15022_s0 + $0x150] sm:$0xff] }
  0x27   :  { %394 = vadd.xlane.f32.xlu0 %v393_v23  ;;  %v498_v23 = vsel %vm365_vm0, %v89_v20, 0.0  ;;  %v495_v24 = vsel %vm365_vm0, %v88_v21, 0.0  ;;  %v492_v25 = vsel %vm365_vm0, %v87_v22, 0.0  ;;  %v108_v20 = vld [vmem:[%s15022_s0 + $0x1f8] sm:$0xff]  ;;  %v561_v22 = vsel %vm365_vm0, %v110_v16, 0.0 }
  0x28   :  { %v124_v16 = vld [vmem:[%s15022_s0 + $0x278] sm:$0xff] }
  0x2e   :  { %409 = vadd.xlane.f32.xlu2 %v408_v27  ;;  %406 = vadd.xlane.f32.xlu1 %v405_v28  ;;  %v91_v27 = vld [vmem:[%s15022_s0 + $0x170] sm:$0xff] }
  0x2f   :  { %403 = vadd.xlane.f32.xlu0 %v402_v29 }
  0x36   :  { %418 = vadd.xlane.f32.xlu2 %v417_v33  ;;  %415 = vadd.xlane.f32.xlu1 %v414_v34  ;;  %v504_v33 = vsel %vm365_vm0, %v91_v27, 0.0  ;;  %v501_v34 = vsel %vm365_vm0, %v90_v30, 0.0 }
  0x37   :  { %412 = vadd.xlane.f32.xlu0 %v411_v35  ;;  %v95_v35 = vld [vmem:[%s15022_s0 + $0x190] sm:$0xff] }
  0x3e   :  { %427 = vadd.xlane.f32.xlu2 %v426_v39  ;;  %424 = vadd.xlane.f32.xlu1 %v423_v40  ;;  %v93_v39 = vld [vmem:[%s15022_s0 + $0x180] sm:$0xff] }
  0x3f   :  { %421 = vadd.xlane.f32.xlu0 %v420_v41  ;;  %v516_v41 = vsel %vm365_vm0, %v95_v35, 0.0  ;;  %v510_v43 = vsel %vm365_vm0, %v93_v39, 0.0  ;;  %v567_v35 = vsel %vm365_vm0, %v112_v26, 0.0  ;;  %v116_v39 = vld [vmem:[%s15022_s0 + $0x238] sm:$0xff] }
  0x46   :  { %436 = vadd.xlane.f32.xlu2 %v435_v45  ;;  %433 = vadd.xlane.f32.xlu1 %v432_v46  ;;  %v97_v45 = vld [vmem:[%s15022_s0 + $0x1a0] sm:$0xff] }
  0x47   :  { %430 = vadd.xlane.f32.xlu0 %v429_v47 }
  0x4e   :  { %445 = vadd.xlane.f32.xlu2 %v444_v51  ;;  %442 = vadd.xlane.f32.xlu1 %v441_v52  ;;  %v522_v51 = vsel %vm365_vm0, %v97_v45, 0.0  ;;  %v519_v52 = vsel %vm365_vm0, %v96_v48, 0.0  ;;  %v579_v48 = vsel %vm365_vm0, %v116_v39, 0.0  ;;  %v126_v39 = vld [vmem:[%s15022_s0 + $0x288] sm:$0xff] }
  0x4f   :  { %439 = vadd.xlane.f32.xlu0 %v438_v53  ;;  %v101_v53 = vld [vmem:[%s15022_s0 + $0x1c0] sm:$0xff] }
  0x56   :  { %454 = vadd.xlane.f32.xlu2 %v453_v57  ;;  %451 = vadd.xlane.f32.xlu1 %v450_v58  ;;  %v99_v57 = vld [vmem:[%s15022_s0 + $0x1b0] sm:$0xff] }
  0x57   :  { %448 = vadd.xlane.f32.xlu0 %v447_v59  ;;  %v534_v59 = vsel %vm365_vm0, %v101_v53, 0.0  ;;  %v528_v61 = vsel %vm365_vm0, %v99_v57, 0.0  ;;  %v118_v53 = vld [vmem:[%s15022_s0 + $0x248] sm:$0xff] }
  0x58   :  { %v585_v62 = vsel %vm365_vm0, %v118_v53, 0.0 }
  0x5e   :  { %463 = vadd.xlane.f32.xlu2 %v462_v63  ;;  %460 = vadd.xlane.f32.xlu1 %v459_v0  ;;  %v103_v63 = vld [vmem:[%s15022_s0 + $0x1d0] sm:$0xff] }
  0x5f   :  { %457 = vadd.xlane.f32.xlu0 %v456_v1 }
  0x66   :  { %472 = vadd.xlane.f32.xlu2 %v471_v5  ;;  %469 = vadd.xlane.f32.xlu1 %v468_v6  ;;  %v540_v5 = vsel %vm365_vm0, %v103_v63, 0.0  ;;  %v537_v6 = vsel %vm365_vm0, %v102_v2, 0.0  ;;  %v122_v2 = vld [vmem:[%s15022_s0 + $0x268] sm:$0xff] }
  0x67   :  { %466 = vadd.xlane.f32.xlu0 %v465_v7  ;;  %v107_v7 = vld [vmem:[%s15022_s0 + $0x1f0] sm:$0xff] }
  0x6e   :  { %481 = vadd.xlane.f32.xlu2 %v480_v11  ;;  %478 = vadd.xlane.f32.xlu1 %v477_v12  ;;  %v105_v11 = vld [vmem:[%s15022_s0 + $0x1e0] sm:$0xff] }
  0x6f   :  { %475 = vadd.xlane.f32.xlu0 %v474_v13  ;;  %v552_v13 = vsel %vm365_vm0, %v107_v7, 0.0  ;;  %v546_v15 = vsel %vm365_vm0, %v105_v11, 0.0  ;;  %v120_v7 = vld [vmem:[%s15022_s0 + $0x258] sm:$0xff]  ;;  %v597_v11 = vsel %vm365_vm0, %v122_v2, 0.0 }
  0x76   :  { %490 = vadd.xlane.f32.xlu2 %v489_v17  ;;  %487 = vadd.xlane.f32.xlu1 %v486_v18  ;;  %v109_v17 = vld [vmem:[%s15022_s0 + $0x200] sm:$0xff] }
  0x77   :  { %484 = vadd.xlane.f32.xlu0 %v483_v19 }
  0x7e   :  { %499 = vadd.xlane.f32.xlu2 %v498_v23  ;;  %496 = vadd.xlane.f32.xlu1 %v495_v24  ;;  %v558_v23 = vsel %vm365_vm0, %v109_v17, 0.0  ;;  %v555_v24 = vsel %vm365_vm0, %v108_v20, 0.0 }
  0x7f   :  { %493 = vadd.xlane.f32.xlu0 %v492_v25  ;;  %v113_v25 = vld [vmem:[%s15022_s0 + $0x220] sm:$0xff] }
  0x81   :  { %v11427_v28 = vpop.xlane.xlu2 %379  ;;  %v11429_v29 = vpop.xlane.xlu1 %373 }
  0x82   :  { %v11434_v31 = vpop.xlane.xlu0 %367 }
  0x86   :  { %508 = vadd.xlane.f32.xlu2 %v507_v32  ;;  %505 = vadd.xlane.f32.xlu1 %v504_v33  ;;  %v111_v32 = vld [vmem:[%s15022_s0 + $0x210] sm:$0xff] }
  0x87   :  { %502 = vadd.xlane.f32.xlu0 %v501_v34  ;;  %v570_v34 = vsel %vm365_vm0, %v113_v25, 0.0  ;;  %v564_v36 = vsel %vm365_vm0, %v111_v32, 0.0  ;;  %v603_v25 = vsel %vm365_vm0, %v124_v16, 0.0  ;;  %v128_v32 = vld [vmem:[%s15022_s0 + $0x298] sm:$0xff] }
  0x89   :  { %v11445_v37 = vpop.xlane.xlu2 %382  ;;  %v11447_v38 = vpop.xlane.xlu1 %376 }
  0x8a   :  { %v11452_v40 = vpop.xlane.xlu0 %370 }
  0x8e   :  { %517 = vadd.xlane.f32.xlu2 %v516_v41  ;;  %514 = vadd.xlane.f32.xlu1 %v513_v42  ;;  %v115_v41 = vld [vmem:[%s15022_s0 + $0x230] sm:$0xff] }
  0x8f   :  { %511 = vadd.xlane.f32.xlu0 %v510_v43 }
  0x91   :  { %v11463_v46 = vpop.xlane.xlu2 %391  ;;  %v11465_v47 = vpop.xlane.xlu1 %388 }
  0x92   :  { %v11470_v49 = vpop.xlane.xlu0 %385 }
  0x96   :  { %526 = vadd.xlane.f32.xlu2 %v525_v50  ;;  %523 = vadd.xlane.f32.xlu1 %v522_v51  ;;  %v576_v50 = vsel %vm365_vm0, %v115_v41, 0.0  ;;  %v573_v51 = vsel %vm365_vm0, %v114_v44, 0.0  ;;  %v615_v44 = vsel %vm365_vm0, %v128_v32, 0.0  ;;  %v136_v32 = vld [vmem:[%s15022_s0 + $0x2d8] sm:$0xff] }
  0x97   :  { %520 = vadd.xlane.f32.xlu0 %v519_v52  ;;  %v119_v52 = vld [vmem:[%s15022_s0 + $0x250] sm:$0xff] }
  0x99   :  { %v11481_v55 = vpop.xlane.xlu2 %400  ;;  %v11483_v56 = vpop.xlane.xlu1 %397 }
  0x9a   :  { %v11488_v58 = vpop.xlane.xlu0 %394 }
  0x9e   :  { %535 = vadd.xlane.f32.xlu2 %v534_v59  ;;  %532 = vadd.xlane.f32.xlu1 %v531_v60  ;;  %v117_v59 = vld [vmem:[%s15022_s0 + $0x240] sm:$0xff] }
  0x9f   :  { %529 = vadd.xlane.f32.xlu0 %v528_v61  ;;  %v588_v61 = vsel %vm365_vm0, %v119_v52, 0.0  ;;  %v582_v63 = vsel %vm365_vm0, %v117_v59, 0.0  ;;  %v130_v52 = vld [vmem:[%s15022_s0 + $0x2a8] sm:$0xff] }
  0xa0   :  { %v621_v2 = vsel %vm365_vm0, %v130_v52, 0.0 }
  0xa1   :  { %v11499_v0 = vpop.xlane.xlu2 %409  ;;  %v11501_v1 = vpop.xlane.xlu1 %406 }
  0xa2   :  { %v11506_v3 = vpop.xlane.xlu0 %403 }
  0xa6   :  { %544 = vadd.xlane.f32.xlu2 %v543_v4  ;;  %541 = vadd.xlane.f32.xlu1 %v540_v5  ;;  %v121_v4 = vld [vmem:[%s15022_s0 + $0x260] sm:$0xff] }
  0xa7   :  { %538 = vadd.xlane.f32.xlu0 %v537_v6 }
  0xa9   :  { %v11517_v9 = vpop.xlane.xlu2 %418  ;;  %v11519_v10 = vpop.xlane.xlu1 %415 }
  0xaa   :  { %v11524_v12 = vpop.xlane.xlu0 %412 }
  0xae   :  { %553 = vadd.xlane.f32.xlu2 %v552_v13  ;;  %550 = vadd.xlane.f32.xlu1 %v549_v14  ;;  %v594_v13 = vsel %vm365_vm0, %v121_v4, 0.0  ;;  %v591_v14 = vsel %vm365_vm0, %v120_v7, 0.0  ;;  %v134_v7 = vld [vmem:[%s15022_s0 + $0x2c8] sm:$0xff] }
  0xaf   :  { %547 = vadd.xlane.f32.xlu0 %v546_v15  ;;  %v125_v15 = vld [vmem:[%s15022_s0 + $0x280] sm:$0xff] }
  0xb1   :  { %v11535_v18 = vpop.xlane.xlu2 %427  ;;  %v11537_v19 = vpop.xlane.xlu1 %424 }
  0xb2   :  { %v11542_v21 = vpop.xlane.xlu0 %421 }
  0xb6   :  { %562 = vadd.xlane.f32.xlu2 %v561_v22  ;;  %559 = vadd.xlane.f32.xlu1 %v558_v23  ;;  %v123_v22 = vld [vmem:[%s15022_s0 + $0x270] sm:$0xff] }
  0xb7   :  { %556 = vadd.xlane.f32.xlu0 %v555_v24  ;;  %v606_v24 = vsel %vm365_vm0, %v125_v15, 0.0  ;;  %v600_v26 = vsel %vm365_vm0, %v123_v22, 0.0  ;;  %v132_v15 = vld [vmem:[%s15022_s0 + $0x2b8] sm:$0xff]  ;;  %v633_v22 = vsel %vm365_vm0, %v134_v7, 0.0  ;;  %v138_v7 = vld [vmem:[%s15022_s0 + $0x2e8] sm:$0xff] }
  0xb9   :  { %v11553_v27 = vpop.xlane.xlu2 %436  ;;  %v11555_v30 = vpop.xlane.xlu1 %433 }
  0xba   :  { %v11560_v33 = vpop.xlane.xlu0 %430 }
  0xbe   :  { %571 = vadd.xlane.f32.xlu2 %v570_v34  ;;  %568 = vadd.xlane.f32.xlu1 %v567_v35  ;;  %v127_v34 = vld [vmem:[%s15022_s0 + $0x290] sm:$0xff] }
  0xbf   :  { %565 = vadd.xlane.f32.xlu0 %v564_v36 }
  0xc1   :  { %v11571_v42 = vpop.xlane.xlu2 %445  ;;  %v11573_v43 = vpop.xlane.xlu1 %442 }
  0xc2   :  { %v11578_v45 = vpop.xlane.xlu0 %439 }
  0xc6   :  { %580 = vadd.xlane.f32.xlu2 %v579_v48  ;;  %577 = vadd.xlane.f32.xlu1 %v576_v50  ;;  %v612_v48 = vsel %vm365_vm0, %v127_v34, 0.0  ;;  %v609_v50 = vsel %vm365_vm0, %v126_v39, 0.0 }
  0xc7   :  { %574 = vadd.xlane.f32.xlu0 %v573_v51  ;;  %v131_v51 = vld [vmem:[%s15022_s0 + $0x2b0] sm:$0xff] }
  0xc9   :  { %v11589_v54 = vpop.xlane.xlu2 %454  ;;  %v11591_v57 = vpop.xlane.xlu1 %451 }
  0xca   :  { %v11596_v60 = vpop.xlane.xlu0 %448 }
  0xce   :  { %589 = vadd.xlane.f32.xlu2 %v588_v61  ;;  %586 = vadd.xlane.f32.xlu1 %v585_v62  ;;  %v129_v61 = vld [vmem:[%s15022_s0 + $0x2a0] sm:$0xff] }
  0xcf   :  { %583 = vadd.xlane.f32.xlu0 %v582_v63  ;;  %v624_v63 = vsel %vm365_vm0, %v131_v51, 0.0  ;;  %v618_v4 = vsel %vm365_vm0, %v129_v61, 0.0  ;;  %v639_v51 = vsel %vm365_vm0, %v136_v32, 0.0  ;;  %v140_v61 = vld [vmem:[%s15022_s0 + $0x2f8] sm:$0xff] }
  0xd1   :  { %v11607_v5 = vpop.xlane.xlu2 %463  ;;  %v11609_v6 = vpop.xlane.xlu1 %460 }
  0xd2   :  { %v11614_v8 = vpop.xlane.xlu0 %457 }
  0xd3   :  { %15064 = vst [vmem:[#allocation11_spill] sm:$0xff] %v11614_v8 }
  0xd6   :  { %598 = vadd.xlane.f32.xlu2 %v597_v11  ;;  %595 = vadd.xlane.f32.xlu1 %v594_v13  ;;  %v133_v11 = vld [vmem:[%s15022_s0 + $0x2c0] sm:$0xff] }
  0xd7   :  { %592 = vadd.xlane.f32.xlu0 %v591_v14 }
  0xd9   :  { %v11625_v17 = vpop.xlane.xlu2 %472  ;;  %v11627_v20 = vpop.xlane.xlu1 %469 }
  0xda   :  { %v11632_v23 = vpop.xlane.xlu0 %466 }
  0xde   :  { %607 = vadd.xlane.f32.xlu2 %v606_v24  ;;  %604 = vadd.xlane.f32.xlu1 %v603_v25  ;;  %v630_v24 = vsel %vm365_vm0, %v133_v11, 0.0  ;;  %v627_v25 = vsel %vm365_vm0, %v132_v15, 0.0  ;;  %v651_v15 = vsel %vm365_vm0, %v140_v61, 0.0 }
  0xdf   :  { %601 = vadd.xlane.f32.xlu0 %v600_v26  ;;  %v137_v26 = vld [vmem:[%s15022_s0 + $0x2e0] sm:$0xff] }
  0xe1   :  { %v11643_v35 = vpop.xlane.xlu2 %481  ;;  %v11645_v36 = vpop.xlane.xlu1 %478 }
  0xe2   :  { %v11650_v41 = vpop.xlane.xlu0 %475 }
  0xe6   :  { %616 = vadd.xlane.f32.xlu2 %v615_v44  ;;  %613 = vadd.xlane.f32.xlu1 %v612_v48  ;;  %v135_v44 = vld [vmem:[%s15022_s0 + $0x2d0] sm:$0xff] }
  0xe7   :  { %610 = vadd.xlane.f32.xlu0 %v609_v50  ;;  %v642_v50 = vsel %vm365_vm0, %v137_v26, 0.0  ;;  %v636_v52 = vsel %vm365_vm0, %v135_v44, 0.0  ;;  %v142_v26 = vld [vmem:[%s15022_s0 + $0x308] sm:$0xff] }
  0xe8   :  { %v657_v61 = vsel %vm365_vm0, %v142_v26, 0.0 }
  0xe9   :  { %v11661_v53 = vpop.xlane.xlu2 %490  ;;  %v11663_v59 = vpop.xlane.xlu1 %487 }
  0xea   :  { %v11668_v62 = vpop.xlane.xlu0 %484 }
  0xee   :  { %625 = vadd.xlane.f32.xlu2 %v624_v63  ;;  %622 = vadd.xlane.f32.xlu1 %v621_v2  ;;  %v139_v63 = vld [vmem:[%s15022_s0 + $0x2f0] sm:$0xff] }
  0xef   :  { %619 = vadd.xlane.f32.xlu0 %v618_v4 }
  0xf1   :  { %v11679_v13 = vpop.xlane.xlu2 %499  ;;  %v11681_v14 = vpop.xlane.xlu1 %496 }
  0xf2   :  { %15065 = vst [vmem:[#allocation12_spill] sm:$0xff] %v11679_v13  ;;  %v11686_v16 = vpop.xlane.xlu0 %493 }
  0xf3   :  { %15066 = vst [vmem:[#allocation13_spill] sm:$0xff] %v11681_v14 }
  0xf4   :  { %15067 = vst [vmem:[#allocation14_spill] sm:$0xff] %v11686_v16 }
  0xf6   :  { %634 = vadd.xlane.f32.xlu2 %v633_v22  ;;  %631 = vadd.xlane.f32.xlu1 %v630_v24  ;;  %v648_v22 = vsel %vm365_vm0, %v139_v63, 0.0  ;;  %v645_v24 = vsel %vm365_vm0, %v138_v7, 0.0  ;;  %v146_v7 = vld [vmem:[%s15022_s0 + $0x328] sm:$0xff] }
  0xf7   :  { %628 = vadd.xlane.f32.xlu0 %v627_v25  ;;  %v143_v25 = vld [vmem:[%s15022_s0 + $0x310] sm:$0xff] }
  0xf9   :  { %v11697_v34 = vpop.xlane.xlu2 %508  ;;  %v11699_v39 = vpop.xlane.xlu1 %505 }
  0xfa   :  { %15068 = vst [vmem:[#allocation15_spill] sm:$0xff] %v11697_v34  ;;  %v11704_v48 = vpop.xlane.xlu0 %502 }
  0xfb   :  { %15069 = vst [vmem:[#allocation16_spill] sm:$0xff] %v11699_v39 }
  0xfc   :  { %15070 = vst [vmem:[#allocation17_spill] sm:$0xff] %v11704_v48 }
  0xfe   :  { %643 = vadd.xlane.f32.xlu2 %v642_v50  ;;  %640 = vadd.xlane.f32.xlu1 %v639_v51  ;;  %v141_v50 = vld [vmem:[%s15022_s0 + $0x300] sm:$0xff] }
  0xff   :  { %637 = vadd.xlane.f32.xlu0 %v636_v52  ;;  %v660_v52 = vsel %vm365_vm0, %v143_v25, 0.0  ;;  %v654_v63 = vsel %vm365_vm0, %v141_v50, 0.0  ;;  %v144_v25 = vld [vmem:[%s15022_s0 + $0x318] sm:$0xff]  ;;  %v669_v50 = vsel %vm365_vm0, %v146_v7, 0.0  ;;  %v147_v7 = vld [vmem:[%s15022_s0 + $0x330] sm:$0xff] }
 0x101   :  { %v11715_v2 = vpop.xlane.xlu2 %517  ;;  %v11717_v4 = vpop.xlane.xlu1 %514 }
 0x102   :  { %v11722_v11 = vpop.xlane.xlu0 %511 }
 0x106   :  { %652 = vadd.xlane.f32.xlu2 %v651_v15  ;;  %649 = vadd.xlane.f32.xlu1 %v648_v22  ;;  %v145_v15 = vld [vmem:[%s15022_s0 + $0x320] sm:$0xff] }
 0x107   :  { %646 = vadd.xlane.f32.xlu0 %v645_v24 }
 0x109   :  { %v11733_v32 = vpop.xlane.xlu2 %526  ;;  %v11735_v44 = vpop.xlane.xlu1 %523 }
 0x10a   :  { %15071 = vst [vmem:[#allocation18_spill] sm:$0xff] %v11733_v32  ;;  %v11740_v51 = vpop.xlane.xlu0 %520 }
 0x10b   :  { %15072 = vst [vmem:[#allocation19_spill] sm:$0xff] %v11735_v44 }
 0x10e   :  { %661 = vadd.xlane.f32.xlu2 %v660_v52  ;;  %658 = vadd.xlane.f32.xlu1 %v657_v61  ;;  %v666_v52 = vsel %vm365_vm0, %v145_v15, 0.0  ;;  %v663_v61 = vsel %vm365_vm0, %v144_v25, 0.0 }
 0x10f   :  { %655 = vadd.xlane.f32.xlu0 %v654_v63  ;;  %v149_v63 = vld [vmem:[%s15022_s0 + $0x340] sm:$0xff] }
 0x110   :  { %v678_v25 = vsel %vm365_vm0, %v149_v63, 0.0 }
 0x111   :  { %v11751_v22 = vpop.xlane.xlu2 %535  ;;  %v11753_v24 = vpop.xlane.xlu1 %532 }
 0x112   :  { %15073 = vst [vmem:[#allocation20_spill] sm:$0xff] %v11751_v22  ;;  %v11758_v26 = vpop.xlane.xlu0 %529  ;;  %v148_v22 = vld [vmem:[%s15022_s0 + $0x338] sm:$0xff] }
 0x113   :  { %15074 = vst [vmem:[#allocation21_spill] sm:$0xff] %v11753_v24 }
 0x114   :  { %15075 = vst [vmem:[#allocation22_spill] sm:$0xff] %v11758_v26 }
 0x116   :  { %670 = vadd.xlane.f32.xlu2 %v669_v50  ;;  %667 = vadd.xlane.f32.xlu1 %v666_v52  ;;  %v675_v50 = vsel %vm365_vm0, %v148_v22, 0.0  ;;  %v672_v52 = vsel %vm365_vm0, %v147_v7, 0.0  ;;  %v150_v22 = vld [vmem:[%s15022_s0 + $0x348] sm:$0xff] }
 0x117   :  { %664 = vadd.xlane.f32.xlu0 %v663_v61  ;;  %v152_v61 = vld [vmem:[%s15022_s0 + $0x358] sm:$0xff] }
 0x118   :  { %v687_v7 = vsel %vm365_vm0, %v152_v61, 0.0 }
 0x119   :  { %v11769_v39 = vpop.xlane.xlu2 %544  ;;  %v11771_v34 = vpop.xlane.xlu1 %541 }
 0x11a   :  { %15076 = vst [vmem:[#allocation23_spill] sm:$0xff] %v11769_v39  ;;  %v11776_v15 = vpop.xlane.xlu0 %538 }
 0x11b   :  { %15077 = vst [vmem:[#allocation24_spill] sm:$0xff] %v11771_v34  ;;  %v151_v34 = vld [vmem:[%s15022_s0 + $0x350] sm:$0xff] }
 0x11c   :  { %15078 = vst [vmem:[#allocation25_spill] sm:$0xff] %v11776_v15 }
 0x11e   :  { %679 = vadd.xlane.f32.xlu2 %v678_v25  ;;  %676 = vadd.xlane.f32.xlu1 %v675_v50  ;;  %v684_v25 = vsel %vm365_vm0, %v151_v34, 0.0  ;;  %v681_v50 = vsel %vm365_vm0, %v150_v22, 0.0  ;;  %v153_v34 = vld [vmem:[%s15022_s0 + $0x360] sm:$0xff] }
 0x11f   :  { %673 = vadd.xlane.f32.xlu0 %v672_v52  ;;  %v155_v52 = vld [vmem:[%s15022_s0 + $0x370] sm:$0xff] }
 0x120   :  { %v696_v22 = vsel %vm365_vm0, %v155_v52, 0.0 }
 0x121   :  { %v11787_v39 = vpop.xlane.xlu2 %553  ;;  %v11789_v15 = vpop.xlane.xlu1 %550 }
 0x122   :  { %15079 = vst [vmem:[#allocation26_spill] sm:$0xff] %v11787_v39  ;;  %v11794_v63 = vpop.xlane.xlu0 %547  ;;  %v154_v39 = vld [vmem:[%s15022_s0 + $0x368] sm:$0xff] }
 0x123   :  { %15080 = vst [vmem:[#allocation27_spill] sm:$0xff] %v11789_v15 }
 0x124   :  { %15081 = vst [vmem:[#allocation28_spill] sm:$0xff] %v11794_v63 }
 0x126   :  { %688 = vadd.xlane.f32.xlu2 %v687_v7  ;;  %685 = vadd.xlane.f32.xlu1 %v684_v25  ;;  %v693_v7 = vsel %vm365_vm0, %v154_v39, 0.0  ;;  %v690_v25 = vsel %vm365_vm0, %v153_v34, 0.0  ;;  %v156_v39 = vld [vmem:[%s15022_s0 + $0x378] sm:$0xff] }
 0x127   :  { %682 = vadd.xlane.f32.xlu0 %v681_v50  ;;  %v158_v50 = vld [vmem:[%s15022_s0 + $0x388] sm:$0xff] }
 0x128   :  { %v705_v34 = vsel %vm365_vm0, %v158_v50, 0.0 }
 0x129   :  { %v11805_v15 = vpop.xlane.xlu2 %562  ;;  %v11807_v63 = vpop.xlane.xlu1 %559 }
 0x12a   :  { %15082 = vst [vmem:[#allocation29_spill] sm:$0xff] %v11805_v15  ;;  %v11812_v61 = vpop.xlane.xlu0 %556 }
 0x12b   :  { %15083 = vst [vmem:[#allocation30_spill] sm:$0xff] %v11807_v63  ;;  %v157_v63 = vld [vmem:[%s15022_s0 + $0x380] sm:$0xff] }
 0x12c   :  { %15084 = vst [vmem:[#allocation31_spill] sm:$0xff] %v11812_v61 }
 0x12e   :  { %697 = vadd.xlane.f32.xlu2 %v696_v22  ;;  %694 = vadd.xlane.f32.xlu1 %v693_v7  ;;  %v702_v22 = vsel %vm365_vm0, %v157_v63, 0.0  ;;  %v699_v7 = vsel %vm365_vm0, %v156_v39, 0.0  ;;  %v159_v63 = vld [vmem:[%s15022_s0 + $0x390] sm:$0xff] }
 0x12f   :  { %691 = vadd.xlane.f32.xlu0 %v690_v25  ;;  %v161_v25 = vld [vmem:[%s15022_s0 + $0x3a0] sm:$0xff] }
 0x130   :  { %v714_v39 = vsel %vm365_vm0, %v161_v25, 0.0 }
 0x131   :  { %v11823_v15 = vpop.xlane.xlu2 %571  ;;  %v11825_v61 = vpop.xlane.xlu1 %568 }
 0x132   :  { %15085 = vst [vmem:[#allocation32_spill] sm:$0xff] %v11823_v15  ;;  %v11830_v52 = vpop.xlane.xlu0 %565  ;;  %v160_v15 = vld [vmem:[%s15022_s0 + $0x398] sm:$0xff] }
 0x133   :  { %15086 = vst [vmem:[#allocation33_spill] sm:$0xff] %v11825_v61 }
 0x134   :  { %15087 = vst [vmem:[#allocation34_spill] sm:$0xff] %v11830_v52 }
 0x136   :  { %706 = vadd.xlane.f32.xlu2 %v705_v34  ;;  %703 = vadd.xlane.f32.xlu1 %v702_v22  ;;  %v711_v34 = vsel %vm365_vm0, %v160_v15, 0.0  ;;  %v708_v22 = vsel %vm365_vm0, %v159_v63, 0.0  ;;  %v162_v15 = vld [vmem:[%s15022_s0 + $0x3a8] sm:$0xff] }
 0x137   :  { %700 = vadd.xlane.f32.xlu0 %v699_v7  ;;  %v164_v7 = vld [vmem:[%s15022_s0 + $0x3b8] sm:$0xff] }
 0x138   :  { %v723_v63 = vsel %vm365_vm0, %v164_v7, 0.0 }
 0x139   :  { %v11841_v61 = vpop.xlane.xlu2 %580  ;;  %v11843_v52 = vpop.xlane.xlu1 %577 }
 0x13a   :  { %15088 = vst [vmem:[#allocation35_spill] sm:$0xff] %v11841_v61  ;;  %v11848_v50 = vpop.xlane.xlu0 %574 }
 0x13b   :  { %15089 = vst [vmem:[#allocation36_spill] sm:$0xff] %v11843_v52  ;;  %v163_v52 = vld [vmem:[%s15022_s0 + $0x3b0] sm:$0xff] }
 0x13c   :  { %15090 = vst [vmem:[#allocation37_spill] sm:$0xff] %v11848_v50 }
 0x13e   :  { %715 = vadd.xlane.f32.xlu2 %v714_v39  ;;  %712 = vadd.xlane.f32.xlu1 %v711_v34  ;;  %v720_v39 = vsel %vm365_vm0, %v163_v52, 0.0  ;;  %v717_v34 = vsel %vm365_vm0, %v162_v15, 0.0  ;;  %v165_v52 = vld [vmem:[%s15022_s0 + $0x3c0] sm:$0xff] }
 0x13f   :  { %709 = vadd.xlane.f32.xlu0 %v708_v22  ;;  %v167_v22 = vld [vmem:[%s15022_s0 + $0x3d0] sm:$0xff] }
 0x140   :  { %v732_v15 = vsel %vm365_vm0, %v167_v22, 0.0 }
 0x141   :  { %v11859_v61 = vpop.xlane.xlu2 %589  ;;  %v11861_v50 = vpop.xlane.xlu1 %586 }
 0x142   :  { %15091 = vst [vmem:[#allocation38_spill] sm:$0xff] %v11859_v61  ;;  %v11866_v25 = vpop.xlane.xlu0 %583  ;;  %v166_v61 = vld [vmem:[%s15022_s0 + $0x3c8] sm:$0xff] }
 0x143   :  { %15092 = vst [vmem:[#allocation39_spill] sm:$0xff] %v11861_v50 }
 0x144   :  { %15093 = vst [vmem:[#allocation40_spill] sm:$0xff] %v11866_v25 }
 0x146   :  { %724 = vadd.xlane.f32.xlu2 %v723_v63  ;;  %721 = vadd.xlane.f32.xlu1 %v720_v39  ;;  %v729_v63 = vsel %vm365_vm0, %v166_v61, 0.0  ;;  %v726_v39 = vsel %vm365_vm0, %v165_v52, 0.0  ;;  %v168_v61 = vld [vmem:[%s15022_s0 + $0x3d8] sm:$0xff] }
 0x147   :  { %718 = vadd.xlane.f32.xlu0 %v717_v34  ;;  %v170_v34 = vld [vmem:[%s15022_s0 + $0x3e8] sm:$0xff] }
 0x148   :  { %v741_v52 = vsel %vm365_vm0, %v170_v34, 0.0 }
 0x149   :  { %v11877_v50 = vpop.xlane.xlu2 %598  ;;  %v11879_v25 = vpop.xlane.xlu1 %595 }
 0x14a   :  { %15094 = vst [vmem:[#allocation41_spill] sm:$0xff] %v11877_v50  ;;  %v11884_v7 = vpop.xlane.xlu0 %592 }
 0x14b   :  { %15095 = vst [vmem:[#allocation42_spill] sm:$0xff] %v11879_v25  ;;  %v169_v25 = vld [vmem:[%s15022_s0 + $0x3e0] sm:$0xff] }
 0x14c   :  { %15096 = vst [vmem:[#allocation43_spill] sm:$0xff] %v11884_v7 }
 0x14e   :  { %733 = vadd.xlane.f32.xlu2 %v732_v15  ;;  %730 = vadd.xlane.f32.xlu1 %v729_v63  ;;  %v738_v15 = vsel %vm365_vm0, %v169_v25, 0.0  ;;  %v735_v63 = vsel %vm365_vm0, %v168_v61, 0.0  ;;  %v171_v25 = vld [vmem:[%s15022_s0 + $0x3f0] sm:$0xff] }
 0x14f   :  { %727 = vadd.xlane.f32.xlu0 %v726_v39  ;;  %v173_v39 = vld [vmem:[%s15022_s0 + $0x400] sm:$0xff] }
 0x150   :  { %v750_v61 = vsel %vm365_vm0, %v173_v39, 0.0 }
 0x151   :  { %v11895_v50 = vpop.xlane.xlu2 %607  ;;  %v11897_v7 = vpop.xlane.xlu1 %604 }
 0x152   :  { %15097 = vst [vmem:[#allocation44_spill] sm:$0xff] %v11895_v50  ;;  %v11902_v22 = vpop.xlane.xlu0 %601 }
 0x153   :  { %15098 = vst [vmem:[#allocation45_spill] sm:$0xff] %v11897_v7  ;;  %v172_v7 = vld [vmem:[%s15022_s0 + $0x3f8] sm:$0xff] }
 0x154   :  { %15099 = vst [vmem:[#allocation46_spill] sm:$0xff] %v11902_v22 }
 0x156   :  { %742 = vadd.xlane.f32.xlu2 %v741_v52  ;;  %739 = vadd.xlane.f32.xlu1 %v738_v15  ;;  %v747_v52 = vsel %vm365_vm0, %v172_v7, 0.0  ;;  %v744_v15 = vsel %vm365_vm0, %v171_v25, 0.0  ;;  %v174_v7 = vld [vmem:[%s15022_s0 + $0x408] sm:$0xff] }
 0x157   :  { %736 = vadd.xlane.f32.xlu0 %v735_v63  ;;  %v176_v63 = vld [vmem:[%s15022_s0 + $0x418] sm:$0xff] }
 0x158   :  { %v759_v25 = vsel %vm365_vm0, %v176_v63, 0.0 }
 0x159   :  { %v11913_v50 = vpop.xlane.xlu2 %616  ;;  %v11915_v22 = vpop.xlane.xlu1 %613 }
 0x15a   :  { %15100 = vst [vmem:[#allocation47_spill] sm:$0xff] %v11913_v50  ;;  %v11920_v34 = vpop.xlane.xlu0 %610 }
 0x15b   :  { %15101 = vst [vmem:[#allocation48_spill] sm:$0xff] %v11915_v22  ;;  %v175_v22 = vld [vmem:[%s15022_s0 + $0x410] sm:$0xff] }
 0x15c   :  { %15102 = vst [vmem:[#allocation49_spill] sm:$0xff] %v11920_v34 }
 0x15e   :  { %751 = vadd.xlane.f32.xlu2 %v750_v61  ;;  %748 = vadd.xlane.f32.xlu1 %v747_v52  ;;  %v756_v61 = vsel %vm365_vm0, %v175_v22, 0.0  ;;  %v753_v52 = vsel %vm365_vm0, %v174_v7, 0.0  ;;  %v177_v22 = vld [vmem:[%s15022_s0 + $0x420] sm:$0xff] }
 0x15f   :  { %745 = vadd.xlane.f32.xlu0 %v744_v15  ;;  %v179_v15 = vld [vmem:[%s15022_s0 + $0x430] sm:$0xff] }
 0x160   :  { %v768_v7 = vsel %vm365_vm0, %v179_v15, 0.0 }
 0x161   :  { %v11931_v50 = vpop.xlane.xlu2 %625  ;;  %v11933_v34 = vpop.xlane.xlu1 %622 }
 0x162   :  { %15103 = vst [vmem:[#allocation50_spill] sm:$0xff] %v11931_v50  ;;  %v11938_v39 = vpop.xlane.xlu0 %619  ;;  %v178_v50 = vld [vmem:[%s15022_s0 + $0x428] sm:$0xff] }
 0x163   :  { %15104 = vst [vmem:[#allocation51_spill] sm:$0xff] %v11933_v34 }
 0x164   :  { %15105 = vst [vmem:[#allocation52_spill] sm:$0xff] %v11938_v39 }
 0x166   :  { %760 = vadd.xlane.f32.xlu2 %v759_v25  ;;  %757 = vadd.xlane.f32.xlu1 %v756_v61  ;;  %v765_v25 = vsel %vm365_vm0, %v178_v50, 0.0  ;;  %v762_v61 = vsel %vm365_vm0, %v177_v22, 0.0  ;;  %v180_v50 = vld [vmem:[%s15022_s0 + $0x438] sm:$0xff] }
 0x167   :  { %754 = vadd.xlane.f32.xlu0 %v753_v52  ;;  %v182_v52 = vld [vmem:[%s15022_s0 + $0x448] sm:$0xff] }
 0x168   :  { %v777_v22 = vsel %vm365_vm0, %v182_v52, 0.0 }
 0x169   :  { %v11949_v34 = vpop.xlane.xlu2 %634  ;;  %v11951_v39 = vpop.xlane.xlu1 %631 }
 0x16a   :  { %15106 = vst [vmem:[#allocation53_spill] sm:$0xff] %v11949_v34  ;;  %v11956_v63 = vpop.xlane.xlu0 %628 }
 0x16b   :  { %15107 = vst [vmem:[#allocation54_spill] sm:$0xff] %v11951_v39  ;;  %v181_v39 = vld [vmem:[%s15022_s0 + $0x440] sm:$0xff] }
 0x16c   :  { %15108 = vst [vmem:[#allocation55_spill] sm:$0xff] %v11956_v63 }
 0x16e   :  { %769 = vadd.xlane.f32.xlu2 %v768_v7  ;;  %766 = vadd.xlane.f32.xlu1 %v765_v25  ;;  %v774_v7 = vsel %vm365_vm0, %v181_v39, 0.0  ;;  %v771_v25 = vsel %vm365_vm0, %v180_v50, 0.0  ;;  %v183_v39 = vld [vmem:[%s15022_s0 + $0x450] sm:$0xff] }
 0x16f   :  { %763 = vadd.xlane.f32.xlu0 %v762_v61  ;;  %v185_v61 = vld [vmem:[%s15022_s0 + $0x460] sm:$0xff] }
 0x170   :  { %v786_v50 = vsel %vm365_vm0, %v185_v61, 0.0 }
 0x171   :  { %v11967_v34 = vpop.xlane.xlu2 %643  ;;  %v11969_v63 = vpop.xlane.xlu1 %640 }
 0x172   :  { %15109 = vst [vmem:[#allocation56_spill] sm:$0xff] %v11967_v34  ;;  %v11974_v15 = vpop.xlane.xlu0 %637  ;;  %v184_v34 = vld [vmem:[%s15022_s0 + $0x458] sm:$0xff] }
 0x173   :  { %15110 = vst [vmem:[#allocation57_spill] sm:$0xff] %v11969_v63 }
 0x174   :  { %15111 = vst [vmem:[#allocation58_spill] sm:$0xff] %v11974_v15 }
 0x176   :  { %778 = vadd.xlane.f32.xlu2 %v777_v22  ;;  %775 = vadd.xlane.f32.xlu1 %v774_v7  ;;  %v783_v22 = vsel %vm365_vm0, %v184_v34, 0.0  ;;  %v780_v7 = vsel %vm365_vm0, %v183_v39, 0.0  ;;  %v186_v34 = vld [vmem:[%s15022_s0 + $0x468] sm:$0xff] }
 0x177   :  { %772 = vadd.xlane.f32.xlu0 %v771_v25  ;;  %v188_v25 = vld [vmem:[%s15022_s0 + $0x478] sm:$0xff] }
 0x178   :  { %v795_v39 = vsel %vm365_vm0, %v188_v25, 0.0 }
 0x179   :  { %v11985_v63 = vpop.xlane.xlu2 %652  ;;  %v11987_v15 = vpop.xlane.xlu1 %649 }
 0x17a   :  { %15112 = vst [vmem:[#allocation59_spill] sm:$0xff] %v11985_v63  ;;  %v11992_v52 = vpop.xlane.xlu0 %646 }
 0x17b   :  { %15113 = vst [vmem:[#allocation60_spill] sm:$0xff] %v11987_v15  ;;  %v187_v15 = vld [vmem:[%s15022_s0 + $0x470] sm:$0xff] }
 0x17c   :  { %15114 = vst [vmem:[#allocation61_spill] sm:$0xff] %v11992_v52 }
 0x17e   :  { %787 = vadd.xlane.f32.xlu2 %v786_v50  ;;  %784 = vadd.xlane.f32.xlu1 %v783_v22  ;;  %v792_v50 = vsel %vm365_vm0, %v187_v15, 0.0  ;;  %v789_v22 = vsel %vm365_vm0, %v186_v34, 0.0  ;;  %v189_v15 = vld [vmem:[%s15022_s0 + $0x480] sm:$0xff] }
 0x17f   :  { %781 = vadd.xlane.f32.xlu0 %v780_v7  ;;  %v191_v7 = vld [vmem:[%s15022_s0 + $0x490] sm:$0xff] }
 0x180   :  { %v804_v34 = vsel %vm365_vm0, %v191_v7, 0.0 }
 0x181   :  { %v12003_v63 = vpop.xlane.xlu2 %661  ;;  %v12005_v52 = vpop.xlane.xlu1 %658 }
 0x182   :  { %15115 = vst [vmem:[#allocation62_spill] sm:$0xff] %v12003_v63  ;;  %v12010_v61 = vpop.xlane.xlu0 %655  ;;  %v190_v63 = vld [vmem:[%s15022_s0 + $0x488] sm:$0xff] }
 0x183   :  { %15116 = vst [vmem:[#allocation63_spill] sm:$0xff] %v12005_v52 }
 0x184   :  { %15117 = vst [vmem:[#allocation64_spill] sm:$0xff] %v12010_v61 }
 0x186   :  { %796 = vadd.xlane.f32.xlu2 %v795_v39  ;;  %793 = vadd.xlane.f32.xlu1 %v792_v50  ;;  %v801_v39 = vsel %vm365_vm0, %v190_v63, 0.0  ;;  %v798_v50 = vsel %vm365_vm0, %v189_v15, 0.0  ;;  %v192_v63 = vld [vmem:[%s15022_s0 + $0x498] sm:$0xff] }
 0x187   :  { %790 = vadd.xlane.f32.xlu0 %v789_v22  ;;  %v194_v22 = vld [vmem:[%s15022_s0 + $0x4a8] sm:$0xff] }
 0x188   :  { %v813_v15 = vsel %vm365_vm0, %v194_v22, 0.0 }
 0x189   :  { %v12021_v52 = vpop.xlane.xlu2 %670  ;;  %v12023_v61 = vpop.xlane.xlu1 %667 }
 0x18a   :  { %15118 = vst [vmem:[#allocation65_spill] sm:$0xff] %v12021_v52  ;;  %v12028_v25 = vpop.xlane.xlu0 %664 }
 0x18b   :  { %15119 = vst [vmem:[#allocation66_spill] sm:$0xff] %v12023_v61  ;;  %v193_v61 = vld [vmem:[%s15022_s0 + $0x4a0] sm:$0xff] }
 0x18c   :  { %15120 = vst [vmem:[#allocation67_spill] sm:$0xff] %v12028_v25 }
 0x18e   :  { %805 = vadd.xlane.f32.xlu2 %v804_v34  ;;  %802 = vadd.xlane.f32.xlu1 %v801_v39  ;;  %v810_v34 = vsel %vm365_vm0, %v193_v61, 0.0  ;;  %v807_v39 = vsel %vm365_vm0, %v192_v63, 0.0  ;;  %v237_v61 = vld [vmem:[%s15022_s0 + $0x600] sm:$0xff] }
 0x18f   :  { %799 = vadd.xlane.f32.xlu0 %v798_v50  ;;  %v239_v50 = vld [vmem:[%s15022_s0 + $0x610] sm:$0xff] }
 0x190   :  { %v948_v63 = vsel %vm365_vm0, %v239_v50, 0.0 }
 0x191   :  { %v12039_v52 = vpop.xlane.xlu2 %679  ;;  %v12041_v25 = vpop.xlane.xlu1 %676 }
 0x192   :  { %15121 = vst [vmem:[#allocation68_spill] sm:$0xff] %v12039_v52  ;;  %v12046_v7 = vpop.xlane.xlu0 %673  ;;  %v238_v52 = vld [vmem:[%s15022_s0 + $0x608] sm:$0xff] }
 0x193   :  { %15122 = vst [vmem:[#allocation69_spill] sm:$0xff] %v12041_v25 }
 0x194   :  { %15123 = vst [vmem:[#allocation70_spill] sm:$0xff] %v12046_v7 }
 0x196   :  { %814 = vadd.xlane.f32.xlu2 %v813_v15  ;;  %811 = vadd.xlane.f32.xlu1 %v810_v34  ;;  %v945_v15 = vsel %vm365_vm0, %v238_v52, 0.0  ;;  %v942_v34 = vsel %vm365_vm0, %v237_v61, 0.0  ;;  %v240_v52 = vld [vmem:[%s15022_s0 + $0x618] sm:$0xff] }
 0x197   :  { %808 = vadd.xlane.f32.xlu0 %v807_v39  ;;  %v206_v39 = vld [vmem:[%s15022_s0 + $0x508] sm:$0xff] }
 0x198   :  { %v849_v61 = vsel %vm365_vm0, %v206_v39, 0.0 }
 0x199   :  { %v12057_v25 = vpop.xlane.xlu2 %688  ;;  %v12059_v7 = vpop.xlane.xlu1 %685 }
 0x19a   :  { %15124 = vst [vmem:[#allocation71_spill] sm:$0xff] %v12057_v25  ;;  %v12064_v22 = vpop.xlane.xlu0 %682 }
 0x19b   :  { %15125 = vst [vmem:[#allocation72_spill] sm:$0xff] %v12059_v7  ;;  %v205_v7 = vld [vmem:[%s15022_s0 + $0x500] sm:$0xff] }
 0x19c   :  { %15126 = vst [vmem:[#allocation73_spill] sm:$0xff] %v12064_v22 }
 0x19e   :  { %949 = vadd.xlane.f32.xlu2 %v948_v63  ;;  %946 = vadd.xlane.f32.xlu1 %v945_v15  ;;  %v846_v63 = vsel %vm365_vm0, %v205_v7, 0.0  ;;  %v951_v15 = vsel %vm365_vm0, %v240_v52, 0.0  ;;  %v253_v7 = vld [vmem:[%s15022_s0 + $0x680] sm:$0xff] }
 0x19f   :  { %943 = vadd.xlane.f32.xlu0 %v942_v34  ;;  %v207_v34 = vld [vmem:[%s15022_s0 + $0x510] sm:$0xff] }
 0x1a0   :  { %v852_v52 = vsel %vm365_vm0, %v207_v34, 0.0 }
 0x1a1   :  { %v12075_v25 = vpop.xlane.xlu2 %697  ;;  %v12077_v22 = vpop.xlane.xlu1 %694 }
 0x1a2   :  { %15127 = vst [vmem:[#allocation74_spill] sm:$0xff] %v12075_v25  ;;  %v12082_v50 = vpop.xlane.xlu0 %691  ;;  %v254_v25 = vld [vmem:[%s15022_s0 + $0x688] sm:$0xff] }
 0x1a3   :  { %15128 = vst [vmem:[#allocation75_spill] sm:$0xff] %v12077_v22 }
 0x1a4   :  { %15129 = vst [vmem:[#allocation76_spill] sm:$0xff] %v12082_v50 }
 0x1a6   :  { %850 = vadd.xlane.f32.xlu2 %v849_v61  ;;  %847 = vadd.xlane.f32.xlu1 %v846_v63  ;;  %v993_v61 = vsel %vm365_vm0, %v254_v25, 0.0  ;;  %v990_v63 = vsel %vm365_vm0, %v253_v7, 0.0  ;;  %v208_v25 = vld [vmem:[%s15022_s0 + $0x518] sm:$0xff] }
 0x1a7   :  { %952 = vadd.xlane.f32.xlu0 %v951_v15  ;;  %v242_v15 = vld [vmem:[%s15022_s0 + $0x628] sm:$0xff] }
 0x1a8   :  { %v957_v7 = vsel %vm365_vm0, %v242_v15, 0.0 }
 0x1a9   :  { %v12093_v22 = vpop.xlane.xlu2 %706  ;;  %v12095_v50 = vpop.xlane.xlu1 %703 }
 0x1aa   :  { %15130 = vst [vmem:[#allocation77_spill] sm:$0xff] %v12093_v22  ;;  %v12100_v39 = vpop.xlane.xlu0 %700 }
 0x1ab   :  { %15131 = vst [vmem:[#allocation78_spill] sm:$0xff] %v12095_v50  ;;  %v241_v50 = vld [vmem:[%s15022_s0 + $0x620] sm:$0xff] }
 0x1ac   :  { %15132 = vst [vmem:[#allocation79_spill] sm:$0xff] %v12100_v39 }
 0x1ae   :  { %853 = vadd.xlane.f32.xlu2 %v852_v52  ;;  %994 = vadd.xlane.f32.xlu1 %v993_v61  ;;  %v954_v52 = vsel %vm365_vm0, %v241_v50, 0.0  ;;  %v855_v61 = vsel %vm365_vm0, %v208_v25, 0.0  ;;  %v255_v50 = vld [vmem:[%s15022_s0 + $0x690] sm:$0xff] }
 0x1af   :  { %991 = vadd.xlane.f32.xlu0 %v990_v63  ;;  %v221_v63 = vld [vmem:[%s15022_s0 + $0x580] sm:$0xff] }
 0x1b0   :  { %v894_v25 = vsel %vm365_vm0, %v221_v63, 0.0 }
 0x1b1   :  { %v12111_v22 = vpop.xlane.xlu2 %715  ;;  %v12113_v39 = vpop.xlane.xlu1 %712 }
 0x1b2   :  { %15133 = vst [vmem:[#allocation80_spill] sm:$0xff] %v12111_v22  ;;  %v12118_v34 = vpop.xlane.xlu0 %709  ;;  %v256_v22 = vld [vmem:[%s15022_s0 + $0x698] sm:$0xff] }
 0x1b3   :  { %15134 = vst [vmem:[#allocation81_spill] sm:$0xff] %v12113_v39 }
 0x1b4   :  { %15135 = vst [vmem:[#allocation82_spill] sm:$0xff] %v12118_v34 }
 0x1b6   :  { %958 = vadd.xlane.f32.xlu2 %v957_v7  ;;  %955 = vadd.xlane.f32.xlu1 %v954_v52  ;;  %v999_v7 = vsel %vm365_vm0, %v256_v22, 0.0  ;;  %v996_v52 = vsel %vm365_vm0, %v255_v50, 0.0  ;;  %v222_v22 = vld [vmem:[%s15022_s0 + $0x588] sm:$0xff] }
 0x1b7   :  { %856 = vadd.xlane.f32.xlu0 %v855_v61  ;;  %v210_v61 = vld [vmem:[%s15022_s0 + $0x528] sm:$0xff] }
 0x1b8   :  { %v861_v50 = vsel %vm365_vm0, %v210_v61, 0.0 }
 0x1b9   :  { %v12129_v39 = vpop.xlane.xlu2 %724  ;;  %v12131_v34 = vpop.xlane.xlu1 %721 }
 0x1ba   :  { %15136 = vst [vmem:[#allocation83_spill] sm:$0xff] %v12129_v39  ;;  %v12136_v15 = vpop.xlane.xlu0 %718 }
 0x1bb   :  { %15137 = vst [vmem:[#allocation84_spill] sm:$0xff] %v12131_v34  ;;  %v209_v34 = vld [vmem:[%s15022_s0 + $0x520] sm:$0xff] }
 0x1bc   :  { %15138 = vst [vmem:[#allocation85_spill] sm:$0xff] %v12136_v15 }
 0x1be   :  { %895 = vadd.xlane.f32.xlu2 %v894_v25  ;;  %1000 = vadd.xlane.f32.xlu1 %v999_v7  ;;  %v858_v25 = vsel %vm365_vm0, %v209_v34, 0.0  ;;  %v897_v7 = vsel %vm365_vm0, %v222_v22, 0.0  ;;  %v223_v34 = vld [vmem:[%s15022_s0 + $0x590] sm:$0xff] }
 0x1bf   :  { %997 = vadd.xlane.f32.xlu0 %v996_v52  ;;  %v243_v52 = vld [vmem:[%s15022_s0 + $0x630] sm:$0xff] }
 0x1c0   :  { %v960_v22 = vsel %vm365_vm0, %v243_v52, 0.0 }
 0x1c1   :  { %v12147_v39 = vpop.xlane.xlu2 %733  ;;  %v12149_v15 = vpop.xlane.xlu1 %730 }
 0x1c2   :  { %15139 = vst [vmem:[#allocation86_spill] sm:$0xff] %v12147_v39  ;;  %v12154_v63 = vpop.xlane.xlu0 %727  ;;  %v224_v39 = vld [vmem:[%s15022_s0 + $0x598] sm:$0xff] }
 0x1c3   :  { %15140 = vst [vmem:[#allocation87_spill] sm:$0xff] %v12149_v15 }
 0x1c4   :  { %15141 = vst [vmem:[#allocation88_spill] sm:$0xff] %v12154_v63 }
 0x1c6   :  { %862 = vadd.xlane.f32.xlu2 %v861_v50  ;;  %859 = vadd.xlane.f32.xlu1 %v858_v25  ;;  %v903_v50 = vsel %vm365_vm0, %v224_v39, 0.0  ;;  %v900_v25 = vsel %vm365_vm0, %v223_v34, 0.0  ;;  %v244_v39 = vld [vmem:[%s15022_s0 + $0x638] sm:$0xff] }
 0x1c7   :  { %898 = vadd.xlane.f32.xlu0 %v897_v7  ;;  %v258_v7 = vld [vmem:[%s15022_s0 + $0x6a8] sm:$0xff] }
 0x1c8   :  { %v1005_v34 = vsel %vm365_vm0, %v258_v7, 0.0 }
 0x1c9   :  { %v12165_v15 = vpop.xlane.xlu2 %742  ;;  %v12167_v63 = vpop.xlane.xlu1 %739 }
 0x1ca   :  { %15142 = vst [vmem:[#allocation89_spill] sm:$0xff] %v12165_v15  ;;  %v12172_v61 = vpop.xlane.xlu0 %736 }
 0x1cb   :  { %15143 = vst [vmem:[#allocation90_spill] sm:$0xff] %v12167_v63  ;;  %v257_v63 = vld [vmem:[%s15022_s0 + $0x6a0] sm:$0xff] }
 0x1cc   :  { %15144 = vst [vmem:[#allocation91_spill] sm:$0xff] %v12172_v61 }
 0x1ce   :  { %961 = vadd.xlane.f32.xlu2 %v960_v22  ;;  %904 = vadd.xlane.f32.xlu1 %v903_v50  ;;  %v1002_v22 = vsel %vm365_vm0, %v257_v63, 0.0  ;;  %v963_v50 = vsel %vm365_vm0, %v244_v39, 0.0  ;;  %v211_v63 = vld [vmem:[%s15022_s0 + $0x530] sm:$0xff] }
 0x1cf   :  { %901 = vadd.xlane.f32.xlu0 %v900_v25  ;;  %v225_v25 = vld [vmem:[%s15022_s0 + $0x5a0] sm:$0xff] }
 0x1d0   :  { %v906_v39 = vsel %vm365_vm0, %v225_v25, 0.0 }
 0x1d1   :  { %v12183_v15 = vpop.xlane.xlu2 %751  ;;  %v12185_v61 = vpop.xlane.xlu1 %748 }
 0x1d2   :  { %15145 = vst [vmem:[#allocation92_spill] sm:$0xff] %v12183_v15  ;;  %v12190_v52 = vpop.xlane.xlu0 %745  ;;  %v212_v15 = vld [vmem:[%s15022_s0 + $0x538] sm:$0xff] }
 0x1d3   :  { %15146 = vst [vmem:[#allocation93_spill] sm:$0xff] %v12185_v61 }
 0x1d4   :  { %15147 = vst [vmem:[#allocation94_spill] sm:$0xff] %v12190_v52 }
 0x1d6   :  { %1006 = vadd.xlane.f32.xlu2 %v1005_v34  ;;  %1003 = vadd.xlane.f32.xlu1 %v1002_v22  ;;  %v867_v34 = vsel %vm365_vm0, %v212_v15, 0.0  ;;  %v864_v22 = vsel %vm365_vm0, %v211_v63, 0.0  ;;  %v226_v15 = vld [vmem:[%s15022_s0 + $0x5a8] sm:$0xff] }
 0x1d7   :  { %964 = vadd.xlane.f32.xlu0 %v963_v50  ;;  %v11213_v50 = vmov 64.0  }
 0x1d8   :  { %11125 = vrcp.f32 %v11213_v50  ;;  %v909_v50 = vsel %vm365_vm0, %v226_v15, 0.0 }
 0x1d9   :  { %v12201_v61 = vpop.xlane.xlu2 %760  ;;  %v12203_v52 = vpop.xlane.xlu1 %757 }
 0x1da   :  { %15148 = vst [vmem:[#allocation95_spill] sm:$0xff] %v12201_v61  ;;  %v12208_v7 = vpop.xlane.xlu0 %754  ;;  %v245_v61 = vld [vmem:[%s15022_s0 + $0x640] sm:$0xff] }
 0x1db   :  { %15149 = vst [vmem:[#allocation96_spill] sm:$0xff] %v12203_v52  ;;  %v246_v52 = vld [vmem:[%s15022_s0 + $0x648] sm:$0xff] }
 0x1dc   :  { %15150 = vst [vmem:[#allocation97_spill] sm:$0xff] %v12208_v7 }
 0x1de   :  { %907 = vadd.xlane.f32.xlu2 %v906_v39  ;;  %868 = vadd.xlane.f32.xlu1 %v867_v34  ;;  %v11126_v39 = vpop.eup %11125  ;;  %v969_v34 = vsel %vm365_vm0, %v246_v52, 0.0 }
 0x1df   :  { %865 = vadd.xlane.f32.xlu0 %v864_v22  ;;  %v966_v22 = vsel %vm365_vm0, %v245_v61, 0.0  ;;  %v1327_v48 = vmul.f32 64.0, %v11126_v39  ;;  %v259_v61 = vld [vmem:[%s15022_s0 + $0x6b0] sm:$0xff]  ;;  %vm1331_vm1 = vweird.f32 %v11126_v39 }
 0x1e1   :  { %v12219_v7 = vpop.xlane.xlu2 %769  ;;  %v12221_v25 = vpop.xlane.xlu1 %766  ;;  %v1328_v52 = vsub.f32 1.0, %v1327_v48  ;;  %v227_v48 = vld [vmem:[%s15022_s0 + $0x5b0] sm:$0xff] }
 0x1e2   :  { %15151 = vst [vmem:[#allocation98_spill] sm:$0xff] %v12219_v7  ;;  %v12226_v63 = vpop.xlane.xlu0 %763  ;;  %v213_v7 = vld [vmem:[%s15022_s0 + $0x540] sm:$0xff] }
 0x1e3   :  { %15152 = vst [vmem:[#allocation99_spill] sm:$0xff] %v12221_v25  ;;  %v260_v25 = vld [vmem:[%s15022_s0 + $0x6b8] sm:$0xff]  ;;  %v1329_v26 = vmul.f32 %v11126_v39, %v1328_v52 }
 0x1e4   :  { %15153 = vst [vmem:[#allocation100_spill] sm:$0xff] %v12226_v63 }
 0x1e6   :  { %970 = vadd.xlane.f32.xlu2 %v969_v34  ;;  %967 = vadd.xlane.f32.xlu1 %v966_v22  ;;  %v870_v34 = vsel %vm365_vm0, %v213_v7, 0.0  ;;  %v1011_v22 = vsel %vm365_vm0, %v260_v25, 0.0  ;;  %v214_v7 = vld [vmem:[%s15022_s0 + $0x548] sm:$0xff]  ;;  %v1330_v25 = vadd.f32 %v11126_v39, %v1329_v26  ;;  %v261_v26 = vld [vmem:[%s15022_s0 + $0x6c0] sm:$0xff] }
 0x1e7   :  { %910 = vadd.xlane.f32.xlu0 %v909_v50  ;;  %v1008_v50 = vsel %vm365_vm0, %v259_v61, 0.0 }
 0x1e9   :  { %v12237_v63 = vpop.xlane.xlu2 %778  ;;  %v12239_v13 = vpop.xlane.xlu1 %775 }
 0x1ea   :  { %15154 = vst [vmem:[#allocation101_spill] sm:$0xff] %v12237_v63  ;;  %v12244_v15 = vpop.xlane.xlu0 %772 }
 0x1eb   :  { %15155 = vst [vmem:[#allocation102_spill] sm:$0xff] %v12239_v13  ;;  %v228_v13 = vld [vmem:[%s15022_s0 + $0x5b8] sm:$0xff] }
 0x1ec   :  { %15156 = vst [vmem:[#allocation103_spill] sm:$0xff] %v12244_v15  ;;  %v915_v52 = vsel %vm365_vm0, %v228_v13, 0.0  ;;  %v248_v13 = vld [vmem:[%s15022_s0 + $0x658] sm:$0xff] }
 0x1ee   :  { %871 = vadd.xlane.f32.xlu2 %v870_v34  ;;  %1012 = vadd.xlane.f32.xlu1 %v1011_v22  ;;  %v912_v34 = vsel %vm365_vm0, %v227_v48, 0.0  ;;  %v873_v22 = vsel %vm365_vm0, %v214_v7, 0.0 }
 0x1ef   :  { %1009 = vadd.xlane.f32.xlu0 %v1008_v50  ;;  %v12267_v50 = vsel %vm1331_vm1, %v11126_v39, %v1330_v25  ;;  %vm3012_vm1 = vcmask 1048512  }
 0x1f0   :  { %v1333_v48 = vmul.f32 %v12267_v50, %v11434_v31  ;;  %v1336_v25 = vmul.f32 %v12267_v50, %v11447_v38  ;;  %v975_v31 = vsel %vm365_vm0, %v248_v13, 0.0  ;;  %v1340_v32 = vmul.f32 %v12267_v50, %v11465_v47  ;;  %v230_v47 = vld [vmem:[%s15022_s0 + $0x5c8] sm:$0xff] }
 0x1f1   :  { %v12255_v63 = vpop.xlane.xlu2 %787  ;;  %v12257_v15 = vpop.xlane.xlu1 %784  ;;  %v1350_v16 = vmul.f32 %v12267_v50, %v11517_v9 }
 0x1f2   :  { %15157 = vst [vmem:[#allocation104_spill] sm:$0xff] %v12255_v63  ;;  %v12262_v61 = vpop.xlane.xlu0 %781  ;;  %v2951_v63 = vlaneseq }
 0x1f3   :  { %15158 = vst [vmem:[#allocation105_spill] sm:$0xff] %v12257_v15  ;;  %v1334_v15 = vmul.f32 %v12267_v50, %v11452_v40  ;;  %v247_v40 = vld [vmem:[%s15022_s0 + $0x650] sm:$0xff] }
 0x1f4   :  { %15159 = vst [vmem:[#allocation106_spill] sm:$0xff] %v12262_v61  ;;  %v1014_v61 = vsel %vm365_vm0, %v261_v26, 0.0 }
 0x1f6   :  { %916 = vadd.xlane.f32.xlu2 %v915_v52  ;;  %913 = vadd.xlane.f32.xlu1 %v912_v34  ;;  %v12290_v34 = vand.u32 127, %v2951_v63  ;;  %v216_v63 = vld [vmem:[%s15022_s0 + $0x558] sm:$0xff] }
 0x1f7   :  { %874 = vadd.xlane.f32.xlu0 %v873_v22  ;;  %v1653_v22 = vpack.c.bf16 %v1334_v15, %v1333_v48  ;;  %v215_v15 = vld [vmem:[%s15022_s0 + $0x550] sm:$0xff]  ;;  %v262_v48 = vld [vmem:[%s15022_s0 + $0x6c8] sm:$0xff] }
 0x1f8   :  { %15163 = vst [vmem:[#allocation110_spill] sm:$0xff] %v12290_v34  ;;  %v12298_v44 = vadd.s32 4294967288, %v12290_v34 }
 0x1f9   :  { %v12279_v39 = vpop.xlane.xlu2 %796  ;;  %v12281_v7 = vpop.xlane.xlu1 %793  ;;  %v2631_v38 = vunpack.c.l.b16 %v1653_v22 }
 0x1fa   :  { %15160 = vst [vmem:[#allocation107_spill] sm:$0xff] %v12279_v39  ;;  %v12288_v52 = vpop.xlane.xlu0 %790  ;;  %v1335_v39 = vmul.f32 %v12267_v50, %v11429_v29  ;;  %v1337_v29 = vmul.f32 %v12267_v50, %v11427_v28 }
 0x1fb   :  { %15161 = vst [vmem:[#allocation108_spill] sm:$0xff] %v12281_v7  ;;  %v972_v7 = vsel %vm365_vm0, %v247_v40, 0.0 }
 0x1fc   :  { %15162 = vst [vmem:[#allocation109_spill] sm:$0xff] %v12288_v52  ;;  %v1654_v24 = vpack.c.bf16 %v1336_v25, %v1335_v39  ;;  %v2632_v52 = vunpack.c.h.b16 %v1653_v22  ;;  %v12318_v39 = vadd.s32 4294967280, %v12290_v34  ;;  %v2953_v25 = vperm.slane %v2631_v38, %v12290_v34 }
 0x1fd   :  { %15164 = vst [vmem:[#allocation111_spill] sm:$0xff] %v12298_v44  ;;  %v876_v22 = vsel %vm365_vm0, %v215_v15, 0.0  ;;  %v249_v15 = vld [vmem:[%s15022_s0 + $0x660] sm:$0xff] }
 0x1fe   :  { %1015 = vadd.xlane.f32.xlu2 %v1014_v61  ;;  %976 = vadd.xlane.f32.xlu1 %v975_v31  ;;  %v1338_v61 = vmul.f32 %v12267_v50, %v11445_v37  ;;  %15167 = vst [vmem:[#allocation114_spill] sm:$0xff] %v12318_v39  ;;  %v2955_v28 = vperm.slane %v2632_v52, %v12298_v44  ;;  %v879_v37 = vsel %vm365_vm0, %v216_v63, 0.0  ;;  %v1017_v31 = vsel %vm365_vm0, %v262_v48, 0.0  ;;  %v229_v48 = vld [vmem:[%s15022_s0 + $0x5c0] sm:$0xff] }
 0x1ff   :  { %973 = vadd.xlane.f32.xlu0 %v972_v7  ;;  %v2633_v7 = vunpack.c.l.b16 %v1654_v24  ;;  %v12335_v52 = vadd.s32 4294967272, %v12290_v34  ;;  %v2634_v38 = vunpack.c.h.b16 %v1654_v24 }
 0x200   :  { %v2957_v63 = vsel %vm2956_vm2, %v2955_v28, %v2953_v25  ;;  %v1341_v25 = vmul.f32 %v12267_v50, %v11463_v46  ;;  %v918_v46 = vsel %vm365_vm0, %v229_v48, 0.0 }
 0x201   :  { %v12310_v26 = vpop.xlane.xlu2 %805  ;;  %v12312_v13 = vpop.xlane.xlu1 %802  ;;  %15169 = vst [vmem:[#allocation116_spill] sm:$0xff] %v12335_v52 }
 0x202   :  { %15165 = vst [vmem:[#allocation112_spill] sm:$0xff] %v12310_v26  ;;  %v12320_v40 = vpop.xlane.xlu0 %799  ;;  %v12327_v26 = vpack.c.bf16 %v1338_v61, %v1337_v29 }
 0x203   :  { %15166 = vst [vmem:[#allocation113_spill] sm:$0xff] %v12312_v13  ;;  %v2959_v13 = vperm.slane %v2633_v7, %v12318_v39 }
 0x204   :  { %15168 = vst [vmem:[#allocation115_spill] sm:$0xff] %v12320_v40  ;;  %v1339_v40 = vmul.f32 %v12267_v50, %v11470_v49  ;;  %v12345_v49 = vadd.s32 4294967264, %v12290_v34  ;;  %v2635_v29 = vunpack.c.l.b16 %v12327_v26 }
 0x205   :  { %v2961_v7 = vsel %vm2960_vm3, %v2959_v13, %v2957_v63  ;;  %v1349_v13 = vmul.f32 %v12267_v50, %v11519_v10  ;;  %v12377_v63 = vadd.s32 4294967248, %v12290_v34  ;;  %v12382_v10 = vadd.s32 4294967256, %v12290_v34 }
 0x206   :  { %880 = vadd.xlane.f32.xlu2 %v879_v37  ;;  %877 = vadd.xlane.f32.xlu1 %v876_v22  ;;  %15170 = vst [vmem:[#allocation117_spill] sm:$0xff] %v12345_v49  ;;  %v1656_v28 = vpack.c.bf16 %v1340_v32, %v1339_v40  ;;  %v1342_v37 = vmul.f32 %v12267_v50, %v11488_v58 }
 0x207   :  { %1018 = vadd.xlane.f32.xlu0 %v1017_v31  ;;  %v2963_v31 = vperm.slane %v2634_v38, %v12335_v52  ;;  %v1352_v58 = vmul.f32 %v12267_v50, %v11537_v19  ;;  %v1351_v40 = vmul.f32 %v12267_v50, %v11542_v21  ;;  %v2967_v38 = vperm.slane %v2635_v29, %v12345_v49 }
 0x208   :  { %15174 = vst [vmem:[#allocation121_spill] sm:$0xff] %v12377_v63  ;;  %v2637_v9 = vunpack.c.l.b16 %v1656_v28  ;;  %v12387_v21 = vadd.s32 4294967240, %v12290_v34  ;;  %v12390_v29 = vadd.s32 4294967232, %v12290_v34  ;;  %v1661_v48 = vpack.c.bf16 %v1350_v16, %v1349_v13  ;;  %v250_v16 = vld [vmem:[%s15022_s0 + $0x668] sm:$0xff] }
 0x209   :  { %v12348_v61 = vpop.xlane.xlu2 %814  ;;  %v12350_v24 = vpop.xlane.xlu1 %811  ;;  %v2965_v32 = vsel %vm15030_vm4, %v2963_v31, %v2961_v7  ;;  %15175 = vst [vmem:[#allocation122_spill] sm:$0xff] %v12382_v10  ;;  %v1353_v7 = vmul.f32 %v12267_v50, %v11535_v18  ;;  %v1343_v18 = vmul.f32 %v12267_v50, %v11483_v56 }
 0x20a   :  { %15171 = vst [vmem:[#allocation118_spill] sm:$0xff] %v12348_v61  ;;  %v12360_v22 = vpop.xlane.xlu0 %808  ;;  %v978_v61 = vsel %vm365_vm0, %v249_v15, 0.0  ;;  %v12379_v15 = vpack.c.bf16 %v1342_v37, %v1341_v25  ;;  %v2969_v19 = vsel %vm2968_vm5, %v2967_v38, %v2965_v32  ;;  %v1662_v25 = vpack.c.bf16 %v1352_v58, %v1351_v40 }
 0x20b   :  { %15172 = vst [vmem:[#allocation119_spill] sm:$0xff] %v12350_v24  ;;  %v921_v24 = vsel %vm365_vm0, %v230_v47, 0.0  ;;  %v2636_v47 = vunpack.c.h.b16 %v12327_v26  ;;  %v263_v26 = vld [vmem:[%s15022_s0 + $0x6d0] sm:$0xff]  ;;  %v1354_v37 = vmul.f32 %v12267_v50, %v11560_v33  ;;  %v2975_v13 = vperm.slane %v2637_v9, %v12377_v63 }
 0x20c   :  { %15173 = vst [vmem:[#allocation120_spill] sm:$0xff] %v12360_v22  ;;  %v2639_v32 = vunpack.c.l.b16 %v12379_v15  ;;  %v1020_v38 = vsel %vm365_vm0, %v263_v26, 0.0  ;;  %v12421_v22 = vadd.s32 4294967224, %v12290_v34  ;;  %v2647_v9 = vunpack.c.l.b16 %v1661_v48 }
 0x20d   :  { %15176 = vst [vmem:[#allocation123_spill] sm:$0xff] %v12387_v21  ;;  %v2971_v33 = vperm.slane %v2636_v47, %v12382_v10  ;;  %v2649_v14 = vunpack.c.l.b16 %v1662_v25 }
 0x20e   :  { %979 = vadd.xlane.f32.xlu2 %v978_v61  ;;  %922 = vadd.xlane.f32.xlu1 %v921_v24  ;;  %v264_v61 = vld [vmem:[%s15022_s0 + $0x6d8] sm:$0xff]  ;;  %v2638_v24 = vunpack.c.h.b16 %v1656_v28  ;;  %v1344_v28 = vmul.f32 %v12267_v50, %v11481_v55  ;;  %v981_v55 = vsel %vm365_vm0, %v250_v16, 0.0  ;;  %v2983_v26 = vperm.slane %v2639_v32, %v12390_v29  ;;  %v218_v16 = vld [vmem:[%s15022_s0 + $0x568] sm:$0xff] }
 0x20f   :  { %919 = vadd.xlane.f32.xlu0 %v918_v46  ;;  %v1023_v40 = vsel %vm365_vm0, %v264_v61, 0.0  ;;  %v2973_v56 = vsel %vm2972_vm6, %v2971_v33, %v2969_v19  ;;  %v2640_v61 = vunpack.c.h.b16 %v12379_v15  ;;  %v1345_v19 = vmul.f32 %v12267_v50, %v11506_v3  ;;  %v231_v15 = vld [vmem:[%s15022_s0 + $0x5d0] sm:$0xff] }
 0x210   :  { %v2977_v47 = vsel %vm2976_vm7, %v2975_v13, %v2973_v56  ;;  %v12427_v8 = vpack.c.bf16 %v1344_v28, %v1343_v18  ;;  %v3017_v3 = vperm.slane %v2649_v14, %v12318_v39  ;;  %v12456_v32 = vadd.s32 4294967208, %v12290_v34 }
 0x211   :  { %v12402_v31 = vpop.xlane.xlu2 %949  ;;  %v12404_v46 = vpop.xlane.xlu1 %946  ;;  %v1356_v14 = vmul.f32 %v12267_v50, %v11553_v27  ;;  %v885_v56 = vsel %vm365_vm0, %v218_v16, 0.0 }
 0x212   :  { %15177 = vst [vmem:[#allocation124_spill] sm:$0xff] %v12402_v31  ;;  %v12415_v58 = vpop.xlane.xlu0 %943  ;;  %v2979_v31 = vperm.slane %v2638_v24, %v12387_v21  ;;  %v3014_v24 = vperm.slane %v2647_v9, %v12290_v34  ;;  %v2641_v33 = vunpack.c.l.b16 %v12427_v8  ;;  %v1355_v9 = vmul.f32 %v12267_v50, %v11555_v30 }
 0x213   :  { %15178 = vst [vmem:[#allocation125_spill] sm:$0xff] %v12404_v46  ;;  %v2648_v46 = vunpack.c.h.b16 %v1661_v48  ;;  %v1346_v48 = vmul.f32 %v12267_v50, %v11501_v1  ;;  %v12445_v1 = vadd.s32 4294967216, %v12290_v34  ;;  %v1358_v30 = vmul.f32 %v12267_v50, %v11573_v43 }
 0x214   :  { %15179 = vst [vmem:[#allocation126_spill] sm:$0xff] %v12415_v58  ;;  %v1663_v58 = vpack.c.bf16 %v1354_v37, %v1353_v7  ;;  %v2650_v37 = vunpack.c.h.b16 %v1662_v25  ;;  %v2981_v13 = vsel %vm2980_vm8, %v2979_v31, %v2977_v47  ;;  %v217_v25 = vld [vmem:[%s15022_s0 + $0x560] sm:$0xff]  ;;  %v2642_v43 = vunpack.c.h.b16 %v12427_v8 }
 0x215   :  { %v3015_v7 = vperm.slane %v2648_v46, %v12298_v44  ;;  %v2985_v31 = vsel %vm2984_vm9, %v2983_v26, %v2981_v13  ;;  %v12469_v47 = vpack.c.bf16 %v1346_v48, %v1345_v19  ;;  %v1365_v48 = vmul.f32 %v12267_v50, %v11607_v5  ;;  %v252_v5 = vld [vmem:[%s15022_s0 + $0x678] sm:$0xff] }
 0x216   :  { %1024 = vadd.xlane.f32.xlu2 %v1023_v40  ;;  %1021 = vadd.xlane.f32.xlu1 %v1020_v38  ;;  %v2651_v28 = vunpack.c.l.b16 %v1663_v58  ;;  %v2987_v40 = vperm.slane %v2640_v61, %v12421_v22  ;;  %v3019_v26 = vperm.slane %v2650_v37, %v12335_v52  ;;  %v882_v61 = vsel %vm365_vm0, %v217_v25, 0.0  ;;  %v232_v25 = vld [vmem:[%s15022_s0 + $0x5d8] sm:$0xff] }
 0x217   :  { %982 = vadd.xlane.f32.xlu0 %v981_v55  ;;  %v924_v55 = vsel %vm365_vm0, %v231_v15, 0.0  ;;  %v1357_v15 = vmul.f32 %v12267_v50, %v11578_v45  ;;  %v1366_v19 = vmul.f32 %v12267_v50, %v11632_v23  ;;  %v251_v23 = vld [vmem:[%s15022_s0 + $0x670] sm:$0xff]  ;;  %v2643_v16 = vunpack.c.l.b16 %v12469_v47 }
 0x218   :  { %v3021_v27 = vperm.slane %v2651_v28, %v12345_v49  ;;  %v2989_v37 = vsel %vm2988_vm10, %v2987_v40, %v2985_v31  ;;  %v1367_v31 = vmul.f32 %v12267_v50, %v11627_v20 }
 0x219   :  { %v12448_v18 = vpop.xlane.xlu2 %850  ;;  %v12450_v46 = vpop.xlane.xlu1 %847  ;;  %v1669_v40 = vpack.c.bf16 %v1366_v19, %v1365_v48  ;;  %v1359_v48 = vmul.f32 %v12267_v50, %v11571_v42  ;;  %v1347_v42 = vmul.f32 %v12267_v50, %v11499_v0 }
 0x21a   :  { %15180 = vst [vmem:[#allocation127_spill] sm:$0xff] %v12450_v46  ;;  %v12461_v38 = vpop.xlane.xlu0 %952  ;;  %v3016_v46 = vsel %vm2956_vm2, %v3015_v7, %v3014_v24  ;;  %v1664_v24 = vpack.c.bf16 %v1356_v14, %v1355_v9  ;;  %v2991_v7 = vperm.slane %v2641_v33, %v12445_v1  ;;  %v1665_v33 = vpack.c.bf16 %v1358_v30, %v1357_v15 }
 0x21b   :  { %15181 = vst [vmem:[#allocation128_spill] sm:$0xff] %v12461_v38  ;;  %v3018_v13 = vsel %vm2960_vm3, %v3017_v3, %v3016_v46  ;;  %v2652_v38 = vunpack.c.h.b16 %v1663_v58  ;;  %v12485_v58 = vadd.s32 4294967200, %v12290_v34  ;;  %v1368_v14 = vmul.f32 %v12267_v50, %v11625_v17 }
 0x21c   :  { %v3020_v45 = vsel %vm15030_vm4, %v3019_v26, %v3018_v13  ;;  %v984_v26 = vsel %vm365_vm0, %v251_v23, 0.0  ;;  %v2993_v13 = vsel %vm2992_vm11, %v2991_v7, %v2989_v37  ;;  %v2644_v17 = vunpack.c.h.b16 %v12469_v47 }
 0x21d   :  { %15182 = vst [vmem:[#allocation129_spill] sm:$0xff] %v12485_v58  ;;  %v3022_v3 = vsel %vm2968_vm5, %v3021_v27, %v3020_v45  ;;  %v3023_v8 = vperm.slane %v2652_v38, %v12382_v10  ;;  %v12514_v38 = vadd.s32 4294967192, %v12290_v34  ;;  %v927_v27 = vsel %vm365_vm0, %v232_v25, 0.0 }
 0x21e   :  { %925 = vadd.xlane.f32.xlu2 %v924_v55  ;;  %886 = vadd.xlane.f32.xlu1 %v885_v56  ;;  %v2653_v55 = vunpack.c.l.b16 %v1664_v24  ;;  %v987_v56 = vsel %vm365_vm0, %v252_v5, 0.0  ;;  %v2999_v20 = vperm.slane %v2643_v16, %v12485_v58  ;;  %v2654_v30 = vunpack.c.h.b16 %v1664_v24 }
 0x21f   :  { %883 = vadd.xlane.f32.xlu0 %v882_v61  ;;  %15183 = vst [vmem:[#allocation130_spill] sm:$0xff] %v12514_v38  ;;  %v2995_v61 = vperm.slane %v2642_v43, %v12456_v32  ;;  %v3024_v15 = vsel %vm2972_vm6, %v3023_v8, %v3022_v3  ;;  %v2655_v19 = vunpack.c.l.b16 %v1665_v33  ;;  %v1360_v45 = vmul.f32 %v12267_v50, %v11596_v60  ;;  %v219_v3 = vld [vmem:[%s15022_s0 + $0x570] sm:$0xff] }
 0x220   :  { %v12528_v43 = vpack.c.bf16 %v1368_v14, %v1367_v31  ;;  %v2663_v7 = vunpack.c.l.b16 %v1669_v40  ;;  %v3025_v47 = vperm.slane %v2653_v55, %v12377_v63  ;;  %v2664_v5 = vunpack.c.h.b16 %v1669_v40 }
 0x221   :  { %v12500_v28 = vpop.xlane.xlu2 %853  ;;  %v12502_v46 = vpop.xlane.xlu1 %994  ;;  %v1370_v24 = vmul.f32 %v12267_v50, %v11645_v36  ;;  %v1369_v23 = vmul.f32 %v12267_v50, %v11650_v41  ;;  %v2997_v60 = vsel %vm2996_vm12, %v2995_v61, %v2993_v13  ;;  %v1348_v37 = vmul.f32 %v12267_v50, %v11524_v12  ;;  %v266_v36 = vld [vmem:[%s15022_s0 + $0x6e8] sm:$0xff] }
 0x222   :  { %v12511_v9 = vpop.xlane.xlu0 %991  ;;  %v2656_v16 = vunpack.c.h.b16 %v1665_v33  ;;  %v3001_v41 = vsel %vm3000_vm13, %v2999_v20, %v2997_v60  ;;  %v3003_v8 = vperm.slane %v2644_v17, %v12514_v38  ;;  %v3027_v0 = vperm.slane %v2654_v30, %v12387_v21  ;;  %v265_v33 = vld [vmem:[%s15022_s0 + $0x6e0] sm:$0xff] }
 0x223   :  { %v3026_v25 = vsel %vm2976_vm7, %v3025_v47, %v3024_v15  ;;  %v3029_v31 = vperm.slane %v2655_v19, %v12390_v29  ;;  %v1666_v40 = vpack.c.bf16 %v1360_v45, %v1359_v48  ;;  %v2665_v55 = vunpack.c.l.b16 %v12528_v43 }
 0x224   :  { %v3046_v61 = vperm.slane %v2664_v5, %v12298_v44  ;;  %v1671_v13 = vpack.c.bf16 %v1370_v24, %v1369_v23  ;;  %v888_v17 = vsel %vm365_vm0, %v219_v3, 0.0  ;;  %v12565_v20 = vpack.c.bf16 %v1348_v37, %v1347_v42  ;;  %v234_v37 = vld [vmem:[%s15022_s0 + $0x5e8] sm:$0xff] }
 0x225   :  { %v3028_v30 = vsel %vm2980_vm8, %v3027_v0, %v3026_v25  ;;  %v3031_v15 = vperm.slane %v2656_v16, %v12421_v22  ;;  %v1026_v48 = vsel %vm365_vm0, %v265_v33, 0.0  ;;  %v1362_v19 = vmul.f32 %v12267_v50, %v11589_v54 }
 0x226   :  { %988 = vadd.xlane.f32.xlu2 %v987_v56  ;;  %985 = vadd.xlane.f32.xlu1 %v984_v26  ;;  %v3045_v56 = vperm.slane %v2663_v7, %v12290_v34  ;;  %v1361_v45 = vmul.f32 %v12267_v50, %v11591_v57  ;;  %v1371_v7 = vmul.f32 %v12267_v50, %v11643_v35  ;;  %v2657_v24 = vunpack.c.l.b16 %v1666_v40 }
 0x227   :  { %928 = vadd.xlane.f32.xlu0 %v927_v27  ;;  %v1029_v27 = vsel %vm365_vm0, %v266_v36, 0.0  ;;  %v1372_v47 = vmul.f32 %v12267_v50, %v11668_v62  ;;  %v3030_v5 = vsel %vm2984_vm9, %v3029_v31, %v3028_v30  ;;  %v2666_v23 = vunpack.c.h.b16 %v12528_v43  ;;  %v233_v43 = vld [vmem:[%s15022_s0 + $0x5e0] sm:$0xff]  ;;  %v220_v31 = vld [vmem:[%s15022_s0 + $0x578] sm:$0xff] }
 0x228   :  { %v3048_v42 = vperm.slane %v2665_v55, %v12318_v39  ;;  %v3047_v54 = vsel %vm2956_vm2, %v3046_v61, %v3045_v56  ;;  %v2667_v60 = vunpack.c.l.b16 %v1671_v13  ;;  %v12583_v57 = vadd.s32 4294967184, %v12290_v34 }
 0x229   :  { %v12550_v14 = vpop.xlane.xlu2 %958  ;;  %v12552_v12 = vpop.xlane.xlu1 %955  ;;  %v12586_v35 = vadd.s32 4294967176, %v12290_v34  ;;  %v2658_v62 = vunpack.c.h.b16 %v1666_v40  ;;  %v12595_v16 = vsel %vm3004_vm14, %v3003_v8, %v3001_v41  ;;  %v2645_v3 = vunpack.c.l.b16 %v12565_v20 }
 0x22a   :  { %15184 = vst [vmem:[#allocation131_spill] sm:$0xff] %v12550_v14  ;;  %v12560_v26 = vpop.xlane.xlu0 %856  ;;  %v3032_v36 = vsel %vm2988_vm10, %v3031_v15, %v3030_v5  ;;  %v1672_v0 = vpack.c.bf16 %v1372_v47, %v1371_v7  ;;  %v12606_v40 = vpack.c.bf16 %v1362_v19, %v1361_v45  ;;  %v3033_v55 = vperm.slane %v2657_v24, %v12445_v1 }
 0x22b   :  { %15185 = vst [vmem:[#allocation132_spill] sm:$0xff] %v12552_v12  ;;  %v3050_v41 = vperm.slane %v2666_v23, %v12335_v52  ;;  %v3049_v8 = vsel %vm2960_vm3, %v3048_v42, %v3047_v54  ;;  %v2668_v61 = vunpack.c.h.b16 %v1671_v13  ;;  %v930_v30 = vsel %vm365_vm0, %v233_v43, 0.0  ;;  %v15186_v23 = vld [vmem:[#allocation11_spill] sm:$0xff]  ;;  %v301_v43 = vld [vmem:[%s15022_s0 + $0x800] sm:$0xff] }
 0x22c   :  { %v3035_v15 = vperm.slane %v2658_v62, %v12456_v32  ;;  %v1381_v19 = vmul.f32 %v12267_v50, %v11722_v11  ;;  %v891_v45 = vsel %vm365_vm0, %v220_v31, 0.0  ;;  %v1364_v7 = vmul.f32 %v12267_v50, %v11609_v6 }
 0x22d   :  { %v3051_v13 = vsel %vm15030_vm4, %v3050_v41, %v3049_v8  ;;  %v1374_v47 = vmul.f32 %v12267_v50, %v11661_v53  ;;  %v2669_v5 = vunpack.c.l.b16 %v1672_v0  ;;  %v1373_v24 = vmul.f32 %v12267_v50, %v11663_v59  ;;  %v15187_v59 = vld [vmem:[#allocation13_spill] sm:$0xff] }
 0x22e   :  { %889 = vadd.xlane.f32.xlu2 %v888_v17  ;;  %1030 = vadd.xlane.f32.xlu1 %v1029_v27  ;;  %v3052_v17 = vperm.slane %v2667_v60, %v12345_v49  ;;  %v933_v27 = vsel %vm365_vm0, %v234_v37, 0.0  ;;  %v1384_v11 = vmul.f32 %v12267_v50, %v11740_v51  ;;  %v3034_v6 = vsel %vm2992_vm11, %v3033_v55, %v3032_v36  ;;  %v268_v36 = vld [vmem:[%s15022_s0 + $0x6f8] sm:$0xff] }
 0x22f   :  { %1027 = vadd.xlane.f32.xlu0 %v1026_v48  ;;  %v1382_v48 = vmul.f32 %v12267_v50, %v11717_v4  ;;  %v1383_v4 = vmul.f32 %v12267_v50, %v11715_v2  ;;  %v1363_v42 = vmul.f32 %v12267_v50, %v15186_v23  ;;  %v3054_v54 = vperm.slane %v2668_v61, %v12382_v10  ;;  %v15188_v2 = vld [vmem:[#allocation14_spill] sm:$0xff] }
 0x230   :  { %v3053_v53 = vsel %vm2968_vm5, %v3052_v17, %v3051_v13  ;;  %v2670_v60 = vunpack.c.h.b16 %v1672_v0  ;;  %v1376_v62 = vmul.f32 %v12267_v50, %v15187_v59  ;;  %v1375_v37 = vmul.f32 %v12267_v50, %v15188_v2  ;;  %v267_v17 = vld [vmem:[%s15022_s0 + $0x6f0] sm:$0xff] }
 0x231   :  { %v12599_v25 = vpop.xlane.xlu2 %895  ;;  %v12601_v33 = vpop.xlane.xlu1 %1000  ;;  %v1677_v51 = vpack.c.bf16 %v1382_v48, %v1381_v19  ;;  %v2646_v31 = vunpack.c.h.b16 %v12565_v20  ;;  %v3007_v55 = vperm.slane %v2645_v3, %v12583_v57  ;;  %v2659_v0 = vunpack.c.l.b16 %v12606_v40 }
 0x232   :  { %v12611_v56 = vpop.xlane.xlu0 %997  ;;  %v3056_v41 = vperm.slane %v2669_v5, %v12377_v63  ;;  %v1673_v48 = vpack.c.bf16 %v1374_v47, %v1373_v24  ;;  %v1678_v20 = vpack.c.bf16 %v1384_v11, %v1383_v4  ;;  %v12663_v3 = vpack.c.bf16 %v1364_v7, %v1363_v42 }
 0x233   :  { %v1134_v13 = vsel %vm365_vm0, %v301_v43, 0.0  ;;  %v1035_v5 = vsel %vm365_vm0, %v268_v36, 0.0  ;;  %v3058_v23 = vperm.slane %v2670_v60, %v12387_v21  ;;  %v12669_v59 = vpack.c.bf16 %v1376_v62, %v1375_v37 }
 0x234   :  { %v3011_v47 = vperm.slane %v2646_v31, %v12586_v35  ;;  %v3037_v24 = vperm.slane %v2659_v0, %v12485_v58  ;;  %v2680_v4 = vunpack.c.h.b16 %v1677_v51  ;;  %v2671_v11 = vunpack.c.l.b16 %v1673_v48 }
 0x235   :  { %v2681_v60 = vunpack.c.l.b16 %v1678_v20  ;;  %v3009_v62 = vsel %vm3008_vm15, %v3007_v55, %v12595_v16  ;;  %v2661_v43 = vunpack.c.l.b16 %v12663_v3  ;;  %v2673_v31 = vunpack.c.l.b16 %v12669_v59  ;;  %v235_v16 = vld [vmem:[%s15022_s0 + $0x5f0] sm:$0xff] }
 0x236   :  { %934 = vadd.xlane.f32.xlu2 %v933_v27  ;;  %931 = vadd.xlane.f32.xlu1 %v930_v30  ;;  %v2660_v27 = vunpack.c.h.b16 %v12606_v40  ;;  %v3036_v30 = vsel %vm2996_vm12, %v3035_v15, %v3034_v6  ;;  %v2679_v40 = vunpack.c.l.b16 %v1677_v51  ;;  %v1032_v15 = vsel %vm365_vm0, %v267_v17, 0.0  ;;  %v15189_v6 = vld [vmem:[#allocation18_spill] sm:$0xff] }
 0x237   :  { %892 = vadd.xlane.f32.xlu0 %v891_v45  ;;  %v3055_v45 = vsel %vm2972_vm6, %v3054_v54, %v3053_v53  ;;  %v1386_v42 = vmul.f32 %v12267_v50, %v15189_v6  ;;  %v15190_v53 = vld [vmem:[#allocation19_spill] sm:$0xff]  ;;  %v3038_v37 = vsel %vm3000_vm13, %v3037_v24, %v3036_v30  ;;  %v2672_v51 = vunpack.c.h.b16 %v1673_v48  ;;  %v15192_v48 = vld [vmem:[#allocation22_spill] sm:$0xff] }
 0x238   :  { %v3057_v7 = vsel %vm2976_vm7, %v3056_v41, %v3055_v45  ;;  %v1385_v54 = vmul.f32 %v12267_v50, %v15190_v53  ;;  %v3039_v2 = vperm.slane %v2660_v27, %v12514_v38  ;;  %v3076_v0 = vperm.slane %v2679_v40, %v12290_v34  ;;  %v236_v41 = vld [vmem:[%s15022_s0 + $0x5f8] sm:$0xff]  ;;  %v15191_v27 = vld [vmem:[#allocation21_spill] sm:$0xff]  ;;  %v15197_v38 = vld [vmem:[#allocation16_spill] sm:$0xff] }
 0x239   :  { %v12652_v8 = vpop.xlane.xlu2 %862  ;;  %v12654_v61 = vpop.xlane.xlu1 %859  ;;  %v3059_v36 = vsel %vm2980_vm8, %v3058_v23, %v3057_v7  ;;  %v3077_v55 = vperm.slane %v2680_v4, %v12298_v44  ;;  %v2682_v17 = vunpack.c.h.b16 %v1678_v20  ;;  %v1388_v30 = vmul.f32 %v12267_v50, %v15191_v27  ;;  %v302_v23 = vld [vmem:[%s15022_s0 + $0x808] sm:$0xff]  ;;  %v15194_v4 = vld [vmem:[#allocation12_spill] sm:$0xff] }
 0x23a   :  { %v12661_v19 = vpop.xlane.xlu0 %898  ;;  %v1387_v45 = vmul.f32 %v12267_v50, %v15192_v48  ;;  %v2662_v40 = vunpack.c.h.b16 %v12663_v3  ;;  %v1679_v24 = vpack.c.bf16 %v1386_v42, %v1385_v54  ;;  %v3079_v20 = vperm.slane %v2681_v60, %v12318_v39  ;;  %v15195_v53 = vld [vmem:[#allocation17_spill] sm:$0xff] }
 0x23b   :  { %v1377_v6 = vmul.f32 %v12267_v50, %v15194_v4  ;;  %v1378_v27 = vmul.f32 %v12267_v50, %v15195_v53  ;;  %v939_v48 = vsel %vm365_vm0, %v236_v41, 0.0  ;;  %v3062_v12 = vperm.slane %v2672_v51, %v12421_v22  ;;  %v15196_v53 = vld [vmem:[#allocation15_spill] sm:$0xff] }
 0x23c   :  { %v1137_v42 = vsel %vm365_vm0, %v302_v23, 0.0  ;;  %v3064_v54 = vperm.slane %v2673_v31, %v12445_v1  ;;  %v3078_v60 = vsel %vm2956_vm2, %v3077_v55, %v3076_v0  ;;  %v3081_v4 = vperm.slane %v2682_v17, %v12335_v52 }
 0x23d   :  { %v1680_v14 = vpack.c.bf16 %v1388_v30, %v1387_v45  ;;  %v1380_v41 = vmul.f32 %v12267_v50, %v15196_v53  ;;  %v2683_v51 = vunpack.c.l.b16 %v1679_v24  ;;  %v12731_v31 = vpack.c.bf16 %v1378_v27, %v1377_v6 }
 0x23e   :  { %1135 = vadd.xlane.f32.xlu2 %v1134_v13  ;;  %1036 = vadd.xlane.f32.xlu1 %v1035_v5  ;;  %v2684_v0 = vunpack.c.h.b16 %v1679_v24  ;;  %v12734_v55 = vsel %vm3004_vm14, %v3039_v2, %v3038_v37  ;;  %v12737_v17 = vperm.slane %v2661_v43, %v12583_v57  ;;  %v1494_v24 = vmul.f32 %v12267_v50, %v12448_v18 }
 0x23f   :  { %1033 = vadd.xlane.f32.xlu0 %v1032_v15  ;;  %v3060_v15 = vperm.slane %v2671_v11, %v12390_v29  ;;  %v2674_v11 = vunpack.c.h.b16 %v12669_v59  ;;  %v12729_v59 = vsel %vm3012_vm1, %v3011_v47, %v3009_v62  ;;  %v269_v47 = vld [vmem:[%s15022_s0 + $0x700] sm:$0xff]  ;;  %v304_v62 = vld [vmem:[%s15022_s0 + $0x818] sm:$0xff]  ;;  %v2685_v43 = vunpack.c.l.b16 %v1680_v14 }
 0x240   :  { %15198 = vst [vmem:[#allocation13_spill] sm:$0xff] %v12729_v59  ;;  %v2686_v53 = vunpack.c.h.b16 %v1680_v14  ;;  %v1541_v14 = vmul.f32 %v12267_v50, %v12511_v9  ;;  %v1544_v9 = vmul.f32 %v12267_v50, %v12601_v33  ;;  %v15224_v59 = vld [vmem:[#allocation31_spill] sm:$0xff] }
 0x241   :  { %v12698_v13 = vpop.xlane.xlu2 %961  ;;  %v12700_v5 = vpop.xlane.xlu1 %904  ;;  %v3061_v3 = vsel %vm2984_vm9, %v3060_v15, %v3059_v36  ;;  %v3080_v36 = vsel %vm2960_vm3, %v3079_v20, %v3078_v60  ;;  %v12753_v2 = vperm.slane %v2674_v11, %v12456_v32  ;;  %v3083_v15 = vperm.slane %v2683_v51, %v12345_v49  ;;  %v15200_v20 = vld [vmem:[#allocation127_spill] sm:$0xff]  ;;  %v15201_v60 = vld [vmem:[#allocation20_spill] sm:$0xff] }
 0x242   :  { %15193 = vst [vmem:[#allocation11_spill] sm:$0xff] %v12698_v13  ;;  %v12708_v7 = vpop.xlane.xlu0 %901  ;;  %v936_v13 = vsel %vm365_vm0, %v235_v16, 0.0  ;;  %v1379_v16 = vmul.f32 %v12267_v50, %v15197_v38  ;;  %v12740_v38 = vperm.slane %v2662_v40, %v12586_v35  ;;  %v3063_v30 = vsel %vm2988_vm10, %v3062_v12, %v3061_v3  ;;  %v303_v12 = vld [vmem:[%s15022_s0 + $0x810] sm:$0xff] }
 0x243   :  { %v12750_v45 = vsel %vm2992_vm11, %v3064_v54, %v3063_v30  ;;  %v3082_v37 = vsel %vm15030_vm4, %v3081_v4, %v3080_v36  ;;  %v1493_v6 = vmul.f32 %v12267_v50, %v15200_v20  ;;  %v3085_v3 = vperm.slane %v2684_v0, %v12382_v10  ;;  %v15203_v36 = vld [vmem:[#allocation24_spill] sm:$0xff]  ;;  %v15204_v30 = vld [vmem:[#allocation25_spill] sm:$0xff] }
 0x244   :  { %15199 = vst [vmem:[#allocation14_spill] sm:$0xff] %v12740_v38  ;;  %v12759_v40 = vpack.c.bf16 %v1380_v41, %v1379_v16  ;;  %v1038_v11 = vsel %vm365_vm0, %v269_v47, 0.0  ;;  %v3084_v54 = vsel %vm2968_vm5, %v3083_v15, %v3082_v37  ;;  %v1389_v4 = vmul.f32 %v12267_v50, %v15201_v60  ;;  %v15202_v16 = vld [vmem:[#allocation23_spill] sm:$0xff] }
 0x245   :  { %v1140_v18 = vsel %vm365_vm0, %v303_v12, 0.0  ;;  %v3087_v41 = vperm.slane %v2685_v43, %v12377_v63  ;;  %v1392_v51 = vmul.f32 %v12267_v50, %v15202_v16  ;;  %v1391_v0 = vmul.f32 %v12267_v50, %v15203_v36 }
 0x246   :  { %940 = vadd.xlane.f32.xlu2 %v939_v48  ;;  %937 = vadd.xlane.f32.xlu1 %v936_v13  ;;  %v2675_v48 = vunpack.c.l.b16 %v12731_v31  ;;  %v1390_v47 = vmul.f32 %v12267_v50, %v15204_v30  ;;  %v1542_v37 = vmul.f32 %v12267_v50, %v12502_v46  ;;  %v3086_v20 = vsel %vm2972_vm6, %v3085_v3, %v3084_v54  ;;  %v317_v3 = vld [vmem:[%s15022_s0 + $0x880] sm:$0xff] }
 0x247   :  { %1138 = vadd.xlane.f32.xlu0 %v1137_v42  ;;  %v1143_v42 = vsel %vm365_vm0, %v304_v62, 0.0  ;;  %v12783_v62 = vpack.c.bf16 %v1494_v24, %v1493_v6  ;;  %v1495_v24 = vmul.f32 %v12267_v50, %v12500_v28  ;;  %v1496_v46 = vmul.f32 %v12267_v50, %v12560_v26 }
 0x248   :  { %v1543_v6 = vmul.f32 %v12267_v50, %v12611_v56  ;;  %v3088_v28 = vsel %vm2976_vm7, %v3087_v41, %v3086_v20  ;;  %v3089_v26 = vperm.slane %v2686_v53, %v12387_v21  ;;  %v12812_v54 = vpack.c.bf16 %v1392_v51, %v1391_v0  ;;  %v270_v56 = vld [vmem:[%s15022_s0 + $0x708] sm:$0xff] }
 0x249   :  { %v1007_v13 = vpop.xlane.xlu2 %1006  ;;  %v1004_v23 = vpop.xlane.xlu1 %1003  ;;  %v2791_v16 = vunpack.c.l.b16 %v12783_v62  ;;  %v1757_v36 = vpack.c.bf16 %v1542_v37, %v1541_v14  ;;  %v2792_v15 = vunpack.c.h.b16 %v12783_v62  ;;  %v1182_v51 = vsel %vm365_vm0, %v317_v3, 0.0 }
 0x24a   :  { %v12766_v27 = vpop.xlane.xlu0 %964  ;;  %v1734_v0 = vpack.c.bf16 %v1496_v46, %v1495_v24  ;;  %v1758_v20 = vpack.c.bf16 %v1544_v9, %v1543_v6  ;;  %v1498_v12 = vmul.f32 %v12267_v50, %v12652_v8  ;;  %v1546_v37 = vmul.f32 %v12267_v50, %v1007_v13 }
 0x24b   :  { %v1545_v62 = vmul.f32 %v12267_v50, %v1004_v23  ;;  %v1509_v24 = vmul.f32 %v12267_v50, %v12599_v25  ;;  %v1510_v46 = vmul.f32 %v12267_v50, %v12661_v19  ;;  %v12837_v8 = vsel %vm2980_vm8, %v3089_v26, %v3088_v28  ;;  %v305_v19 = vld [vmem:[%s15022_s0 + $0x820] sm:$0xff]  ;;  %v272_v28 = vld [vmem:[%s15022_s0 + $0x718] sm:$0xff] }
 0x24c   :  { %v1512_v13 = vmul.f32 %v12267_v50, %v12700_v5  ;;  %v1511_v23 = vmul.f32 %v12267_v50, %v12708_v7  ;;  %v3293_v25 = vperm.slane %v2791_v16, %v12290_v34  ;;  %v2793_v3 = vunpack.c.l.b16 %v1734_v0 }
 0x24d   :  { %v2841_v26 = vunpack.c.l.b16 %v1758_v20  ;;  %v1759_v5 = vpack.c.bf16 %v1546_v37, %v1545_v62  ;;  %v3294_v16 = vperm.slane %v2792_v15, %v12298_v44  ;;  %v2794_v37 = vunpack.c.h.b16 %v1734_v0  ;;  %v15205_v0 = vld [vmem:[#allocation27_spill] sm:$0xff] }
 0x24e   :  { %1039 = vadd.xlane.f32.xlu2 %v1038_v11  ;;  %1144 = vadd.xlane.f32.xlu1 %v1143_v42  ;;  %v318_v11 = vld [vmem:[%s15022_s0 + $0x888] sm:$0xff]  ;;  %v12808_v42 = vperm.slane %v2675_v48, %v12485_v58  ;;  %v3296_v62 = vperm.slane %v2793_v3, %v12318_v39  ;;  %v2842_v43 = vunpack.c.h.b16 %v1758_v20  ;;  %v12876_v20 = vmul.f32 %v12267_v50, %v15205_v0 }
 0x24f   :  { %1141 = vadd.xlane.f32.xlu0 %v1140_v18  ;;  %v1681_v18 = vpack.c.bf16 %v1390_v47, %v1389_v4  ;;  %v1185_v53 = vsel %vm365_vm0, %v318_v11, 0.0  ;;  %v1041_v4 = vsel %vm365_vm0, %v270_v56, 0.0  ;;  %v1497_v47 = vmul.f32 %v12267_v50, %v12654_v61 }
 0x250   :  { %v2840_v11 = vunpack.c.h.b16 %v1757_v36  ;;  %v3389_v15 = vperm.slane %v2841_v26, %v12318_v39  ;;  %v2843_v38 = vunpack.c.l.b16 %v1759_v5  ;;  %v3295_v3 = vsel %vm2956_vm2, %v3294_v16, %v3293_v25 }
 0x251   :  { %v908_v33 = vpop.xlane.xlu2 %907  ;;  %v869_v60 = vpop.xlane.xlu1 %868  ;;  %v2687_v9 = vunpack.c.l.b16 %v1681_v18  ;;  %v2688_v6 = vunpack.c.h.b16 %v1681_v18  ;;  %v1735_v56 = vpack.c.bf16 %v1498_v12, %v1497_v47  ;;  %v271_v18 = vld [vmem:[%s15022_s0 + $0x710] sm:$0xff]  ;;  %v1742_v12 = vpack.c.bf16 %v1512_v13, %v1511_v23 }
 0x252   :  { %v1500_v30 = vmul.f32 %v12267_v50, %v869_v60  ;;  %v866_v48 = vpop.xlane.xlu0 %865  ;;  %v2839_v60 = vunpack.c.l.b16 %v1757_v36  ;;  %v1513_v36 = vmul.f32 %v12267_v50, %v908_v33  ;;  %v1146_v33 = vsel %vm365_vm0, %v305_v19, 0.0 }
 0x253   :  { %v1499_v41 = vmul.f32 %v12267_v50, %v866_v48  ;;  %v1047_v47 = vsel %vm365_vm0, %v272_v28, 0.0  ;;  %v1044_v61 = vsel %vm365_vm0, %v271_v18, 0.0  ;;  %v2809_v28 = vunpack.c.l.b16 %v1742_v12  ;;  %v320_v18 = vld [vmem:[%s15022_s0 + $0x898] sm:$0xff] }
 0x254   :  { %v3386_v48 = vperm.slane %v2839_v60, %v12290_v34  ;;  %v2795_v60 = vunpack.c.l.b16 %v1735_v56  ;;  %v3297_v26 = vsel %vm2960_vm3, %v3296_v62, %v3295_v3  ;;  %v2796_v16 = vunpack.c.h.b16 %v1735_v56 }
 0x255   :  { %v12830_v14 = vpack.c.bf16 %v1500_v30, %v1499_v41  ;;  %v3387_v41 = vperm.slane %v2840_v11, %v12298_v44  ;;  %v3327_v56 = vperm.slane %v2809_v28, %v12318_v39 }
 0x256   :  { %1186 = vadd.xlane.f32.xlu2 %v1185_v53  ;;  %1183 = vadd.xlane.f32.xlu1 %v1182_v51  ;;  %v1741_v53 = vpack.c.bf16 %v1510_v46, %v1509_v24  ;;  %v3091_v24 = vperm.slane %v2687_v9, %v12390_v29  ;;  %v12872_v46 = vperm.slane %v2688_v6, %v12421_v22 }
 0x257   :  { %1042 = vadd.xlane.f32.xlu0 %v1041_v4  ;;  %v3388_v19 = vsel %vm2956_vm2, %v3387_v41, %v3386_v48  ;;  %v3298_v9 = vperm.slane %v2794_v37, %v12335_v52  ;;  %v3391_v6 = vperm.slane %v2842_v43, %v12335_v52  ;;  %v3393_v48 = vperm.slane %v2843_v38, %v12345_v49  ;;  %v306_v43 = vld [vmem:[%s15022_s0 + $0x828] sm:$0xff] }
 0x258   :  { %v2807_v13 = vunpack.c.l.b16 %v1741_v53  ;;  %v2808_v23 = vunpack.c.h.b16 %v1741_v53  ;;  %v319_v53 = vld [vmem:[%s15022_s0 + $0x890] sm:$0xff]  ;;  %v3390_v25 = vsel %vm2960_vm3, %v3389_v15, %v3388_v19  ;;  %v1191_v38 = vsel %vm365_vm0, %v320_v18, 0.0  ;;  %v273_v18 = vld [vmem:[%s15022_s0 + $0x720] sm:$0xff] }
 0x259   :  { %v12852_v7 = vpop.xlane.xlu2 %970  ;;  %v12854_v30 = vpop.xlane.xlu1 %967  ;;  %v1188_v15 = vsel %vm365_vm0, %v319_v53, 0.0  ;;  %v3299_v0 = vsel %vm15030_vm4, %v3298_v9, %v3297_v26  ;;  %v3302_v3 = vperm.slane %v2796_v16, %v12382_v10  ;;  %v8657_v9 = vld [vmem:[#allocation2 + $0x5c0] sm:$0xf] }
 0x25a   :  { %v911_v51 = vpop.xlane.xlu0 %910 }
 0x25b   :  { %v1514_v4 = vmul.f32 %v12267_v50, %v911_v51 }
 0x25d   :  { %v12868_v11 = vpack.c.bf16 %v1514_v4, %v1513_v36  ;;  %v2844_v36 = vunpack.c.h.b16 %v1759_v5  ;;  %v3324_v5 = vperm.slane %v2807_v13, %v12290_v34  ;;  %v3325_v4 = vperm.slane %v2808_v23, %v12298_v44 }
 0x25e   :  { %1147 = vadd.xlane.f32.xlu2 %v1146_v33  ;;  %1048 = vadd.xlane.f32.xlu1 %v1047_v47  ;;  %v2810_v33 = vunpack.c.h.b16 %v1742_v12  ;;  %v3392_v13 = vsel %vm15030_vm4, %v3391_v6, %v3390_v25  ;;  %v1149_v12 = vsel %vm365_vm0, %v306_v43, 0.0  ;;  %v2797_v25 = vunpack.c.l.b16 %v12830_v14 }
 0x25f   :  { %1045 = vadd.xlane.f32.xlu0 %v1044_v61  ;;  %v3300_v61 = vperm.slane %v2795_v60, %v12345_v49  ;;  %v12904_v60 = vsel %vm2984_vm9, %v3091_v24, %v12837_v8  ;;  %v3395_v23 = vperm.slane %v2844_v36, %v12382_v10  ;;  %v3394_v19 = vsel %vm2968_vm5, %v3393_v48, %v3392_v13  ;;  %v286_v8 = vld [vmem:[%s15022_s0 + $0x788] sm:$0xff] }
 0x260   :  { %v3326_v6 = vsel %vm2956_vm2, %v3325_v4, %v3324_v5  ;;  %v3329_v36 = vperm.slane %v2810_v33, %v12335_v52  ;;  %v2811_v26 = vunpack.c.l.b16 %v12868_v11  ;;  %v1089_v5 = vsel %vm365_vm0, %v286_v8, 0.0 }
 0x261   :  { %v872_v41 = vpop.xlane.xlu2 %871  ;;  %v1013_v51 = vpop.xlane.xlu1 %1012  ;;  %v3301_v24 = vsel %vm2968_vm5, %v3300_v61, %v3299_v0  ;;  %v3328_v53 = vsel %vm2960_vm3, %v3327_v56, %v3326_v6  ;;  %v3396_v43 = vsel %vm2972_vm6, %v3395_v23, %v3394_v19  ;;  %v1050_v61 = vsel %vm365_vm0, %v273_v18, 0.0  ;;  %v10659_v19 = vld [vmem:[#allocation2 + $0x59c] sm:$0xf0] }
 0x262   :  { %v1548_v47 = vmul.f32 %v12267_v50, %v1013_v51  ;;  %v1010_v37 = vpop.xlane.xlu0 %1009  ;;  %v10667_v51 = vld [vmem:[#allocation2 + $0x5dc] sm:$0xf0]  ;;  %v2812_v33 = vunpack.c.h.b16 %v12868_v11  ;;  %v2798_v13 = vunpack.c.h.b16 %v12830_v14  ;;  %v3331_v23 = vperm.slane %v2811_v26, %v12345_v49 }
 0x263   :  { %v1547_v62 = vmul.f32 %v12267_v50, %v1010_v37  ;;  %v8658_v4 = vor.u32 %v10667_v51, %v8657_v9  ;;  %v15206_v9 = vld [vmem:[#allocation28_spill] sm:$0xff]  ;;  %v3303_v51 = vsel %vm2972_vm6, %v3302_v3, %v3301_v24  ;;  %v288_v3 = vld [vmem:[%s15022_s0 + $0x798] sm:$0xff] }
 0x264   :  { %v1393_v14 = vmul.f32 %v12267_v50, %v15206_v9 }
 0x265   :  { %v1760_v28 = vpack.c.bf16 %v1548_v47, %v1547_v62  ;;  %v1501_v47 = vmul.f32 %v12267_v50, %v872_v41  ;;  %6860 = vmatpush.bf16.msra.mxu2 %v8658_v4  ;;  %v8625_v41 = vld [vmem:[#allocation2 + $0x580] sm:$0xf]  ;;  %v3330_v4 = vsel %vm15030_vm4, %v3329_v36, %v3328_v53 }
 0x266   :  { %1192 = vadd.xlane.f32.xlu2 %v1191_v38  ;;  %1189 = vadd.xlane.f32.xlu1 %v1188_v15  ;;  %v285_v15 = vld [vmem:[%s15022_s0 + $0x780] sm:$0xff]  ;;  %v8626_v6 = vor.u32 %v10659_v19, %v8625_v41 }
 0x267   :  { %v2845_v16 = vunpack.c.l.b16 %v1760_v28  ;;  %v2846_v48 = vunpack.c.h.b16 %v1760_v28  ;;  %1150 = vadd.xlane.f32.xlu0 %v1149_v12  ;;  %v3304_v28 = vperm.slane %v2797_v25, %v12377_v63  ;;  %v3333_v25 = vperm.slane %v2812_v33, %v12382_v10  ;;  %v10651_v41 = vld [vmem:[#allocation2 + $0x55c] sm:$0xf0]  ;;  %v15209_v33 = vld [vmem:[#allocation125_spill] sm:$0xff] }
 0x268   :  { %v15208_v36 = vld [vmem:[#allocation124_spill] sm:$0xff] }
 0x269   :  { %v3397_v37 = vperm.slane %v2845_v16, %v12377_v63  ;;  %v3399_v56 = vperm.slane %v2846_v48, %v12387_v21  ;;  %v917_v62 = vpop.xlane.xlu2 %916  ;;  %v914_v38 = vpop.xlane.xlu1 %913  ;;  %v1086_v48 = vsel %vm365_vm0, %v285_v15, 0.0  ;;  %6861 = vmatpush.bf16.msra.mxu2 %v8626_v6  ;;  %v1527_v53 = vmul.f32 %v12267_v50, %v15208_v36 }
 0x26a   :  { %v1516_v12 = vmul.f32 %v12267_v50, %v917_v62  ;;  %v1515_v11 = vmul.f32 %v12267_v50, %v914_v38  ;;  %v875_v0 = vpop.xlane.xlu0 %874 }
 0x26b   :  { %v3398_v18 = vsel %vm2976_vm7, %v3397_v37, %v3396_v43  ;;  %v1502_v8 = vmul.f32 %v12267_v50, %v875_v0  ;;  %v3306_v43 = vperm.slane %v2798_v13, %v12387_v21  ;;  %v3332_v37 = vsel %vm2968_vm5, %v3331_v23, %v3330_v4  ;;  %v287_v13 = vld [vmem:[%s15022_s0 + $0x790] sm:$0xff] }
 0x26c   :  { %v12944_v26 = vsel %vm2980_vm8, %v3399_v56, %v3398_v18  ;;  %v1744_v16 = vpack.c.bf16 %v1516_v12, %v1515_v11  ;;  %v8593_v56 = vld [vmem:[#allocation2 + $0x540] sm:$0xf]  ;;  %v3305_v12 = vsel %vm2976_vm7, %v3304_v28, %v3303_v51  ;;  %v15210_v23 = vld [vmem:[#allocation126_spill] sm:$0xff]  ;;  %v3334_v28 = vsel %vm2972_vm6, %v3333_v25, %v3332_v37 }
 0x26d   :  { %15207 = vst [vmem:[#allocation18_spill] sm:$0xff] %v12944_v26  ;;  %v1737_v62 = vpack.c.bf16 %v1502_v8, %v1501_v47  ;;  %v8594_v24 = vor.u32 %v10651_v41, %v8593_v56  ;;  %v1525_v19 = vmul.f32 %v12267_v50, %v15210_v23  ;;  %v3307_v4 = vsel %vm2980_vm8, %v3306_v43, %v3305_v12 }
 0x26e   :  { %v2813_v38 = vunpack.c.l.b16 %v1744_v16  ;;  %v2814_v0 = vunpack.c.h.b16 %v1744_v16  ;;  %1051 = vadd.xlane.f32.xlu2 %v1050_v61  ;;  %1090 = vadd.xlane.f32.xlu1 %v1089_v5  ;;  %v1526_v61 = vmul.f32 %v12267_v50, %v15209_v33  ;;  %v274_v16 = vld [vmem:[%s15022_s0 + $0x728] sm:$0xff]  ;;  %v1095_v37 = vsel %vm365_vm0, %v288_v3, 0.0 }
 0x26f   :  { %v2799_v15 = vunpack.c.l.b16 %v1737_v62  ;;  %v2800_v11 = vunpack.c.h.b16 %v1737_v62  ;;  %1087 = vadd.xlane.f32.xlu0 %v1086_v48  ;;  %v15211_v48 = vld [vmem:[#allocation128_spill] sm:$0xff]  ;;  %6862 = vmatpush.bf16.msra.mxu2 %v8594_v24  ;;  %v3067_v43 = vsel %vm2996_vm12, %v12753_v2, %v12750_v45  ;;  %v3094_v12 = vsel %vm2988_vm10, %v12872_v46, %v12904_v60 }
 0x270   :  { %v3335_v5 = vperm.slane %v2813_v38, %v12377_v63  ;;  %v3337_v47 = vperm.slane %v2814_v0, %v12387_v21  ;;  %v1528_v51 = vmul.f32 %v12267_v50, %v15211_v48  ;;  %v8561_v38 = vld [vmem:[#allocation2 + $0x500] sm:$0xf]  ;;  %v1053_v36 = vsel %vm365_vm0, %v274_v16, 0.0  ;;  %v15220_v48 = vld [vmem:[#allocation30_spill] sm:$0xff] }
 0x271   :  { %v3308_v18 = vperm.slane %v2799_v15, %v12390_v29  ;;  %v3310_v8 = vperm.slane %v2800_v11, %v12421_v22  ;;  %v12970_v6 = vpop.xlane.xlu2 %1015  ;;  %v12972_v9 = vpop.xlane.xlu1 %976  ;;  %v10643_v0 = vld [vmem:[#allocation2 + $0x51c] sm:$0xf0]  ;;  %v1092_v15 = vsel %vm365_vm0, %v287_v13, 0.0  ;;  %v2690_v33 = vunpack.c.h.b16 %v12812_v54 }
 0x272   :  { %v3336_v62 = vsel %vm2976_vm7, %v3335_v5, %v3334_v28  ;;  %v12981_v25 = vpop.xlane.xlu0 %973  ;;  %v8562_v11 = vor.u32 %v10643_v0, %v8561_v38  ;;  %v15214_v5 = vunpack.c.l.b16 %v12812_v54  ;;  %v1749_v13 = vpack.c.bf16 %v1526_v61, %v1525_v19  ;;  %v8145_v54 = vld [vmem:[#allocation2 + $0x1c0] sm:$0xf] }
 0x273   :  { %v12985_v56 = vsel %vm2980_vm8, %v3337_v47, %v3336_v62  ;;  %v3309_v41 = vsel %vm2984_vm9, %v3308_v18, %v3307_v4  ;;  %v13004_v47 = vpack.c.bf16 %v12876_v20, %v1393_v14  ;;  %v15215_v45 = vunpack.c.l.b16 %v12759_v40  ;;  %v15217_v14 = vld [vmem:[#allocation130_spill] sm:$0xff]  ;;  %v8529_v18 = vld [vmem:[#allocation2 + $0x4c0] sm:$0xf] }
 0x274   :  { %15212 = vst [vmem:[#allocation19_spill] sm:$0xff] %v12985_v56  ;;  %v12996_v3 = vsel %vm2988_vm10, %v3310_v8, %v3309_v41  ;;  %v3095_v24 = vperm.slane %v15214_v5, %v12445_v1  ;;  %v15216_v46 = vunpack.c.h.b16 %v12759_v40  ;;  %v13016_v23 = vpack.c.bf16 %v1528_v51, %v1527_v53  ;;  %6863 = vmatpush.bf16.msra.mxu2 %v8562_v11  ;;  %v10539_v40 = vld [vmem:[#allocation2 + $0x1dc] sm:$0xf0]  ;;  %v15219_v8 = vld [vmem:[#allocation29_spill] sm:$0xff] }
 0x275   :  { %15213 = vst [vmem:[#allocation21_spill] sm:$0xff] %v12996_v3  ;;  %v13009_v2 = vperm.slane %v15215_v45, %v12583_v57  ;;  %v13020_v20 = vsel %vm3000_vm13, %v12808_v42, %v3067_v43  ;;  %v15218_v61 = vunpack.c.h.b16 %v12731_v31  ;;  %v10635_v53 = vld [vmem:[#allocation2 + $0x4dc] sm:$0xf0]  ;;  %v1398_v16 = vmul.f32 %v12267_v50, %v15219_v8  ;;  %v308_v31 = vld [vmem:[%s15022_s0 + $0x838] sm:$0xff]  ;;  %v307_v43 = vld [vmem:[%s15022_s0 + $0x830] sm:$0xff] }
 0x276   :  { %v13014_v60 = vperm.slane %v15216_v46, %v12586_v35  ;;  %1096 = vadd.xlane.f32.xlu2 %v1095_v37  ;;  %1093 = vadd.xlane.f32.xlu1 %v1092_v15  ;;  %v3096_v28 = vsel %vm2992_vm11, %v3095_v24, %v3094_v12  ;;  %v1397_v51 = vmul.f32 %v12267_v50, %v15220_v48  ;;  %v321_v42 = vld [vmem:[%s15022_s0 + $0x8a0] sm:$0xff]  ;;  %v2691_v38 = vunpack.c.l.b16 %v13004_v47  ;;  %v15221_v12 = vld [vmem:[#allocation26_spill] sm:$0xff]  ;;  %v15222_v24 = vld [vmem:[#allocation131_spill] sm:$0xff] }
 0x277   :  { %v13025_v19 = vperm.slane %v15218_v61, %v15217_v14  ;;  %1054 = vadd.xlane.f32.xlu0 %v1053_v36  ;;  %v8146_v4 = vor.u32 %v10539_v40, %v8145_v54  ;;  %v8530_v62 = vor.u32 %v10635_v53, %v8529_v18  ;;  %v3097_v37 = vperm.slane %v2690_v33, %v12456_v32  ;;  %v15223_v45 = vld [vmem:[#allocation132_spill] sm:$0xff]  ;;  %v15225_v3 = vld [vmem:[#allocation33_spill] sm:$0xff] }
 0x278   :  { %v2823_v0 = vunpack.c.l.b16 %v1749_v13  ;;  %v2824_v41 = vunpack.c.h.b16 %v1749_v13  ;;  %v1395_v36 = vmul.f32 %v12267_v50, %v15221_v12  ;;  %v2825_v5 = vunpack.c.l.b16 %v13016_v23  ;;  %v8113_v54 = vld [vmem:[#allocation2 + $0x180] sm:$0xf] }
 0x279   :  { %v13040_v15 = vpop.xlane.xlu2 %880  ;;  %v13042_v11 = vpop.xlane.xlu1 %877  ;;  %v1530_v33 = vmul.f32 %v12267_v50, %v15222_v24  ;;  %v1529_v46 = vmul.f32 %v12267_v50, %v15223_v45  ;;  %6834 = vmatpush.bf16.msra.mxu0 %v8146_v4  ;;  %v10531_v61 = vld [vmem:[#allocation2 + $0x19c] sm:$0xf0]  ;;  %v13057_v18 = vsel %vm2996_vm12, %v3097_v37, %v3096_v28  ;;  %v1194_v53 = vsel %vm365_vm0, %v321_v42, 0.0  ;;  %6864 = vmatpush.bf16.msra.mxu2 %v8530_v62 }
 0x27a   :  { %v13054_v13 = vpop.xlane.xlu0 %1018  ;;  %v8497_v40 = vld [vmem:[#allocation2 + $0x480] sm:$0xf]  ;;  %v1155_v8 = vsel %vm365_vm0, %v308_v31, 0.0  ;;  %v8114_v48 = vor.u32 %v10531_v61, %v8113_v54  ;;  %v13061_v24 = vpack.c.bf16 %v1398_v16, %v1397_v51  ;;  %v1396_v45 = vmul.f32 %v12267_v50, %v15224_v59  ;;  %v276_v16 = vld [vmem:[%s15022_s0 + $0x738] sm:$0xff]  ;;  %v15226_v51 = vld [vmem:[#allocation34_spill] sm:$0xff] }
 0x27b   :  { %v10627_v12 = vld [vmem:[#allocation2 + $0x49c] sm:$0xf0]  ;;  %v1152_v4 = vsel %vm365_vm0, %v307_v43, 0.0  ;;  %v3099_v26 = vperm.slane %v2691_v38, %v12485_v58  ;;  %v1400_v28 = vmul.f32 %v12267_v50, %v15225_v3  ;;  %v3355_v42 = vperm.slane %v2823_v0, %v12290_v34  ;;  %v275_v3 = vld [vmem:[%s15022_s0 + $0x730] sm:$0xff]  ;;  %v15227_v54 = vld [vmem:[#allocation11_spill] sm:$0xff] }
 0x27c   :  { %v8498_v56 = vor.u32 %v10627_v12, %v8497_v40  ;;  %v3356_v31 = vperm.slane %v2824_v41, %v12298_v44  ;;  %v1399_v62 = vmul.f32 %v12267_v50, %v15226_v51  ;;  %v2826_v59 = vunpack.c.h.b16 %v13016_v23  ;;  %v8081_v38 = vld [vmem:[#allocation2 + $0x140] sm:$0xf] }
 0x27d   :  { %v3358_v37 = vperm.slane %v2825_v5, %v12318_v39  ;;  %v13078_v43 = vpack.c.bf16 %v1530_v33, %v1529_v46  ;;  %v10523_v0 = vld [vmem:[#allocation2 + $0x15c] sm:$0xf0]  ;;  %v2692_v41 = vunpack.c.h.b16 %v13004_v47  ;;  %v1531_v61 = vmul.f32 %v12267_v50, %v15227_v54  ;;  %6835 = vmatpush.bf16.msra.mxu0 %v8114_v48 }
 0x27e   :  { %1195 = vadd.xlane.f32.xlu2 %v1194_v53  ;;  %1156 = vadd.xlane.f32.xlu1 %v1155_v8  ;;  %v1532_v23 = vmul.f32 %v12267_v50, %v12766_v27  ;;  %v8082_v5 = vor.u32 %v10523_v0, %v8081_v38  ;;  %v8465_v33 = vld [vmem:[#allocation2 + $0x440] sm:$0xf]  ;;  %v2695_v40 = vunpack.c.l.b16 %v13061_v24  ;;  %v2696_v53 = vunpack.c.h.b16 %v13061_v24  ;;  %v322_v24 = vld [vmem:[%s15022_s0 + $0x8a8] sm:$0xff] }
 0x27f   :  { %1153 = vadd.xlane.f32.xlu0 %v1152_v4  ;;  %v10619_v46 = vld [vmem:[#allocation2 + $0x45c] sm:$0xf0]  ;;  %v13090_v8 = vpack.c.bf16 %v1396_v45, %v1395_v36  ;;  %6865 = vmatpush.bf16.msra.mxu2 %v8498_v56  ;;  %v3357_v54 = vsel %vm2956_vm2, %v3356_v31, %v3355_v42  ;;  %v1059_v48 = vsel %vm365_vm0, %v276_v16, 0.0  ;;  %v1056_v4 = vsel %vm365_vm0, %v275_v3, 0.0 }
 0x280   :  { %v8466_v12 = vor.u32 %v10619_v46, %v8465_v33  ;;  %v8913_v47 = vld [vmem:[#allocation2 + $0x7c0] sm:$0xf]  ;;  %v13102_v45 = vpack.c.bf16 %v1400_v28, %v1399_v62  ;;  %v3359_v56 = vsel %vm2960_vm3, %v3358_v37, %v3357_v54  ;;  %v3360_v38 = vperm.slane %v2826_v59, %v12335_v52 }
 0x281   :  { %v10731_v51 = vld [vmem:[#allocation2 + $0x7dc] sm:$0xf0]  ;;  %v13093_v58 = vpop.xlane.xlu2 %979  ;;  %v13095_v27 = vpop.xlane.xlu1 %922  ;;  %v2827_v42 = vunpack.c.l.b16 %v13078_v43  ;;  %v2828_v3 = vunpack.c.h.b16 %v13078_v43  ;;  %v13110_v46 = vpack.c.bf16 %v1532_v23, %v1531_v61  ;;  %v1533_v28 = vmul.f32 %v12267_v50, %v12854_v30  ;;  %6836 = vmatpush.bf16.msra.mxu0 %v8082_v5 }
 0x282   :  { %15228 = vst [vmem:[#allocation22_spill] sm:$0xff] %v13095_v27  ;;  %v8914_v36 = vor.u32 %v10731_v51, %v8913_v47  ;;  %v13107_v31 = vpop.xlane.xlu0 %919  ;;  %v8049_v0 = vld [vmem:[#allocation2 + $0x100] sm:$0xf]  ;;  %v1534_v47 = vmul.f32 %v12267_v50, %v12852_v7  ;;  %v1197_v51 = vsel %vm365_vm0, %v322_v24, 0.0  ;;  %v3071_v43 = vsel %vm3004_vm14, %v13025_v19, %v13020_v20 }
 0x283   :  { %15229 = vst [vmem:[#allocation12_spill] sm:$0xff] %v13107_v31  ;;  %v10515_v33 = vld [vmem:[#allocation2 + $0x11c] sm:$0xf0]  ;;  %6866 = vmatpush.bf16.msra.mxu2 %v8466_v12  ;;  %v3100_v7 = vsel %vm3000_vm13, %v3099_v26, %v13057_v18  ;;  %v3101_v30 = vperm.slane %v2692_v41, %v15217_v14  ;;  %v2693_v61 = vunpack.c.l.b16 %v13090_v8  ;;  %v3107_v5 = vperm.slane %v2695_v40, %v12290_v34  ;;  %v290_v26 = vld [vmem:[%s15022_s0 + $0x7a8] sm:$0xff] }
 0x284   :  { %v8433_v16 = vld [vmem:[#allocation2 + $0x400] sm:$0xf]  ;;  %6873 = vmatpush.bf16.msra.mxu3 %v8914_v36  ;;  %v8050_v54 = vor.u32 %v10515_v33, %v8049_v0  ;;  %v3108_v12 = vperm.slane %v2696_v53, %v12298_v44  ;;  %v2694_v24 = vunpack.c.h.b16 %v13090_v8  ;;  %v3362_v36 = vperm.slane %v2827_v42, %v12345_v49 }
 0x285   :  { %v10611_v62 = vld [vmem:[#allocation2 + $0x41c] sm:$0xf0]  ;;  %v2697_v19 = vunpack.c.l.b16 %v13102_v45  ;;  %v3361_v18 = vsel %vm15030_vm4, %v3360_v38, %v3359_v56  ;;  %v2829_v41 = vunpack.c.l.b16 %v13110_v46  ;;  %v13137_v40 = vpack.c.bf16 %v1534_v47, %v1533_v28 }
 0x286   :  { %v8881_v59 = vld [vmem:[#allocation2 + $0x780] sm:$0xf]  ;;  %v8434_v31 = vor.u32 %v10611_v62, %v8433_v16  ;;  %1060 = vadd.xlane.f32.xlu2 %v1059_v48  ;;  %1057 = vadd.xlane.f32.xlu1 %v1056_v4  ;;  %v3364_v48 = vperm.slane %v2828_v3, %v12382_v10  ;;  %v1536_v56 = vmul.f32 %v12267_v50, %v12972_v9  ;;  %v1101_v3 = vsel %vm365_vm0, %v290_v26, 0.0 }
 0x287   :  { %v10723_v37 = vld [vmem:[#allocation2 + $0x79c] sm:$0xf0]  ;;  %1198 = vadd.xlane.f32.xlu0 %v1197_v51  ;;  %6837 = vmatpush.bf16.msra.mxu0 %v8050_v54  ;;  %v1535_v38 = vmul.f32 %v12267_v50, %v12981_v25  ;;  %v3102_v9 = vsel %vm3004_vm14, %v3101_v30, %v3100_v7  ;;  %v2830_v25 = vunpack.c.h.b16 %v13110_v46  ;;  %v13164_v30 = vperm.slane %v2694_v24, %v12586_v35 }
 0x288   :  { %v8882_v27 = vor.u32 %v10723_v37, %v8881_v59  ;;  %v309_v23 = vld [vmem:[%s15022_s0 + $0x840] sm:$0xff]  ;;  %6867 = vmatpush.bf16.msra.mxu2 %v8434_v31  ;;  %v13155_v59 = vsel %vm3008_vm15, %v13009_v2, %v3071_v43  ;;  %v3363_v37 = vsel %vm2968_vm5, %v3362_v36, %v3361_v18  ;;  %v2698_v24 = vunpack.c.h.b16 %v13102_v45 }
 0x289   :  { %v8017_v20 = vld [vmem:[#allocation2 + $0xc0] sm:$0xf]  ;;  %v1158_v4 = vsel %vm365_vm0, %v309_v23, 0.0  ;;  %v13145_v47 = vpop.xlane.xlu2 %1024  ;;  %v13147_v28 = vpop.xlane.xlu1 %1021 }
 0x28a   :  { %v10507_v53 = vld [vmem:[#allocation2 + $0xdc] sm:$0xf0]  ;;  %6874 = vmatpush.bf16.msra.mxu3 %v8882_v27  ;;  %v983_v51 = vpop.xlane.xlu0 %982 }
 0x28b   :  { %v8401_v8 = vld [vmem:[#allocation2 + $0x3c0] sm:$0xf]  ;;  %v8018_v0 = vor.u32 %v10507_v53, %v8017_v20  ;;  %v3103_v20 = vperm.slane %v2693_v61, %v12583_v57  ;;  %v3366_v53 = vperm.slane %v2829_v41, %v12377_v63  ;;  %v3110_v61 = vperm.slane %v2697_v19, %v12318_v39 }
 0x28c   :  { %v10603_v42 = vld [vmem:[#allocation2 + $0x3dc] sm:$0xf0]  ;;  %v3365_v41 = vsel %vm2972_vm6, %v3364_v48, %v3363_v37 }
 0x28d   :  { %v8402_v33 = vor.u32 %v10603_v42, %v8401_v8  ;;  %v8849_v16 = vld [vmem:[#allocation2 + $0x740] sm:$0xf]  ;;  %v2831_v8 = vunpack.c.l.b16 %v13137_v40  ;;  %6838 = vmatpush.bf16.msra.mxu0 %v8018_v0  ;;  %v324_v0 = vld [vmem:[%s15022_s0 + $0x8b8] sm:$0xff]  ;;  %v3367_v48 = vsel %vm2976_vm7, %v3366_v53, %v3365_v41 }
 0x28e   :  { %v10715_v62 = vld [vmem:[#allocation2 + $0x75c] sm:$0xf0]  ;;  %1159 = vadd.xlane.f32.xlu2 %v1158_v4  ;;  %1102 = vadd.xlane.f32.xlu1 %v1101_v3  ;;  %v3104_v4 = vsel %vm3008_vm15, %v3103_v20, %v3102_v9  ;;  %v310_v9 = vld [vmem:[%s15022_s0 + $0x848] sm:$0xff] }
 0x28f   :  { %v289_v27 = vld [vmem:[%s15022_s0 + $0x7a0] sm:$0xff]  ;;  %v8850_v31 = vor.u32 %v10715_v62, %v8849_v16  ;;  %6847 = vmatpush.bf16.msra.mxu1 %v8402_v33  ;;  %v3109_v33 = vsel %vm2956_vm2, %v3108_v12, %v3107_v5  ;;  %v13170_v16 = vpack.c.bf16 %v1536_v56, %v1535_v38  ;;  %v3368_v62 = vperm.slane %v2830_v25, %v12387_v21  ;;  %v323_v5 = vld [vmem:[%s15022_s0 + $0x8b0] sm:$0xff] }
 0x290   :  { %v7985_v54 = vld [vmem:[#allocation2 + $0x80] sm:$0xf]  ;;  %v1098_v46 = vsel %vm365_vm0, %v289_v27, 0.0  ;;  %v1537_v27 = vmul.f32 %v12267_v50, %v13093_v58  ;;  %v2832_v56 = vunpack.c.h.b16 %v13137_v40  ;;  %v3370_v45 = vperm.slane %v2831_v8, %v12390_v29 }
 0x291   :  { %v10499_v23 = vld [vmem:[#allocation2 + $0x9c] sm:$0xf0]  ;;  %6875 = vmatpush.bf16.msra.mxu3 %v8850_v31  ;;  %v1538_v31 = vmul.f32 %v12267_v50, %v983_v51  ;;  %1099 = vadd.xlane.f32.xlu0 %v1098_v46  ;;  %v13190_v40 = vpop.xlane.xlu2 %925  ;;  %v13192_v53 = vpop.xlane.xlu1 %886  ;;  %v1203_v8 = vsel %vm365_vm0, %v324_v0, 0.0 }
 0x292   :  { %v8369_v26 = vld [vmem:[#allocation2 + $0x380] sm:$0xf]  ;;  %v7986_v2 = vor.u32 %v10499_v23, %v7985_v54 }
 0x293   :  { %v10595_v43 = vld [vmem:[#allocation2 + $0x39c] sm:$0xf0]  ;;  %v13202_v46 = vpack.c.bf16 %v1538_v31, %v1537_v27  ;;  %v1161_v27 = vsel %vm365_vm0, %v310_v9, 0.0 }
 0x294   :  { %v8817_v42 = vld [vmem:[#allocation2 + $0x700] sm:$0xf]  ;;  %v8370_v36 = vor.u32 %v10595_v43, %v8369_v26  ;;  %6839 = vmatpush.bf16.msra.mxu0 %v7986_v2  ;;  %v2833_v26 = vunpack.c.l.b16 %v13170_v16  ;;  %v1200_v2 = vsel %vm365_vm0, %v323_v5, 0.0  ;;  %v3111_v43 = vsel %vm2960_vm3, %v3110_v61, %v3109_v33 }
 0x295   :  { %v10707_v7 = vld [vmem:[#allocation2 + $0x71c] sm:$0xf0] }
 0x296   :  { %v8818_v18 = vor.u32 %v10707_v7, %v8817_v42  ;;  %v7953_v12 = vld [vmem:[#allocation2 + $0x40] sm:$0xf]  ;;  %6848 = vmatpush.bf16.msra.mxu1 %v8370_v36  ;;  %v3112_v42 = vperm.slane %v2698_v24, %v12335_v52  ;;  %v3369_v7 = vsel %vm2980_vm8, %v3368_v62, %v3367_v48  ;;  %v13204_v36 = vpop.xlane.xlu0 %883  ;;  %v2834_v62 = vunpack.c.h.b16 %v13170_v16  ;;  %1204 = vadd.xlane.f32.xlu2 %v1203_v8  ;;  %v291_v8 = vld [vmem:[%s15022_s0 + $0x7b0] sm:$0xff] }
 0x297   :  { %v10491_v19 = vld [vmem:[#allocation2 + $0x5c] sm:$0xf0]  ;;  %v13225_v16 = vsel %vm3012_vm1, %v13014_v60, %v13155_v59  ;;  %1201 = vadd.xlane.f32.xlu1 %v1200_v2  ;;  %v1549_v60 = vmul.f32 %v12267_v50, %v12970_v6 }
 0x298   :  { %v7954_v38 = vor.u32 %v10491_v19, %v7953_v12  ;;  %v8337_v58 = vld [vmem:[#allocation2 + $0x340] sm:$0xf]  ;;  %6876 = vmatpush.bf16.msra.mxu3 %v8818_v18  ;;  %v15231_v12 = vld [vmem:[#allocation37_spill] sm:$0xff]  ;;  %v3371_v19 = vsel %vm2984_vm9, %v3370_v45, %v3369_v7  ;;  %v3374_v45 = vperm.slane %v2833_v26, %v12445_v1  ;;  %v1504_v7 = vmul.f32 %v12267_v50, %v13040_v15 }
 0x299   :  { %v10587_v37 = vld [vmem:[#allocation2 + $0x35c] sm:$0xf0]  ;;  %v1402_v5 = vmul.f32 %v12267_v50, %v15231_v12  ;;  %1162 = vadd.xlane.f32.xlu0 %v1161_v27  ;;  %v986_v12 = vpop.xlane.xlu1 %985 }
 0x29a   :  { %v15230_v3 = vld [vmem:[#allocation32_spill] sm:$0xff]  ;;  %v8338_v51 = vor.u32 %v10587_v37, %v8337_v58  ;;  %v3372_v58 = vperm.slane %v2832_v56, %v12421_v22  ;;  %6840 = vmatpush.bf16.msra.mxu0 %v7954_v38  ;;  %v13219_v56 = vsel %vm3012_vm1, %v13164_v30, %v3104_v4  ;;  %v13228_v38 = vsel %vm15030_vm4, %v3112_v42, %v3111_v43 }
 0x29b   :  { %v1401_v25 = vmul.f32 %v12267_v50, %v15230_v3  ;;  %v8785_v54 = vld [vmem:[#allocation2 + $0x6c0] sm:$0xf]  ;;  %v13215_v3 = vsel %vm3008_vm15, %v12737_v17, %v12734_v55  ;;  %v2835_v17 = vunpack.c.l.b16 %v13202_v46  ;;  %v3376_v43 = vperm.slane %v2834_v62, %v12456_v32 }
 0x29c   :  { %v10699_v23 = vld [vmem:[#allocation2 + $0x6dc] sm:$0xf0]  ;;  %6849 = vmatpush.bf16.msra.mxu1 %v8338_v51  ;;  %v15232_v51 = vld [vmem:[#allocation35_spill] sm:$0xff]  ;;  %v3373_v26 = vsel %vm2988_vm10, %v3372_v58, %v3371_v19  ;;  %v1550_v19 = vmul.f32 %v12267_v50, %v13054_v13  ;;  %v15234_v58 = vld [vmem:[#allocation129_spill] sm:$0xff]  ;;  %v1539_v15 = vmul.f32 %v12267_v50, %v986_v12  ;;  %vm15031_vm4 = vcmask 1041409  }
 0x29d   :  { %v8786_v20 = vor.u32 %v10699_v23, %v8785_v54  ;;  %v7921_v18 = vld [vmem:[#allocation2] sm:$0xf]  ;;  %v1404_v54 = vmul.f32 %v12267_v50, %v15232_v51  ;;  %v13235_v4 = vpack.c.bf16 %v1402_v5, %v1401_v25  ;;  %v278_v25 = vld [vmem:[%s15022_s0 + $0x748] sm:$0xff]  ;;  %v3375_v6 = vsel %vm2992_vm11, %v3374_v45, %v3373_v26  ;;  %v311_v12 = vld [vmem:[%s15022_s0 + $0x850] sm:$0xff] }
 0x29e   :  { %v10483_v41 = vld [vmem:[#allocation2 + $0x1c] sm:$0xf0]  ;;  %v3377_v26 = vsel %vm2996_vm12, %v3376_v43, %v3375_v6  ;;  %v1506_v6 = vmul.f32 %v12267_v50, %v13192_v53 }
 0x29f   :  { %v8305_v0 = vld [vmem:[#allocation2 + $0x300] sm:$0xf]  ;;  %v7922_v33 = vor.u32 %v10483_v41, %v7921_v18  ;;  %6877 = vmatpush.bf16.msra.mxu3 %v8786_v20  ;;  %v1503_v18 = vmul.f32 %v12267_v50, %v13042_v11  ;;  %v2836_v41 = vunpack.c.h.b16 %v13202_v46  ;;  %v2699_v27 = vunpack.c.l.b16 %v13235_v4 }
 0x2a0   :  { %v10579_v61 = vld [vmem:[#allocation2 + $0x31c] sm:$0xf0] }
 0x2a1   :  { %v8753_v24 = vld [vmem:[#allocation2 + $0x680] sm:$0xf]  ;;  %v8306_v31 = vor.u32 %v10579_v61, %v8305_v0  ;;  %6841 = vmatpush.bf16.msra.mxu0 %v7922_v33  ;;  %v989_v0 = vpop.xlane.xlu2 %988  ;;  %v3378_v33 = vperm.slane %v2835_v17, %v15234_v58 }
 0x2a2   :  { %v10691_v37 = vld [vmem:[#allocation2 + $0x69c] sm:$0xf0]  ;;  %v1540_v61 = vmul.f32 %v12267_v50, %v989_v0 }
 0x2a3   :  { %v8754_v48 = vor.u32 %v10691_v37, %v8753_v24  ;;  %v15233_v23 = vld [vmem:[#allocation36_spill] sm:$0xff]  ;;  %6850 = vmatpush.bf16.msra.mxu1 %v8306_v31  ;;  %v13261_v24 = vpop.xlane.xlu0 %928  ;;  %v1104_v31 = vsel %vm365_vm0, %v291_v8, 0.0 }
 0x2a4   :  { %v1403_v55 = vmul.f32 %v12267_v50, %v15233_v23  ;;  %v8273_v30 = vld [vmem:[#allocation2 + $0x2c0] sm:$0xf]  ;;  %v1756_v45 = vpack.c.bf16 %v1540_v61, %v1539_v15  ;;  %1105 = vadd.xlane.f32.xlu2 %v1104_v31  ;;  %v1031_v15 = vpop.xlane.xlu1 %1030 }
 0x2a5   :  { %v10571_v59 = vld [vmem:[#allocation2 + $0x2dc] sm:$0xf0]  ;;  %6878 = vmatpush.bf16.msra.mxu3 %v8754_v48  ;;  %v1065_v48 = vsel %vm365_vm0, %v278_v25, 0.0 }
 0x2a6   :  { %v8721_v9 = vld [vmem:[#allocation2 + $0x640] sm:$0xf]  ;;  %v8274_v2 = vor.u32 %v10571_v59, %v8273_v30  ;;  %v13263_v62 = vpack.c.bf16 %v1404_v54, %v1403_v55  ;;  %v2700_v30 = vunpack.c.h.b16 %v13235_v4  ;;  %v13271_v54 = vpack.c.bf16 %v1504_v7, %v1503_v18  ;;  %1066 = vadd.xlane.f32.xlu1 %v1065_v48 }
 0x2a7   :  { %v10683_v20 = vld [vmem:[#allocation2 + $0x65c] sm:$0xf0]  ;;  %v3380_v55 = vperm.slane %v2836_v41, %v15217_v14  ;;  %v13274_v59 = vpack.c.bf16 %v1550_v19, %v1549_v60  ;;  %v2838_v8 = vunpack.c.h.b16 %v1756_v45  ;;  %v1505_v60 = vmul.f32 %v12267_v50, %v13204_v36  ;;  %v312_v41 = vld [vmem:[%s15022_s0 + $0x858] sm:$0xff] }
 0x2a8   :  { %v8722_v42 = vor.u32 %v10683_v20, %v8721_v9  ;;  %v277_v5 = vld [vmem:[%s15022_s0 + $0x740] sm:$0xff]  ;;  %6851 = vmatpush.bf16.msra.mxu1 %v8274_v2  ;;  %v3379_v9 = vsel %vm3000_vm13, %v3378_v33, %v3377_v26  ;;  %v2837_v20 = vunpack.c.l.b16 %v1756_v45  ;;  %v1552_v36 = vmul.f32 %v12267_v50, %v13145_v47 }
 0x2a9   :  { %v8241_v11 = vld [vmem:[#allocation2 + $0x280] sm:$0xf]  ;;  %v1062_v51 = vsel %vm365_vm0, %v277_v5, 0.0  ;;  %v3384_v18 = vperm.slane %v2838_v8, %v12586_v35  ;;  %v2801_v5 = vunpack.c.l.b16 %v13271_v54  ;;  %v1551_v19 = vmul.f32 %v12267_v50, %v13147_v28  ;;  %v890_v61 = vpop.xlane.xlu2 %889 }
 0x2aa   :  { %v10563_v37 = vld [vmem:[#allocation2 + $0x29c] sm:$0xf0]  ;;  %6879 = vmatpush.bf16.msra.mxu3 %v8722_v42  ;;  %v15235_v42 = vld [vmem:[#allocation22_spill] sm:$0xff]  ;;  %1063 = vadd.xlane.f32.xlu0 %v1062_v51  ;;  %v3382_v7 = vperm.slane %v2837_v20, %v12583_v57  ;;  %v3381_v33 = vsel %vm3004_vm14, %v3380_v55, %v3379_v9  ;;  %v2847_v31 = vunpack.c.l.b16 %v13274_v59  ;;  %v1739_v45 = vpack.c.bf16 %v1506_v6, %v1505_v60 }
 0x2ab   :  { %v8689_v46 = vld [vmem:[#allocation2 + $0x600] sm:$0xf]  ;;  %v8242_v23 = vor.u32 %v10563_v37, %v8241_v11  ;;  %v1518_v0 = vmul.f32 %v12267_v50, %v15235_v42  ;;  %v292_v11 = vld [vmem:[%s15022_s0 + $0x7b8] sm:$0xff]  ;;  %v13303_v37 = vperm.slane %v2699_v27, %v12345_v49  ;;  %v1028_v48 = vpop.xlane.xlu0 %1027  ;;  %v3312_v9 = vperm.slane %v2801_v5, %v12445_v1  ;;  %v326_v5 = vld [vmem:[%s15022_s0 + $0x8c8] sm:$0xff] }
 0x2ac   :  { %v10675_v13 = vld [vmem:[#allocation2 + $0x61c] sm:$0xf0]  ;;  %v3383_v47 = vsel %vm3008_vm15, %v3382_v7, %v3381_v33  ;;  %v2848_v20 = vunpack.c.h.b16 %v13274_v59  ;;  %v1762_v8 = vpack.c.bf16 %v1552_v36, %v1551_v19  ;;  %v13322_v42 = vperm.slane %v2700_v30, %v12382_v10  ;;  %v279_v30 = vld [vmem:[%s15022_s0 + $0x750] sm:$0xff]  ;;  %v15240_v36 = vld [vmem:[#allocation21_spill] sm:$0xff] }
 0x2ad   :  { %v8690_v17 = vor.u32 %v10675_v13, %v8689_v46  ;;  %v8209_v25 = vld [vmem:[#allocation2 + $0x240] sm:$0xf]  ;;  %6852 = vmatpush.bf16.msra.mxu1 %v8242_v23  ;;  %v2802_v46 = vunpack.c.h.b16 %v13271_v54  ;;  %v3385_v51 = vsel %vm3012_vm1, %v3384_v18, %v3383_v47  ;;  %v1167_v23 = vsel %vm365_vm0, %v312_v41, 0.0 }
 0x2ae   :  { %v10555_v2 = vld [vmem:[#allocation2 + $0x25c] sm:$0xf0]  ;;  %v3606_v27 = vsel %vm15031_vm4, %v3385_v51, %v13225_v16  ;;  %v1107_v54 = vsel %vm365_vm0, %v292_v11, 0.0  ;;  %v3401_v16 = vperm.slane %v2847_v31, %v12390_v29  ;;  %1168 = vadd.xlane.f32.xlu2 %v1167_v23  ;;  %v2803_v59 = vunpack.c.l.b16 %v1739_v45  ;;  %v932_v31 = vpop.xlane.xlu1 %931 }
 0x2af   :  { %v15236_v4 = vld [vmem:[#allocation12_spill] sm:$0xff]  ;;  %6880 = vmatpush.bf16.msra.mxu3 %v8690_v17  ;;  %v8210_v53 = vor.u32 %v10555_v2, %v8209_v25  ;;  %v1164_v17 = vsel %vm365_vm0, %v311_v12, 0.0  ;;  %v13318_v25 = vpack.c.b16 %v3606_v27, %v3606_v27  ;;  %v2701_v2 = vunpack.c.l.b16 %v13263_v62 }
 0x2b0   :  { %v1517_v43 = vmul.f32 %v12267_v50, %v15236_v4  ;;  %v8177_v13 = vld [vmem:[#allocation2 + $0x200] sm:$0xf]  ;;  %1165 = vadd.xlane.f32.xlu1 %v1164_v17  ;;  %v1554_v60 = vmul.f32 %v12267_v50, %v1031_v15  ;;  %v1553_v7 = vmul.f32 %v12267_v50, %v1028_v48  ;;  %v3314_v18 = vperm.slane %v2802_v46, %v12456_v32 }
 0x2b1   :  { %v10547_v28 = vld [vmem:[#allocation2 + $0x21c] sm:$0xf0]  ;;  %6853 = vmatpush.bf16.msra.mxu1 %v8210_v53  ;;  %15237 = vst [vmem:[#allocation17_spill] sm:$0xff] %v13318_v25  ;;  %6868 = vmatmul.bf16.vlgmr.msra.gmra.mxu2 %v13318_v25  ;;  %v1519_v12 = vmul.f32 %v12267_v50, %v13190_v40  ;;  %v1520_v53 = vmul.f32 %v12267_v50, %v13261_v24  ;;  %v2849_v15 = vunpack.c.l.b16 %v1762_v8  ;;  %v935_v46 = vpop.xlane.xlu2 %934  ;;  %v15241_v24 = vld [vmem:[#allocation18_spill] sm:$0xff]  ;;  %v1068_v51 = vsel %vm365_vm0, %v279_v30, 0.0 }
 0x2b2   :  { %v13311_v26 = vpack.c.bf16 %v1518_v0, %v1517_v43  ;;  %v8178_v55 = vor.u32 %v10547_v28, %v8177_v13  ;;  %v15238_v0 = vld [vmem:[#allocation39_spill] sm:$0xff]  ;;  %v15239_v43 = vld [vmem:[#allocation40_spill] sm:$0xff]  ;;  %1108 = vadd.xlane.f32.xlu0 %v1107_v54  ;;  %v3313_v19 = vsel %vm2992_vm11, %v3312_v9, %v15240_v36  ;;  %v3403_v33 = vperm.slane %v2848_v20, %v12421_v22 }
 0x2b3   :  { %v13326_v4 = vmul.f32 %v12267_v50, %v15238_v0  ;;  %v13331_v6 = vmul.f32 %v12267_v50, %v15239_v43  ;;  %v1507_v11 = vmul.f32 %v12267_v50, %v890_v61  ;;  %v325_v40 = vld [vmem:[%s15022_s0 + $0x8c0] sm:$0xff]  ;;  %v3402_v47 = vsel %vm2984_vm9, %v3401_v16, %v15241_v24  ;;  %v893_v28 = vpop.xlane.xlu0 %892 }
 0x2b4   :  { %v2815_v41 = vunpack.c.l.b16 %v13311_v26  ;;  %v2816_v48 = vunpack.c.h.b16 %v13311_v26  ;;  %v2804_v13 = vunpack.c.h.b16 %v1739_v45  ;;  %v3316_v23 = vperm.slane %v2803_v59, %v15234_v58 }
 0x2b5   :  { %6854 = vmatpush.bf16.msra.mxu1 %v8178_v55  ;;  %v1763_v17 = vpack.c.bf16 %v1554_v60, %v1553_v7  ;;  %v1508_v61 = vmul.f32 %v12267_v50, %v893_v28  ;;  %v1209_v27 = vsel %vm365_vm0, %v326_v5, 0.0  ;;  %v2850_v55 = vunpack.c.h.b16 %v1762_v8  ;;  %v294_v8 = vld [vmem:[%s15022_s0 + $0x7c8] sm:$0xff] }
 0x2b6   :  { %v3339_v54 = vperm.slane %v2815_v41, %v12390_v29  ;;  %v1746_v9 = vpack.c.bf16 %v1520_v53, %v1519_v12  ;;  %v1206_v20 = vsel %vm365_vm0, %v325_v40, 0.0  ;;  %v3315_v0 = vsel %vm2996_vm12, %v3314_v18, %v3313_v19  ;;  %1069 = vadd.xlane.f32.xlu2 %v1068_v51  ;;  %v15242_v53 = vld [vmem:[#allocation19_spill] sm:$0xff]  ;;  %v1037_v24 = vpop.xlane.xlu1 %1036 }
 0x2b7   :  { %v3404_v45 = vsel %vm2988_vm10, %v3403_v33, %v3402_v47  ;;  %v3405_v26 = vperm.slane %v2849_v15, %v12445_v1  ;;  %v1740_v16 = vpack.c.bf16 %v1508_v61, %v1507_v11  ;;  %v2702_v43 = vunpack.c.h.b16 %v13263_v62  ;;  %v293_v15 = vld [vmem:[%s15022_s0 + $0x7c0] sm:$0xff] }
 0x2b8   :  { %v3318_v59 = vperm.slane %v2804_v13, %v15217_v14  ;;  %v1522_v60 = vmul.f32 %v12267_v50, %v935_v46  ;;  %v1521_v7 = vmul.f32 %v12267_v50, %v932_v31  ;;  %1210 = vadd.xlane.f32.xlu1 %v1209_v27  ;;  %v3317_v30 = vsel %vm3000_vm13, %v3316_v23, %v3315_v0  ;;  %v281_v62 = vld [vmem:[%s15022_s0 + $0x760] sm:$0xff] }
 0x2b9   :  { %v2851_v18 = vunpack.c.l.b16 %v1763_v17  ;;  %v2805_v41 = vunpack.c.l.b16 %v1740_v16  ;;  %v2806_v12 = vunpack.c.h.b16 %v1740_v16  ;;  %v3340_v5 = vsel %vm2984_vm9, %v3339_v54, %v15242_v53  ;;  %v1136_v40 = vpop.xlane.xlu2 %1135 }
 0x2ba   :  { %1207 = vadd.xlane.f32.xlu0 %v1206_v20  ;;  %v3341_v36 = vperm.slane %v2816_v48, %v12421_v22  ;;  %v3407_v19 = vperm.slane %v2850_v55, %v12456_v32  ;;  %v2817_v33 = vunpack.c.l.b16 %v1746_v9  ;;  %v3406_v11 = vsel %vm2992_vm11, %v3405_v26, %v3404_v45  ;;  %v280_v48 = vld [vmem:[%s15022_s0 + $0x758] sm:$0xff] }
 0x2bb   :  { %v3320_v46 = vperm.slane %v2805_v41, %v12583_v57  ;;  %v3322_v31 = vperm.slane %v2806_v12, %v12586_v35  ;;  %v1113_v47 = vsel %vm365_vm0, %v294_v8, 0.0  ;;  %v3319_v13 = vsel %vm3004_vm14, %v3318_v59, %v3317_v30  ;;  %v1034_v61 = vpop.xlane.xlu0 %1033 }
 0x2bc   :  { %v2852_v28 = vunpack.c.h.b16 %v1763_v17  ;;  %v1747_v51 = vpack.c.bf16 %v1522_v60, %v1521_v7  ;;  %v1556_v23 = vmul.f32 %v12267_v50, %v1037_v24  ;;  %v3409_v27 = vperm.slane %v2851_v18, %v15234_v58  ;;  %v15243_v60 = vld [vmem:[#allocation13_spill] sm:$0xff]  ;;  %v313_v24 = vld [vmem:[%s15022_s0 + $0x860] sm:$0xff] }
 0x2bd   :  { %v3321_v54 = vsel %vm3008_vm15, %v3320_v46, %v3319_v13  ;;  %v1555_v55 = vmul.f32 %v12267_v50, %v1034_v61  ;;  %v1110_v20 = vsel %vm365_vm0, %v293_v15, 0.0  ;;  %v2818_v0 = vunpack.c.h.b16 %v1746_v9 }
 0x2be   :  { %v3343_v45 = vperm.slane %v2817_v33, %v12445_v1  ;;  %v3323_v26 = vsel %vm3012_vm1, %v3322_v31, %v3321_v54  ;;  %v1071_v16 = vsel %vm365_vm0, %v280_v48, 0.0  ;;  %v3118_v17 = vperm.slane %v2701_v2, %v12377_v63  ;;  %1114 = vadd.xlane.f32.xlu2 %v1113_v47  ;;  %v938_v31 = vpop.xlane.xlu1 %937 }
 0x2bf   :  { %v3115_v59 = vsel %vm2968_vm5, %v13303_v37, %v13228_v38  ;;  %v3604_v7 = vsel %vm15031_vm4, %v3323_v26, %v15243_v60  ;;  %v1764_v8 = vpack.c.bf16 %v1556_v23, %v1555_v55  ;;  %v3408_v9 = vsel %vm2996_vm12, %v3407_v19, %v3406_v11 }
 0x2c0   :  { %v3411_v30 = vperm.slane %v2852_v28, %v15217_v14  ;;  %v2819_v18 = vunpack.c.l.b16 %v1747_v51  ;;  %v13408_v41 = vpack.c.b16 %v3604_v7, %v3604_v7  ;;  %1111 = vadd.xlane.f32.xlu1 %v1110_v20  ;;  %v3342_v12 = vsel %vm2988_vm10, %v3341_v36, %v3340_v5  ;;  %v327_v5 = vld [vmem:[%s15022_s0 + $0x8d0] sm:$0xff]  ;;  %v314_v36 = vld [vmem:[%s15022_s0 + $0x868] sm:$0xff] }
 0x2c1   :  { %v3410_v2 = vsel %vm3000_vm13, %v3409_v27, %v3408_v9  ;;  %v2853_v53 = vunpack.c.l.b16 %v1764_v8  ;;  %v2854_v33 = vunpack.c.h.b16 %v1764_v8  ;;  %v3117_v38 = vsel %vm2972_vm6, %v13322_v42, %v3115_v59  ;;  %v941_v46 = vpop.xlane.xlu2 %940 }
 0x2c2   :  { %15244 = vst [vmem:[#allocation15_spill] sm:$0xff] %v13408_v41  ;;  %1072 = vadd.xlane.f32.xlu0 %v1071_v16  ;;  %v13416_v37 = vpack.c.bf16 %v13326_v4, %v13331_v6  ;;  %v3344_v19 = vsel %vm2992_vm11, %v3343_v45, %v3342_v12  ;;  %v3345_v15 = vperm.slane %v2818_v0, %v12456_v32  ;;  %v2820_v11 = vunpack.c.h.b16 %v1747_v51 }
 0x2c3   :  { %6842 = vmatmul.bf16.vlgmr.msra.gmra.mxu0 %v13408_v41  ;;  %v1589_v42 = vmul.f32 %v12267_v50, %v1136_v40  ;;  %v3413_v4 = vperm.slane %v2853_v53, %v12583_v57  ;;  %v3415_v6 = vperm.slane %v2854_v33, %v12586_v35  ;;  %v3412_v47 = vsel %vm3004_vm14, %v3411_v30, %v3410_v2  ;;  %v1139_v51 = vpop.xlane.xlu0 %1138  ;;  %v15246_v30 = vld [vmem:[#allocation14_spill] sm:$0xff]  ;;  %v15248_v33 = vld [vmem:[#allocation43_spill] sm:$0xff] }
 0x2c4   :  { %v3347_v48 = vperm.slane %v2819_v18, %v15234_v58  ;;  %v1524_v13 = vmul.f32 %v12267_v50, %v941_v46  ;;  %v1523_v28 = vmul.f32 %v12267_v50, %v938_v31  ;;  %v1590_v23 = vmul.f32 %v12267_v50, %v1139_v51  ;;  %v15247_v2 = vld [vmem:[#allocation38_spill] sm:$0xff] }
 0x2c5   :  { %v3414_v40 = vsel %vm3008_vm15, %v3413_v4, %v3412_v47  ;;  %v1212_v61 = vsel %vm365_vm0, %v327_v5, 0.0  ;;  %v1173_v27 = vsel %vm365_vm0, %v314_v36, 0.0  ;;  %v2703_v54 = vunpack.c.l.b16 %v13416_v37 }
 0x2c6   :  { %v3416_v55 = vsel %vm3012_vm1, %v3415_v6, %v3414_v40  ;;  %v1748_v20 = vpack.c.bf16 %v1524_v13, %v1523_v28  ;;  %v1170_v0 = vsel %vm365_vm0, %v313_v24, 0.0  ;;  %v3346_v45 = vsel %vm2996_vm12, %v3345_v15, %v3344_v19  ;;  %1213 = vadd.xlane.f32.xlu2 %v1212_v61  ;;  %v1145_v4 = vpop.xlane.xlu1 %1144  ;;  %v328_v6 = vld [vmem:[%s15022_s0 + $0x8d8] sm:$0xff]  ;;  %v15250_v40 = vld [vmem:[#allocation42_spill] sm:$0xff] }
 0x2c7   :  { %v3349_v26 = vperm.slane %v2820_v11, %v15217_v14  ;;  %v3607_v16 = vsel %vm15031_vm4, %v3416_v55, %v13219_v56  ;;  %v1781_v59 = vpack.c.bf16 %v1590_v23, %v1589_v42  ;;  %v3348_v60 = vsel %vm3000_vm13, %v3347_v48, %v3346_v45  ;;  %v15251_v55 = vld [vmem:[#allocation44_spill] sm:$0xff] }
 0x2c8   :  { %v13449_v7 = vpack.c.b16 %v3607_v16, %v3607_v16  ;;  %v2821_v8 = vunpack.c.l.b16 %v1748_v20  ;;  %v2822_v9 = vunpack.c.h.b16 %v1748_v20  ;;  %1174 = vadd.xlane.f32.xlu1 %v1173_v27  ;;  %v3044_v18 = vsel %vm3012_vm1, %v15246_v30, %v13215_v3  ;;  %v282_v3 = vld [vmem:[%s15022_s0 + $0x768] sm:$0xff] }
 0x2c9   :  { %v3120_v12 = vperm.slane %v2702_v43, %v12387_v21  ;;  %v1407_v56 = vmul.f32 %v12267_v50, %v15247_v2  ;;  %v3119_v53 = vsel %vm2976_vm7, %v3118_v17, %v3117_v38  ;;  %v1408_v19 = vmul.f32 %v12267_v50, %v15248_v33  ;;  %v15249_v38 = vld [vmem:[#allocation41_spill] sm:$0xff]  ;;  %v1040_v42 = vpop.xlane.xlu2 %1039 }
 0x2ca   :  { %15245 = vst [vmem:[#allocation16_spill] sm:$0xff] %v13449_v7  ;;  %1171 = vadd.xlane.f32.xlu0 %v1170_v0  ;;  %v3351_v15 = vperm.slane %v2821_v8, %v12583_v57  ;;  %v3353_v5 = vperm.slane %v2822_v9, %v12586_v35  ;;  %6881 = vmatmul.bf16.vlgmr.msra.gmra.mxu3 %v13449_v7  ;;  %v2704_v43 = vunpack.c.h.b16 %v13416_v37  ;;  %v2887_v31 = vunpack.c.l.b16 %v1781_v59  ;;  %v15252_v0 = vld [vmem:[#allocation49_spill] sm:$0xff] }
 0x2cb   :  { %v3122_v17 = vperm.slane %v2703_v54, %v12390_v29  ;;  %v1410_v36 = vmul.f32 %v12267_v50, %v15249_v38  ;;  %v3350_v11 = vsel %vm3004_vm14, %v3349_v26, %v3348_v60  ;;  %v2888_v24 = vunpack.c.h.b16 %v1781_v59  ;;  %v1142_v37 = vpop.xlane.xlu0 %1141 }
 0x2cc   :  { %v3352_v46 = vsel %vm3008_vm15, %v3351_v15, %v3350_v11  ;;  %v1592_v47 = vmul.f32 %v12267_v50, %v1145_v4  ;;  %v1591_v13 = vmul.f32 %v12267_v50, %v1142_v37  ;;  %v1077_v28 = vsel %vm365_vm0, %v282_v3, 0.0  ;;  %v296_v3 = vld [vmem:[%s15022_s0 + $0x7d8] sm:$0xff]  ;;  %v295_v4 = vld [vmem:[%s15022_s0 + $0x7d0] sm:$0xff] }
 0x2cd   :  { %v3354_v48 = vsel %vm3012_vm1, %v3353_v5, %v3352_v46  ;;  %v1074_v51 = vsel %vm365_vm0, %v281_v62, 0.0  ;;  %v1409_v23 = vmul.f32 %v12267_v50, %v15250_v40  ;;  %v1690_v61 = vpack.c.bf16 %v1408_v19, %v1407_v56  ;;  %v15254_v19 = vld [vmem:[#allocation47_spill] sm:$0xff]  ;;  %v315_v5 = vld [vmem:[%s15022_s0 + $0x870] sm:$0xff] }
 0x2ce   :  { %v3605_v27 = vsel %vm15031_vm4, %v3354_v48, %v3044_v18  ;;  %v1215_v54 = vsel %vm365_vm0, %v328_v6, 0.0  ;;  %v1413_v20 = vmul.f32 %v12267_v50, %v15251_v55  ;;  %v1414_v45 = vmul.f32 %v12267_v50, %v15252_v0  ;;  %1078 = vadd.xlane.f32.xlu2 %v1077_v28  ;;  %v1184_v11 = vpop.xlane.xlu1 %1183 }
 0x2cf   :  { %v13493_v26 = vpack.c.b16 %v3605_v27, %v3605_v27  ;;  %v1782_v16 = vpack.c.bf16 %v1592_v47, %v1591_v13  ;;  %v3121_v59 = vsel %vm2980_vm8, %v3120_v12, %v3119_v53  ;;  %v3479_v60 = vperm.slane %v2887_v31, %v12290_v34  ;;  %v15255_v53 = vld [vmem:[#allocation48_spill] sm:$0xff] }
 0x2d0   :  { %v3480_v8 = vperm.slane %v2888_v24, %v12298_v44  ;;  %1075 = vadd.xlane.f32.xlu1 %v1074_v51  ;;  %v3123_v9 = vsel %vm2984_vm9, %v3122_v17, %v3121_v59  ;;  %v3124_v30 = vperm.slane %v2704_v43, %v12421_v22  ;;  %v13501_v56 = vpack.c.bf16 %v1410_v36, %v1409_v23 }
 0x2d1   :  { %15253 = vst [vmem:[#allocation127_spill] sm:$0xff] %v13493_v26  ;;  %v2889_v18 = vunpack.c.l.b16 %v1782_v16  ;;  %v2890_v2 = vunpack.c.h.b16 %v1782_v16  ;;  %6855 = vmatmul.bf16.vlgmr.msra.gmra.mxu1 %v13493_v26  ;;  %v2705_v33 = vunpack.c.l.b16 %v1690_v61  ;;  %v1416_v12 = vmul.f32 %v12267_v50, %v15254_v19  ;;  %v1187_v36 = vpop.xlane.xlu2 %1186 }
 0x2d2   :  { %1216 = vadd.xlane.f32.xlu0 %v1215_v54  ;;  %v1415_v15 = vmul.f32 %v12267_v50, %v15255_v53  ;;  %v1693_v62 = vpack.c.bf16 %v1414_v45, %v1413_v20  ;;  %v1557_v43 = vmul.f32 %v12267_v50, %v1040_v42  ;;  %v2706_v6 = vunpack.c.h.b16 %v1690_v61  ;;  %v15257_v20 = vld [vmem:[#allocation45_spill] sm:$0xff]  ;;  %v15258_v45 = vld [vmem:[#allocation46_spill] sm:$0xff] }
 0x2d3   :  { %v3482_v17 = vperm.slane %v2889_v18, %v12318_v39  ;;  %v3484_v38 = vperm.slane %v2890_v2, %v12335_v52  ;;  %v3481_v46 = vsel %vm2956_vm2, %v3480_v8, %v3479_v60  ;;  %v1606_v31 = vmul.f32 %v12267_v50, %v1187_v36  ;;  %v1043_v47 = vpop.xlane.xlu0 %1042  ;;  %v330_v2 = vld [vmem:[%s15022_s0 + $0x8e8] sm:$0xff] }
 0x2d4   :  { %v1605_v24 = vmul.f32 %v12267_v50, %v1184_v11  ;;  %v1558_v37 = vmul.f32 %v12267_v50, %v1043_v47  ;;  %v1176_v48 = vsel %vm365_vm0, %v315_v5, 0.0  ;;  %v1119_v13 = vsel %vm365_vm0, %v296_v3, 0.0  ;;  %v316_v3 = vld [vmem:[%s15022_s0 + $0x878] sm:$0xff] }
 0x2d5   :  { %v3483_v42 = vsel %vm2960_vm3, %v3482_v17, %v3481_v46  ;;  %v13526_v28 = vpack.c.bf16 %v1416_v12, %v1415_v15  ;;  %vm15256_vm4 = vcmask 261312   ;;  %v1116_v23 = vsel %vm365_vm0, %v295_v4, 0.0 }
 0x2d6   :  { %v13529_v51 = vsel %vm15256_vm4, %v3484_v38, %v3483_v42  ;;  %v13531_v40 = vpack.c.bf16 %v1606_v31, %v1605_v24  ;;  %v3126_v61 = vperm.slane %v2705_v33, %v12445_v1  ;;  %v2711_v27 = vunpack.c.l.b16 %v1693_v62  ;;  %1177 = vadd.xlane.f32.xlu2 %v1176_v48  ;;  %v329_v33 = vld [vmem:[%s15022_s0 + $0x8e0] sm:$0xff]  ;;  %v1049_v5 = vpop.xlane.xlu1 %1048 }
 0x2d7   :  { %v2712_v54 = vunpack.c.h.b16 %v1693_v62  ;;  %v1765_v55 = vpack.c.bf16 %v1558_v37, %v1557_v43  ;;  %v1412_v0 = vmul.f32 %v12267_v50, %v15257_v20  ;;  %v1411_v16 = vmul.f32 %v12267_v50, %v15258_v45  ;;  %v15260_v62 = vld [vmem:[#allocation52_spill] sm:$0xff] }
 0x2d8   :  { %1120 = vadd.xlane.f32.xlu1 %v1119_v13  ;;  %v3125_v59 = vsel %vm2988_vm10, %v3124_v30, %v3123_v9  ;;  %v2707_v60 = vunpack.c.l.b16 %v13501_v56  ;;  %v3128_v8 = vperm.slane %v2706_v6, %v12456_v32  ;;  %v2713_v18 = vunpack.c.l.b16 %v13526_v28  ;;  %v15259_v30 = vld [vmem:[#allocation51_spill] sm:$0xff] }
 0x2d9   :  { %v3127_v19 = vsel %vm2992_vm11, %v3126_v61, %v3125_v59  ;;  %v3138_v12 = vperm.slane %v2711_v27, %v12290_v34  ;;  %v3139_v9 = vperm.slane %v2712_v54, %v12298_v44  ;;  %v1418_v53 = vmul.f32 %v12267_v50, %v15259_v30  ;;  %v1148_v15 = vpop.xlane.xlu2 %1147 }
 0x2da   :  { %1117 = vadd.xlane.f32.xlu0 %v1116_v23  ;;  %v1417_v43 = vmul.f32 %v12267_v50, %v15260_v62  ;;  %v2855_v17 = vunpack.c.l.b16 %v1765_v55  ;;  %v2856_v38 = vunpack.c.h.b16 %v1765_v55  ;;  %v1560_v36 = vmul.f32 %v12267_v50, %v1049_v5  ;;  %v283_v5 = vld [vmem:[%s15022_s0 + $0x770] sm:$0xff] }
 0x2db   :  { %v1046_v11 = vpop.xlane.xlu0 %1045  ;;  %v13560_v4 = vpack.c.bf16 %v1412_v0, %v1411_v16  ;;  %v1221_v46 = vsel %vm365_vm0, %v330_v2, 0.0  ;;  %v1218_v31 = vsel %vm365_vm0, %v329_v33, 0.0  ;;  %v3129_v24 = vsel %vm2996_vm12, %v3128_v8, %v3127_v19  ;;  %v297_v2 = vld [vmem:[%s15022_s0 + $0x7e0] sm:$0xff]  ;;  %v284_v33 = vld [vmem:[%s15022_s0 + $0x778] sm:$0xff] }
 0x2dc   :  { %v1559_v6 = vmul.f32 %v12267_v50, %v1046_v11  ;;  %v3141_v47 = vperm.slane %v2713_v18, %v12318_v39  ;;  %v1179_v42 = vsel %vm365_vm0, %v316_v3, 0.0  ;;  %v3130_v37 = vperm.slane %v2707_v60, %v15234_v58  ;;  %v15261_v60 = vld [vmem:[#allocation50_spill] sm:$0xff] }
 0x2dd   :  { %v3140_v48 = vsel %vm2956_vm2, %v3139_v9, %v3138_v12  ;;  %v2708_v23 = vunpack.c.h.b16 %v13501_v56  ;;  %v13571_v61 = vpack.c.bf16 %v1418_v53, %v1417_v43  ;;  %v3417_v27 = vperm.slane %v2855_v17, %v12290_v34 }
 0x2de   :  { %v1766_v13 = vpack.c.bf16 %v1560_v36, %v1559_v6  ;;  %v3418_v54 = vperm.slane %v2856_v38, %v12298_v44  ;;  %1222 = vadd.xlane.f32.xlu2 %v1221_v46  ;;  %v13576_v55 = vsel %vm3000_vm13, %v3130_v37, %v3129_v24  ;;  %v2709_v20 = vunpack.c.l.b16 %v13560_v4  ;;  %v1190_v53 = vpop.xlane.xlu1 %1189  ;;  %v15262_v6 = vld [vmem:[#allocation55_spill] sm:$0xff] }
 0x2df   :  { %v2714_v16 = vunpack.c.h.b16 %v13526_v28  ;;  %v3142_v59 = vsel %vm2960_vm3, %v3141_v47, %v3140_v48  ;;  %v1419_v8 = vmul.f32 %v12267_v50, %v15261_v60  ;;  %v2903_v18 = vunpack.c.l.b16 %v13531_v40 }
 0x2e0   :  { %1219 = vadd.xlane.f32.xlu1 %v1218_v31  ;;  %v2857_v0 = vunpack.c.l.b16 %v1766_v13  ;;  %v2858_v45 = vunpack.c.h.b16 %v1766_v13  ;;  %v2904_v19 = vunpack.c.h.b16 %v13531_v40  ;;  %v1593_v12 = vmul.f32 %v12267_v50, %v1148_v15 }
 0x2e1   :  { %v1193_v30 = vpop.xlane.xlu2 %1192  ;;  %v2715_v3 = vunpack.c.l.b16 %v13571_v61  ;;  %v3419_v62 = vsel %vm2956_vm2, %v3418_v54, %v3417_v27  ;;  %v1607_v40 = vmul.f32 %v12267_v50, %v1190_v53  ;;  %v1122_v36 = vsel %vm365_vm0, %v297_v2, 0.0 }
 0x2e2   :  { %1180 = vadd.xlane.f32.xlu0 %v1179_v42  ;;  %v3420_v28 = vperm.slane %v2857_v0, %v12318_v39  ;;  %v3422_v9 = vperm.slane %v2858_v45, %v12335_v52  ;;  %v1608_v43 = vmul.f32 %v12267_v50, %v1193_v30  ;;  %v1083_v11 = vsel %vm365_vm0, %v284_v33, 0.0 }
 0x2e3   :  { %v1151_v17 = vpop.xlane.xlu0 %1150  ;;  %v1420_v46 = vmul.f32 %v12267_v50, %v15262_v6  ;;  %v1080_v47 = vsel %vm365_vm0, %v283_v5, 0.0  ;;  %v3143_v42 = vperm.slane %v2714_v16, %v12335_v52  ;;  %v3510_v37 = vperm.slane %v2903_v18, %v12290_v34  ;;  %v332_v16 = vld [vmem:[%s15022_s0 + $0x8f8] sm:$0xff] }
 0x2e4   :  { %v3421_v15 = vsel %vm2960_vm3, %v3420_v28, %v3419_v62  ;;  %v1594_v38 = vmul.f32 %v12267_v50, %v1151_v17  ;;  %v1790_v24 = vpack.c.bf16 %v1608_v43, %v1607_v40  ;;  %v3511_v48 = vperm.slane %v2904_v19, %v12298_v44  ;;  %v15264_v62 = vld [vmem:[#allocation54_spill] sm:$0xff] }
 0x2e5   :  { %v13608_v31 = vsel %vm15256_vm4, %v3422_v9, %v3421_v15  ;;  %v2710_v27 = vunpack.c.h.b16 %v13560_v4  ;;  %v3134_v54 = vperm.slane %v2709_v20, %v12583_v57  ;;  %v3144_v60 = vsel %vm15256_vm4, %v3143_v42, %v3142_v59  ;;  %v331_v59 = vld [vmem:[%s15022_s0 + $0x8f0] sm:$0xff] }
 0x2e6   :  { %v1783_v13 = vpack.c.bf16 %v1594_v38, %v1593_v12  ;;  %v2905_v0 = vunpack.c.l.b16 %v1790_v24  ;;  %v2906_v45 = vunpack.c.h.b16 %v1790_v24  ;;  %1123 = vadd.xlane.f32.xlu2 %v1122_v36  ;;  %v2716_v2 = vunpack.c.h.b16 %v13571_v61  ;;  %v15263_v12 = vld [vmem:[#allocation53_spill] sm:$0xff] }
 0x2e7   :  { %v3145_v18 = vperm.slane %v2715_v3, %v12345_v49  ;;  %v1696_v4 = vpack.c.bf16 %v1420_v46, %v1419_v8  ;;  %v1422_v61 = vmul.f32 %v12267_v50, %v15263_v12  ;;  %v3512_v9 = vsel %vm2956_vm2, %v3511_v48, %v3510_v37  ;;  %v1091_v3 = vpop.xlane.xlu1 %1090  ;;  %v298_v8 = vld [vmem:[%s15022_s0 + $0x7e8] sm:$0xff] }
 0x2e8   :  { %1084 = vadd.xlane.f32.xlu1 %v1083_v11  ;;  %v2891_v33 = vunpack.c.l.b16 %v1783_v13  ;;  %v2892_v28 = vunpack.c.h.b16 %v1783_v13  ;;  %v3513_v20 = vperm.slane %v2905_v0, %v12318_v39  ;;  %v3515_v19 = vperm.slane %v2906_v45, %v12335_v52 }
 0x2e9   :  { %v1052_v5 = vpop.xlane.xlu2 %1051  ;;  %v1421_v43 = vmul.f32 %v12267_v50, %v15264_v62  ;;  %v1574_v17 = vmul.f32 %v12267_v50, %v1091_v3  ;;  %v1227_v38 = vsel %vm365_vm0, %v332_v16, 0.0  ;;  %v1224_v46 = vsel %vm365_vm0, %v331_v59, 0.0 }
 0x2ea   :  { %1081 = vadd.xlane.f32.xlu0 %v1080_v47  ;;  %v3486_v30 = vperm.slane %v2891_v33, %v12345_v49  ;;  %v3488_v53 = vperm.slane %v2892_v28, %v12382_v10  ;;  %v3514_v40 = vsel %vm2960_vm3, %v3513_v20, %v3512_v9  ;;  %v3147_v24 = vperm.slane %v2716_v2, %v12382_v10 }
 0x2eb   :  { %v1088_v15 = vpop.xlane.xlu0 %1087  ;;  %v13641_v36 = vsel %vm15256_vm4, %v3515_v19, %v3514_v40  ;;  %v2717_v47 = vunpack.c.l.b16 %v1696_v4  ;;  %v1125_v37 = vsel %vm365_vm0, %v298_v8, 0.0  ;;  %v3132_v48 = vperm.slane %v2708_v23, %v15217_v14 }
 0x2ec   :  { %v3487_v11 = vsel %vm2968_vm5, %v3486_v30, %v13529_v51  ;;  %v1573_v6 = vmul.f32 %v12267_v50, %v1088_v15  ;;  %v3146_v13 = vsel %vm2968_vm5, %v3145_v18, %v3144_v60  ;;  %v13656_v51 = vpack.c.bf16 %v1422_v61, %v1421_v43  ;;  %v15265_v60 = vld [vmem:[#allocation63_spill] sm:$0xff]  ;;  %v333_v18 = vld [vmem:[%s15022_s0 + $0x900] sm:$0xff]  ;;  %v299_v61 = vld [vmem:[%s15022_s0 + $0x7f0] sm:$0xff] }
 0x2ed   :  { %v13649_v42 = vsel %vm2972_vm6, %v3488_v53, %v3487_v11  ;;  %v3133_v45 = vsel %vm3004_vm14, %v3132_v48, %v13576_v55  ;;  %v13661_v2 = vperm.slane %v2710_v27, %v12586_v35  ;;  %v2718_v33 = vunpack.c.h.b16 %v1696_v4  ;;  %v300_v55 = vld [vmem:[%s15022_s0 + $0x7f8] sm:$0xff]  ;;  %v15266_v27 = vld [vmem:[#allocation64_spill] sm:$0xff]  ;;  %v15267_v15 = vld [vmem:[#allocation57_spill] sm:$0xff] }
 0x2ee   :  { %v1773_v0 = vpack.c.bf16 %v1574_v17, %v1573_v6  ;;  %1228 = vadd.xlane.f32.xlu2 %v1227_v38  ;;  %v13664_v28 = vsel %vm3008_vm15, %v3134_v54, %v3133_v45  ;;  %v3148_v56 = vsel %vm2972_vm6, %v3147_v24, %v3146_v13  ;;  %v3149_v23 = vperm.slane %v2717_v47, %v12377_v63  ;;  %v15268_v48 = vld [vmem:[#allocation62_spill] sm:$0xff] }
 0x2ef   :  { %v1430_v16 = vmul.f32 %v12267_v50, %v15265_v60  ;;  %v1429_v4 = vmul.f32 %v12267_v50, %v15266_v27  ;;  %v1561_v54 = vmul.f32 %v12267_v50, %v1052_v5  ;;  %v1094_v12 = vpop.xlane.xlu1 %1093  ;;  %v2719_v9 = vunpack.c.l.b16 %v13656_v51  ;;  %v15271_v27 = vld [vmem:[#allocation65_spill] sm:$0xff] }
 0x2f0   :  { %1225 = vadd.xlane.f32.xlu1 %v1224_v46  ;;  %v2871_v20 = vunpack.c.l.b16 %v1773_v0  ;;  %v2872_v19 = vunpack.c.h.b16 %v1773_v0  ;;  %v2720_v30 = vunpack.c.h.b16 %v13656_v51  ;;  %v1575_v3 = vmul.f32 %v12267_v50, %v1094_v12  ;;  %v15269_v0 = vld [vmem:[#allocation67_spill] sm:$0xff]  ;;  %v335_v12 = vld [vmem:[%s15022_s0 + $0x910] sm:$0xff] }
 0x2f1   :  { %v1097_v59 = vpop.xlane.xlu2 %1096  ;;  %v3151_v62 = vperm.slane %v2718_v33, %v12387_v21  ;;  %v1230_v43 = vsel %vm365_vm0, %v333_v18, 0.0  ;;  %v1131_v40 = vsel %vm365_vm0, %v300_v55, 0.0  ;;  %v3150_v17 = vsel %vm2976_vm7, %v3149_v23, %v3148_v56  ;;  %v15270_v23 = vld [vmem:[#allocation58_spill] sm:$0xff]  ;;  %v336_v55 = vld [vmem:[%s15022_s0 + $0x918] sm:$0xff] }
 0x2f2   :  { %1126 = vadd.xlane.f32.xlu0 %v1125_v37  ;;  %v1576_v53 = vmul.f32 %v12267_v50, %v1097_v59  ;;  %v1424_v38 = vmul.f32 %v12267_v50, %v15267_v15  ;;  %v1128_v6 = vsel %vm365_vm0, %v299_v61, 0.0  ;;  %v1701_v46 = vpack.c.bf16 %v1430_v16, %v1429_v4 }
 0x2f3   :  { %v1055_v8 = vpop.xlane.xlu0 %1054  ;;  %v3448_v24 = vperm.slane %v2871_v20, %v12290_v34  ;;  %v3449_v47 = vperm.slane %v2872_v19, %v12298_v44  ;;  %v1431_v13 = vmul.f32 %v12267_v50, %v15268_v48  ;;  %v1432_v51 = vmul.f32 %v12267_v50, %v15269_v0 }
 0x2f4   :  { %v1562_v5 = vmul.f32 %v12267_v50, %v1055_v8  ;;  %v1774_v11 = vpack.c.bf16 %v1576_v53, %v1575_v3  ;;  %v3152_v56 = vsel %vm2980_vm8, %v3151_v62, %v3150_v17  ;;  %v1423_v60 = vmul.f32 %v12267_v50, %v15270_v23 }
 0x2f5   :  { %v1434_v4 = vmul.f32 %v12267_v50, %v15271_v27  ;;  %v2727_v61 = vunpack.c.l.b16 %v1701_v46  ;;  %v3450_v53 = vsel %vm2956_vm2, %v3449_v47, %v3448_v24  ;;  %v1236_v48 = vsel %vm365_vm0, %v335_v12, 0.0 }
 0x2f6   :  { %v1767_v37 = vpack.c.bf16 %v1562_v5, %v1561_v54  ;;  %v2873_v45 = vunpack.c.l.b16 %v1774_v11  ;;  %v2874_v33 = vunpack.c.h.b16 %v1774_v11  ;;  %1231 = vadd.xlane.f32.xlu2 %v1230_v43  ;;  %v15272_v54 = vld [vmem:[#allocation66_spill] sm:$0xff]  ;;  %v334_v43 = vld [vmem:[%s15022_s0 + $0x908] sm:$0xff]  ;;  %v2728_v0 = vunpack.c.h.b16 %v1701_v46 }
 0x2f7   :  { %v1433_v20 = vmul.f32 %v12267_v50, %v15272_v54  ;;  %v1157_v5 = vpop.xlane.xlu1 %1156  ;;  %v13753_v54 = vpack.c.bf16 %v1424_v38, %v1423_v60 }
 0x2f8   :  { %1132 = vadd.xlane.f32.xlu1 %v1131_v40  ;;  %v2859_v16 = vunpack.c.l.b16 %v1767_v37  ;;  %v2860_v18 = vunpack.c.h.b16 %v1767_v37  ;;  %v3451_v19 = vperm.slane %v2873_v45, %v12318_v39  ;;  %v3453_v59 = vperm.slane %v2874_v33, %v12335_v52 }
 0x2f9   :  { %v1196_v62 = vpop.xlane.xlu2 %1195  ;;  %v1702_v40 = vpack.c.bf16 %v1432_v51, %v1431_v13  ;;  %v1596_v15 = vmul.f32 %v12267_v50, %v1157_v5  ;;  %v13731_v45 = vpack.c.bf16 %v1434_v4, %v1433_v20  ;;  %v1233_v51 = vsel %vm365_vm0, %v334_v43, 0.0  ;;  %v350_v20 = vld [vmem:[%s15022_s0 + $0x988] sm:$0xff] }
 0x2fa   :  { %1129 = vadd.xlane.f32.xlu0 %v1128_v6  ;;  %v3424_v3 = vperm.slane %v2859_v16, %v12345_v49  ;;  %v3426_v8 = vperm.slane %v2860_v18, %v12382_v10  ;;  %v3452_v17 = vsel %vm2960_vm3, %v3451_v19, %v3450_v53  ;;  %v1239_v6 = vsel %vm365_vm0, %v336_v55, 0.0  ;;  %v15274_v55 = vld [vmem:[#allocation56_spill] sm:$0xff] }
 0x2fb   :  { %v1154_v11 = vpop.xlane.xlu0 %1153  ;;  %v13725_v24 = vsel %vm15256_vm4, %v3453_v59, %v3452_v17  ;;  %v3153_v33 = vperm.slane %v2719_v9, %v12390_v29  ;;  %v13741_v16 = vsel %vm3012_vm1, %v13661_v2, %v13664_v28  ;;  %v2729_v18 = vunpack.c.l.b16 %v1702_v40  ;;  %v349_v53 = vld [vmem:[%s15022_s0 + $0x980] sm:$0xff] }
 0x2fc   :  { %v3425_v47 = vsel %vm2968_vm5, %v3424_v3, %v13608_v31  ;;  %v1595_v37 = vmul.f32 %v12267_v50, %v1154_v11  ;;  %15273 = vst [vmem:[#allocation20_spill] sm:$0xff] %v13741_v16  ;;  %v13744_v31 = vperm.slane %v2720_v30, %v12421_v22  ;;  %v13751_v27 = vmul.f32 %v12267_v50, %v15274_v55 }
 0x2fd   :  { %v13734_v13 = vsel %vm2972_vm6, %v3426_v8, %v3425_v47  ;;  %v13747_v46 = vsel %vm2984_vm9, %v3153_v33, %v3152_v56  ;;  %v3169_v2 = vperm.slane %v2727_v61, %v12290_v34  ;;  %v3170_v28 = vperm.slane %v2728_v0, %v12298_v44  ;;  %v337_v56 = vld [vmem:[%s15022_s0 + $0x920] sm:$0xff]  ;;  %v15275_v8 = vld [vmem:[#allocation69_spill] sm:$0xff]  ;;  %v15276_v47 = vld [vmem:[#allocation70_spill] sm:$0xff] }
 0x2fe   :  { %v1784_v23 = vpack.c.bf16 %v1596_v15, %v1595_v37  ;;  %1240 = vadd.xlane.f32.xlu2 %v1239_v6  ;;  %v2731_v30 = vunpack.c.l.b16 %v13731_v45  ;;  %v2730_v19 = vunpack.c.h.b16 %v1702_v40  ;;  %v1609_v59 = vmul.f32 %v12267_v50, %v1196_v62  ;;  %v9681_v33 = vld [vmem:[#allocation2 + $0xdc0] sm:$0xf] }
 0x2ff   :  { %v1058_v61 = vpop.xlane.xlu1 %1057  ;;  %v3172_v3 = vperm.slane %v2729_v18, %v12318_v39  ;;  %v1436_v5 = vmul.f32 %v12267_v50, %v15275_v8  ;;  %v1242_v11 = vsel %vm365_vm0, %v337_v56, 0.0  ;;  %v1281_v6 = vsel %vm365_vm0, %v350_v20, 0.0  ;;  %v10915_v8 = vld [vmem:[#allocation2 + $0xd9c] sm:$0xf0] }
 0x300   :  { %1237 = vadd.xlane.f32.xlu1 %v1236_v48  ;;  %v2893_v9 = vunpack.c.l.b16 %v1784_v23  ;;  %v2894_v4 = vunpack.c.h.b16 %v1784_v23  ;;  %v1563_v40 = vmul.f32 %v12267_v50, %v1058_v61  ;;  %v1435_v37 = vmul.f32 %v12267_v50, %v15276_v47  ;;  %v10923_v23 = vld [vmem:[#allocation2 + $0xddc] sm:$0xf0] }
 0x301   :  { %v1061_v12 = vpop.xlane.xlu2 %1060  ;;  %v2721_v18 = vunpack.c.l.b16 %v13753_v54  ;;  %v3174_v56 = vperm.slane %v2730_v19, %v12335_v52 }
 0x302   :  { %1234 = vadd.xlane.f32.xlu0 %v1233_v51  ;;  %v3490_v38 = vperm.slane %v2893_v9, %v12377_v63  ;;  %v3492_v60 = vperm.slane %v2894_v4, %v12387_v21  ;;  %v1564_v43 = vmul.f32 %v12267_v50, %v1061_v12  ;;  %v1278_v51 = vsel %vm365_vm0, %v349_v53, 0.0 }
 0x303   :  { %v1199_v62 = vpop.xlane.xlu0 %1198  ;;  %v9682_v9 = vor.u32 %v10923_v23, %v9681_v33  ;;  %v3171_v4 = vsel %vm2956_vm2, %v3170_v28, %v3169_v2  ;;  %v3176_v2 = vperm.slane %v2731_v30, %v12345_v49  ;;  %v13796_v28 = vpack.c.bf16 %v1436_v5, %v1435_v37 }
 0x304   :  { %v3491_v17 = vsel %vm2976_vm7, %v3490_v38, %v13649_v42  ;;  %v1610_v15 = vmul.f32 %v12267_v50, %v1199_v62  ;;  %v1768_v0 = vpack.c.bf16 %v1564_v43, %v1563_v40  ;;  %v2722_v42 = vunpack.c.h.b16 %v13753_v54  ;;  %v352_v54 = vld [vmem:[%s15022_s0 + $0x998] sm:$0xff]  ;;  %v15277_v43 = vld [vmem:[#allocation68_spill] sm:$0xff] }
 0x305   :  { %v13783_v48 = vsel %vm2980_vm8, %v3492_v60, %v3491_v17  ;;  %v2732_v60 = vunpack.c.h.b16 %v13731_v45  ;;  %v3173_v12 = vsel %vm2960_vm3, %v3172_v3, %v3171_v4  ;;  %6912 = vmatpush.bf16.msrb.mxu2 %v9682_v9  ;;  %v351_v45 = vld [vmem:[%s15022_s0 + $0x990] sm:$0xff]  ;;  %v9649_v3 = vld [vmem:[#allocation2 + $0xd80] sm:$0xf]  ;;  %v1437_v40 = vmul.f32 %v12267_v50, %v15277_v43 }
 0x306   :  { %v1791_v55 = vpack.c.bf16 %v1610_v15, %v1609_v59  ;;  %v2861_v20 = vunpack.c.l.b16 %v1768_v0  ;;  %v2862_v38 = vunpack.c.h.b16 %v1768_v0  ;;  %1243 = vadd.xlane.f32.xlu2 %v1242_v11  ;;  %v338_v15 = vld [vmem:[%s15022_s0 + $0x928] sm:$0xff]  ;;  %v9650_v11 = vor.u32 %v10915_v8, %v9649_v3  ;;  %v15280_v8 = vld [vmem:[#allocation72_spill] sm:$0xff] }
 0x307   :  { %v1103_v5 = vpop.xlane.xlu1 %1102  ;;  %v1284_v9 = vsel %vm365_vm0, %v351_v45, 0.0  ;;  %v2733_v4 = vunpack.c.l.b16 %v13796_v28  ;;  %v15279_v45 = vld [vmem:[#allocation71_spill] sm:$0xff]  ;;  %v1439_v43 = vmul.f32 %v12267_v50, %v15280_v8  ;;  %v10891_v8 = vld [vmem:[#allocation2 + $0xcdc] sm:$0xf0] }
 0x308   :  { %1282 = vadd.xlane.f32.xlu1 %v1281_v6  ;;  %v2907_v61 = vunpack.c.l.b16 %v1791_v55  ;;  %v2908_v53 = vunpack.c.h.b16 %v1791_v55  ;;  %v3428_v19 = vperm.slane %v2861_v20, %v12377_v63  ;;  %v3430_v59 = vperm.slane %v2862_v38, %v12387_v21 }
 0x309   :  { %v1160_v30 = vpop.xlane.xlu2 %1159  ;;  %v3175_v6 = vsel %vm15256_vm4, %v3174_v56, %v3173_v12  ;;  %v1578_v37 = vmul.f32 %v12267_v50, %v1103_v5  ;;  %6913 = vmatpush.bf16.msrb.mxu2 %v9650_v11  ;;  %v15278_v56 = vld [vmem:[#allocation73_spill] sm:$0xff]  ;;  %v1245_v38 = vsel %vm365_vm0, %v338_v15, 0.0  ;;  %v9617_v12 = vld [vmem:[#allocation2 + $0xd40] sm:$0xf]  ;;  %v1440_v3 = vmul.f32 %v12267_v50, %v15279_v45  ;;  %v339_v11 = vld [vmem:[%s15022_s0 + $0x930] sm:$0xff] }
 0x30a   :  { %1279 = vadd.xlane.f32.xlu0 %v1278_v51  ;;  %v3517_v62 = vperm.slane %v2907_v61, %v12345_v49  ;;  %v3519_v17 = vperm.slane %v2908_v53, %v12382_v10  ;;  %v3429_v47 = vsel %vm2976_vm7, %v3428_v19, %v13734_v13  ;;  %v1287_v51 = vsel %vm365_vm0, %v352_v54, 0.0  ;;  %v10907_v61 = vld [vmem:[#allocation2 + $0xd5c] sm:$0xf0] }
 0x30b   :  { %v1100_v0 = vpop.xlane.xlu0 %1099  ;;  %v13816_v33 = vsel %vm2980_vm8, %v3430_v59, %v3429_v47  ;;  %v1438_v13 = vmul.f32 %v12267_v50, %v15278_v56  ;;  %v3177_v53 = vsel %vm2968_vm5, %v3176_v2, %v3175_v6  ;;  %v9618_v19 = vor.u32 %v10907_v61, %v9617_v12  ;;  %v9585_v6 = vld [vmem:[#allocation2 + $0xd00] sm:$0xf] }
 0x30c   :  { %v3518_v23 = vsel %vm2968_vm5, %v3517_v62, %v13641_v36  ;;  %v1577_v55 = vmul.f32 %v12267_v50, %v1100_v0  ;;  %v13832_v36 = vsel %vm2988_vm10, %v13744_v31, %v13747_v46  ;;  %v3178_v59 = vperm.slane %v2732_v60, %v12382_v10  ;;  %v353_v60 = vld [vmem:[%s15022_s0 + $0x9a0] sm:$0xff] }
 0x30d   :  { %v13826_v20 = vsel %vm2972_vm6, %v3519_v17, %v3518_v23  ;;  %v13841_v62 = vperm.slane %v2721_v18, %v12445_v1  ;;  %v13844_v31 = vperm.slane %v2722_v42, %v12456_v32  ;;  %v340_v17 = vld [vmem:[%s15022_s0 + $0x938] sm:$0xff]  ;;  %6914 = vmatpush.bf16.msrb.mxu2 %v9618_v19  ;;  %v2734_v18 = vunpack.c.h.b16 %v13796_v28  ;;  %v10899_v47 = vld [vmem:[#allocation2 + $0xd1c] sm:$0xf0] }
 0x30e   :  { %v1775_v54 = vpack.c.bf16 %v1578_v37, %v1577_v55  ;;  %1288 = vadd.xlane.f32.xlu2 %v1287_v51  ;;  %v3179_v5 = vsel %vm2972_vm6, %v3178_v59, %v3177_v53  ;;  %v3180_v15 = vperm.slane %v2733_v4, %v12377_v63  ;;  %v13855_v42 = vpack.c.bf16 %v1438_v13, %v1437_v40 }
 0x30f   :  { %15281 = vst [vmem:[#allocation23_spill] sm:$0xff] %v13844_v31  ;;  %v1597_v37 = vmul.f32 %v12267_v50, %v1160_v30  ;;  %v1202_v55 = vpop.xlane.xlu1 %1201  ;;  %v13863_v28 = vpack.c.bf16 %v1440_v3, %v1439_v43  ;;  %v1290_v13 = vsel %vm365_vm0, %v353_v60, 0.0  ;;  %v1251_v12 = vsel %vm365_vm0, %v340_v17, 0.0  ;;  %v9553_v3 = vld [vmem:[#allocation2 + $0xcc0] sm:$0xf] }
 0x310   :  { %1285 = vadd.xlane.f32.xlu1 %v1284_v9  ;;  %v2875_v46 = vunpack.c.l.b16 %v1775_v54  ;;  %v2876_v2 = vunpack.c.h.b16 %v1775_v54  ;;  %v9586_v9 = vor.u32 %v10899_v47, %v9585_v6  ;;  %v1611_v4 = vmul.f32 %v12267_v50, %v1202_v55  ;;  %v15282_v54 = vld [vmem:[#allocation77_spill] sm:$0xff]  ;;  %v9937_v43 = vld [vmem:[#allocation2 + $0xfc0] sm:$0xf]  ;;  %v15285_v47 = vld [vmem:[#allocation82_spill] sm:$0xff] }
 0x311   :  { %v1205_v23 = vpop.xlane.xlu2 %1204  ;;  %v1248_v61 = vsel %vm365_vm0, %v339_v11, 0.0  ;;  %v2735_v53 = vunpack.c.l.b16 %v13855_v42  ;;  %v1446_v19 = vmul.f32 %v12267_v50, %v15282_v54  ;;  %v9554_v11 = vor.u32 %v10891_v8, %v9553_v3  ;;  %v10987_v6 = vld [vmem:[#allocation2 + $0xfdc] sm:$0xf0] }
 0x312   :  { %1246 = vadd.xlane.f32.xlu0 %v1245_v38  ;;  %v3455_v0 = vperm.slane %v2875_v46, %v12345_v49  ;;  %v3457_v51 = vperm.slane %v2876_v2, %v12382_v10  ;;  %v1612_v40 = vmul.f32 %v12267_v50, %v1205_v23  ;;  %6915 = vmatpush.bf16.msrb.mxu2 %v9586_v9  ;;  %v15284_v2 = vld [vmem:[#allocation81_spill] sm:$0xff] }
 0x313   :  { %v1163_v56 = vpop.xlane.xlu0 %1162  ;;  %v1448_v60 = vmul.f32 %v12267_v50, %v15284_v2  ;;  %v3181_v9 = vsel %vm2976_vm7, %v3180_v15, %v3179_v5  ;;  %v9521_v15 = vld [vmem:[#allocation2 + $0xc80] sm:$0xf] }
 0x314   :  { %v3456_v38 = vsel %vm2968_vm5, %v3455_v0, %v13725_v24  ;;  %v1598_v30 = vmul.f32 %v12267_v50, %v1163_v56  ;;  %v1792_v45 = vpack.c.bf16 %v1612_v40, %v1611_v4  ;;  %v15283_v24 = vld [vmem:[#allocation78_spill] sm:$0xff]  ;;  %v1447_v0 = vmul.f32 %v12267_v50, %v15285_v47  ;;  %v10979_v2 = vld [vmem:[#allocation2 + $0xf9c] sm:$0xf0] }
 0x315   :  { %v13877_v59 = vsel %vm2972_vm6, %v3457_v51, %v3456_v38  ;;  %v1445_v46 = vmul.f32 %v12267_v50, %v15283_v24  ;;  %v9938_v51 = vor.u32 %v10987_v6, %v9937_v43  ;;  %v3182_v40 = vperm.slane %v2734_v18, %v12387_v21  ;;  %v195_v38 = vld [vmem:[%s15022_s0 + $0x4b0] sm:$0xff] }
 0x316   :  { %v1785_v17 = vpack.c.bf16 %v1598_v30, %v1597_v37  ;;  %v2909_v23 = vunpack.c.l.b16 %v1792_v45  ;;  %v2910_v55 = vunpack.c.h.b16 %v1792_v45  ;;  %1291 = vadd.xlane.f32.xlu2 %v1290_v13  ;;  %v196_v37 = vld [vmem:[%s15022_s0 + $0x4b8] sm:$0xff]  ;;  %6916 = vmatpush.bf16.msrb.mxu2 %v9554_v11  ;;  %v2737_v13 = vunpack.c.l.b16 %v13863_v28 }
 0x317   :  { %v2736_v30 = vunpack.c.h.b16 %v13855_v42  ;;  %6925 = vmatpush.bf16.msrb.mxu3 %v9938_v51  ;;  %v1709_v54 = vpack.c.bf16 %v1446_v19, %v1445_v46  ;;  %v354_v42 = vld [vmem:[%s15022_s0 + $0x9a8] sm:$0xff]  ;;  %v13905_v11 = vpack.c.bf16 %v1448_v60, %v1447_v0  ;;  %v816_v51 = vsel %vm365_vm0, %v195_v38, 0.0 }
 0x318   :  { %1252 = vadd.xlane.f32.xlu1 %v1251_v12  ;;  %v2895_v4 = vunpack.c.l.b16 %v1785_v17  ;;  %v2896_v56 = vunpack.c.h.b16 %v1785_v17  ;;  %v3521_v5 = vperm.slane %v2909_v23, %v12377_v63  ;;  %v3523_v18 = vperm.slane %v2910_v55, %v12387_v21  ;;  %v10883_v12 = vld [vmem:[#allocation2 + $0xc9c] sm:$0xf0]  ;;  %v15288_v0 = vld [vmem:[#allocation85_spill] sm:$0xff] }
 0x319   :  { %v1106_v8 = vpop.xlane.xlu2 %1105  ;;  %v13899_v43 = vpop.xlane.xlu1 %1066  ;;  %v9522_v24 = vor.u32 %v10883_v12, %v9521_v15  ;;  %v3184_v17 = vperm.slane %v2735_v53, %v12390_v29  ;;  %v819_v55 = vsel %vm365_vm0, %v196_v37, 0.0  ;;  %v15287_v53 = vld [vmem:[#allocation80_spill] sm:$0xff]  ;;  %v2743_v38 = vunpack.c.l.b16 %v1709_v54 }
 0x31a   :  { %1249 = vadd.xlane.f32.xlu0 %v1248_v61  ;;  %v9905_v61 = vld [vmem:[#allocation2 + $0xf80] sm:$0xf]  ;;  %v3494_v45 = vperm.slane %v2895_v4, %v12390_v29  ;;  %v3496_v3 = vperm.slane %v2896_v56, %v12421_v22  ;;  %v3522_v19 = vsel %vm2976_vm7, %v3521_v5, %v13826_v20  ;;  %v1449_v60 = vmul.f32 %v12267_v50, %v15287_v53 }
 0x31b   :  { %v9906_v6 = vor.u32 %v10979_v2, %v9905_v61  ;;  %v13912_v47 = vsel %vm2980_vm8, %v3523_v18, %v3522_v19  ;;  %6917 = vmatpush.bf16.msrb.mxu2 %v9522_v24  ;;  %v1450_v20 = vmul.f32 %v12267_v50, %v15288_v0  ;;  %v1293_v56 = vsel %vm365_vm0, %v354_v42, 0.0  ;;  %v9489_v5 = vld [vmem:[#allocation2 + $0xc40] sm:$0xf]  ;;  %v15290_v24 = vld [vmem:[#allocation75_spill] sm:$0xff]  ;;  %v355_v0 = vld [vmem:[%s15022_s0 + $0x9b0] sm:$0xff] }
 0x31c   :  { %15286 = vst [vmem:[#allocation24_spill] sm:$0xff] %v13912_v47  ;;  %v3495_v23 = vsel %vm2984_vm9, %v3494_v45, %v13783_v48  ;;  %v10875_v18 = vld [vmem:[#allocation2 + $0xc5c] sm:$0xf0]  ;;  %v15289_v48 = vld [vmem:[#allocation59_spill] sm:$0xff]  ;;  %v2744_v15 = vunpack.c.h.b16 %v1709_v54  ;;  %v1442_v2 = vmul.f32 %v12267_v50, %v15290_v24  ;;  %v13937_v53 = vperm.slane %v2737_v13, %v12445_v1 }
 0x31d   :  { %v13909_v46 = vpop.xlane.xlu0 %1063  ;;  %v13923_v4 = vsel %vm2988_vm10, %v3496_v3, %v3495_v23  ;;  %6926 = vmatpush.bf16.msrb.mxu3 %v9906_v6  ;;  %v13928_v37 = vmul.f32 %v12267_v50, %v15289_v48  ;;  %v9490_v12 = vor.u32 %v10875_v18, %v9489_v5  ;;  %v9873_v61 = vld [vmem:[#allocation2 + $0xf40] sm:$0xf]  ;;  %v3183_v6 = vsel %vm2980_vm8, %v3182_v40, %v3181_v9  ;;  %v8147_v23 = vld [vmem:[#allocation2 + $0x1e0] sm:$0xf0] }
 0x31e   :  { %v10971_v45 = vld [vmem:[#allocation2 + $0xf5c] sm:$0xf0]  ;;  %820 = vadd.xlane.f32.xlu2 %v819_v55  ;;  %v2745_v54 = vunpack.c.l.b16 %v13905_v11  ;;  %v342_v55 = vld [vmem:[%s15022_s0 + $0x948] sm:$0xff]  ;;  %v3185_v40 = vsel %vm2984_vm9, %v3184_v17, %v3183_v6  ;;  %v3186_v13 = vperm.slane %v2736_v30, %v12421_v22  ;;  %v13955_v5 = vpack.c.bf16 %v1450_v20, %v1449_v60 }
 0x31f   :  { %v15291_v19 = vld [vmem:[#allocation76_spill] sm:$0xff]  ;;  %v9874_v42 = vor.u32 %v10971_v45, %v9873_v61  ;;  %6918 = vmatpush.bf16.msrb.mxu2 %v9490_v12  ;;  %v3200_v45 = vperm.slane %v2743_v38, %v12290_v34  ;;  %v3201_v24 = vperm.slane %v2744_v15, %v12298_v44  ;;  %v1579_v12 = vmul.f32 %v12267_v50, %v1106_v8 }
 0x320   :  { %v1441_v3 = vmul.f32 %v12267_v50, %v15291_v19  ;;  %817 = vadd.xlane.f32.xlu1 %v816_v51  ;;  %v341_v9 = vld [vmem:[%s15022_s0 + $0x940] sm:$0xff]  ;;  %v15292_v51 = vld [vmem:[#allocation74_spill] sm:$0xff]  ;;  %v2746_v20 = vunpack.c.h.b16 %v13905_v11  ;;  %v3203_v38 = vperm.slane %v2745_v54, %v12318_v39  ;;  %v1296_v8 = vsel %vm365_vm0, %v355_v0, 0.0 }
 0x321   :  { %6927 = vmatpush.bf16.msrb.mxu3 %v9874_v42  ;;  %v9457_v18 = vld [vmem:[#allocation2 + $0xc00] sm:$0xf]  ;;  %v13960_v19 = vpop.xlane.xlu2 %1168  ;;  %v1257_v26 = vsel %vm365_vm0, %v342_v55, 0.0  ;;  %v2747_v11 = vunpack.c.l.b16 %v13955_v5  ;;  %v3202_v0 = vsel %vm2956_vm2, %v3201_v24, %v3200_v45  ;;  %v198_v24 = vld [vmem:[%s15022_s0 + $0x4c8] sm:$0xff] }
 0x322   :  { %1294 = vadd.xlane.f32.xlu0 %v1293_v56  ;;  %v13953_v56 = vmul.f32 %v12267_v50, %v15292_v51  ;;  %v10867_v48 = vld [vmem:[#allocation2 + $0xc1c] sm:$0xf0]  ;;  %v10535_v51 = vld [vmem:[#allocation2 + $0x1c4] sm:$0xf]  ;;  %v13964_v60 = vpack.c.bf16 %v1442_v2, %v1441_v3  ;;  %v1254_v3 = vsel %vm365_vm0, %v341_v9, 0.0 }
 0x323   :  { %v9841_v61 = vld [vmem:[#allocation2 + $0xf00] sm:$0xf]  ;;  %v13962_v17 = vpop.xlane.xlu1 %1165  ;;  %v9458_v30 = vor.u32 %v10867_v48, %v9457_v18  ;;  %v8150_v25 = vor.u32 %v10535_v51, %v8147_v23  ;;  %v15293_v18 = vld [vmem:[#allocation83_spill] sm:$0xff]  ;;  %v2748_v51 = vunpack.c.h.b16 %v13955_v5  ;;  %v8115_v9 = vld [vmem:[#allocation2 + $0x1a0] sm:$0xf0] }
 0x324   :  { %v10963_v6 = vld [vmem:[#allocation2 + $0xf1c] sm:$0xf0]  ;;  %v1452_v48 = vmul.f32 %v12267_v50, %v15293_v18 }
 0x325   :  { %v1109_v42 = vpop.xlane.xlu0 %1108  ;;  %v9842_v7 = vor.u32 %v10963_v6, %v9841_v61  ;;  %6919 = vmatpush.bf16.msrb.mxu2 %v9458_v30  ;;  %v15294_v44 = vld [vmem:[#allocation84_spill] sm:$0xff]  ;;  %v13978_v61 = vsel %vm2988_vm10, %v3186_v13, %v3185_v40  ;;  %v3205_v6 = vperm.slane %v2746_v20, %v12335_v52  ;;  %v3204_v40 = vsel %vm2960_vm3, %v3203_v38, %v3202_v0  ;;  %v15297_v0 = vld [vmem:[#allocation79_spill] sm:$0xff] }
 0x326   :  { %v1580_v15 = vmul.f32 %v12267_v50, %v1109_v42  ;;  %v1451_v2 = vmul.f32 %v12267_v50, %v15294_v44  ;;  %v9809_v23 = vld [vmem:[#allocation2 + $0xec0] sm:$0xf]  ;;  %v15295_v44 = vld [vmem:[#allocation87_spill] sm:$0xff]  ;;  %1297 = vadd.xlane.f32.xlu2 %v1296_v8 }
 0x327   :  { %6928 = vmatpush.bf16.msrb.mxu3 %v9842_v7  ;;  %v10955_v54 = vld [vmem:[#allocation2 + $0xedc] sm:$0xf0]  ;;  %v1454_v42 = vmul.f32 %v12267_v50, %v15295_v44 }
 0x328   :  { %v1776_v55 = vpack.c.bf16 %v1580_v15, %v1579_v12  ;;  %v9810_v30 = vor.u32 %v10955_v54, %v9809_v23  ;;  %v15296_v18 = vld [vmem:[#allocation88_spill] sm:$0xff]  ;;  %1258 = vadd.xlane.f32.xlu1 %v1257_v26  ;;  %v2739_v15 = vunpack.c.l.b16 %v13964_v60  ;;  %v13992_v23 = vpack.c.bf16 %v1452_v48, %v1451_v2  ;;  %v356_v2 = vld [vmem:[%s15022_s0 + $0x9b8] sm:$0xff] }
 0x329   :  { %6964 = vmatpush.bf16.msra.mxu2 %v8150_v25  ;;  %v1453_v7 = vmul.f32 %v12267_v50, %v15296_v18  ;;  %v10527_v25 = vld [vmem:[#allocation2 + $0x184] sm:$0xf]  ;;  %v9169_v12 = vld [vmem:[#allocation2 + $0x9c0] sm:$0xf]  ;;  %v3207_v26 = vperm.slane %v2747_v11, %v12345_v49 }
 0x32a   :  { %v2877_v13 = vunpack.c.l.b16 %v1776_v55  ;;  %v2878_v45 = vunpack.c.h.b16 %v1776_v55  ;;  %1255 = vadd.xlane.f32.xlu0 %v1254_v3  ;;  %v8118_v5 = vor.u32 %v10527_v25, %v8115_v9  ;;  %v10795_v20 = vld [vmem:[#allocation2 + $0x9dc] sm:$0xf0]  ;;  %v1444_v55 = vmul.f32 %v12267_v50, %v15297_v0  ;;  %v14002_v25 = vpop.xlane.xlu2 %1069  ;;  %v8083_v9 = vld [vmem:[#allocation2 + $0x160] sm:$0xf0] }
 0x32b   :  { %v197_v38 = vld [vmem:[%s15022_s0 + $0x4c0] sm:$0xff]  ;;  %6929 = vmatpush.bf16.msrb.mxu3 %v9810_v30  ;;  %v9170_v8 = vor.u32 %v10795_v20, %v9169_v12  ;;  %v14004_v48 = vpop.xlane.xlu1 %1210  ;;  %v3206_v12 = vsel %vm15256_vm4, %v3205_v6, %v3204_v40  ;;  %v3209_v20 = vperm.slane %v2748_v51, %v12382_v10  ;;  %v14011_v0 = vpack.c.bf16 %v1454_v42, %v1453_v7 }
 0x32c   :  { %v9777_v3 = vld [vmem:[#allocation2 + $0xe80] sm:$0xf]  ;;  %v3459_v44 = vperm.slane %v2877_v13, %v12377_v63  ;;  %v3461_v18 = vperm.slane %v2878_v45, %v12387_v21  ;;  %v10519_v30 = vld [vmem:[#allocation2 + $0x144] sm:$0xf]  ;;  %v2749_v6 = vunpack.c.l.b16 %v13992_v23  ;;  %v3208_v51 = vsel %vm2968_vm5, %v3207_v26, %v3206_v12  ;;  %v344_v12 = vld [vmem:[%s15022_s0 + $0x958] sm:$0xff] }
 0x32d   :  { %v10947_v54 = vld [vmem:[#allocation2 + $0xe9c] sm:$0xf0]  ;;  %6965 = vmatpush.bf16.msra.mxu2 %v8118_v5  ;;  %v14013_v13 = vpop.xlane.xlu0 %1207  ;;  %6886 = vmatpush.bf16.msrb.mxu0 %v9170_v8  ;;  %v8086_v45 = vor.u32 %v10519_v30, %v8083_v9  ;;  %v825_v5 = vsel %vm365_vm0, %v198_v24, 0.0  ;;  %v1299_v7 = vsel %vm365_vm0, %v356_v2, 0.0  ;;  %v2750_v30 = vunpack.c.h.b16 %v13992_v23  ;;  %v10599_v10 = vld [vmem:[#allocation2 + $0x3c4] sm:$0xf] }
 0x32e   :  { %v9778_v11 = vor.u32 %v10947_v54, %v9777_v3  ;;  %v9137_v49 = vld [vmem:[#allocation2 + $0x980] sm:$0xf]  ;;  %v3460_v34 = vsel %vm2976_vm7, %v3459_v44, %v13877_v59  ;;  %v822_v3 = vsel %vm365_vm0, %v197_v38, 0.0  ;;  %v15299_v59 = vld [vmem:[#allocation86_spill] sm:$0xff]  ;;  %v15300_v44 = vld [vmem:[#allocation91_spill] sm:$0xff]  ;;  %v15303_v2 = vunpack.c.h.b16 %v13863_v28  ;;  %826 = vadd.xlane.f32.xlu2 %v825_v5 }
 0x32f   :  { %v10787_v52 = vld [vmem:[#allocation2 + $0x99c] sm:$0xf0]  ;;  %v14022_v42 = vsel %vm2980_vm8, %v3461_v18, %v3460_v34  ;;  %v1455_v24 = vmul.f32 %v12267_v50, %v15299_v59  ;;  %v15302_v34 = vld [vmem:[#allocation61_spill] sm:$0xff]  ;;  %v2751_v23 = vunpack.c.l.b16 %v14011_v0  ;;  %v2740_v28 = vunpack.c.h.b16 %v13964_v60 }
 0x330   :  { %v9138_v54 = vor.u32 %v10787_v52, %v9137_v49  ;;  %15298 = vst [vmem:[#allocation25_spill] sm:$0xff] %v14022_v42  ;;  %6930 = vmatpush.bf16.msrb.mxu3 %v9778_v11  ;;  %v9745_v40 = vld [vmem:[#allocation2 + $0xe40] sm:$0xf]  ;;  %v1456_v52 = vmul.f32 %v12267_v50, %v15300_v44  ;;  %v1426_v18 = vmul.f32 %v12267_v50, %v15302_v34  ;;  %vm15311_vm4 = vcmask 1041409  }
 0x331   :  { %v10939_v8 = vld [vmem:[#allocation2 + $0xe5c] sm:$0xf0]  ;;  %6966 = vmatpush.bf16.msra.mxu2 %v8086_v45  ;;  %v3190_v11 = vperm.slane %v15303_v2, %v12456_v32  ;;  %823 = vadd.xlane.f32.xlu1 %v822_v3  ;;  %v10511_v45 = vld [vmem:[#allocation2 + $0x104] sm:$0xf]  ;;  %v3210_v5 = vsel %vm2972_vm6, %v3209_v20, %v3208_v51  ;;  %v3211_v34 = vperm.slane %v2749_v6, %v12377_v63 }
 0x332   :  { %v9746_v49 = vor.u32 %v10939_v8, %v9745_v40  ;;  %v15301_v38 = vld [vmem:[#allocation60_spill] sm:$0xff]  ;;  %v3189_v40 = vsel %vm2992_vm11, %v13937_v53, %v13978_v61  ;;  %v3192_v8 = vperm.slane %v2739_v15, %v15234_v58  ;;  %1300 = vadd.xlane.f32.xlu0 %v1299_v7  ;;  %6887 = vmatpush.bf16.msrb.mxu0 %v9138_v54  ;;  %v343_v53 = vld [vmem:[%s15022_s0 + $0x950] sm:$0xff]  ;;  %v2752_v54 = vunpack.c.h.b16 %v14011_v0  ;;  %v14063_v7 = vpop.xlane.xlu2 %1114 }
 0x333   :  { %v14032_v26 = vmul.f32 %v12267_v50, %v15301_v38  ;;  %v357_v9 = vld [vmem:[%s15022_s0 + $0x9c0] sm:$0xff]  ;;  %v14053_v38 = vpack.c.bf16 %v1444_v55, %v13953_v56  ;;  %v3213_v20 = vperm.slane %v2750_v30, %v12387_v21  ;;  %v14061_v51 = vpack.c.bf16 %v1456_v52, %v1455_v24  ;;  %v14065_v56 = vpop.xlane.xlu1 %1111  ;;  %v15305_v30 = vld [vmem:[#allocation90_spill] sm:$0xff] }
 0x334   :  { %v8051_v3 = vld [vmem:[#allocation2 + $0x120] sm:$0xf0]  ;;  %v9105_v59 = vld [vmem:[#allocation2 + $0x940] sm:$0xf]  ;;  %6931 = vmatpush.bf16.msrb.mxu3 %v9746_v49  ;;  %v3212_v49 = vsel %vm2976_vm7, %v3211_v34, %v3210_v5  ;;  %v1457_v0 = vmul.f32 %v12267_v50, %v15305_v30  ;;  %v14075_v52 = vpop.f32.mrf.mxu2  ;;  %v1302_v21 = vsel %vm365_vm0, %v357_v9, 0.0  ;;  %v1263_v5 = vsel %vm365_vm0, %v344_v12, 0.0 }
 0x335   :  { %v10779_v44 = vld [vmem:[#allocation2 + $0x95c] sm:$0xf0]  ;;  %v8054_v60 = vor.u32 %v10511_v45, %v8051_v3  ;;  %v10503_v6 = vld [vmem:[#allocation2 + $0xc4] sm:$0xf]  ;;  %v3215_v45 = vperm.slane %v2751_v23, %v12390_v29  ;;  %v15304_v3 = vld [vmem:[#allocation89_spill] sm:$0xff]  ;;  %v14073_v24 = vpop.xlane.xlu0 %1072  ;;  %v14083_v30 = vpack.c.bf16 %v1426_v18, %v13751_v27  ;;  %v3191_v39 = vsel %vm2996_vm12, %v3190_v11, %v3189_v40 }
 0x336   :  { %v9106_v61 = vor.u32 %v10779_v44, %v9105_v59  ;;  %v9713_v15 = vld [vmem:[#allocation2 + $0xe00] sm:$0xf]  ;;  %v8019_v63 = vld [vmem:[#allocation2 + $0xe0] sm:$0xf0]  ;;  %v1458_v59 = vmul.f32 %v12267_v50, %v15304_v3  ;;  %v200_v23 = vld [vmem:[%s15022_s0 + $0x4d8] sm:$0xff]  ;;  %v2741_v41 = vunpack.c.l.b16 %v14053_v38  ;;  %v3214_v31 = vsel %vm2980_vm8, %v3213_v20, %v3212_v49  ;;  %1303 = vadd.xlane.f32.xlu2 %v1302_v21 }
 0x337   :  { %v10931_v2 = vld [vmem:[#allocation2 + $0xe1c] sm:$0xf0]  ;;  %6967 = vmatpush.bf16.msra.mxu2 %v8054_v60  ;;  %v8403_v44 = vld [vmem:[#allocation2 + $0x3e0] sm:$0xf0]  ;;  %v8022_v34 = vor.u32 %v10503_v6, %v8019_v63  ;;  %v1260_v60 = vsel %vm365_vm0, %v343_v53, 0.0  ;;  %v199_v9 = vld [vmem:[%s15022_s0 + $0x4d0] sm:$0xff]  ;;  %v3217_v63 = vperm.slane %v2752_v54, %v12421_v22  ;;  %v3216_v27 = vsel %vm2984_vm9, %v3215_v45, %v3214_v31 }
 0x338   :  { %v9714_v55 = vor.u32 %v10931_v2, %v9713_v15  ;;  %v9073_v15 = vld [vmem:[#allocation2 + $0x900] sm:$0xf]  ;;  %6888 = vmatpush.bf16.msrb.mxu0 %v9106_v61  ;;  %v8406_v3 = vor.u32 %v10599_v10, %v8403_v44  ;;  %v2753_v10 = vunpack.c.l.b16 %v14061_v51  ;;  %v14095_v18 = vpack.c.bf16 %v1458_v59, %v1457_v0  ;;  %v10495_v53 = vld [vmem:[#allocation2 + $0x84] sm:$0xf]  ;;  %v358_v31 = vld [vmem:[%s15022_s0 + $0x9c8] sm:$0xff] }
 0x339   :  { %v10771_v2 = vld [vmem:[#allocation2 + $0x91c] sm:$0xf0]  ;;  %v2754_v11 = vunpack.c.h.b16 %v14061_v51  ;;  %1264 = vadd.xlane.f32.xlu1 %v1263_v5  ;;  %v831_v40 = vsel %vm365_vm0, %v200_v23, 0.0  ;;  %v7987_v61 = vld [vmem:[#allocation2 + $0xa0] sm:$0xf0]  ;;  %v3194_v20 = vperm.slane %v2740_v28, %v15217_v14  ;;  %v828_v54 = vsel %vm365_vm0, %v199_v9, 0.0 }
 0x33a   :  { %6932 = vmatpush.bf16.msrb.mxu3 %v9714_v55  ;;  %v9074_v12 = vor.u32 %v10771_v2, %v9073_v15  ;;  %v3193_v55 = vsel %vm3000_vm13, %v3192_v8, %v3191_v39  ;;  %1261 = vadd.xlane.f32.xlu0 %v1260_v60  ;;  %v7990_v6 = vor.u32 %v10495_v53, %v7987_v61  ;;  %v10591_v51 = vld [vmem:[#allocation2 + $0x384] sm:$0xf]  ;;  %v2742_v49 = vunpack.c.h.b16 %v14053_v38  ;;  %v9041_v8 = vld [vmem:[#allocation2 + $0x8c0] sm:$0xf]  ;;  %v14113_v5 = vpop.xlane.xlu2 %1213  ;;  %v15306_v9 = vld [vmem:[#allocation93_spill] sm:$0xff] }
 0x33b   :  { %6968 = vmatpush.bf16.msra.mxu2 %v8022_v34  ;;  %v8371_v21 = vld [vmem:[#allocation2 + $0x3a0] sm:$0xf0]  ;;  %v1566_v45 = vmul.f32 %v12267_v50, %v13899_v43  ;;  %v1565_v39 = vmul.f32 %v12267_v50, %v13909_v46  ;;  %v10763_v59 = vld [vmem:[#allocation2 + $0x8dc] sm:$0xf0]  ;;  %v3196_v44 = vperm.slane %v2741_v41, %v12583_v57  ;;  %v3218_v15 = vsel %vm2988_vm10, %v3217_v63, %v3216_v27  ;;  %v14115_v38 = vpop.xlane.xlu1 %1174  ;;  %v359_v43 = vld [vmem:[%s15022_s0 + $0x9d0] sm:$0xff] }
 0x33c   :  { %6889 = vmatpush.bf16.msrb.mxu0 %v9074_v12  ;;  %v8374_v28 = vor.u32 %v10591_v51, %v8371_v21  ;;  %v9425_v0 = vld [vmem:[#allocation2 + $0xbc0] sm:$0xf]  ;;  %v3219_v2 = vperm.slane %v2753_v10, %v12445_v1  ;;  %v9042_v46 = vor.u32 %v10763_v59, %v9041_v8  ;;  %v10487_v34 = vld [vmem:[#allocation2 + $0x44] sm:$0xf]  ;;  %v2755_v60 = vunpack.c.l.b16 %v14095_v18  ;;  %v6871_v10 = vpop.f32.mrf.mxu2  ;;  %v15307_v21 = vld [vmem:[#allocation94_spill] sm:$0xff] }
 0x33d   :  { %v10859_v23 = vld [vmem:[#allocation2 + $0xbdc] sm:$0xf0]  ;;  %v3221_v41 = vperm.slane %v2754_v11, %v12456_v32  ;;  %v1460_v12 = vmul.f32 %v12267_v50, %v15306_v9  ;;  %v14124_v63 = vpop.xlane.xlu0 %1171  ;;  %v10583_v53 = vld [vmem:[#allocation2 + $0x344] sm:$0xf]  ;;  %v1459_v8 = vmul.f32 %v12267_v50, %v15307_v21  ;;  %v1600_v59 = vmul.f32 %v12267_v50, %v13960_v19 }
 0x33e   :  { %6977 = vmatpush.bf16.msra.mxu3 %v8406_v3  ;;  %v7955_v3 = vld [vmem:[#allocation2 + $0x60] sm:$0xf0]  ;;  %v9426_v27 = vor.u32 %v10859_v23, %v9425_v0  ;;  %v9009_v51 = vld [vmem:[#allocation2 + $0x880] sm:$0xf]  ;;  %v1599_v11 = vmul.f32 %v12267_v50, %v13962_v17  ;;  %v14132_v10 = vpack.c.bf16 %v1566_v45, %v1565_v39  ;;  %v14138_v19 = vsel %vm2992_vm11, %v13841_v62, %v13832_v36  ;;  %v346_v36 = vld [vmem:[%s15022_s0 + $0x968] sm:$0xff] }
 0x33f   :  { %v8339_v61 = vld [vmem:[#allocation2 + $0x360] sm:$0xf0]  ;;  %6969 = vmatpush.bf16.msra.mxu2 %v7990_v6  ;;  %v7958_v16 = vor.u32 %v10487_v34, %v7955_v3  ;;  %v10755_v9 = vld [vmem:[#allocation2 + $0x89c] sm:$0xf0]  ;;  %v3195_v17 = vsel %vm3004_vm14, %v3194_v20, %v3193_v55  ;;  %v3220_v6 = vsel %vm2992_vm11, %v3219_v2, %v3218_v15  ;;  %v2723_v45 = vunpack.c.l.b16 %v14083_v30  ;;  %832 = vadd.xlane.f32.xlu2 %v831_v40 }
 0x340   :  { %v9393_v42 = vld [vmem:[#allocation2 + $0xb80] sm:$0xf]  ;;  %6890 = vmatpush.bf16.msrb.mxu0 %v9042_v46  ;;  %6899 = vmatpush.bf16.msrb.mxu1 %v9426_v27  ;;  %v8342_v0 = vor.u32 %v10583_v53, %v8339_v61  ;;  %v9010_v23 = vor.u32 %v10755_v9, %v9009_v51  ;;  %v14142_v34 = vpop.f32.mrf.mxu0  ;;  %v3198_v39 = vperm.slane %v2742_v49, %v12586_v35  ;;  %v14148_v46 = vsel %vm365_vm0, %v359_v43, 0.0  ;;  %v10479_v62 = vld [vmem:[#allocation2 + $0x4] sm:$0xf] }
 0x341   :  { %v10851_v47 = vld [vmem:[#allocation2 + $0xb9c] sm:$0xf0]  ;;  %829 = vadd.xlane.f32.xlu1 %v828_v54  ;;  %v2756_v55 = vunpack.c.h.b16 %v14095_v18  ;;  %v14157_v20 = vpack.c.bf16 %v1600_v59, %v1599_v11  ;;  %v7923_v40 = vld [vmem:[#allocation2 + $0x20] sm:$0xf0]  ;;  %v2863_v15 = vunpack.c.l.b16 %v14132_v10  ;;  %v14175_v59 = vpack.c.bf16 %v13928_v37, %v14032_v26 }
 0x342   :  { %6978 = vmatpush.bf16.msra.mxu3 %v8374_v28  ;;  %v1305_v28 = vsel %vm365_vm0, %v358_v31, 0.0  ;;  %v9394_v3 = vor.u32 %v10851_v47, %v9393_v42  ;;  %v3197_v31 = vsel %vm3008_vm15, %v3196_v44, %v3195_v17  ;;  %v3223_v47 = vperm.slane %v2755_v60, %v15234_v58  ;;  %v10575_v54 = vld [vmem:[#allocation2 + $0x304] sm:$0xf]  ;;  %v8977_v18 = vld [vmem:[#allocation2 + $0x840] sm:$0xf]  ;;  %v14165_v53 = vpop.xlane.xlu2 %1078 }
 0x343   :  { %v14155_v42 = vpack.c.bf16 %v1460_v12, %v1459_v8  ;;  %1306 = vadd.xlane.f32.xlu0 %v1305_v28  ;;  %6970 = vmatpush.bf16.msra.mxu2 %v7958_v16  ;;  %v8307_v49 = vld [vmem:[#allocation2 + $0x320] sm:$0xf0]  ;;  %v3222_v44 = vsel %vm2996_vm12, %v3221_v41, %v3220_v6  ;;  %v7926_v2 = vor.u32 %v10479_v62, %v7923_v40  ;;  %v10747_v27 = vld [vmem:[#allocation2 + $0x85c] sm:$0xf0]  ;;  %v14167_v61 = vpop.xlane.xlu1 %1075  ;;  %v1269_v41 = vsel %vm365_vm0, %v346_v36, 0.0 }
 0x344   :  { %6891 = vmatpush.bf16.msrb.mxu0 %v9010_v23  ;;  %v8310_v43 = vor.u32 %v10575_v54, %v8307_v49  ;;  %v9361_v60 = vld [vmem:[#allocation2 + $0xb40] sm:$0xf]  ;;  %v1614_v12 = vmul.f32 %v12267_v50, %v14004_v48  ;;  %v1613_v16 = vmul.f32 %v12267_v50, %v14013_v13  ;;  %6900 = vmatpush.bf16.msrb.mxu1 %v9394_v3  ;;  %v10567_v28 = vld [vmem:[#allocation2 + $0x2c4] sm:$0xf]  ;;  %v2897_v37 = vunpack.c.l.b16 %v14157_v20 }
 0x345   :  { %v345_v51 = vld [vmem:[%s15022_s0 + $0x960] sm:$0xff]  ;;  %v8978_v21 = vor.u32 %v10747_v27, %v8977_v18  ;;  %v14178_v48 = vperm.slane %v2723_v45, %v15234_v58  ;;  %v14181_v13 = vsel %vm3012_vm1, %v3198_v39, %v3197_v31  ;;  %v14183_v11 = vpop.xlane.xlu0 %1216  ;;  %v3224_v17 = vsel %vm3000_vm13, %v3223_v47, %v3222_v44 }
 0x346   :  { %6979 = vmatpush.bf16.msra.mxu3 %v8342_v0  ;;  %v10843_v8 = vld [vmem:[#allocation2 + $0xb5c] sm:$0xf0]  ;;  %v8275_v0 = vld [vmem:[#allocation2 + $0x2e0] sm:$0xf0]  ;;  %v2757_v6 = vunpack.c.l.b16 %v14155_v42  ;;  %v2758_v3 = vunpack.c.h.b16 %v14155_v42  ;;  %v3225_v31 = vperm.slane %v2756_v55, %v15217_v14  ;;  %v1266_v62 = vsel %vm365_vm0, %v345_v51, 0.0 }
 0x347   :  { %v9362_v9 = vor.u32 %v10843_v8, %v9361_v60  ;;  %v8945_v23 = vld [vmem:[#allocation2 + $0x800] sm:$0xf]  ;;  %6971 = vmatpush.bf16.msra.mxu2 %v7926_v2  ;;  %v8278_v40 = vor.u32 %v10567_v28, %v8275_v0  ;;  %v2864_v47 = vunpack.c.h.b16 %v14132_v10  ;;  %v3432_v49 = vperm.slane %v2863_v15, %v12390_v29  ;;  %v10559_v18 = vld [vmem:[#allocation2 + $0x284] sm:$0xf]  ;;  %1309 = vadd.xlane.f32.xlu2 %v14148_v46 }
 0x348   :  { %v10739_v26 = vld [vmem:[#allocation2 + $0x81c] sm:$0xf0]  ;;  %6892 = vmatpush.bf16.msrb.mxu0 %v8978_v21  ;;  %v14193_v42 = vpack.c.bf16 %v1614_v12, %v1613_v16  ;;  %v6845_v44 = vpop.f32.mrf.mxu0  ;;  %v3226_v27 = vsel %vm3004_vm14, %v3225_v31, %v3224_v17  ;;  %v2898_v55 = vunpack.c.h.b16 %v14157_v20  ;;  %v1601_v60 = vmul.f32 %v12267_v50, %v14124_v63  ;;  %v8243_v10 = vld [vmem:[#allocation2 + $0x2a0] sm:$0xf0]  ;;  %v360_v17 = vld [vmem:[%s15022_s0 + $0x9d8] sm:$0xff] }
 0x349   :  { %v9329_v45 = vld [vmem:[#allocation2 + $0xb00] sm:$0xf]  ;;  %v8946_v54 = vor.u32 %v10739_v26, %v8945_v23  ;;  %6901 = vmatpush.bf16.msrb.mxu1 %v9362_v9  ;;  %1270 = vadd.xlane.f32.xlu1 %v1269_v41  ;;  %v3227_v12 = vperm.slane %v2757_v6, %v12583_v57  ;;  %v14204_v16 = vperm.slane %v2758_v3, %v12586_v35  ;;  %v202_v41 = vld [vmem:[%s15022_s0 + $0x4e8] sm:$0xff]  ;;  %v10551_v3 = vld [vmem:[#allocation2 + $0x244] sm:$0xf] }
 0x34a   :  { %v10835_v36 = vld [vmem:[#allocation2 + $0xb1c] sm:$0xf0]  ;;  %6980 = vmatpush.bf16.msra.mxu3 %v8310_v43  ;;  %v1602_v43 = vmul.f32 %v12267_v50, %v14115_v38  ;;  %v3498_v51 = vperm.slane %v2897_v37, %v12445_v1  ;;  %v2724_v38 = vunpack.c.h.b16 %v14083_v30  ;;  %v1567_v63 = vmul.f32 %v12267_v50, %v14002_v25  ;;  %v1178_v23 = vpop.xlane.xlu2 %1177  ;;  %v8211_v37 = vld [vmem:[#allocation2 + $0x260] sm:$0xf0] }
 0x34b   :  { %v2453_v39 = vld [vmem:[#allocation5] sm:$0xff]  ;;  %v9330_v2 = vor.u32 %v10835_v36, %v9329_v45  ;;  %1267 = vadd.xlane.f32.xlu0 %v1266_v62  ;;  %v1568_v46 = vmul.f32 %v12267_v50, %v14073_v24  ;;  %v8246_v9 = vor.u32 %v10559_v18, %v8243_v10  ;;  %v3433_v28 = vsel %vm2984_vm9, %v3432_v49, %v13816_v33  ;;  %v14222_v24 = vpop.xlane.xlu1 %1120 }
 0x34c   :  { %v9297_v15 = vld [vmem:[#allocation2 + $0xac0] sm:$0xf]  ;;  %v2455_v21 = vperm.slane %v2453_v39, 0  ;;  %6893 = vmatpush.bf16.msrb.mxu0 %v8946_v54  ;;  %v3434_v0 = vperm.slane %v2864_v47, %v12421_v22  ;;  %v2911_v25 = vunpack.c.l.b16 %v14193_v42  ;;  %v3500_v26 = vperm.slane %v2898_v55, %v12456_v32  ;;  %v10543_v10 = vld [vmem:[#allocation2 + $0x204] sm:$0xf] }
 0x34d   :  { %v10827_v20 = vld [vmem:[#allocation2 + $0xadc] sm:$0xf0]  ;;  %6902 = vmatpush.bf16.msrb.mxu1 %v9330_v2  ;;  %v1582_v33 = vmul.f32 %v12267_v50, %v14063_v7  ;;  %v1581_v45 = vmul.f32 %v12267_v50, %v14065_v56  ;;  %v14232_v36 = vpack.c.bf16 %v1602_v43, %v1601_v60  ;;  %v14234_v31 = vpop.xlane.xlu0 %1117  ;;  %v6882_v47 = vpop.f32.mrf.mxu3  ;;  %v837_v49 = vsel %vm365_vm0, %v202_v41, 0.0 }
 0x34e   :  { %v201_v8 = vld [vmem:[%s15022_s0 + $0x4e0] sm:$0xff]  ;;  %6981 = vmatpush.bf16.msra.mxu3 %v8278_v40  ;;  %v9298_v6 = vor.u32 %v10827_v20, %v9297_v15  ;;  %v2912_v40 = vunpack.c.h.b16 %v14193_v42  ;;  %v6844_v54 = vadd.f32 %v14142_v34, %v2455_v21  ;;  %v3499_v7 = vsel %vm2992_vm11, %v3498_v51, %v13923_v4  ;;  %v6856_v56 = vpop.f32.mrf.mxu1 }
 0x34f   :  { %v9265_v39 = vld [vmem:[#allocation2 + $0xa80] sm:$0xf]  ;;  %v834_v44 = vsel %vm365_vm0, %v201_v8, 0.0  ;;  %v14242_v2 = vpack.c.bf16 %v1568_v46, %v1567_v63  ;;  %v1311_v18 = vsel %vm365_vm0, %v360_v17, 0.0  ;;  %v8214_v55 = vor.u32 %v10551_v3, %v8211_v37  ;;  %v8179_v15 = vld [vmem:[#allocation2 + $0x220] sm:$0xf0]  ;;  %838 = vadd.xlane.f32.xlu2 %v837_v49 }
 0x350   :  { %v10819_v62 = vld [vmem:[#allocation2 + $0xa9c] sm:$0xf0]  ;;  %v14246_v43 = vsel %vm3008_vm15, %v3227_v12, %v3226_v27  ;;  %v3525_v34 = vperm.slane %v2911_v25, %v12390_v29  ;;  %v6857_v42 = vadd.f32 %v6856_v56, %v6844_v54  ;;  %v1777_v21 = vpack.c.bf16 %v1582_v33, %v1581_v45 }
 0x351   :  { %6903 = vmatpush.bf16.msrb.mxu1 %v9298_v6  ;;  %v9266_v60 = vor.u32 %v10819_v62, %v9265_v39  ;;  %v2899_v4 = vunpack.c.l.b16 %v14232_v36  ;;  %v1570_v51 = vmul.f32 %v12267_v50, %v14165_v53  ;;  %v1569_v20 = vmul.f32 %v12267_v50, %v14167_v61  ;;  %835 = vadd.xlane.f32.xlu1 %v834_v44  ;;  %v9233_v27 = vld [vmem:[#allocation2 + $0xa40] sm:$0xf] }
 0x352   :  { %6982 = vmatpush.bf16.msra.mxu3 %v8246_v9  ;;  %v10811_v12 = vld [vmem:[#allocation2 + $0xa5c] sm:$0xf0]  ;;  %v3435_v63 = vsel %vm2988_vm10, %v3434_v0, %v3433_v28  ;;  %v3501_v46 = vsel %vm2996_vm12, %v3500_v26, %v3499_v7  ;;  %v3527_v41 = vperm.slane %v2912_v40, %v12421_v22  ;;  %v6870_v8 = vadd.f32 %v14075_v52, %v6857_v42  ;;  %v348_v28 = vld [vmem:[%s15022_s0 + $0x978] sm:$0xff]  ;;  %v1223_v6 = vpop.xlane.xlu2 %1222 }
 0x353   :  { %1312 = vadd.xlane.f32.xlu0 %v1311_v18  ;;  %v2865_v9 = vunpack.c.l.b16 %v14242_v2  ;;  %v1615_v53 = vmul.f32 %v12267_v50, %v14113_v5  ;;  %v1616_v61 = vmul.f32 %v12267_v50, %v14183_v11  ;;  %v361_v25 = vld [vmem:[%s15022_s0 + $0x9e0] sm:$0xff]  ;;  %v8182_v0 = vor.u32 %v10543_v10, %v8179_v15  ;;  %v1220_v3 = vpop.xlane.xlu1 %1219  ;;  %v347_v5 = vld [vmem:[%s15022_s0 + $0x970] sm:$0xff] }
 0x354   :  { %v2900_v52 = vunpack.c.h.b16 %v14232_v36  ;;  %v1603_v17 = vmul.f32 %v12267_v50, %v1178_v23  ;;  %v9234_v11 = vor.u32 %v10811_v12, %v9233_v27  ;;  %v14274_v37 = vadd.f32 %v6882_v47, %v6870_v8  ;;  %v15309_v26 = vld [vmem:[#allocation24_spill] sm:$0xff]  ;;  %v203_v12 = vld [vmem:[%s15022_s0 + $0x4f0] sm:$0xff] }
 0x355   :  { %6904 = vmatpush.bf16.msrb.mxu1 %v9266_v60  ;;  %v3526_v33 = vsel %vm2984_vm9, %v3525_v34, %v15309_v26  ;;  %v2879_v45 = vunpack.c.l.b16 %v1777_v21  ;;  %v3502_v39 = vperm.slane %v2899_v4, %v15234_v58  ;;  %v14279_v62 = vpack.c.bf16 %v1570_v51, %v1569_v20  ;;  %v1181_v36 = vpop.xlane.xlu0 %1180  ;;  %v9201_v23 = vld [vmem:[#allocation2 + $0xa00] sm:$0xf]  ;;  %v6884_v44 = vpop.f32.mrf.mxu3 }
 0x356   :  { %6983 = vmatpush.bf16.msra.mxu3 %v8214_v55  ;;  %15308 = vst [vmem:[#allocation27_spill] sm:$0xff] %v14274_v37  ;;  %v10803_v40 = vld [vmem:[#allocation2 + $0xa1c] sm:$0xf0]  ;;  %v2880_v54 = vunpack.c.h.b16 %v1777_v21  ;;  %v1604_v49 = vmul.f32 %v12267_v50, %v1181_v36  ;;  %v1314_v7 = vsel %vm365_vm0, %v361_v25, 0.0  ;;  %v1275_v47 = vsel %vm365_vm0, %v348_v28, 0.0  ;;  %v6858_v34 = vpop.f32.mrf.mxu1  ;;  %v204_v21 = vld [vmem:[%s15022_s0 + $0x4f8] sm:$0xff] }
 0x357   :  { %v2866_v56 = vunpack.c.h.b16 %v14242_v2  ;;  %v3436_v18 = vperm.slane %v2865_v9, %v12445_v1  ;;  %v14286_v55 = vpack.c.bf16 %v1616_v61, %v1615_v53  ;;  %v1272_v42 = vsel %vm365_vm0, %v347_v5, 0.0  ;;  %1315 = vadd.xlane.f32.xlu2 %v1314_v7  ;;  %v10791_v36 = vld [vmem:[#allocation2 + $0x9c4] sm:$0xf]  ;;  %v10732_v37 = vld [vmem:[#allocation2 + $0x7e4] sm:$0xf0] }
 0x358   :  { %v14290_v60 = vsel %vm2988_vm10, %v3527_v41, %v3526_v33  ;;  %v3504_v10 = vperm.slane %v2900_v52, %v15217_v14  ;;  %v1788_v15 = vpack.c.bf16 %v1604_v49, %v1603_v17  ;;  %v9202_v2 = vor.u32 %v10803_v40, %v9201_v23  ;;  %v9171_v23 = vld [vmem:[#allocation2 + $0x9e0] sm:$0xf0] }
 0x359   :  { %6905 = vmatpush.bf16.msrb.mxu1 %v9234_v11  ;;  %v3503_v4 = vsel %vm3000_vm13, %v3502_v39, %v3501_v46  ;;  %v2867_v51 = vunpack.c.l.b16 %v14279_v62  ;;  %v1618_v20 = vmul.f32 %v12267_v50, %v1223_v6  ;;  %v1617_v27 = vmul.f32 %v12267_v50, %v1220_v3  ;;  %1276 = vadd.xlane.f32.xlu1 %v1275_v47 }
 0x35a   :  { %6984 = vmatpush.bf16.msra.mxu3 %v8182_v0  ;;  %v3463_v41 = vperm.slane %v2879_v45, %v12390_v29  ;;  %v14305_v8 = vperm.slane %v2880_v54, %v12421_v22  ;;  %v2901_v9 = vunpack.c.l.b16 %v1788_v15  ;;  %v2902_v53 = vunpack.c.h.b16 %v1788_v15  ;;  %v1124_v6 = vpop.xlane.xlu2 %1123  ;;  %v9139_v15 = vld [vmem:[#allocation2 + $0x9a0] sm:$0xf0] }
 0x35b   :  { %1273 = vadd.xlane.f32.xlu0 %v1272_v42  ;;  %v3437_v46 = vsel %vm2992_vm11, %v3436_v18, %v3435_v63  ;;  %v3438_v61 = vperm.slane %v2866_v56, %v12456_v32  ;;  %v2913_v25 = vunpack.c.l.b16 %v14286_v55  ;;  %v843_v28 = vsel %vm365_vm0, %v204_v21, 0.0  ;;  %v1085_v3 = vpop.xlane.xlu1 %1084  ;;  %v362_v63 = vld [vmem:[%s15022_s0 + $0x9e8] sm:$0xff] }
 0x35c   :  { %v3505_v0 = vsel %vm3004_vm14, %v3504_v10, %v3503_v4  ;;  %v3506_v52 = vperm.slane %v2901_v9, %v12583_v57  ;;  %v3508_v17 = vperm.slane %v2902_v53, %v12586_v35  ;;  %v840_v5 = vsel %vm365_vm0, %v203_v12, 0.0  ;;  %v15310_v18 = vld [vmem:[#allocation25_spill] sm:$0xff]  ;;  %v10783_v10 = vld [vmem:[#allocation2 + $0x984] sm:$0xf] }
 0x35d   :  { %6906 = vmatpush.bf16.msrb.mxu1 %v9202_v2  ;;  %v2868_v11 = vunpack.c.h.b16 %v14279_v62  ;;  %v3440_v26 = vperm.slane %v2867_v51, %v15234_v58  ;;  %v1795_v33 = vpack.c.bf16 %v1618_v20, %v1617_v27  ;;  %v1572_v45 = vmul.f32 %v12267_v50, %v1085_v3  ;;  %v1082_v39 = vpop.xlane.xlu0 %1081  ;;  %v10775_v3 = vld [vmem:[#allocation2 + $0x944] sm:$0xf] }
 0x35e   :  { %v1584_v40 = vmul.f32 %v12267_v50, %v14222_v24  ;;  %v1583_v54 = vmul.f32 %v12267_v50, %v14234_v31  ;;  %v3507_v49 = vsel %vm3008_vm15, %v3506_v52, %v3505_v0  ;;  %v1571_v44 = vmul.f32 %v12267_v50, %v1082_v39 }
 0x35f   :  { %v2914_v62 = vunpack.c.h.b16 %v14286_v55  ;;  %v3529_v7 = vperm.slane %v2913_v25, %v12445_v1  ;;  %v3509_v47 = vsel %vm3012_vm1, %v3508_v17, %v3507_v49  ;;  %v1317_v56 = vsel %vm365_vm0, %v362_v63, 0.0  ;;  %v364_v55 = vld [vmem:[%s15022_s0 + $0x9f8] sm:$0xff]  ;;  %844 = vadd.xlane.f32.xlu2 %v843_v28 }
 0x360   :  { %v14333_v34 = vsel %vm2984_vm9, %v3463_v41, %v15310_v18  ;;  %v3610_v24 = vsel %vm15311_vm4, %v3509_v47, %v14181_v13  ;;  %v1772_v31 = vpack.c.bf16 %v1572_v45, %v1571_v44  ;;  %v9174_v42 = vor.u32 %v10791_v36, %v9171_v23  ;;  %v15313_v47 = vld [vmem:[#allocation20_spill] sm:$0xff] }
 0x361   :  { %v3439_v21 = vsel %vm2996_vm12, %v3438_v61, %v3437_v46  ;;  %v3442_v2 = vperm.slane %v2868_v11, %v15217_v14  ;;  %v2915_v4 = vunpack.c.l.b16 %v1795_v33  ;;  %v14342_v51 = vpack.c.b16 %v3610_v24, %v3610_v24  ;;  %841 = vadd.xlane.f32.xlu1 %v840_v5  ;;  %v363_v61 = vld [vmem:[%s15022_s0 + $0x9f0] sm:$0xff]  ;;  %v9107_v5 = vld [vmem:[#allocation2 + $0x960] sm:$0xf0]  ;;  %s11214_s0 = smov [#allocation7]  }
 0x362   :  { %v3441_v20 = vsel %vm3000_vm13, %v3440_v26, %v3439_v21  ;;  %v14345_v13 = vpack.c.bf16 %v1584_v40, %v1583_v54  ;;  %v2869_v27 = vunpack.c.l.b16 %v1772_v31  ;;  %v2870_v12 = vunpack.c.h.b16 %v1772_v31  ;;  %v15315_v21 = vld [vmem:[#allocation23_spill] sm:$0xff]  ;;  %s7906_s25 = sshll.u32 %s11214_s0, 4  ;;  %s7907_s25 = int_to_ptr.vmem [resolvable:$true] %s7906_s25 }
 0x363   :  { %15312 = vst [vmem:[#allocation28_spill] sm:$0xff] %v14342_v51  ;;  %1318 = vadd.xlane.f32.xlu0 %v1317_v56  ;;  %v3530_v41 = vsel %vm2992_vm11, %v3529_v7, %v14290_v60  ;;  %v3531_v9 = vperm.slane %v2914_v62, %v12456_v32  ;;  %6920 = vmatmul.bf16.vlgmr.msrb.gmra.mxu2 %v14342_v51  ;;  %v1323_v46 = vsel %vm365_vm0, %v364_v55, 0.0  ;;  %v2916_v25 = vunpack.c.h.b16 %v1795_v33  ;;  %v1229_v60 = vpop.xlane.xlu2 %1228  ;;  %v1226_v17 = vpop.xlane.xlu1 %1225  ;;  %v9075_v55 = vld [vmem:[#allocation2 + $0x920] sm:$0xf0] }
 0x364   :  { %v9142_v53 = vor.u32 %v10783_v10, %v9139_v15  ;;  %v1585_v28 = vmul.f32 %v12267_v50, %v1124_v6  ;;  %v3444_v0 = vperm.slane %v2869_v27, %v12583_v57  ;;  %v3446_v52 = vperm.slane %v2870_v12, %v12586_v35  ;;  %7016 = vmatpush.bf16.msrb.mxu2 %v9174_v42  ;;  %v10767_v15 = vld [vmem:[#allocation2 + $0x904] sm:$0xf] }
 0x365   :  { %v3443_v63 = vsel %vm3004_vm14, %v3442_v2, %v3441_v20  ;;  %v3533_v11 = vperm.slane %v2915_v4, %v15234_v58  ;;  %v1620_v26 = vmul.f32 %v12267_v50, %v1229_v60  ;;  %v1619_v45 = vmul.f32 %v12267_v50, %v1226_v17  ;;  %v1127_v33 = vpop.xlane.xlu0 %1126  ;;  %v9043_v17 = vld [vmem:[#allocation2 + $0x8e0] sm:$0xf0] }
 0x366   :  { %v2881_v6 = vunpack.c.l.b16 %v14345_v13  ;;  %v3445_v39 = vsel %vm3008_vm15, %v3444_v0, %v3443_v63  ;;  %v1586_v36 = vmul.f32 %v12267_v50, %v1127_v33  ;;  %v1320_v23 = vsel %vm365_vm0, %v363_v61, 0.0  ;;  %v10855_v61 = vld [vmem:[#allocation2 + $0xbc4] sm:$0xf]  ;;  %vm15316_vm0 = vmmov %vm15311_vm4 }
 0x367   :  { %v3532_v40 = vsel %vm2996_vm12, %v3531_v9, %v3530_v41  ;;  %v3447_v54 = vsel %vm3012_vm1, %v3446_v52, %v3445_v39  ;;  %v1796_v49 = vpack.c.bf16 %v1620_v26, %v1619_v45  ;;  %v9110_v44 = vor.u32 %v10775_v3, %v9107_v5  ;;  %v10847_v39 = vld [vmem:[#allocation2 + $0xb84] sm:$0xf] }
 0x368   :  { %v2882_v62 = vunpack.c.h.b16 %v14345_v13  ;;  %v3535_v7 = vperm.slane %v2916_v25, %v15217_v14  ;;  %v3608_v56 = vsel %vm15311_vm4, %v3447_v54, %v15313_v47  ;;  %v1779_v18 = vpack.c.bf16 %v1586_v36, %v1585_v28  ;;  %7017 = vmatpush.bf16.msrb.mxu2 %v9142_v53  ;;  %v9427_v25 = vld [vmem:[#allocation2 + $0xbe0] sm:$0xf0]  ;;  %vm15319_vm4 = vmmov %vm15316_vm0 }
 0x369   :  { %v3534_v24 = vsel %vm3000_vm13, %v3533_v11, %v3532_v40  ;;  %v14373_v31 = vpack.c.b16 %v3608_v56, %v3608_v56  ;;  %v2917_v42 = vunpack.c.l.b16 %v1796_v49  ;;  %v2918_v10 = vunpack.c.h.b16 %v1796_v49  ;;  %1324 = vadd.xlane.f32.xlu1 %v1323_v46  ;;  %v9395_v36 = vld [vmem:[#allocation2 + $0xba0] sm:$0xf0] }
 0x36a   :  { %v3160_v2 = vsel %vm2996_vm12, %v15315_v21, %v14138_v19  ;;  %v2725_v4 = vunpack.c.l.b16 %v14175_v59  ;;  %v3467_v20 = vperm.slane %v2881_v6, %v12445_v1  ;;  %v2883_v13 = vunpack.c.l.b16 %v1779_v18  ;;  %v15352_v51 = vld [vmem:[#allocation120_spill] sm:$0xff] }
 0x36b   :  { %15314 = vst [vmem:[#allocation124_spill] sm:$0xff] %v14373_v31  ;;  %1321 = vadd.xlane.f32.xlu0 %v1320_v23  ;;  %v3162_v27 = vsel %vm3000_vm13, %v14178_v48, %v3160_v2  ;;  %v3163_v12 = vperm.slane %v2724_v38, %v15217_v14  ;;  %v3537_v41 = vperm.slane %v2917_v42, %v12583_v57  ;;  %v1232_v46 = vpop.xlane.xlu2 %1231  ;;  %v1133_v30 = vpop.xlane.xlu1 %1132  ;;  %v2884_v52 = vunpack.c.h.b16 %v1779_v18 }
 0x36c   :  { %v3539_v9 = vperm.slane %v2918_v10, %v12586_v35  ;;  %6894 = vmatmul.bf16.vlgmr.msrb.gmra.mxu0 %v14373_v31  ;;  %v3230_v19 = vsel %vm3012_vm1, %v14204_v16, %v14246_v43  ;;  %v3466_v53 = vsel %vm2988_vm10, %v14305_v8, %v14333_v34  ;;  %v3536_v48 = vsel %vm3004_vm14, %v3535_v7, %v3534_v24  ;;  %v10759_v43 = vld [vmem:[#allocation2 + $0x8c4] sm:$0xf]  ;;  %v15318_v24 = vld [vmem:[#allocation15_spill] sm:$0xff] }
 0x36d   :  { %7018 = vmatpush.bf16.msrb.mxu2 %v9110_v44  ;;  %v9078_v38 = vor.u32 %v10767_v15, %v9075_v55  ;;  %v3469_v28 = vperm.slane %v2882_v62, %v12456_v32  ;;  %v3538_v0 = vsel %vm3008_vm15, %v3537_v41, %v3536_v48  ;;  %v1588_v60 = vmul.f32 %v12267_v50, %v1133_v30  ;;  %v1130_v16 = vpop.xlane.xlu0 %1129  ;;  %v10751_v44 = vld [vmem:[#allocation2 + $0x884] sm:$0xf] }
 0x36e   :  { %v3468_v8 = vsel %vm2992_vm11, %v3467_v20, %v3466_v53  ;;  %v3540_v34 = vsel %vm3012_vm1, %v3539_v9, %v3538_v0  ;;  %v3471_v3 = vperm.slane %v2883_v13, %v15234_v58  ;;  %v1587_v5 = vmul.f32 %v12267_v50, %v1130_v16  ;;  %v9011_v62 = vld [vmem:[#allocation2 + $0x8a0] sm:$0xf0] }
 0x36f   :  { %v3611_v63 = vsel %vm15316_vm0, %v3540_v34, %v3230_v19  ;;  %v9430_v11 = vor.u32 %v10855_v61, %v9427_v25  ;;  %v3164_v26 = vsel %vm3004_vm14, %v3163_v12, %v3162_v27  ;;  %v9046_v6 = vor.u32 %v10759_v43, %v9043_v17  ;;  %v9363_v20 = vld [vmem:[#allocation2 + $0xb60] sm:$0xf0] }
 0x370   :  { %v14404_v45 = vpack.c.b16 %v3611_v63, %v3611_v63  ;;  %v1780_v33 = vpack.c.bf16 %v1588_v60, %v1587_v5  ;;  %v2726_v23 = vunpack.c.h.b16 %v14175_v59  ;;  %v3165_v40 = vperm.slane %v2725_v4, %v12583_v57  ;;  %v10839_v4 = vld [vmem:[#allocation2 + $0xb44] sm:$0xf] }
 0x371   :  { %7019 = vmatpush.bf16.msrb.mxu2 %v9078_v38  ;;  %v3470_v54 = vsel %vm2996_vm12, %v3469_v28, %v3468_v8  ;;  %v3473_v49 = vperm.slane %v2884_v52, %v15217_v14  ;;  %v9398_v59 = vor.u32 %v10847_v39, %v9395_v36  ;;  %v1621_v42 = vmul.f32 %v12267_v50, %v1232_v46  ;;  %v10743_v19 = vld [vmem:[#allocation2 + $0x844] sm:$0xf]  ;;  %v15323_v36 = vld [vmem:[#allocation111_spill] sm:$0xff] }
 0x372   :  { %15317 = vst [vmem:[#allocation125_spill] sm:$0xff] %v14404_v45  ;;  %v3472_v7 = vsel %vm3000_vm13, %v3471_v3, %v3470_v54  ;;  %v2885_v47 = vunpack.c.l.b16 %v1780_v33  ;;  %v2886_v56 = vunpack.c.h.b16 %v1780_v33  ;;  %6933 = vmatmul.bf16.vlgmr.msrb.gmra.mxu3 %v14404_v45  ;;  %v3166_v18 = vsel %vm3008_vm15, %v3165_v40, %v3164_v26  ;;  %v8979_v53 = vld [vmem:[#allocation2 + $0x860] sm:$0xf0]  ;;  %v8569_v45 = vld [vmem:[#allocation2 + $0x508] sm:$0xf] }
 0x373   :  { %6972 = vmatmul.bf16.vlgmr.msra.gmra.mxu2 %v15318_v24  ;;  %7029 = vmatpush.bf16.msrb.mxu3 %v9430_v11  ;;  %v1241_v55 = vpop.xlane.xlu2 %1240  ;;  %v1238_v21 = vpop.xlane.xlu1 %1237  ;;  %v9014_v2 = vor.u32 %v10751_v44, %v9011_v62  ;;  %v3167_v13 = vperm.slane %v2726_v23, %v12586_v35  ;;  %v3474_v27 = vsel %vm3004_vm14, %v3473_v49, %v3472_v7  ;;  %v10831_v60 = vld [vmem:[#allocation2 + $0xb04] sm:$0xf]  ;;  %v15321_v11 = vld [vmem:[#allocation114_spill] sm:$0xff]  ;;  %vm15325_vm0 = vcmask 261312  }
 0x374   :  { %v3475_v10 = vperm.slane %v2885_v47, %v12583_v57  ;;  %v3477_v15 = vperm.slane %v2886_v56, %v12586_v35  ;;  %v1624_v12 = vmul.f32 %v12267_v50, %v1241_v55  ;;  %v1623_v41 = vmul.f32 %v12267_v50, %v1238_v21  ;;  %v9331_v16 = vld [vmem:[#allocation2 + $0xb20] sm:$0xf0] }
 0x375   :  { %7020 = vmatpush.bf16.msrb.mxu2 %v9046_v6  ;;  %v1235_v9 = vpop.xlane.xlu0 %1234  ;;  %v3168_v30 = vsel %vm3012_vm1, %v3167_v13, %v3166_v18  ;;  %v9366_v25 = vor.u32 %v10839_v4, %v9363_v20  ;;  %v8982_v52 = vor.u32 %v10743_v19, %v8979_v53  ;;  %v10735_v8 = vld [vmem:[#allocation2 + $0x804] sm:$0xf]  ;;  %v9334_v33 = vor.u32 %v10831_v60, %v9331_v16  ;;  %v15322_v6 = vld [vmem:[#allocation110_spill] sm:$0xff]  ;;  %v15326_v19 = vld [vmem:[#allocation127_spill] sm:$0xff] }
 0x376   :  { %v3476_v48 = vsel %vm3008_vm15, %v3475_v10, %v3474_v27  ;;  %v1622_v46 = vmul.f32 %v12267_v50, %v1235_v9  ;;  %v1798_v61 = vpack.c.bf16 %v1624_v12, %v1623_v41  ;;  %v8947_v34 = vld [vmem:[#allocation2 + $0x820] sm:$0xf0]  ;;  %v10193_v10 = vld [vmem:[#allocation2 + $0x11c0] sm:$0xf] }
 0x377   :  { %v3478_v38 = vsel %vm3012_vm1, %v3477_v15, %v3476_v48  ;;  %7030 = vmatpush.bf16.msrb.mxu3 %v9398_v59  ;;  %v8950_v49 = vor.u32 %v10735_v8, %v8947_v34  ;;  %v10823_v44 = vld [vmem:[#allocation2 + $0xac4] sm:$0xf]  ;;  %v11051_v15 = vld [vmem:[#allocation2 + $0x11dc] sm:$0xf0] }
 0x378   :  { %v3609_v28 = vsel %vm15319_vm4, %v3478_v38, %v3168_v30  ;;  %v1797_v0 = vpack.c.bf16 %v1622_v46, %v1621_v42  ;;  %v2921_v17 = vunpack.c.l.b16 %v1798_v61  ;;  %v2922_v3 = vunpack.c.h.b16 %v1798_v61  ;;  %v9299_v62 = vld [vmem:[#allocation2 + $0xae0] sm:$0xf0]  ;;  %v10161_v53 = vld [vmem:[#allocation2 + $0x1180] sm:$0xf]  ;;  %vm15333_vm4 = vmmov %vm15325_vm0 }
 0x379   :  { %7021 = vmatpush.bf16.msrb.mxu2 %v9014_v2  ;;  %v14426_v43 = vpack.c.b16 %v3609_v28, %v3609_v28  ;;  %v15324_v56 = vld [vmem:[#allocation116_spill] sm:$0xff]  ;;  %v9302_v2 = vor.u32 %v10823_v44, %v9299_v62  ;;  %v10194_v4 = vor.u32 %v11051_v15, %v10193_v10 }
 0x37a   :  { %v2919_v5 = vunpack.c.l.b16 %v1797_v0  ;;  %v2920_v63 = vunpack.c.h.b16 %v1797_v0  ;;  %v3544_v26 = vperm.slane %v2921_v17, %v15321_v11  ;;  %v3546_v18 = vperm.slane %v2922_v3, %v15324_v56  ;;  %v11047_v55 = vld [vmem:[#allocation2 + $0x11c4] sm:$0xf]  ;;  %v11043_v48 = vld [vmem:[#allocation2 + $0x119c] sm:$0xf0]  ;;  %v15328_v3 = vld [vmem:[#allocation97_spill] sm:$0xff] }
 0x37b   :  { %15320 = vst [vmem:[#allocation126_spill] sm:$0xff] %v14426_v43  ;;  %6907 = vmatmul.bf16.vlgmr.msrb.gmra.mxu1 %v14426_v43  ;;  %7031 = vmatpush.bf16.msrb.mxu3 %v9366_v25  ;;  %v14432_v40 = vpop.xlane.xlu2 %1243  ;;  %v1283_v54 = vpop.xlane.xlu1 %1282  ;;  %v10195_v20 = vld [vmem:[#allocation2 + $0x11e0] sm:$0xf0]  ;;  %v10162_v38 = vor.u32 %v11043_v48, %v10161_v53 }
 0x37c   :  { %v3541_v39 = vperm.slane %v2919_v5, %v15322_v6  ;;  %v3542_v23 = vperm.slane %v2920_v63, %v15323_v36  ;;  %v1638_v7 = vmul.f32 %v12267_v50, %v1283_v54  ;;  %v10815_v12 = vld [vmem:[#allocation2 + $0xa84] sm:$0xf]  ;;  %v10198_v9 = vor.u32 %v11047_v55, %v10195_v20  ;;  %6938 = vmatpush.bf16.msra.mxu0 %v10194_v4 }
 0x37d   :  { %7022 = vmatpush.bf16.msrb.mxu2 %v8982_v52  ;;  %v1280_v47 = vpop.xlane.xlu0 %1279  ;;  %v9267_v41 = vld [vmem:[#allocation2 + $0xaa0] sm:$0xf0]  ;;  %v1462_v5 = vmul.f32 %v12267_v50, %v15328_v3 }
 0x37e   :  { %v3543_v59 = vsel %vm2956_vm2, %v3542_v23, %v3541_v39  ;;  %v1637_v42 = vmul.f32 %v12267_v50, %v1280_v47  ;;  %v11039_v46 = vld [vmem:[#allocation2 + $0x1184] sm:$0xf]  ;;  %v9270_v30 = vor.u32 %v10815_v12, %v9267_v41  ;;  %v10129_v39 = vld [vmem:[#allocation2 + $0x1140] sm:$0xf]  ;;  %v15329_v47 = vld [vmem:[#allocation95_spill] sm:$0xff] }
 0x37f   :  { %v3545_v21 = vsel %vm2960_vm3, %v3544_v26, %v3543_v59  ;;  %7032 = vmatpush.bf16.msrb.mxu3 %v9334_v33  ;;  %v10163_v61 = vld [vmem:[#allocation2 + $0x11a0] sm:$0xf0]  ;;  %v11035_v23 = vld [vmem:[#allocation2 + $0x115c] sm:$0xf0] }
 0x380   :  { %v1805_v13 = vpack.c.bf16 %v1638_v7, %v1637_v42  ;;  %v14440_v27 = vsel %vm15325_vm0, %v3546_v18, %v3545_v21  ;;  %v10807_v60 = vld [vmem:[#allocation2 + $0xa44] sm:$0xf]  ;;  %v10166_v17 = vor.u32 %v11039_v46, %v10163_v61  ;;  %6939 = vmatpush.bf16.msra.mxu0 %v10162_v38  ;;  %v10130_v62 = vor.u32 %v11035_v23, %v10129_v39  ;;  %v10097_v12 = vld [vmem:[#allocation2 + $0x1100] sm:$0xf] }
 0x381   :  { %7023 = vmatpush.bf16.msrb.mxu2 %v8950_v49  ;;  %v9235_v16 = vld [vmem:[#allocation2 + $0xa60] sm:$0xf0]  ;;  %v1464_v18 = vmul.f32 %v12267_v50, %v15329_v47  ;;  %v11027_v41 = vld [vmem:[#allocation2 + $0x111c] sm:$0xf0] }
 0x382   :  { %6985 = vmatmul.bf16.vlgmr.msra.gmra.mxu3 %v15326_v19  ;;  %v2935_v25 = vunpack.c.l.b16 %v1805_v13  ;;  %v2936_v28 = vunpack.c.h.b16 %v1805_v13  ;;  %v15327_v8 = vld [vmem:[#allocation92_spill] sm:$0xff]  ;;  %v9238_v44 = vor.u32 %v10807_v60, %v9235_v16 }
 0x383   :  { %7033 = vmatpush.bf16.msrb.mxu3 %v9302_v2  ;;  %v1289_v0 = vpop.xlane.xlu2 %1288  ;;  %v1286_v52 = vpop.xlane.xlu1 %1285  ;;  %v1461_v34 = vmul.f32 %v12267_v50, %v15327_v8  ;;  %v11031_v54 = vld [vmem:[#allocation2 + $0x1144] sm:$0xf]  ;;  %v10065_v39 = vld [vmem:[#allocation2 + $0x10c0] sm:$0xf] }
 0x384   :  { %7024 = vmatmul.bf16.vlgmr.msrb.gmra.mxu2 %v14373_v31  ;;  %v1640_v63 = vmul.f32 %v12267_v50, %v1289_v0  ;;  %v1639_v26 = vmul.f32 %v12267_v50, %v1286_v52  ;;  %v10131_v7 = vld [vmem:[#allocation2 + $0x1160] sm:$0xf0]  ;;  %v3572_v59 = vperm.slane %v2935_v25, %v15322_v6  ;;  %v3573_v42 = vperm.slane %v2936_v28, %v15323_v36  ;;  %v11019_v23 = vld [vmem:[#allocation2 + $0x10dc] sm:$0xf0] }
 0x385   :  { %7068 = vmatpush.bf16.msra.mxu2 %v10198_v9  ;;  %v14450_v33 = vpop.xlane.xlu0 %1246  ;;  %v10799_v10 = vld [vmem:[#allocation2 + $0xa04] sm:$0xf]  ;;  %v10134_v55 = vor.u32 %v11031_v54, %v10131_v7  ;;  %v1717_v4 = vpack.c.bf16 %v1462_v5, %v1461_v34  ;;  %6940 = vmatpush.bf16.msra.mxu0 %v10130_v62  ;;  %v15331_v34 = vld [vmem:[#allocation99_spill] sm:$0xff]  ;;  %v10449_v54 = vld [vmem:[#allocation2 + $0x13c0] sm:$0xf] }
 0x386   :  { %v1806_v49 = vpack.c.bf16 %v1640_v63, %v1639_v26  ;;  %v9203_v15 = vld [vmem:[#allocation2 + $0xa20] sm:$0xf0]  ;;  %v3574_v61 = vsel %vm2956_vm2, %v3573_v42, %v3572_v59  ;;  %v1466_v3 = vmul.f32 %v12267_v50, %v15331_v34 }
 0x387   :  { %7034 = vmatpush.bf16.msrb.mxu3 %v9270_v30  ;;  %v15330_v21 = vld [vmem:[#allocation96_spill] sm:$0xff]  ;;  %v9206_v46 = vor.u32 %v10799_v10, %v9203_v15  ;;  %v10098_v30 = vor.u32 %v11027_v41, %v10097_v12  ;;  %v2759_v60 = vunpack.c.l.b16 %v1717_v4  ;;  %v2760_v8 = vunpack.c.h.b16 %v1717_v4  ;;  %v15335_v12 = vld [vmem:[#allocation98_spill] sm:$0xff] }
 0x388   :  { %v1463_v2 = vmul.f32 %v12267_v50, %v15330_v21  ;;  %v2937_v20 = vunpack.c.l.b16 %v1806_v49  ;;  %v2938_v13 = vunpack.c.h.b16 %v1806_v49  ;;  %v11023_v9 = vld [vmem:[#allocation2 + $0x1104] sm:$0xf]  ;;  %v10066_v49 = vor.u32 %v11019_v23, %v10065_v39  ;;  %v10033_v4 = vld [vmem:[#allocation2 + $0x1080] sm:$0xf] }
 0x389   :  { %7069 = vmatpush.bf16.msra.mxu2 %v10166_v17  ;;  %v10099_v38 = vld [vmem:[#allocation2 + $0x1120] sm:$0xf0]  ;;  %6941 = vmatpush.bf16.msra.mxu0 %v10098_v30  ;;  %v3232_v21 = vperm.slane %v2760_v8, %v15323_v36  ;;  %v1467_v41 = vmul.f32 %v12267_v50, %v15335_v12  ;;  %v15337_v12 = vld [vmem:[#allocation117_spill] sm:$0xff] }
 0x38a   :  { %v3575_v53 = vperm.slane %v2937_v20, %v15321_v11  ;;  %v3577_v48 = vperm.slane %v2938_v13, %v15324_v56  ;;  %v10102_v0 = vor.u32 %v11023_v9, %v10099_v38  ;;  %v14465_v52 = vpack.c.bf16 %v1464_v18, %v1463_v2  ;;  %v15332_v5 = vld [vmem:[#allocation100_spill] sm:$0xff]  ;;  %v15336_v9 = vld [vmem:[#allocation103_spill] sm:$0xff] }
 0x38b   :  { %7035 = vmatpush.bf16.msrb.mxu3 %v9238_v44  ;;  %v14461_v25 = vpop.xlane.xlu2 %1291  ;;  %v14463_v28 = vpop.xlane.xlu1 %1252  ;;  %v1465_v63 = vmul.f32 %v12267_v50, %v15332_v5  ;;  %v11115_v44 = vld [vmem:[#allocation2 + $0x13dc] sm:$0xf0]  ;;  %v11015_v62 = vld [vmem:[#allocation2 + $0x10c4] sm:$0xf] }
 0x38c   :  { %v3576_v16 = vsel %vm2960_vm3, %v3575_v53, %v3574_v61  ;;  %v10067_v7 = vld [vmem:[#allocation2 + $0x10e0] sm:$0xf0]  ;;  %v10450_v47 = vor.u32 %v11115_v44, %v10449_v54  ;;  %v2761_v10 = vunpack.c.l.b16 %v14465_v52  ;;  %v11011_v20 = vld [vmem:[#allocation2 + $0x109c] sm:$0xf0]  ;;  %v1468_v53 = vmul.f32 %v12267_v50, %v15336_v9 }
 0x38d   :  { %7070 = vmatpush.bf16.msra.mxu2 %v10134_v55  ;;  %v14468_v17 = vpop.xlane.xlu0 %1249  ;;  %v14475_v26 = vsel %vm15333_vm4, %v3577_v48, %v3576_v16  ;;  %v10070_v18 = vor.u32 %v11015_v62, %v10067_v7  ;;  %v11111_v59 = vld [vmem:[#allocation2 + $0x13c4] sm:$0xf]  ;;  %6942 = vmatpush.bf16.msra.mxu0 %v10066_v49  ;;  %v3231_v55 = vperm.slane %v2759_v60, %v15322_v6  ;;  %v10417_v13 = vld [vmem:[#allocation2 + $0x1380] sm:$0xf]  ;;  %v2762_v62 = vunpack.c.h.b16 %v14465_v52 }
 0x38e   :  { %15334 = vst [vmem:[#allocation128_spill] sm:$0xff] %v14475_v26  ;;  %v10451_v42 = vld [vmem:[#allocation2 + $0x13e0] sm:$0xf0]  ;;  %v14480_v2 = vpack.c.bf16 %v1466_v3, %v1465_v63  ;;  %6951 = vmatpush.bf16.msra.mxu1 %v10450_v47  ;;  %v10034_v48 = vor.u32 %v11011_v20, %v10033_v4  ;;  %v3234_v3 = vperm.slane %v2761_v10, %v15321_v11  ;;  %v10001_v54 = vld [vmem:[#allocation2 + $0x1040] sm:$0xf] }
 0x38f   :  { %7036 = vmatpush.bf16.msrb.mxu3 %v9206_v46  ;;  %v10454_v15 = vor.u32 %v11111_v59, %v10451_v42  ;;  %v11107_v46 = vld [vmem:[#allocation2 + $0x139c] sm:$0xf0]  ;;  %v11007_v30 = vld [vmem:[#allocation2 + $0x1084] sm:$0xf]  ;;  %v3233_v39 = vsel %vm2956_vm2, %v3232_v21, %v3231_v55  ;;  %v14497_v7 = vpack.c.bf16 %v1468_v53, %v1467_v41  ;;  %v15338_v41 = vld [vmem:[#allocation101_spill] sm:$0xff] }
 0x390   :  { %v10035_v38 = vld [vmem:[#allocation2 + $0x10a0] sm:$0xf0]  ;;  %v10418_v60 = vor.u32 %v11107_v46, %v10417_v13  ;;  %v2763_v23 = vunpack.c.l.b16 %v14480_v2  ;;  %v11003_v49 = vld [vmem:[#allocation2 + $0x105c] sm:$0xf0]  ;;  %v3235_v21 = vsel %vm2960_vm3, %v3234_v3, %v3233_v39  ;;  %v2764_v13 = vunpack.c.h.b16 %v14480_v2  ;;  %v15339_v53 = vld [vmem:[#allocation102_spill] sm:$0xff] }
 0x391   :  { %7071 = vmatpush.bf16.msra.mxu2 %v10102_v0  ;;  %v10038_v16 = vor.u32 %v11007_v30, %v10035_v38  ;;  %v11103_v8 = vld [vmem:[#allocation2 + $0x1384] sm:$0xf]  ;;  %6943 = vmatpush.bf16.msra.mxu0 %v10034_v48  ;;  %v10385_v44 = vld [vmem:[#allocation2 + $0x1340] sm:$0xf]  ;;  %v10002_v47 = vor.u32 %v11003_v49, %v10001_v54  ;;  %v1470_v9 = vmul.f32 %v12267_v50, %v15338_v41 }
 0x392   :  { %7037 = vmatmul.bf16.vlgmr.msrb.gmra.mxu3 %v14426_v43  ;;  %v10419_v34 = vld [vmem:[#allocation2 + $0x13a0] sm:$0xf0]  ;;  %6952 = vmatpush.bf16.msra.mxu1 %v10418_v60  ;;  %v3238_v52 = vperm.slane %v2763_v23, %v15337_v12  ;;  %v1469_v48 = vmul.f32 %v12267_v50, %v15339_v53  ;;  %v9969_v46 = vld [vmem:[#allocation2 + $0x1000] sm:$0xf]  ;;  %v3236_v60 = vperm.slane %v2762_v62, %v15324_v56 }
 0x393   :  { %7081 = vmatpush.bf16.msra.mxu3 %v10454_v15  ;;  %v14487_v61 = vpop.xlane.xlu2 %820  ;;  %v14489_v0 = vpop.xlane.xlu1 %817  ;;  %v10422_v63 = vor.u32 %v11103_v8, %v10419_v34  ;;  %v10999_v59 = vld [vmem:[#allocation2 + $0x1044] sm:$0xf]  ;;  %v10995_v30 = vld [vmem:[#allocation2 + $0x101c] sm:$0xf0] }
 0x394   :  { %v10003_v42 = vld [vmem:[#allocation2 + $0x1060] sm:$0xf0]  ;;  %v10353_v38 = vld [vmem:[#allocation2 + $0x1300] sm:$0xf]  ;;  %v9970_v8 = vor.u32 %v10995_v30, %v9969_v46  ;;  %v14517_v41 = vpack.c.bf16 %v1470_v9, %v1469_v48  ;;  %v15343_v9 = vld [vmem:[#allocation106_spill] sm:$0xff] }
 0x395   :  { %7072 = vmatpush.bf16.msra.mxu2 %v10070_v18  ;;  %v14492_v5 = vpop.xlane.xlu0 %1294  ;;  %v11099_v18 = vld [vmem:[#allocation2 + $0x135c] sm:$0xf0]  ;;  %v10006_v15 = vor.u32 %v10999_v59, %v10003_v42  ;;  %v11095_v4 = vld [vmem:[#allocation2 + $0x1344] sm:$0xf]  ;;  %6944 = vmatpush.bf16.msra.mxu0 %v10002_v47  ;;  %v1471_v48 = vmul.f32 %v12267_v50, %v15343_v9 }
 0x396   :  { %v10386_v10 = vor.u32 %v11099_v18, %v10385_v44  ;;  %v10387_v55 = vld [vmem:[#allocation2 + $0x1360] sm:$0xf0]  ;;  %v11091_v2 = vld [vmem:[#allocation2 + $0x131c] sm:$0xf0]  ;;  %v3237_v18 = vsel %vm15325_vm0, %v3236_v60, %v3235_v21  ;;  %v2766_v21 = vunpack.c.h.b16 %v14497_v7  ;;  %v15341_v60 = vld [vmem:[#allocation121_spill] sm:$0xff] }
 0x397   :  { %7082 = vmatpush.bf16.msra.mxu3 %v10422_v63  ;;  %v10390_v20 = vor.u32 %v11095_v4, %v10387_v55  ;;  %v10991_v34 = vld [vmem:[#allocation2 + $0x1004] sm:$0xf]  ;;  %v10354_v23 = vor.u32 %v11091_v2, %v10353_v38  ;;  %v3239_v4 = vsel %vm2968_vm5, %v3238_v52, %v3237_v18  ;;  %v15340_v55 = vld [vmem:[#allocation122_spill] sm:$0xff]  ;;  %v10321_v46 = vld [vmem:[#allocation2 + $0x12c0] sm:$0xf] }
 0x398   :  { %6953 = vmatpush.bf16.msra.mxu1 %v10386_v10  ;;  %v9971_v3 = vld [vmem:[#allocation2 + $0x1020] sm:$0xf0]  ;;  %v8665_v10 = vld [vmem:[#allocation2 + $0x5c8] sm:$0xf]  ;;  %v11083_v30 = vld [vmem:[#allocation2 + $0x12dc] sm:$0xf0] }
 0x399   :  { %7073 = vmatpush.bf16.msra.mxu2 %v10038_v16  ;;  %v2765_v16 = vunpack.c.l.b16 %v14497_v7  ;;  %v9974_v54 = vor.u32 %v10991_v34, %v9971_v3  ;;  %v11087_v49 = vld [vmem:[#allocation2 + $0x1304] sm:$0xf]  ;;  %6945 = vmatpush.bf16.msra.mxu0 %v9970_v8  ;;  %v10322_v34 = vor.u32 %v11083_v30, %v10321_v46  ;;  %v8633_v18 = vld [vmem:[#allocation2 + $0x588] sm:$0xf]  ;;  %v15344_v30 = vld [vmem:[#allocation123_spill] sm:$0xff] }
 0x39a   :  { %v10355_v44 = vld [vmem:[#allocation2 + $0x1320] sm:$0xf0]  ;;  %v10660_v7 = vld [vmem:[#allocation2 + $0x5a4] sm:$0xf0] }
 0x39b   :  { %7083 = vmatpush.bf16.msra.mxu3 %v10390_v20  ;;  %v14508_v63 = vpop.xlane.xlu2 %1297  ;;  %v14510_v39 = vpop.xlane.xlu1 %1258  ;;  %v10663_v47 = vld [vmem:[#allocation2 + $0x5c4] sm:$0xf]  ;;  %v10358_v59 = vor.u32 %v11087_v49, %v10355_v44  ;;  %v3240_v20 = vperm.slane %v2764_v13, %v15340_v55  ;;  %v3242_v2 = vperm.slane %v2765_v16, %v15341_v60  ;;  %v15342_v44 = vld [vmem:[#allocation105_spill] sm:$0xff]  ;;  %v8634_v16 = vor.u32 %v10660_v7, %v8633_v18 }
 0x39c   :  { %v8659_v42 = vld [vmem:[#allocation2 + $0x5e0] sm:$0xf0]  ;;  %6954 = vmatpush.bf16.msra.mxu1 %v10354_v23  ;;  %v1472_v13 = vmul.f32 %v12267_v50, %v15342_v44  ;;  %v3244_v44 = vperm.slane %v2766_v21, %v15344_v30  ;;  %v8601_v7 = vld [vmem:[#allocation2 + $0x548] sm:$0xf] }
 0x39d   :  { %7074 = vmatpush.bf16.msra.mxu2 %v10006_v15  ;;  %v14513_v62 = vpop.xlane.xlu0 %1255  ;;  %v10668_v15 = vld [vmem:[#allocation2 + $0x5e4] sm:$0xf0]  ;;  %v8662_v53 = vor.u32 %v10663_v47, %v8659_v42  ;;  %v11079_v38 = vld [vmem:[#allocation2 + $0x12c4] sm:$0xf]  ;;  %v10289_v42 = vld [vmem:[#allocation2 + $0x1280] sm:$0xf] }
 0x39e   :  { %v8666_v8 = vor.u32 %v10668_v15, %v8665_v10  ;;  %v10323_v3 = vld [vmem:[#allocation2 + $0x12e0] sm:$0xf0]  ;;  %v11075_v10 = vld [vmem:[#allocation2 + $0x129c] sm:$0xf0] }
 0x39f   :  { %7084 = vmatpush.bf16.msra.mxu3 %v10358_v59  ;;  %v10655_v49 = vld [vmem:[#allocation2 + $0x584] sm:$0xf]  ;;  %6990 = vmatpush.bf16.msrb.mxu0 %v8662_v53  ;;  %v10326_v23 = vor.u32 %v11079_v38, %v10323_v3  ;;  %v2767_v59 = vunpack.c.l.b16 %v14517_v41  ;;  %v10290_v38 = vor.u32 %v11075_v10, %v10289_v42  ;;  %v2768_v42 = vunpack.c.h.b16 %v14517_v41 }
 0x3a0   :  { %v8627_v52 = vld [vmem:[#allocation2 + $0x5a0] sm:$0xf0]  ;;  %6955 = vmatpush.bf16.msra.mxu1 %v10322_v34 }
 0x3a1   :  { %7075 = vmatpush.bf16.msra.mxu2 %v9974_v54  ;;  %v8630_v47 = vor.u32 %v10655_v49, %v8627_v52  ;;  %v3241_v54 = vsel %vm2972_vm6, %v3240_v20, %v3239_v4  ;;  %v11071_v15 = vld [vmem:[#allocation2 + $0x1284] sm:$0xf]  ;;  %v14531_v52 = vpack.c.bf16 %v1472_v13, %v1471_v48  ;;  %v15346_v4 = vld [vmem:[#allocation109_spill] sm:$0xff]  ;;  %v3246_v13 = vperm.slane %v2767_v59, %v12390_v29 }
 0x3a2   :  { %v3243_v46 = vsel %vm2976_vm7, %v3242_v2, %v3241_v54  ;;  %v15345_v9 = vld [vmem:[#allocation104_spill] sm:$0xff]  ;;  %v1474_v20 = vmul.f32 %v12267_v50, %v15346_v4  ;;  %v10652_v54 = vld [vmem:[#allocation2 + $0x564] sm:$0xf0]  ;;  %v15348_v4 = vld [vmem:[#allocation115_spill] sm:$0xff] }
 0x3a3   :  { %v1473_v53 = vmul.f32 %v12267_v50, %v15345_v9  ;;  %7085 = vmatpush.bf16.msra.mxu3 %v10326_v23  ;;  %v10291_v3 = vld [vmem:[#allocation2 + $0x12a0] sm:$0xf0]  ;;  %v14535_v34 = vpop.xlane.xlu2 %826  ;;  %6991 = vmatpush.bf16.msrb.mxu0 %v8630_v47  ;;  %v8602_v23 = vor.u32 %v10652_v54, %v8601_v7  ;;  %v15347_v48 = vld [vmem:[#allocation113_spill] sm:$0xff]  ;;  %v1477_v43 = vmul.f32 %v12267_v50, %v15348_v4  ;;  %v10257_v47 = vld [vmem:[#allocation2 + $0x1240] sm:$0xf]  ;;  %v2769_v19 = vunpack.c.l.b16 %v14531_v52 }
 0x3a4   :  { %v8595_v49 = vld [vmem:[#allocation2 + $0x560] sm:$0xf0]  ;;  %v14537_v18 = vpop.xlane.xlu1 %823  ;;  %v10294_v2 = vor.u32 %v11071_v15, %v10291_v3  ;;  %v1478_v10 = vmul.f32 %v12267_v50, %v15347_v48  ;;  %6956 = vmatpush.bf16.msra.mxu1 %v10290_v38  ;;  %v11067_v15 = vld [vmem:[#allocation2 + $0x125c] sm:$0xf0] }
 0x3a5   :  { %7120 = vmatpush.bf16.msrb.mxu2 %v8666_v8  ;;  %v10647_v8 = vld [vmem:[#allocation2 + $0x544] sm:$0xf]  ;;  %v14539_v9 = vpop.xlane.xlu0 %1300  ;;  %v10258_v59 = vor.u32 %v11067_v15, %v10257_v47  ;;  %v14553_v4 = vpack.c.bf16 %v1474_v20, %v1473_v53  ;;  %v3248_v47 = vperm.slane %v2768_v42, %v12421_v22  ;;  %v2770_v53 = vunpack.c.h.b16 %v14531_v52 }
 0x3a6   :  { %v8598_v21 = vor.u32 %v10647_v8, %v8595_v49  ;;  %v11063_v3 = vld [vmem:[#allocation2 + $0x1244] sm:$0xf]  ;;  %v3245_v8 = vsel %vm2980_vm8, %v3244_v44, %v3243_v46  ;;  %v15349_v49 = vld [vmem:[#allocation107_spill] sm:$0xff]  ;;  %v10644_v46 = vld [vmem:[#allocation2 + $0x524] sm:$0xf0]  ;;  %v14562_v20 = vpack.c.bf16 %v1478_v10, %v1477_v43  ;;  %v3250_v43 = vperm.slane %v2769_v19, %v12445_v1 }
 0x3a7   :  { %v15350_v7 = vld [vmem:[#allocation108_spill] sm:$0xff]  ;;  %7086 = vmatpush.bf16.msra.mxu3 %v10294_v2  ;;  %v8570_v2 = vor.u32 %v10644_v46, %v8569_v45  ;;  %v3247_v15 = vsel %vm2984_vm9, %v3246_v13, %v3245_v8  ;;  %v2771_v52 = vunpack.c.l.b16 %v14553_v4  ;;  %v8537_v46 = vld [vmem:[#allocation2 + $0x4c8] sm:$0xf]  ;;  %v3252_v26 = vperm.slane %v2770_v53, %v12456_v32 }
 0x3a8   :  { %v1475_v41 = vmul.f32 %v12267_v50, %v15350_v7  ;;  %v10259_v54 = vld [vmem:[#allocation2 + $0x1260] sm:$0xf0]  ;;  %6992 = vmatpush.bf16.msrb.mxu0 %v8598_v21  ;;  %v1480_v7 = vmul.f32 %v12267_v50, %v15352_v51  ;;  %6957 = vmatpush.bf16.msra.mxu1 %v10258_v59  ;;  %v11059_v21 = vld [vmem:[#allocation2 + $0x121c] sm:$0xf0]  ;;  %v1626_v51 = vmul.f32 %v12267_v50, %v14450_v33 }
 0x3a9   :  { %7121 = vmatpush.bf16.msrb.mxu2 %v8634_v16  ;;  %v1476_v16 = vmul.f32 %v12267_v50, %v15349_v49  ;;  %v10639_v31 = vld [vmem:[#allocation2 + $0x504] sm:$0xf]  ;;  %v10262_v38 = vor.u32 %v11063_v3, %v10259_v54  ;;  %v3249_v33 = vsel %vm2988_vm10, %v3248_v47, %v3247_v15 }
 0x3aa   :  { %v8563_v48 = vld [vmem:[#allocation2 + $0x520] sm:$0xf0]  ;;  %v3251_v53 = vsel %vm2992_vm11, %v3250_v43, %v3249_v33  ;;  %v8889_v43 = vld [vmem:[#allocation2 + $0x788] sm:$0xf] }
 0x3ab   :  { %v8566_v24 = vor.u32 %v10639_v31, %v8563_v48  ;;  %v15351_v44 = vld [vmem:[#allocation112_spill] sm:$0xff]  ;;  %v14564_v54 = vpack.c.bf16 %v1476_v16, %v1475_v41  ;;  %v1625_v48 = vmul.f32 %v12267_v50, %v14432_v40  ;;  %7087 = vmatpush.bf16.msra.mxu3 %v10262_v38  ;;  %v14572_v10 = vpop.xlane.xlu2 %1303  ;;  %v10724_v33 = vld [vmem:[#allocation2 + $0x7a4] sm:$0xf0] }
 0x3ac   :  { %v1479_v49 = vmul.f32 %v12267_v50, %v15351_v44  ;;  %v10225_v31 = vld [vmem:[#allocation2 + $0x1200] sm:$0xf]  ;;  %v11055_v3 = vld [vmem:[#allocation2 + $0x1204] sm:$0xf]  ;;  %v14574_v8 = vpop.xlane.xlu1 %1264 }
 0x3ad   :  { %7122 = vmatpush.bf16.msrb.mxu2 %v8602_v23  ;;  %v10226_v45 = vor.u32 %v11059_v21, %v10225_v31  ;;  %v10227_v23 = vld [vmem:[#allocation2 + $0x1220] sm:$0xf0]  ;;  %6993 = vmatpush.bf16.msrb.mxu0 %v8566_v24  ;;  %v14579_v44 = vpop.xlane.xlu0 %1261  ;;  %v10636_v31 = vld [vmem:[#allocation2 + $0x4e4] sm:$0xf0]  ;;  %v2775_v24 = vunpack.c.l.b16 %v14562_v20 }
 0x3ae   :  { %v10631_v42 = vld [vmem:[#allocation2 + $0x4c4] sm:$0xf]  ;;  %v10230_v16 = vor.u32 %v11055_v3, %v10227_v23  ;;  %v14577_v38 = vpack.c.bf16 %v1480_v7, %v1479_v49  ;;  %v8921_v21 = vld [vmem:[#allocation2 + $0x7c8] sm:$0xf]  ;;  %v2776_v3 = vunpack.c.h.b16 %v14562_v20  ;;  %v8538_v23 = vor.u32 %v10636_v31, %v8537_v46 }
 0x3af   :  { %v8531_v13 = vld [vmem:[#allocation2 + $0x4e0] sm:$0xf0]  ;;  %6958 = vmatpush.bf16.msra.mxu1 %v10226_v45  ;;  %v2772_v49 = vunpack.c.h.b16 %v14553_v4  ;;  %v14586_v7 = vpack.c.bf16 %v1626_v51, %v1625_v48  ;;  %v8505_v31 = vld [vmem:[#allocation2 + $0x488] sm:$0xf]  ;;  %v15354_v48 = vld [vmem:[#allocation119_spill] sm:$0xff] }
 0x3b0   :  { %v8534_v41 = vor.u32 %v10631_v42, %v8531_v13  ;;  %v10727_v40 = vld [vmem:[#allocation2 + $0x7c4] sm:$0xf]  ;;  %v2773_v42 = vunpack.c.l.b16 %v14564_v54  ;;  %7088 = vmatpush.bf16.msra.mxu3 %v10230_v16  ;;  %v10628_v4 = vld [vmem:[#allocation2 + $0x4a4] sm:$0xf0]  ;;  %v1481_v51 = vmul.f32 %v12267_v50, %v15354_v48 }
 0x3b1   :  { %v8915_v59 = vld [vmem:[#allocation2 + $0x7e0] sm:$0xf0]  ;;  %7123 = vmatpush.bf16.msrb.mxu2 %v8570_v2  ;;  %v8922_v2 = vor.u32 %v10732_v37, %v8921_v21  ;;  %v2777_v37 = vunpack.c.l.b16 %v14577_v38  ;;  %v3263_v21 = vperm.slane %v2776_v3, %v15323_v36  ;;  %v3256_v48 = vperm.slane %v2772_v49, %v15217_v14  ;;  %v8473_v49 = vld [vmem:[#allocation2 + $0x448] sm:$0xf] }
 0x3b2   :  { %v8918_v19 = vor.u32 %v10727_v40, %v8915_v59  ;;  %v10623_v47 = vld [vmem:[#allocation2 + $0x484] sm:$0xf]  ;;  %v3254_v40 = vperm.slane %v2771_v52, %v15234_v58  ;;  %v15353_v59 = vld [vmem:[#allocation118_spill] sm:$0xff]  ;;  %6994 = vmatpush.bf16.msrb.mxu0 %v8534_v41  ;;  %v3262_v52 = vperm.slane %v2775_v24, %v15322_v6  ;;  %v2778_v41 = vunpack.c.h.b16 %v14577_v38 }
 0x3b3   :  { %v8499_v15 = vld [vmem:[#allocation2 + $0x4a0] sm:$0xf0]  ;;  %v1482_v20 = vmul.f32 %v12267_v50, %v15353_v59  ;;  %v14600_v59 = vperm.slane %v2773_v42, %v12583_v57  ;;  %v1628_v36 = vmul.f32 %v12267_v50, %v14463_v28  ;;  %v1627_v38 = vmul.f32 %v12267_v50, %v14468_v17  ;;  %v8857_v17 = vld [vmem:[#allocation2 + $0x748] sm:$0xf] }
 0x3b4   :  { %7003 = vmatpush.bf16.msrb.mxu1 %v8918_v19  ;;  %v10719_v13 = vld [vmem:[#allocation2 + $0x784] sm:$0xf]  ;;  %v8502_v45 = vor.u32 %v10623_v47, %v8499_v15  ;;  %7133 = vmatpush.bf16.msrb.mxu3 %v8922_v2  ;;  %v8506_v19 = vor.u32 %v10628_v4, %v8505_v31  ;;  %v8890_v47 = vor.u32 %v10724_v33, %v8889_v43  ;;  %v14611_v24 = vpop.xlane.xlu1 %829  ;;  %v2774_v31 = vunpack.c.h.b16 %v14564_v54  ;;  %v10716_v43 = vld [vmem:[#allocation2 + $0x764] sm:$0xf0] }
 0x3b5   :  { %v8883_v46 = vld [vmem:[#allocation2 + $0x7a0] sm:$0xf0]  ;;  %7124 = vmatpush.bf16.msrb.mxu2 %v8538_v23  ;;  %v3253_v15 = vsel %vm2996_vm12, %v3252_v26, %v3251_v53  ;;  %v2923_v23 = vunpack.c.l.b16 %v14586_v7  ;;  %v14609_v26 = vpop.xlane.xlu2 %832  ;;  %v10620_v53 = vld [vmem:[#allocation2 + $0x464] sm:$0xf0]  ;;  %v14614_v4 = vpack.c.bf16 %v1482_v20, %v1481_v51  ;;  %v3264_v33 = vsel %vm2956_vm2, %v3263_v21, %v3262_v52  ;;  %vm15355_vm2 = vmmov %vm15325_vm0 }
 0x3b6   :  { %v8886_v16 = vor.u32 %v10719_v13, %v8883_v46  ;;  %v10615_v2 = vld [vmem:[#allocation2 + $0x444] sm:$0xf]  ;;  %v3255_v6 = vsel %vm3000_vm13, %v3254_v40, %v3253_v15  ;;  %6995 = vmatpush.bf16.msrb.mxu0 %v8502_v45  ;;  %v3265_v40 = vperm.slane %v2777_v37, %v15321_v11  ;;  %v3267_v45 = vperm.slane %v2778_v41, %v15324_v56  ;;  %v8441_v41 = vld [vmem:[#allocation2 + $0x408] sm:$0xf] }
 0x3b7   :  { %v8467_v13 = vld [vmem:[#allocation2 + $0x460] sm:$0xf0]  ;;  %v8474_v15 = vor.u32 %v10620_v53, %v8473_v49  ;;  %v3548_v54 = vperm.slane %v2923_v23, %v15337_v12  ;;  %v1484_v11 = vmul.f32 %v12267_v50, %v14487_v61  ;;  %v1483_v20 = vmul.f32 %v12267_v50, %v14489_v0  ;;  %v10612_v23 = vld [vmem:[#allocation2 + $0x424] sm:$0xf0] }
 0x3b8   :  { %7004 = vmatpush.bf16.msrb.mxu1 %v8886_v16  ;;  %v10711_v46 = vld [vmem:[#allocation2 + $0x744] sm:$0xf]  ;;  %v8470_v3 = vor.u32 %v10615_v2, %v8467_v13  ;;  %v14617_v16 = vpop.xlane.xlu0 %1306  ;;  %7134 = vmatpush.bf16.msrb.mxu3 %v8890_v47  ;;  %v8858_v2 = vor.u32 %v10716_v43, %v8857_v17  ;;  %v2924_v13 = vunpack.c.h.b16 %v14586_v7  ;;  %v1800_v47 = vpack.c.bf16 %v1628_v36, %v1627_v38  ;;  %v8825_v36 = vld [vmem:[#allocation2 + $0x708] sm:$0xf] }
 0x3b9   :  { %v8851_v42 = vld [vmem:[#allocation2 + $0x760] sm:$0xf0]  ;;  %7125 = vmatpush.bf16.msrb.mxu2 %v8506_v19  ;;  %v1630_v56 = vmul.f32 %v12267_v50, %v14510_v39  ;;  %v1629_v52 = vmul.f32 %v12267_v50, %v14513_v62  ;;  %v2779_v61 = vunpack.c.l.b16 %v14614_v4  ;;  %v3266_v0 = vsel %vm2960_vm3, %v3265_v40, %v3264_v33  ;;  %v10708_v38 = vld [vmem:[#allocation2 + $0x724] sm:$0xf0] }
 0x3ba   :  { %v8854_v28 = vor.u32 %v10711_v46, %v8851_v42  ;;  %v10607_v51 = vld [vmem:[#allocation2 + $0x404] sm:$0xf]  ;;  %6996 = vmatpush.bf16.msrb.mxu0 %v8470_v3  ;;  %v8442_v42 = vor.u32 %v10612_v23, %v8441_v41  ;;  %v2780_v39 = vunpack.c.h.b16 %v14614_v4  ;;  %v1641_v62 = vmul.f32 %v12267_v50, %v14461_v25 }
 0x3bb   :  { %v8435_v37 = vld [vmem:[#allocation2 + $0x420] sm:$0xf0]  ;;  %v1642_v3 = vmul.f32 %v12267_v50, %v14492_v5  ;;  %v8826_v49 = vor.u32 %v10708_v38, %v8825_v36  ;;  %v14639_v53 = vperm.slane %v2774_v31, %v12586_v35  ;;  %v3257_v40 = vsel %vm3004_vm14, %v3256_v48, %v3255_v6  ;;  %v8793_v48 = vld [vmem:[#allocation2 + $0x6c8] sm:$0xf] }
 0x3bc   :  { %7005 = vmatpush.bf16.msrb.mxu1 %v8854_v28  ;;  %v10703_v19 = vld [vmem:[#allocation2 + $0x704] sm:$0xf]  ;;  %v8438_v7 = vor.u32 %v10607_v51, %v8435_v37  ;;  %7135 = vmatpush.bf16.msrb.mxu3 %v8858_v2  ;;  %v3550_v28 = vperm.slane %v2924_v13, %v15340_v55  ;;  %v14643_v17 = vpack.c.bf16 %v1484_v11, %v1483_v20  ;;  %v2925_v25 = vunpack.c.l.b16 %v1800_v47  ;;  %v10692_v38 = vld [vmem:[#allocation2 + $0x6a4] sm:$0xf0] }
 0x3bd   :  { %v8819_v21 = vld [vmem:[#allocation2 + $0x720] sm:$0xf0]  ;;  %7126 = vmatpush.bf16.msrb.mxu2 %v8474_v15  ;;  %v3268_v43 = vsel %vm15355_vm2, %v3267_v45, %v3266_v0  ;;  %v3549_v4 = vsel %vm2968_vm5, %v3548_v54, %v14440_v27  ;;  %v14648_v33 = vpack.c.bf16 %v1630_v56, %v1629_v52  ;;  %v14650_v5 = vpop.xlane.xlu2 %1309  ;;  %v1271_v15 = vpop.xlane.xlu1 %1270  ;;  %v3269_v6 = vperm.slane %v2779_v61, %v15337_v12  ;;  %v10700_v54 = vld [vmem:[#allocation2 + $0x6e4] sm:$0xf0] }
 0x3be   :  { %v8822_v46 = vor.u32 %v10703_v19, %v8819_v21  ;;  %6997 = vmatpush.bf16.msrb.mxu0 %v8438_v7  ;;  %v10695_v31 = vld [vmem:[#allocation2 + $0x6c4] sm:$0xf]  ;;  %v2926_v13 = vunpack.c.h.b16 %v1800_v47  ;;  %v1632_v11 = vmul.f32 %v12267_v50, %v14574_v8  ;;  %v1631_v45 = vmul.f32 %v12267_v50, %v14579_v44  ;;  %v8761_v61 = vld [vmem:[#allocation2 + $0x688] sm:$0xf] }
 0x3bf   :  { %v8787_v2 = vld [vmem:[#allocation2 + $0x6e0] sm:$0xf0]  ;;  %v3259_v20 = vsel %vm3008_vm15, %v14600_v59, %v3257_v40  ;;  %v3271_v51 = vperm.slane %v2780_v39, %v15340_v55  ;;  %v1807_v37 = vpack.c.bf16 %v1642_v3, %v1641_v62  ;;  %v3270_v56 = vsel %vm2968_vm5, %v3269_v6, %v3268_v43  ;;  %v8729_v6 = vld [vmem:[#allocation2 + $0x648] sm:$0xf] }
 0x3c0   :  { %7006 = vmatpush.bf16.msrb.mxu1 %v8822_v46  ;;  %v1268_v27 = vpop.xlane.xlu0 %1267  ;;  %7136 = vmatpush.bf16.msrb.mxu3 %v8826_v49  ;;  %v8790_v19 = vor.u32 %v10695_v31, %v8787_v2  ;;  %v3551_v47 = vsel %vm2972_vm6, %v3550_v28, %v3549_v4  ;;  %v2781_v8 = vunpack.c.l.b16 %v14643_v17  ;;  %v8794_v52 = vor.u32 %v10700_v54, %v8793_v48  ;;  %v10687_v41 = vld [vmem:[#allocation2 + $0x684] sm:$0xf] }
 0x3c1   :  { %7127 = vmatpush.bf16.msrb.mxu2 %v8442_v42  ;;  %v3552_v44 = vperm.slane %v2925_v25, %v15341_v60  ;;  %v2927_v7 = vunpack.c.l.b16 %v14648_v33  ;;  %v1486_v21 = vmul.f32 %v12267_v50, %v14535_v34  ;;  %v1485_v59 = vmul.f32 %v12267_v50, %v14537_v18  ;;  %v8755_v23 = vld [vmem:[#allocation2 + $0x6a0] sm:$0xf0] }
 0x3c2   :  { %v3554_v0 = vperm.slane %v2926_v13, %v15344_v30  ;;  %v2782_v46 = vunpack.c.h.b16 %v14643_v17  ;;  %v14671_v42 = vpack.c.bf16 %v1632_v11, %v1631_v45  ;;  %v8758_v36 = vor.u32 %v10687_v41, %v8755_v23  ;;  %v10679_v2 = vld [vmem:[#allocation2 + $0x644] sm:$0xf]  ;;  %v10684_v45 = vld [vmem:[#allocation2 + $0x664] sm:$0xf0] }
 0x3c3   :  { %v2939_v39 = vunpack.c.l.b16 %v1807_v37  ;;  %v1634_v62 = vmul.f32 %v12267_v50, %v1271_v15  ;;  %v1633_v34 = vmul.f32 %v12267_v50, %v1268_v27  ;;  %v8762_v3 = vor.u32 %v10692_v38, %v8761_v61  ;;  %v8723_v48 = vld [vmem:[#allocation2 + $0x660] sm:$0xf0]  ;;  %v10676_v61 = vld [vmem:[#allocation2 + $0x624] sm:$0xf0] }
 0x3c4   :  { %7007 = vmatpush.bf16.msrb.mxu1 %v8790_v19  ;;  %7137 = vmatpush.bf16.msrb.mxu3 %v8794_v52  ;;  %v3273_v18 = vperm.slane %v2781_v8, %v15341_v60  ;;  %v2940_v49 = vunpack.c.h.b16 %v1807_v37  ;;  %v1643_v40 = vmul.f32 %v12267_v50, %v14508_v63  ;;  %v1644_v28 = vmul.f32 %v12267_v50, %v14539_v9 }
 0x3c5   :  { %v3553_v17 = vsel %vm2976_vm7, %v3552_v44, %v3551_v47  ;;  %v2928_v43 = vunpack.c.h.b16 %v14648_v33  ;;  %v3556_v4 = vperm.slane %v2927_v7, %v12390_v29  ;;  %v14683_v25 = vpack.c.bf16 %v1486_v21, %v1485_v59  ;;  %v14685_v15 = vpop.xlane.xlu2 %838  ;;  %v14687_v31 = vpop.xlane.xlu1 %835  ;;  %v10671_v7 = vld [vmem:[#allocation2 + $0x604] sm:$0xf]  ;;  %v8697_v21 = vld [vmem:[#allocation2 + $0x608] sm:$0xf] }
 0x3c6   :  { %v3272_v63 = vsel %vm2972_vm6, %v3271_v51, %v3270_v56  ;;  %v2929_v9 = vunpack.c.l.b16 %v14671_v42  ;;  %v14693_v33 = vsel %vm3012_vm1, %v14639_v53, %v3259_v20  ;;  %v8726_v11 = vor.u32 %v10679_v2, %v8723_v48 }
 0x3c7   :  { %v3275_v27 = vperm.slane %v2782_v46, %v15344_v30  ;;  %v3579_v54 = vperm.slane %v2939_v39, %v15337_v12  ;;  %v1803_v37 = vpack.c.bf16 %v1634_v62, %v1633_v34  ;;  %v8730_v19 = vor.u32 %v10684_v45, %v8729_v6  ;;  %v8691_v12 = vld [vmem:[#allocation2 + $0x620] sm:$0xf0] }
 0x3c8   :  { %7008 = vmatpush.bf16.msrb.mxu1 %v8758_v36  ;;  %v1313_v13 = vpop.xlane.xlu0 %1312  ;;  %7138 = vmatpush.bf16.msrb.mxu3 %v8762_v3  ;;  %v3555_v47 = vsel %vm2980_vm8, %v3554_v0, %v3553_v17  ;;  %v3274_v51 = vsel %vm2976_vm7, %v3273_v18, %v3272_v63  ;;  %v3581_v56 = vperm.slane %v2940_v49, %v15340_v55  ;;  %v2783_v20 = vunpack.c.l.b16 %v14683_v25  ;;  %v15356_v46 = vld [vmem:[#allocation128_spill] sm:$0xff] }
 0x3c9   :  { %v1808_v8 = vpack.c.bf16 %v1644_v28, %v1643_v40  ;;  %v3557_v52 = vsel %vm2984_vm9, %v3556_v4, %v3555_v47  ;;  %v3558_v53 = vperm.slane %v2928_v43, %v12421_v22  ;;  %v2930_v44 = vunpack.c.h.b16 %v14671_v42 }
 0x3ca   :  { %v1645_v59 = vmul.f32 %v12267_v50, %v14572_v10  ;;  %v3560_v41 = vperm.slane %v2929_v9, %v12445_v1  ;;  %v1646_v55 = vmul.f32 %v12267_v50, %v14617_v16  ;;  %v8694_v23 = vor.u32 %v10671_v7, %v8691_v12 }
 0x3cb   :  { %v3276_v0 = vsel %vm2980_vm8, %v3275_v27, %v3274_v51  ;;  %v3580_v42 = vsel %vm2968_vm5, %v3579_v54, %v15356_v46  ;;  %v2931_v36 = vunpack.c.l.b16 %v1803_v37  ;;  %v8698_v38 = vor.u32 %v10676_v61, %v8697_v21  ;;  %v10924_v61 = vld [vmem:[#allocation2 + $0xde4] sm:$0xf0] }
 0x3cc   :  { %7009 = vmatpush.bf16.msrb.mxu1 %v8726_v11  ;;  %7139 = vmatpush.bf16.msrb.mxu3 %v8730_v19  ;;  %v2784_v39 = vunpack.c.h.b16 %v14683_v25  ;;  %v2941_v62 = vunpack.c.l.b16 %v1808_v8  ;;  %v1488_v10 = vmul.f32 %v12267_v50, %v14609_v26  ;;  %v1487_v34 = vmul.f32 %v12267_v50, %v14611_v24 }
 0x3cd   :  { %v3559_v16 = vsel %vm2988_vm10, %v3558_v53, %v3557_v52  ;;  %v3277_v3 = vperm.slane %v2783_v20, %v12390_v29  ;;  %v2942_v18 = vunpack.c.h.b16 %v1808_v8  ;;  %v3562_v49 = vperm.slane %v2930_v44, %v12456_v32  ;;  %v1316_v40 = vpop.xlane.xlu2 %1315  ;;  %v1277_v28 = vpop.xlane.xlu1 %1276  ;;  %v10919_v44 = vld [vmem:[#allocation2 + $0xdc4] sm:$0xf] }
 0x3ce   :  { %v3561_v17 = vsel %vm2992_vm11, %v3560_v41, %v3559_v16  ;;  %v1809_v43 = vpack.c.bf16 %v1646_v55, %v1645_v59  ;;  %v2932_v4 = vunpack.c.h.b16 %v1803_v37  ;;  %v1636_v25 = vmul.f32 %v12267_v50, %v1277_v28  ;;  %v9683_v55 = vld [vmem:[#allocation2 + $0xde0] sm:$0xf0] }
 0x3cf   :  { %v1647_v24 = vmul.f32 %v12267_v50, %v14650_v5  ;;  %v3564_v2 = vperm.slane %v2931_v36, %v15234_v58  ;;  %v1648_v48 = vmul.f32 %v12267_v50, %v1313_v13  ;;  %v3582_v63 = vsel %vm2972_vm6, %v3581_v56, %v3580_v42 }
 0x3d0   :  { %7010 = vmatpush.bf16.msrb.mxu1 %v8694_v23  ;;  %v1274_v26 = vpop.xlane.xlu0 %1273  ;;  %7140 = vmatpush.bf16.msrb.mxu3 %v8698_v38  ;;  %v3279_v9 = vperm.slane %v2784_v39, %v12421_v22  ;;  %v3583_v11 = vperm.slane %v2941_v62, %v15341_v60  ;;  %v1730_v45 = vpack.c.bf16 %v1488_v10, %v1487_v34  ;;  %v2943_v47 = vunpack.c.l.b16 %v1809_v43  ;;  %v9689_v23 = vld [vmem:[#allocation2 + $0xdc8] sm:$0xf] }
 0x3d1   :  { %v1635_v6 = vmul.f32 %v12267_v50, %v1274_v26  ;;  %v3278_v27 = vsel %vm2984_vm9, %v3277_v3, %v3276_v0  ;;  %v1490_v54 = vmul.f32 %v12267_v50, %v14685_v15  ;;  %v1489_v5 = vmul.f32 %v12267_v50, %v14687_v31 }
 0x3d2   :  { %v3585_v13 = vperm.slane %v2942_v18, %v15344_v30  ;;  %v3563_v19 = vsel %vm2996_vm12, %v3562_v49, %v3561_v17  ;;  %v3566_v51 = vperm.slane %v2932_v4, %v15217_v14  ;;  %v14739_v60 = vpack.c.bf16 %v1648_v48, %v1647_v24  ;;  %v9657_v48 = vld [vmem:[#allocation2 + $0xd88] sm:$0xf] }
 0x3d3   :  { %v1804_v37 = vpack.c.bf16 %v1636_v25, %v1635_v6  ;;  %v3565_v56 = vsel %vm3000_vm13, %v3564_v2, %v3563_v19  ;;  %v3280_v53 = vsel %vm2988_vm10, %v3279_v9, %v3278_v27  ;;  %v3584_v15 = vsel %vm2976_vm7, %v3583_v11, %v3582_v63  ;;  %v9651_v2 = vld [vmem:[#allocation2 + $0xda0] sm:$0xf0]  ;;  %v10916_v6 = vld [vmem:[#allocation2 + $0xda4] sm:$0xf0] }
 0x3d4   :  { %v2785_v20 = vunpack.c.l.b16 %v1730_v45  ;;  %v2786_v31 = vunpack.c.h.b16 %v1730_v45  ;;  %v14743_v7 = vpack.c.bf16 %v1490_v54, %v1489_v5  ;;  %v1649_v30 = vmul.f32 %v12267_v50, %v1316_v40 }
 0x3d5   :  { %v2933_v8 = vunpack.c.l.b16 %v1804_v37  ;;  %v2934_v52 = vunpack.c.h.b16 %v1804_v37  ;;  %v845_v59 = vpop.xlane.xlu2 %844  ;;  %v842_v41 = vpop.xlane.xlu1 %841  ;;  %v2944_v0 = vunpack.c.h.b16 %v1809_v43  ;;  %v3567_v46 = vsel %vm3004_vm14, %v3566_v51, %v3565_v56  ;;  %v10908_v51 = vld [vmem:[#allocation2 + $0xd64] sm:$0xf0] }
 0x3d6   :  { %v1492_v42 = vmul.f32 %v12267_v50, %v845_v59  ;;  %v1491_v36 = vmul.f32 %v12267_v50, %v842_v41  ;;  %v3587_v39 = vperm.slane %v2943_v47, %v12390_v29  ;;  %v2945_v62 = vunpack.c.l.b16 %v14739_v60  ;;  %v10911_v29 = vld [vmem:[#allocation2 + $0xd84] sm:$0xf] }
 0x3d7   :  { %v3568_v12 = vperm.slane %v2933_v8, %v12583_v57  ;;  %v3570_v21 = vperm.slane %v2934_v52, %v12586_v35  ;;  %v3281_v16 = vperm.slane %v2785_v20, %v12445_v1  ;;  %v9686_v18 = vor.u32 %v10919_v44, %v9683_v55  ;;  %v9619_v47 = vld [vmem:[#allocation2 + $0xd60] sm:$0xf0] }
 0x3d8   :  { %v1319_v38 = vpop.xlane.xlu0 %1318  ;;  %v9690_v49 = vor.u32 %v10924_v61, %v9689_v23  ;;  %v2787_v40 = vunpack.c.l.b16 %v14743_v7  ;;  %vm15357_vm3 = vcmask 1041409   ;;  %v1732_v17 = vpack.c.bf16 %v1492_v42, %v1491_v36  ;;  %v10895_v59 = vld [vmem:[#allocation2 + $0xd04] sm:$0xf]  ;;  %v9593_v61 = vld [vmem:[#allocation2 + $0xd08] sm:$0xf] }
 0x3d9   :  { %v3569_v10 = vsel %vm3008_vm15, %v3568_v12, %v3567_v46  ;;  %v1650_v34 = vmul.f32 %v12267_v50, %v1319_v38  ;;  %v3586_v4 = vsel %vm2980_vm8, %v3585_v13, %v3584_v15  ;;  %v3589_v25 = vperm.slane %v2944_v0, %v12421_v22  ;;  %v10903_v22 = vld [vmem:[#allocation2 + $0xd44] sm:$0xf]  ;;  %v10900_v0 = vld [vmem:[#allocation2 + $0xd24] sm:$0xf0]  ;;  %vm15358_vm5 = vmmov %vm15357_vm3 }
 0x3da   :  { %v3571_v3 = vsel %vm3012_vm1, %v3570_v21, %v3569_v10  ;;  %v2946_v26 = vunpack.c.h.b16 %v14739_v60  ;;  %v3283_v63 = vperm.slane %v2786_v31, %v12456_v32  ;;  %v3588_v9 = vsel %vm2984_vm9, %v3587_v39, %v3586_v4  ;;  %v9587_v23 = vld [vmem:[#allocation2 + $0xd20] sm:$0xf0] }
 0x3db   :  { %v3612_v28 = vsel %vm15357_vm3, %v3571_v3, %v14693_v33  ;;  %v1811_v43 = vpack.c.bf16 %v1650_v34, %v1649_v30  ;;  %v3591_v33 = vperm.slane %v2945_v62, %v12445_v1  ;;  %v3282_v45 = vsel %vm2992_vm11, %v3281_v16, %v3280_v53  ;;  %v9625_v1 = vld [vmem:[#allocation2 + $0xd48] sm:$0xf] }
 0x3dc   :  { %v14763_v24 = vpack.c.b16 %v3612_v28, %v3612_v28  ;;  %v2788_v27 = vunpack.c.h.b16 %v14743_v7  ;;  %v3285_v54 = vperm.slane %v2787_v40, %v15234_v58  ;;  %v2789_v5 = vunpack.c.l.b16 %v1732_v17  ;;  %v10983_v40 = vld [vmem:[#allocation2 + $0xfc4] sm:$0xf] }
 0x3dd   :  { %v2947_v11 = vunpack.c.l.b16 %v1811_v43  ;;  %v1325_v37 = vpop.xlane.xlu1 %1324  ;;  %v9654_v13 = vor.u32 %v10911_v29, %v9651_v2  ;;  %v9658_v19 = vor.u32 %v10916_v6, %v9657_v48  ;;  %v3590_v56 = vsel %vm2988_vm10, %v3589_v25, %v3588_v9  ;;  %v9939_v28 = vld [vmem:[#allocation2 + $0xfe0] sm:$0xf0]  ;;  %v9561_v29 = vld [vmem:[#allocation2 + $0xcc8] sm:$0xf] }
 0x3de   :  { %6946 = vmatmul.bf16.vlgmr.msra.gmra.mxu0 %v14763_v24  ;;  %7076 = vmatmul.bf16.vlgmr.msra.gmra.mxu2 %v14763_v24  ;;  %v3593_v60 = vperm.slane %v2946_v26, %v12456_v32  ;;  %v2948_v8 = vunpack.c.h.b16 %v1811_v43  ;;  %v1652_v52 = vmul.f32 %v12267_v50, %v1325_v37  ;;  %v3284_v15 = vsel %vm2996_vm12, %v3283_v63, %v3282_v45  ;;  %v9945_v26 = vld [vmem:[#allocation2 + $0xfc8] sm:$0xf]  ;;  %v10879_v9 = vld [vmem:[#allocation2 + $0xc84] sm:$0xf] }
 0x3df   :  { %7042 = vmatpush.bf16.msra.mxu0 %v9686_v18  ;;  %7172 = vmatpush.bf16.msra.mxu2 %v9690_v49  ;;  %v3592_v20 = vsel %vm2992_vm11, %v3591_v33, %v3590_v56  ;;  %v3595_v31 = vperm.slane %v2947_v11, %v15234_v58  ;;  %v3287_v7 = vperm.slane %v2788_v27, %v15217_v14  ;;  %v2790_v30 = vunpack.c.h.b16 %v1732_v17  ;;  %v10887_v18 = vld [vmem:[#allocation2 + $0xcc4] sm:$0xf]  ;;  %v15359_v11 = vld [vmem:[#allocation27_spill] sm:$0xff] }
 0x3e0   :  { %v1322_v53 = vpop.xlane.xlu0 %1321  ;;  %v9622_v12 = vor.u32 %v10903_v22, %v9619_v47  ;;  %v9626_v21 = vor.u32 %v10908_v51, %v9625_v1  ;;  %v3286_v32 = vsel %vm3000_vm13, %v3285_v54, %v3284_v15  ;;  %v3289_v41 = vperm.slane %v2789_v5, %v12583_v57  ;;  %v9555_v49 = vld [vmem:[#allocation2 + $0xce0] sm:$0xf0]  ;;  %v10884_v47 = vld [vmem:[#allocation2 + $0xca4] sm:$0xf0] }
 0x3e1   :  { %v1651_v44 = vmul.f32 %v12267_v50, %v1322_v53  ;;  %v3594_v58 = vsel %vm2996_vm12, %v3593_v60, %v3592_v20  ;;  %v3597_v50 = vperm.slane %v2948_v8, %v15217_v14  ;;  %v3288_v38 = vsel %vm3004_vm14, %v3287_v7, %v3286_v32  ;;  %v9523_v27 = vld [vmem:[#allocation2 + $0xca0] sm:$0xf0]  ;;  %v9913_v1 = vld [vmem:[#allocation2 + $0xf88] sm:$0xf] }
 0x3e2   :  { %v3596_v46 = vsel %vm3000_vm13, %v3595_v31, %v3594_v58  ;;  %v3291_v39 = vperm.slane %v2790_v30, %v12586_v35  ;;  %v9590_v62 = vor.u32 %v10895_v59, %v9587_v23  ;;  %v9594_v10 = vor.u32 %v10900_v0, %v9593_v61  ;;  %v10975_v22 = vld [vmem:[#allocation2 + $0xf84] sm:$0xf]  ;;  %v10980_v51 = vld [vmem:[#allocation2 + $0xfa4] sm:$0xf0] }
 0x3e3   :  { %v1812_v55 = vpack.c.bf16 %v1652_v52, %v1651_v44  ;;  %7043 = vmatpush.bf16.msra.mxu0 %v9654_v13  ;;  %7173 = vmatpush.bf16.msra.mxu2 %v9658_v19  ;;  %v3290_v34 = vsel %vm3008_vm15, %v3289_v41, %v3288_v38  ;;  %v3598_v14 = vsel %vm3004_vm14, %v3597_v50, %v3596_v46  ;;  %v9907_v54 = vld [vmem:[#allocation2 + $0xfa0] sm:$0xf0]  ;;  %v9529_v13 = vld [vmem:[#allocation2 + $0xc88] sm:$0xf]  ;;  %vm7888_vm6 = vcmask 1041408  }
 0x3e4   :  { %v3292_v4 = vsel %vm3012_vm1, %v3291_v39, %v3290_v34  ;;  %v9558_v6 = vor.u32 %v10887_v18, %v9555_v49  ;;  %v9942_v63 = vor.u32 %v10983_v40, %v9939_v28  ;;  %v15360_v19 = vld [vmem:[#allocation17_spill] sm:$0xff]  ;;  %v9526_v56 = vor.u32 %v10879_v9, %v9523_v27  ;;  %v10871_v8 = vld [vmem:[#allocation2 + $0xc44] sm:$0xf] }
 0x3e5   :  { %v2949_v42 = vunpack.c.l.b16 %v1812_v55  ;;  %v2950_v36 = vunpack.c.h.b16 %v1812_v55  ;;  %v9910_v60 = vor.u32 %v10975_v22, %v9907_v54  ;;  %v9491_v52 = vld [vmem:[#allocation2 + $0xc60] sm:$0xf0]  ;;  %v9530_v31 = vor.u32 %v10884_v47, %v9529_v13  ;;  %v9497_v7 = vld [vmem:[#allocation2 + $0xc48] sm:$0xf] }
 0x3e6   :  { %v14793_v43 = vpop.f32.mrf.mxu2  ;;  %v10967_v53 = vld [vmem:[#allocation2 + $0xf44] sm:$0xf]  ;;  %v9914_v44 = vor.u32 %v10980_v51, %v9913_v1  ;;  %v10876_v30 = vld [vmem:[#allocation2 + $0xc64] sm:$0xf0]  ;;  %v9494_v32 = vor.u32 %v10871_v8, %v9491_v52  ;;  %v10520_v8 = vld [vmem:[#allocation2 + $0x14c] sm:$0xf] }
 0x3e7   :  { %v3599_v16 = vperm.slane %v2949_v42, %v12583_v57  ;;  %v3601_v3 = vperm.slane %v2950_v36, %v12586_v35  ;;  %7044 = vmatpush.bf16.msra.mxu0 %v9622_v12  ;;  %7174 = vmatpush.bf16.msra.mxu2 %v9626_v21  ;;  %v10892_v57 = vld [vmem:[#allocation2 + $0xce4] sm:$0xf0]  ;;  %v9875_v15 = vld [vmem:[#allocation2 + $0xf60] sm:$0xf0]  ;;  %v9498_v58 = vor.u32 %v10876_v30, %v9497_v7  ;;  %v8091_v52 = vld [vmem:[#allocation2 + $0x168] sm:$0xf0] }
 0x3e8   :  { %v10988_v35 = vld [vmem:[#allocation2 + $0xfe4] sm:$0xf0]  ;;  %v9562_v5 = vor.u32 %v10892_v57, %v9561_v29  ;;  %v9878_v41 = vor.u32 %v10967_v53, %v9875_v15  ;;  %v10863_v55 = vld [vmem:[#allocation2 + $0xc04] sm:$0xf]  ;;  %vm7890_vm7 = vcmask 1045508   ;;  %vm7892_vm8 = vcmask 1043456  }
 0x3e9   :  { %v3600_v17 = vsel %vm3008_vm15, %v3599_v16, %v3598_v14  ;;  %v6895_v48 = vpop.f32.mrf.mxu0  ;;  %v9946_v37 = vor.u32 %v10988_v35, %v9945_v26  ;;  %v9881_v12 = vld [vmem:[#allocation2 + $0xf48] sm:$0xf]  ;;  %v9459_v23 = vld [vmem:[#allocation2 + $0xc20] sm:$0xf0]  ;;  %v10536_v16 = vld [vmem:[#allocation2 + $0x1cc] sm:$0xf] }
 0x3ea   :  { %v3602_v25 = vsel %vm3012_vm1, %v3601_v3, %v3600_v17  ;;  %v14801_v45 = vadd.f32 %v6895_v48, %v15359_v11  ;;  %v10972_v21 = vld [vmem:[#allocation2 + $0xf64] sm:$0xf0]  ;;  %v10959_v61 = vld [vmem:[#allocation2 + $0xf04] sm:$0xf]  ;;  %v8155_v3 = vld [vmem:[#allocation2 + $0x1e8] sm:$0xf0] }
 0x3eb   :  { %v3613_v2 = vsel %vm15358_vm5, %v3602_v25, %v3292_v4  ;;  %7045 = vmatpush.bf16.msra.mxu0 %v9590_v62  ;;  %7175 = vmatpush.bf16.msra.mxu2 %v9594_v10  ;;  %v9843_v0 = vld [vmem:[#allocation2 + $0xf20] sm:$0xf0]  ;;  %v9882_v50 = vor.u32 %v10972_v21, %v9881_v12  ;;  %v9465_v46 = vld [vmem:[#allocation2 + $0xc08] sm:$0xf]  ;;  %v9462_v10 = vor.u32 %v10863_v55, %v9459_v23 }
 0x3ec   :  { %v14798_v33 = vpack.c.b16 %v3613_v2, %v3613_v2  ;;  %v8153_v42 = vld [vmem:[#allocation2 + $0x1c8] sm:$0xf]  ;;  %v9846_v34 = vor.u32 %v10959_v61, %v9843_v0  ;;  %v10951_v49 = vld [vmem:[#allocation2 + $0xec4] sm:$0xf]  ;;  %v8158_v25 = vor.u32 %v10536_v16, %v8155_v3  ;;  %v8094_v12 = vor.u32 %v10520_v8, %v8091_v52  ;;  %v10512_v0 = vld [vmem:[#allocation2 + $0x10c] sm:$0xf] }
 0x3ed   :  { %v10540_v36 = vld [vmem:[#allocation2 + $0x1e4] sm:$0xf0]  ;;  %v9811_v40 = vld [vmem:[#allocation2 + $0xee0] sm:$0xf0] }
 0x3ee   :  { %6959 = vmatmul.bf16.vlgmr.msra.gmra.mxu1 %v14798_v33  ;;  %6998 = vmatmul.bf16.vlgmr.msrb.gmra.mxu0 %v15360_v19  ;;  %v6923_v20 = vpop.f32.mrf.mxu2  ;;  %v10868_v38 = vld [vmem:[#allocation2 + $0xc24] sm:$0xf0]  ;;  %v8154_v14 = vor.u32 %v10540_v36, %v8153_v42  ;;  %v9814_v48 = vor.u32 %v10951_v49, %v9811_v40  ;;  %v10943_v11 = vld [vmem:[#allocation2 + $0xe84] sm:$0xf]  ;;  %v8027_v40 = vld [vmem:[#allocation2 + $0xe8] sm:$0xf0] }
 0x3ef   :  { %7046 = vmatpush.bf16.msra.mxu0 %v9558_v6  ;;  %7055 = vmatpush.bf16.msra.mxu1 %v9942_v63  ;;  %v9849_v39 = vld [vmem:[#allocation2 + $0xf08] sm:$0xf]  ;;  %v9466_v17 = vor.u32 %v10868_v38, %v9465_v46  ;;  %v10528_v6 = vld [vmem:[#allocation2 + $0x18c] sm:$0xf]  ;;  %v9779_v27 = vld [vmem:[#allocation2 + $0xea0] sm:$0xf0] }
 0x3f0   :  { %7089 = vmatmul.bf16.vlgmr.msra.gmra.mxu3 %v14798_v33  ;;  %7128 = vmatmul.bf16.vlgmr.msrb.gmra.mxu2 %v15360_v19  ;;  %v10964_v62 = vld [vmem:[#allocation2 + $0xf24] sm:$0xf0]  ;;  %v8123_v63 = vld [vmem:[#allocation2 + $0x1a8] sm:$0xf0]  ;;  %v15361_v13 = vld [vmem:[#allocation16_spill] sm:$0xff] }
 0x3f1   :  { %7176 = vmatpush.bf16.msra.mxu2 %v9562_v5  ;;  %7185 = vmatpush.bf16.msra.mxu3 %v9946_v37  ;;  %v6897_v59 = vpop.f32.mrf.mxu0  ;;  %v9850_v29 = vor.u32 %v10964_v62, %v9849_v39  ;;  %v9817_v4 = vld [vmem:[#allocation2 + $0xec8] sm:$0xf]  ;;  %v8126_v47 = vor.u32 %v10528_v6, %v8123_v63  ;;  %v10935_v15 = vld [vmem:[#allocation2 + $0xe44] sm:$0xf] }
 0x3f2   :  { %v10956_v57 = vld [vmem:[#allocation2 + $0xee4] sm:$0xf0]  ;;  %v9715_v46 = vld [vmem:[#allocation2 + $0xe20] sm:$0xf0] }
 0x3f3   :  { %7047 = vmatpush.bf16.msra.mxu0 %v9526_v56  ;;  %7056 = vmatpush.bf16.msra.mxu1 %v9910_v60  ;;  %v8121_v26 = vld [vmem:[#allocation2 + $0x188] sm:$0xf]  ;;  %v9818_v22 = vor.u32 %v10956_v57, %v9817_v4  ;;  %v15362_v60 = vld [vmem:[#allocation28_spill] sm:$0xff] }
 0x3f4   :  { %v10532_v35 = vld [vmem:[#allocation2 + $0x1a4] sm:$0xf0] }
 0x3f5   :  { %7177 = vmatpush.bf16.msra.mxu2 %v9530_v31  ;;  %7186 = vmatpush.bf16.msra.mxu3 %v9914_v44  ;;  %v6934_v18 = vpop.f32.mrf.mxu3  ;;  %v8122_v54 = vor.u32 %v10532_v35, %v8121_v26  ;;  %v9785_v5 = vld [vmem:[#allocation2 + $0xe88] sm:$0xf] }
 0x3f6   :  { %v14807_v28 = vpop.f32.mrf.mxu2  ;;  %v10948_v1 = vld [vmem:[#allocation2 + $0xea4] sm:$0xf0] }
 0x3f7   :  { %7048 = vmatpush.bf16.msra.mxu0 %v9494_v32  ;;  %7057 = vmatpush.bf16.msra.mxu1 %v9878_v41  ;;  %v8089_v51 = vld [vmem:[#allocation2 + $0x148] sm:$0xf]  ;;  %v9786_v44 = vor.u32 %v10948_v1, %v9785_v5  ;;  %v11127_v41 = vld [vmem:[#allocation5] sm:$0xff]  ;;  %v8379_v5 = vld [vmem:[#allocation2 + $0x3a8] sm:$0xf0] }
 0x3f8   :  { %v6908_v2 = vpop.f32.mrf.mxu1  ;;  %v10524_v56 = vld [vmem:[#allocation2 + $0x164] sm:$0xf0]  ;;  %v2456_v55 = vperm.slane %v11127_v41, 1 }
 0x3f9   :  { %7178 = vmatpush.bf16.msra.mxu2 %v9498_v58  ;;  %7187 = vmatpush.bf16.msra.mxu3 %v9882_v50  ;;  %v6909_v9 = vadd.f32 %v6908_v2, %v14801_v45  ;;  %v9782_v45 = vor.u32 %v10943_v11, %v9779_v27  ;;  %v8090_v7 = vor.u32 %v10524_v56, %v8089_v51  ;;  %v9753_v30 = vld [vmem:[#allocation2 + $0xe48] sm:$0xf]  ;;  %v8059_v58 = vld [vmem:[#allocation2 + $0x128] sm:$0xf0]  ;;  %v10927_v50 = vld [vmem:[#allocation2 + $0xe04] sm:$0xf] }
 0x3fa   :  { %v10940_v21 = vld [vmem:[#allocation2 + $0xe64] sm:$0xf0]  ;;  %v9718_v49 = vor.u32 %v10927_v50, %v9715_v46  ;;  %v10496_v27 = vld [vmem:[#allocation2 + $0x8c] sm:$0xf] }
 0x3fb   :  { %7049 = vmatpush.bf16.msra.mxu0 %v9462_v10  ;;  %7058 = vmatpush.bf16.msra.mxu1 %v9846_v34  ;;  %v6922_v37 = vadd.f32 %v14793_v43, %v6909_v9  ;;  %v9747_v43 = vld [vmem:[#allocation2 + $0xe60] sm:$0xf0]  ;;  %v8057_v59 = vld [vmem:[#allocation2 + $0x108] sm:$0xf]  ;;  %v9754_v36 = vor.u32 %v10940_v21, %v9753_v30  ;;  %v8062_v34 = vor.u32 %v10512_v0, %v8059_v58  ;;  %v10480_v0 = vld [vmem:[#allocation2 + $0xc] sm:$0xf] }
 0x3fc   :  { %v10516_v32 = vld [vmem:[#allocation2 + $0x124] sm:$0xf0]  ;;  %v9750_v61 = vor.u32 %v10935_v15, %v9747_v43  ;;  %v7963_v43 = vld [vmem:[#allocation2 + $0x68] sm:$0xf0] }
 0x3fd   :  { %7179 = vmatpush.bf16.msra.mxu2 %v9466_v17  ;;  %7188 = vmatpush.bf16.msra.mxu3 %v9850_v29  ;;  %v6936_v53 = vpop.f32.mrf.mxu3  ;;  %v14815_v20 = vadd.f32 %v6934_v18, %v6922_v37  ;;  %v9721_v42 = vld [vmem:[#allocation2 + $0xe08] sm:$0xf]  ;;  %v8058_v38 = vor.u32 %v10516_v32, %v8057_v59  ;;  %v10504_v18 = vld [vmem:[#allocation2 + $0xcc] sm:$0xf] }
 0x3fe   :  { %7011 = vmatmul.bf16.vlgmr.msrb.gmra.mxu1 %v15361_v13  ;;  %7050 = vmatmul.bf16.vlgmr.msra.gmra.mxu0 %v15362_v60  ;;  %v6975_v31 = vpop.f32.mrf.mxu2  ;;  %v10932_v39 = vld [vmem:[#allocation2 + $0xe24] sm:$0xf0]  ;;  %v10600_v17 = vld [vmem:[#allocation2 + $0x3cc] sm:$0xf]  ;;  %v8030_v63 = vor.u32 %v10504_v18, %v8027_v40 }
 0x3ff   :  { %7094 = vmatpush.bf16.msrb.mxu0 %v8154_v14  ;;  %7059 = vmatpush.bf16.msra.mxu1 %v9814_v48  ;;  %v8409_v62 = vld [vmem:[#allocation2 + $0x3c8] sm:$0xf]  ;;  %v6974_v14 = vadd.f32 %v14807_v28, %v2456_v55  ;;  %v8411_v29 = vld [vmem:[#allocation2 + $0x3e8] sm:$0xf0]  ;;  %v9722_v35 = vor.u32 %v10932_v39, %v9721_v42 }
 0x400   :  { %7141 = vmatmul.bf16.vlgmr.msrb.gmra.mxu3 %v15361_v13  ;;  %7180 = vmatmul.bf16.vlgmr.msra.gmra.mxu2 %v15362_v60  ;;  %v6910_v23 = vpop.f32.mrf.mxu1  ;;  %v10604_v10 = vld [vmem:[#allocation2 + $0x3e4] sm:$0xf0]  ;;  %v8414_v28 = vor.u32 %v10600_v17, %v8411_v29  ;;  %v10488_v53 = vld [vmem:[#allocation2 + $0x4c] sm:$0xf] }
 0x401   :  { %7224 = vmatpush.bf16.msrb.mxu2 %v8158_v25  ;;  %7189 = vmatpush.bf16.msra.mxu3 %v9818_v22  ;;  %v8025_v16 = vld [vmem:[#allocation2 + $0xc8] sm:$0xf]  ;;  %v8410_v25 = vor.u32 %v10604_v10, %v8409_v62  ;;  %v7995_v22 = vld [vmem:[#allocation2 + $0xa8] sm:$0xf0]  ;;  %v7966_v55 = vor.u32 %v10488_v53, %v7963_v43 }
 0x402   :  { %v10508_v3 = vld [vmem:[#allocation2 + $0xe4] sm:$0xf0]  ;;  %v7998_v56 = vor.u32 %v10496_v27, %v7995_v22  ;;  %v10584_v31 = vld [vmem:[#allocation2 + $0x34c] sm:$0xf] }
 0x403   :  { %7095 = vmatpush.bf16.msrb.mxu0 %v8122_v54  ;;  %7060 = vmatpush.bf16.msra.mxu1 %v9782_v45  ;;  %v8026_v2 = vor.u32 %v10508_v3, %v8025_v16  ;;  %v8377_v48 = vld [vmem:[#allocation2 + $0x388] sm:$0xf]  ;;  %v10592_v54 = vld [vmem:[#allocation2 + $0x38c] sm:$0xf] }
 0x404   :  { %v10596_v6 = vld [vmem:[#allocation2 + $0x3a4] sm:$0xf0]  ;;  %v8382_v45 = vor.u32 %v10592_v54, %v8379_v5  ;;  %v7931_v58 = vld [vmem:[#allocation2 + $0x28] sm:$0xf0]  ;;  %v15364_v5 = vld [vmem:[#allocation15_spill] sm:$0xff] }
 0x405   :  { %7225 = vmatpush.bf16.msrb.mxu2 %v8126_v47  ;;  %7190 = vmatpush.bf16.msra.mxu3 %v9786_v44  ;;  %v6986_v4 = vpop.f32.mrf.mxu3  ;;  %v7993_v9 = vld [vmem:[#allocation2 + $0x88] sm:$0xf]  ;;  %v8378_v37 = vor.u32 %v10596_v6, %v8377_v48  ;;  %v8347_v44 = vld [vmem:[#allocation2 + $0x368] sm:$0xf0]  ;;  %v7934_v3 = vor.u32 %v10480_v0, %v7931_v58 }
 0x406   :  { %v14818_v57 = vadd.f32 %v6986_v4, %v6974_v14  ;;  %v10500_v11 = vld [vmem:[#allocation2 + $0xa4] sm:$0xf0]  ;;  %v8350_v23 = vor.u32 %v10584_v31, %v8347_v44  ;;  %v10576_v50 = vld [vmem:[#allocation2 + $0x30c] sm:$0xf] }
 0x407   :  { %7096 = vmatpush.bf16.msrb.mxu0 %v8090_v7  ;;  %7061 = vmatpush.bf16.msra.mxu1 %v9750_v61  ;;  %v14820_v26 = vpop.f32.mrf.mxu2  ;;  %v7994_v47 = vor.u32 %v10500_v11, %v7993_v9  ;;  %v8345_v1 = vld [vmem:[#allocation2 + $0x348] sm:$0xf]  ;;  %v8315_v46 = vld [vmem:[#allocation2 + $0x328] sm:$0xf0] }
 0x408   :  { %v10588_v51 = vld [vmem:[#allocation2 + $0x364] sm:$0xf0]  ;;  %v10792_v39 = vld [vmem:[#allocation2 + $0x9cc] sm:$0xf]  ;;  %v8318_v18 = vor.u32 %v10576_v50, %v8315_v46 }
 0x409   :  { %7226 = vmatpush.bf16.msrb.mxu2 %v8094_v12  ;;  %7191 = vmatpush.bf16.msra.mxu3 %v9754_v36  ;;  %v7961_v8 = vld [vmem:[#allocation2 + $0x48] sm:$0xf]  ;;  %v8346_v30 = vor.u32 %v10588_v51, %v8345_v1  ;;  %v9179_v62 = vld [vmem:[#allocation2 + $0x9e8] sm:$0xf0] }
 0x40a   :  { %v10492_v52 = vld [vmem:[#allocation2 + $0x64] sm:$0xf0]  ;;  %v10568_v40 = vld [vmem:[#allocation2 + $0x2cc] sm:$0xf] }
 0x40b   :  { %7097 = vmatpush.bf16.msrb.mxu0 %v8058_v38  ;;  %7062 = vmatpush.bf16.msra.mxu1 %v9718_v49  ;;  %v15363_v15 = vld [vmem:[#allocation125_spill] sm:$0xff]  ;;  %v7962_v21 = vor.u32 %v10492_v52, %v7961_v8  ;;  %v9182_v49 = vor.u32 %v10792_v39, %v9179_v62 }
 0x40c   :  { %v7929_v59 = vld [vmem:[#allocation2 + $0x8] sm:$0xf]  ;;  %v8283_v17 = vld [vmem:[#allocation2 + $0x2e8] sm:$0xf0] }
 0x40d   :  { %7227 = vmatpush.bf16.msrb.mxu2 %v8062_v34  ;;  %7192 = vmatpush.bf16.msra.mxu3 %v9722_v35  ;;  %v6988_v7 = vpop.f32.mrf.mxu3  ;;  %v8313_v32 = vld [vmem:[#allocation2 + $0x308] sm:$0xf]  ;;  %v9147_v48 = vld [vmem:[#allocation2 + $0x9a8] sm:$0xf0] }
 0x40e   :  { %7063 = vmatmul.bf16.vlgmr.msra.gmra.mxu1 %v15363_v15  ;;  %v10580_v41 = vld [vmem:[#allocation2 + $0x324] sm:$0xf0]  ;;  %v10560_v27 = vld [vmem:[#allocation2 + $0x28c] sm:$0xf] }
 0x40f   :  { %7107 = vmatpush.bf16.msrb.mxu1 %v8410_v25  ;;  %7098 = vmatpush.bf16.msrb.mxu0 %v8026_v2  ;;  %v7027_v12 = vpop.f32.mrf.mxu2  ;;  %v10484_v61 = vld [vmem:[#allocation2 + $0x24] sm:$0xf0]  ;;  %v8314_v36 = vor.u32 %v10580_v41, %v8313_v32  ;;  %v10784_v2 = vld [vmem:[#allocation2 + $0x98c] sm:$0xf] }
 0x410   :  { %7193 = vmatmul.bf16.vlgmr.msra.gmra.mxu3 %v15363_v15  ;;  %v9177_v42 = vld [vmem:[#allocation2 + $0x9c8] sm:$0xf]  ;;  %v7930_v10 = vor.u32 %v10484_v61, %v7929_v59  ;;  %v9150_v11 = vor.u32 %v10784_v2, %v9147_v48  ;;  %v8251_v22 = vld [vmem:[#allocation2 + $0x2a8] sm:$0xf0] }
 0x411   :  { %7228 = vmatpush.bf16.msrb.mxu2 %v8030_v63  ;;  %7237 = vmatpush.bf16.msrb.mxu3 %v8414_v28  ;;  %v10796_v38 = vld [vmem:[#allocation2 + $0x9e4] sm:$0xf0]  ;;  %v8286_v28 = vor.u32 %v10568_v40, %v8283_v17  ;;  %v10776_v1 = vld [vmem:[#allocation2 + $0x94c] sm:$0xf]  ;;  %v8254_v8 = vor.u32 %v10560_v27, %v8251_v22 }
 0x412   :  { %v8281_v34 = vld [vmem:[#allocation2 + $0x2c8] sm:$0xf]  ;;  %v9178_v14 = vor.u32 %v10796_v38, %v9177_v42  ;;  %v9115_v51 = vld [vmem:[#allocation2 + $0x968] sm:$0xf0] }
 0x413   :  { %7108 = vmatpush.bf16.msrb.mxu1 %v8378_v37  ;;  %7099 = vmatpush.bf16.msrb.mxu0 %v7994_v47  ;;  %v10572_v16 = vld [vmem:[#allocation2 + $0x2e4] sm:$0xf0]  ;;  %v9118_v53 = vor.u32 %v10776_v1, %v9115_v51  ;;  %v10552_v43 = vld [vmem:[#allocation2 + $0x24c] sm:$0xf] }
 0x414   :  { %v9145_v29 = vld [vmem:[#allocation2 + $0x988] sm:$0xf]  ;;  %v8282_v25 = vor.u32 %v10572_v16, %v8281_v34  ;;  %v8219_v31 = vld [vmem:[#allocation2 + $0x268] sm:$0xf0] }
 0x415   :  { %7229 = vmatpush.bf16.msrb.mxu2 %v7998_v56  ;;  %7238 = vmatpush.bf16.msrb.mxu3 %v8382_v45  ;;  %v14824_v4 = vpop.f32.mrf.mxu3  ;;  %v10788_v35 = vld [vmem:[#allocation2 + $0x9a4] sm:$0xf0]  ;;  %v9083_v59 = vld [vmem:[#allocation2 + $0x928] sm:$0xf0] }
 0x416   :  { %v8249_v6 = vld [vmem:[#allocation2 + $0x288] sm:$0xf]  ;;  %v9146_v9 = vor.u32 %v10788_v35, %v9145_v29  ;;  %v10544_v50 = vld [vmem:[#allocation2 + $0x20c] sm:$0xf] }
 0x417   :  { %7109 = vmatpush.bf16.msrb.mxu1 %v8346_v30  ;;  %7100 = vmatpush.bf16.msrb.mxu0 %v7962_v21  ;;  %v10564_v63 = vld [vmem:[#allocation2 + $0x2a4] sm:$0xf0]  ;;  %v10768_v21 = vld [vmem:[#allocation2 + $0x90c] sm:$0xf] }
 0x418   :  { %v9113_v54 = vld [vmem:[#allocation2 + $0x948] sm:$0xf]  ;;  %v8250_v37 = vor.u32 %v10564_v63, %v8249_v6  ;;  %v9086_v58 = vor.u32 %v10768_v21, %v9083_v59  ;;  %v8187_v46 = vld [vmem:[#allocation2 + $0x228] sm:$0xf0] }
 0x419   :  { %7230 = vmatpush.bf16.msrb.mxu2 %v7966_v55  ;;  %7239 = vmatpush.bf16.msrb.mxu3 %v8350_v23  ;;  %v10780_v47 = vld [vmem:[#allocation2 + $0x964] sm:$0xf0]  ;;  %v8222_v55 = vor.u32 %v10552_v43, %v8219_v31  ;;  %v10760_v39 = vld [vmem:[#allocation2 + $0x8cc] sm:$0xf] }
 0x41a   :  { %v8217_v56 = vld [vmem:[#allocation2 + $0x248] sm:$0xf]  ;;  %v9114_v52 = vor.u32 %v10780_v47, %v9113_v54  ;;  %v9051_v62 = vld [vmem:[#allocation2 + $0x8e8] sm:$0xf0]  ;;  %v15365_v54 = vld [vmem:[#allocation127_spill] sm:$0xff] }
 0x41b   :  { %7110 = vmatpush.bf16.msrb.mxu1 %v8314_v36  ;;  %7101 = vmatpush.bf16.msrb.mxu0 %v7930_v10  ;;  %v10556_v45 = vld [vmem:[#allocation2 + $0x264] sm:$0xf0]  ;;  %v10856_v34 = vld [vmem:[#allocation2 + $0xbcc] sm:$0xf]  ;;  %v9054_v40 = vor.u32 %v10760_v39, %v9051_v62 }
 0x41c   :  { %v9081_v44 = vld [vmem:[#allocation2 + $0x908] sm:$0xf]  ;;  %v8218_v30 = vor.u32 %v10556_v45, %v8217_v56  ;;  %v9435_v16 = vld [vmem:[#allocation2 + $0xbe8] sm:$0xf0] }
 0x41d   :  { %7231 = vmatpush.bf16.msrb.mxu2 %v7934_v3  ;;  %7240 = vmatpush.bf16.msrb.mxu3 %v8318_v18  ;;  %v7040_v7 = vpop.f32.mrf.mxu3  ;;  %v10772_v12 = vld [vmem:[#allocation2 + $0x924] sm:$0xf0]  ;;  %v8190_v3 = vor.u32 %v10544_v50, %v8187_v46  ;;  %v9438_v29 = vor.u32 %v10856_v34, %v9435_v16  ;;  %v10752_v35 = vld [vmem:[#allocation2 + $0x88c] sm:$0xf] }
 0x41e   :  { %7102 = vmatmul.bf16.vlgmr.msrb.gmra.mxu0 %v15364_v5  ;;  %v8185_v32 = vld [vmem:[#allocation2 + $0x208] sm:$0xf]  ;;  %v9082_v0 = vor.u32 %v10772_v12, %v9081_v44  ;;  %v9019_v2 = vld [vmem:[#allocation2 + $0x8a8] sm:$0xf0] }
 0x41f   :  { %7146 = vmatpush.bf16.msra.mxu0 %v9178_v14  ;;  %7111 = vmatpush.bf16.msrb.mxu1 %v8282_v25  ;;  %v10548_v41 = vld [vmem:[#allocation2 + $0x224] sm:$0xf0]  ;;  %v10848_v6 = vld [vmem:[#allocation2 + $0xb8c] sm:$0xf]  ;;  %v9022_v27 = vor.u32 %v10752_v35, %v9019_v2 }
 0x420   :  { %7232 = vmatmul.bf16.vlgmr.msrb.gmra.mxu2 %v15364_v5  ;;  %v9433_v23 = vld [vmem:[#allocation2 + $0xbc8] sm:$0xf]  ;;  %v8186_v36 = vor.u32 %v10548_v41, %v8185_v32  ;;  %v9403_v63 = vld [vmem:[#allocation2 + $0xba8] sm:$0xf0] }
 0x421   :  { %7276 = vmatpush.bf16.msra.mxu2 %v9182_v49  ;;  %7241 = vmatpush.bf16.msrb.mxu3 %v8286_v28  ;;  %v10860_v61 = vld [vmem:[#allocation2 + $0xbe4] sm:$0xf0]  ;;  %v10744_v1 = vld [vmem:[#allocation2 + $0x84c] sm:$0xf] }
 0x422   :  { %v9049_v42 = vld [vmem:[#allocation2 + $0x8c8] sm:$0xf]  ;;  %v9434_v10 = vor.u32 %v10860_v61, %v9433_v23  ;;  %v8987_v51 = vld [vmem:[#allocation2 + $0x868] sm:$0xf0] }
 0x423   :  { %7147 = vmatpush.bf16.msra.mxu0 %v9146_v9  ;;  %7112 = vmatpush.bf16.msrb.mxu1 %v8250_v37  ;;  %v10764_v38 = vld [vmem:[#allocation2 + $0x8e4] sm:$0xf0]  ;;  %v9406_v37 = vor.u32 %v10848_v6, %v9403_v63  ;;  %v10840_v45 = vld [vmem:[#allocation2 + $0xb4c] sm:$0xf]  ;;  %v8990_v31 = vor.u32 %v10744_v1, %v8987_v51 }
 0x424   :  { %v9401_v18 = vld [vmem:[#allocation2 + $0xb88] sm:$0xf]  ;;  %v9050_v49 = vor.u32 %v10764_v38, %v9049_v42  ;;  %v8955_v21 = vld [vmem:[#allocation2 + $0x828] sm:$0xf0] }
 0x425   :  { %7277 = vmatpush.bf16.msra.mxu2 %v9150_v11  ;;  %7242 = vmatpush.bf16.msrb.mxu3 %v8254_v8  ;;  %v10852_v14 = vld [vmem:[#allocation2 + $0xba4] sm:$0xf0]  ;;  %v9371_v8 = vld [vmem:[#allocation2 + $0xb68] sm:$0xf0] }
 0x426   :  { %v9017_v17 = vld [vmem:[#allocation2 + $0x888] sm:$0xf]  ;;  %v9402_v48 = vor.u32 %v10852_v14, %v9401_v18  ;;  %v9374_v12 = vor.u32 %v10840_v45, %v9371_v8  ;;  %v10832_v59 = vld [vmem:[#allocation2 + $0xb0c] sm:$0xf] }
 0x427   :  { %7148 = vmatpush.bf16.msra.mxu0 %v9114_v52  ;;  %7113 = vmatpush.bf16.msrb.mxu1 %v8218_v30  ;;  %v10756_v25 = vld [vmem:[#allocation2 + $0x8a4] sm:$0xf0]  ;;  %v10736_v30 = vld [vmem:[#allocation2 + $0x80c] sm:$0xf] }
 0x428   :  { %v9369_v28 = vld [vmem:[#allocation2 + $0xb48] sm:$0xf]  ;;  %v9018_v11 = vor.u32 %v10756_v25, %v9017_v17  ;;  %v9339_v32 = vld [vmem:[#allocation2 + $0xb28] sm:$0xf0]  ;;  %v8958_v42 = vor.u32 %v10736_v30, %v8955_v21 }
 0x429   :  { %7278 = vmatpush.bf16.msra.mxu2 %v9118_v53  ;;  %7243 = vmatpush.bf16.msrb.mxu3 %v8222_v55  ;;  %v10844_v9 = vld [vmem:[#allocation2 + $0xb64] sm:$0xf0]  ;;  %v11048_v61 = vld [vmem:[#allocation2 + $0x11cc] sm:$0xf] }
 0x42a   :  { %v8985_v22 = vld [vmem:[#allocation2 + $0x848] sm:$0xf]  ;;  %v9370_v56 = vor.u32 %v10844_v9, %v9369_v28  ;;  %v10824_v39 = vld [vmem:[#allocation2 + $0xacc] sm:$0xf]  ;;  %v15366_v9 = vld [vmem:[#allocation124_spill] sm:$0xff] }
 0x42b   :  { %7149 = vmatpush.bf16.msra.mxu0 %v9082_v0  ;;  %7114 = vmatpush.bf16.msrb.mxu1 %v8186_v36  ;;  %v10748_v47 = vld [vmem:[#allocation2 + $0x864] sm:$0xf0]  ;;  %v10203_v0 = vld [vmem:[#allocation2 + $0x11e8] sm:$0xf0]  ;;  %v9342_v36 = vor.u32 %v10832_v59, %v9339_v32 }
 0x42c   :  { %v9337_v52 = vld [vmem:[#allocation2 + $0xb08] sm:$0xf]  ;;  %v8986_v43 = vor.u32 %v10748_v47, %v8985_v22  ;;  %v9307_v62 = vld [vmem:[#allocation2 + $0xae8] sm:$0xf0] }
 0x42d   :  { %7279 = vmatpush.bf16.msra.mxu2 %v9086_v58  ;;  %7244 = vmatpush.bf16.msrb.mxu3 %v8190_v3  ;;  %v10836_v53 = vld [vmem:[#allocation2 + $0xb24] sm:$0xf0]  ;;  %v11040_v18 = vld [vmem:[#allocation2 + $0x118c] sm:$0xf]  ;;  %v9310_v17 = vor.u32 %v10824_v39, %v9307_v62 }
 0x42e   :  { %7115 = vmatmul.bf16.vlgmr.msrb.gmra.mxu1 %v15365_v54  ;;  %v8953_v44 = vld [vmem:[#allocation2 + $0x808] sm:$0xf]  ;;  %v9338_v41 = vor.u32 %v10836_v53, %v9337_v52  ;;  %v10171_v14 = vld [vmem:[#allocation2 + $0x11a8] sm:$0xf0] }
 0x42f   :  { %7159 = vmatpush.bf16.msra.mxu1 %v9434_v10  ;;  %7150 = vmatpush.bf16.msra.mxu0 %v9050_v49  ;;  %v10740_v7 = vld [vmem:[#allocation2 + $0x824] sm:$0xf0]  ;;  %v10206_v10 = vor.u32 %v11048_v61, %v10203_v0  ;;  %v10816_v25 = vld [vmem:[#allocation2 + $0xa8c] sm:$0xf]  ;;  %v10174_v2 = vor.u32 %v11040_v18, %v10171_v14 }
 0x430   :  { %7245 = vmatmul.bf16.vlgmr.msrb.gmra.mxu3 %v15365_v54  ;;  %v10201_v55 = vld [vmem:[#allocation2 + $0x11c8] sm:$0xf]  ;;  %v8954_v46 = vor.u32 %v10740_v7, %v8953_v44  ;;  %v9275_v35 = vld [vmem:[#allocation2 + $0xaa8] sm:$0xf0] }
 0x431   :  { %7280 = vmatpush.bf16.msra.mxu2 %v9054_v40  ;;  %7289 = vmatpush.bf16.msra.mxu3 %v9438_v29  ;;  %v11052_v23 = vld [vmem:[#allocation2 + $0x11e4] sm:$0xf0]  ;;  %v11032_v28 = vld [vmem:[#allocation2 + $0x114c] sm:$0xf] }
 0x432   :  { %v9305_v58 = vld [vmem:[#allocation2 + $0xac8] sm:$0xf]  ;;  %v10202_v38 = vor.u32 %v11052_v23, %v10201_v55  ;;  %v10808_v1 = vld [vmem:[#allocation2 + $0xa4c] sm:$0xf] }
 0x433   :  { %7160 = vmatpush.bf16.msra.mxu1 %v9402_v48  ;;  %7151 = vmatpush.bf16.msra.mxu0 %v9018_v11  ;;  %v10828_v50 = vld [vmem:[#allocation2 + $0xae4] sm:$0xf0]  ;;  %v10139_v11 = vld [vmem:[#allocation2 + $0x1168] sm:$0xf0] }
 0x434   :  { %v9306_v34 = vor.u32 %v10828_v50, %v9305_v58  ;;  %v10169_v16 = vld [vmem:[#allocation2 + $0x1188] sm:$0xf]  ;;  %v9243_v51 = vld [vmem:[#allocation2 + $0xa68] sm:$0xf0] }
 0x435   :  { %7281 = vmatpush.bf16.msra.mxu2 %v9022_v27  ;;  %7290 = vmatpush.bf16.msra.mxu3 %v9406_v37  ;;  %v11044_v3 = vld [vmem:[#allocation2 + $0x11a4] sm:$0xf0]  ;;  %v9278_v37 = vor.u32 %v10816_v25, %v9275_v35  ;;  %v11024_v53 = vld [vmem:[#allocation2 + $0x110c] sm:$0xf] }
 0x436   :  { %v9273_v49 = vld [vmem:[#allocation2 + $0xa88] sm:$0xf]  ;;  %v10170_v29 = vor.u32 %v11044_v3, %v10169_v16  ;;  %v10800_v59 = vld [vmem:[#allocation2 + $0xa0c] sm:$0xf] }
 0x437   :  { %7161 = vmatpush.bf16.msra.mxu1 %v9370_v56  ;;  %7152 = vmatpush.bf16.msra.mxu0 %v8986_v43  ;;  %v10820_v40 = vld [vmem:[#allocation2 + $0xaa4] sm:$0xf0]  ;;  %v10142_v56 = vor.u32 %v11032_v28, %v10139_v11  ;;  %v10107_v43 = vld [vmem:[#allocation2 + $0x1128] sm:$0xf0]  ;;  %v15367_v11 = vld [vmem:[#allocation126_spill] sm:$0xff] }
 0x438   :  { %v9274_v48 = vor.u32 %v10820_v40, %v9273_v49  ;;  %v10137_v6 = vld [vmem:[#allocation2 + $0x1148] sm:$0xf]  ;;  %v9211_v32 = vld [vmem:[#allocation2 + $0xa28] sm:$0xf0] }
 0x439   :  { %7282 = vmatpush.bf16.msra.mxu2 %v8990_v31  ;;  %7291 = vmatpush.bf16.msra.mxu3 %v9374_v12  ;;  %v11036_v63 = vld [vmem:[#allocation2 + $0x1164] sm:$0xf0]  ;;  %v9246_v12 = vor.u32 %v10808_v1, %v9243_v51  ;;  %v11016_v0 = vld [vmem:[#allocation2 + $0x10cc] sm:$0xf] }
 0x43a   :  { %v9241_v27 = vld [vmem:[#allocation2 + $0xa48] sm:$0xf]  ;;  %v10138_v47 = vor.u32 %v11036_v63, %v10137_v6  ;;  %v10075_v50 = vld [vmem:[#allocation2 + $0x10e8] sm:$0xf0] }
 0x43b   :  { %7162 = vmatpush.bf16.msra.mxu1 %v9338_v41  ;;  %7153 = vmatpush.bf16.msra.mxu0 %v8954_v46  ;;  %v10812_v22 = vld [vmem:[#allocation2 + $0xa64] sm:$0xf0]  ;;  %v10110_v41 = vor.u32 %v11024_v53, %v10107_v43  ;;  %v11112_v46 = vld [vmem:[#allocation2 + $0x13cc] sm:$0xf] }
 0x43c   :  { %v9242_v45 = vor.u32 %v10812_v22, %v9241_v27  ;;  %v10105_v8 = vld [vmem:[#allocation2 + $0x1108] sm:$0xf]  ;;  %v11008_v18 = vld [vmem:[#allocation2 + $0x108c] sm:$0xf] }
 0x43d   :  { %7283 = vmatpush.bf16.msra.mxu2 %v8958_v42  ;;  %7292 = vmatpush.bf16.msra.mxu3 %v9342_v36  ;;  %v11028_v52 = vld [vmem:[#allocation2 + $0x1124] sm:$0xf0]  ;;  %v10459_v42 = vld [vmem:[#allocation2 + $0x13e8] sm:$0xf0]  ;;  %v9214_v36 = vor.u32 %v10800_v59, %v9211_v32  ;;  %v8673_v59 = vld [vmem:[#allocation2 + $0x5d0] sm:$0xf] }
 0x43e   :  { %7154 = vmatmul.bf16.vlgmr.msra.gmra.mxu0 %v15366_v9  ;;  %v9209_v31 = vld [vmem:[#allocation2 + $0xa08] sm:$0xf]  ;;  %v10106_v21 = vor.u32 %v11028_v52, %v10105_v8  ;;  %v10043_v14 = vld [vmem:[#allocation2 + $0x10a8] sm:$0xf0]  ;;  %v10669_v32 = vld [vmem:[#allocation2 + $0x5ec] sm:$0xf0] }
 0x43f   :  { %7198 = vmatpush.bf16.msrb.mxu0 %v10202_v38  ;;  %7163 = vmatpush.bf16.msra.mxu1 %v9306_v34  ;;  %v10804_v44 = vld [vmem:[#allocation2 + $0xa24] sm:$0xf0]  ;;  %v10462_v34 = vor.u32 %v11112_v46, %v10459_v42  ;;  %v11104_v49 = vld [vmem:[#allocation2 + $0x138c] sm:$0xf] }
 0x440   :  { %7284 = vmatmul.bf16.vlgmr.msra.gmra.mxu2 %v15366_v9  ;;  %v10457_v7 = vld [vmem:[#allocation2 + $0x13c8] sm:$0xf]  ;;  %v9210_v55 = vor.u32 %v10804_v44, %v9209_v31  ;;  %v10427_v40 = vld [vmem:[#allocation2 + $0x13a8] sm:$0xf0] }
 0x441   :  { %7328 = vmatpush.bf16.msrb.mxu2 %v10206_v10  ;;  %7293 = vmatpush.bf16.msra.mxu3 %v9310_v17  ;;  %v11116_v30 = vld [vmem:[#allocation2 + $0x13e4] sm:$0xf0]  ;;  %v10078_v10 = vor.u32 %v11016_v0, %v10075_v50  ;;  %v11000_v28 = vld [vmem:[#allocation2 + $0x104c] sm:$0xf]  ;;  %v8674_v50 = vor.u32 %v10669_v32, %v8673_v59 }
 0x442   :  { %v10073_v23 = vld [vmem:[#allocation2 + $0x10c8] sm:$0xf]  ;;  %v10458_v58 = vor.u32 %v11116_v30, %v10457_v7  ;;  %v10011_v27 = vld [vmem:[#allocation2 + $0x1068] sm:$0xf0] }
 0x443   :  { %7199 = vmatpush.bf16.msrb.mxu0 %v10170_v29  ;;  %7164 = vmatpush.bf16.msra.mxu1 %v9274_v48  ;;  %v11020_v61 = vld [vmem:[#allocation2 + $0x10e4] sm:$0xf0]  ;;  %v10430_v48 = vor.u32 %v11104_v49, %v10427_v40  ;;  %v11096_v22 = vld [vmem:[#allocation2 + $0x134c] sm:$0xf]  ;;  %v10014_v8 = vor.u32 %v11000_v28, %v10011_v27 }
 0x444   :  { %v10074_v38 = vor.u32 %v11020_v61, %v10073_v23  ;;  %v10425_v39 = vld [vmem:[#allocation2 + $0x1388] sm:$0xf]  ;;  %v10992_v43 = vld [vmem:[#allocation2 + $0x100c] sm:$0xf] }
 0x445   :  { %7329 = vmatpush.bf16.msrb.mxu2 %v10174_v2  ;;  %7294 = vmatpush.bf16.msra.mxu3 %v9278_v37  ;;  %v11108_v62 = vld [vmem:[#allocation2 + $0x13a4] sm:$0xf0]  ;;  %v10046_v2 = vor.u32 %v11008_v18, %v10043_v14  ;;  %v10395_v37 = vld [vmem:[#allocation2 + $0x1368] sm:$0xf0] }
 0x446   :  { %v10041_v16 = vld [vmem:[#allocation2 + $0x1088] sm:$0xf]  ;;  %v10426_v17 = vor.u32 %v11108_v62, %v10425_v39  ;;  %v10398_v52 = vor.u32 %v11096_v22, %v10395_v37  ;;  %v9979_v31 = vld [vmem:[#allocation2 + $0x1028] sm:$0xf0]  ;;  %v8641_v62 = vld [vmem:[#allocation2 + $0x590] sm:$0xf] }
 0x447   :  { %7200 = vmatpush.bf16.msrb.mxu0 %v10138_v47  ;;  %7165 = vmatpush.bf16.msra.mxu1 %v9242_v45  ;;  %v11012_v3 = vld [vmem:[#allocation2 + $0x10a4] sm:$0xf0]  ;;  %v11088_v44 = vld [vmem:[#allocation2 + $0x130c] sm:$0xf]  ;;  %v9982_v61 = vor.u32 %v10992_v43, %v9979_v31 }
 0x448   :  { %v10042_v29 = vor.u32 %v11012_v3, %v10041_v16  ;;  %v10393_v25 = vld [vmem:[#allocation2 + $0x1348] sm:$0xf]  ;;  %v10363_v7 = vld [vmem:[#allocation2 + $0x1328] sm:$0xf0] }
 0x449   :  { %7330 = vmatpush.bf16.msrb.mxu2 %v10142_v56  ;;  %7295 = vmatpush.bf16.msra.mxu3 %v9246_v12  ;;  %v11100_v35 = vld [vmem:[#allocation2 + $0x1364] sm:$0xf0]  ;;  %v10664_v30 = vld [vmem:[#allocation2 + $0x5cc] sm:$0xf]  ;;  %v10366_v0 = vor.u32 %v11088_v44, %v10363_v7 }
 0x44a   :  { %v10009_v6 = vld [vmem:[#allocation2 + $0x1048] sm:$0xf]  ;;  %v10394_v47 = vor.u32 %v11100_v35, %v10393_v25  ;;  %v11080_v46 = vld [vmem:[#allocation2 + $0x12cc] sm:$0xf]  ;;  %v8609_v35 = vld [vmem:[#allocation2 + $0x550] sm:$0xf] }
 0x44b   :  { %7201 = vmatpush.bf16.msrb.mxu0 %v10106_v21  ;;  %7166 = vmatpush.bf16.msra.mxu1 %v9210_v55  ;;  %v11004_v63 = vld [vmem:[#allocation2 + $0x1064] sm:$0xf0]  ;;  %v8667_v21 = vld [vmem:[#allocation2 + $0x5e8] sm:$0xf0] }
 0x44c   :  { %v10010_v1 = vor.u32 %v11004_v63, %v10009_v6  ;;  %v9977_v51 = vld [vmem:[#allocation2 + $0x1008] sm:$0xf]  ;;  %v10331_v42 = vld [vmem:[#allocation2 + $0x12e8] sm:$0xf0] }
 0x44d   :  { %7331 = vmatpush.bf16.msrb.mxu2 %v10110_v41  ;;  %7296 = vmatpush.bf16.msra.mxu3 %v9214_v36  ;;  %v10361_v56 = vld [vmem:[#allocation2 + $0x1308] sm:$0xf]  ;;  %v10656_v36 = vld [vmem:[#allocation2 + $0x58c] sm:$0xf]  ;;  %v10334_v3 = vor.u32 %v11080_v46, %v10331_v42 }
 0x44e   :  { %7167 = vmatmul.bf16.vlgmr.msra.gmra.mxu1 %v15367_v11  ;;  %v11092_v45 = vld [vmem:[#allocation2 + $0x1324] sm:$0xf0]  ;;  %v8635_v39 = vld [vmem:[#allocation2 + $0x5a8] sm:$0xf0] }
 0x44f   :  { %7211 = vmatpush.bf16.msrb.mxu1 %v10458_v58  ;;  %7202 = vmatpush.bf16.msrb.mxu0 %v10074_v38  ;;  %v10996_v53 = vld [vmem:[#allocation2 + $0x1024] sm:$0xf0]  ;;  %v10362_v12 = vor.u32 %v11092_v45, %v10361_v56  ;;  %v8670_v58 = vor.u32 %v10664_v30, %v8667_v21  ;;  %v8638_v18 = vor.u32 %v10656_v36, %v8635_v39  ;;  %v11072_v49 = vld [vmem:[#allocation2 + $0x128c] sm:$0xf]  ;;  %v8577_v45 = vld [vmem:[#allocation2 + $0x510] sm:$0xf] }
 0x450   :  { %7297 = vmatmul.bf16.vlgmr.msra.gmra.mxu3 %v15367_v11  ;;  %v9978_v41 = vor.u32 %v10996_v53, %v9977_v51  ;;  %v10329_v55 = vld [vmem:[#allocation2 + $0x12c8] sm:$0xf]  ;;  %v10299_v40 = vld [vmem:[#allocation2 + $0x12a8] sm:$0xf0] }
 0x451   :  { %7332 = vmatpush.bf16.msrb.mxu2 %v10078_v10  ;;  %7341 = vmatpush.bf16.msrb.mxu3 %v10462_v34  ;;  %v11084_v23 = vld [vmem:[#allocation2 + $0x12e4] sm:$0xf0]  ;;  %v10661_v10 = vld [vmem:[#allocation2 + $0x5ac] sm:$0xf0]  ;;  %v8603_v25 = vld [vmem:[#allocation2 + $0x568] sm:$0xf0]  ;;  %v10302_v63 = vor.u32 %v11072_v49, %v10299_v40 }
 0x452   :  { %v10330_v38 = vor.u32 %v11084_v23, %v10329_v55  ;;  %v10297_v34 = vld [vmem:[#allocation2 + $0x1288] sm:$0xf]  ;;  %v8642_v14 = vor.u32 %v10661_v10, %v8641_v62  ;;  %v11064_v22 = vld [vmem:[#allocation2 + $0x124c] sm:$0xf]  ;;  %v8545_v23 = vld [vmem:[#allocation2 + $0x4d0] sm:$0xf] }
 0x453   :  { %7212 = vmatpush.bf16.msrb.mxu1 %v10426_v17  ;;  %7203 = vmatpush.bf16.msrb.mxu0 %v10042_v29  ;;  %v11076_v16 = vld [vmem:[#allocation2 + $0x12a4] sm:$0xf0]  ;;  %v10648_v17 = vld [vmem:[#allocation2 + $0x54c] sm:$0xf]  ;;  %v8897_v49 = vld [vmem:[#allocation2 + $0x790] sm:$0xf] }
 0x454   :  { %v10298_v29 = vor.u32 %v11076_v16, %v10297_v34  ;;  %v11068_v6 = vld [vmem:[#allocation2 + $0x1264] sm:$0xf0]  ;;  %v8606_v28 = vor.u32 %v10648_v17, %v8603_v25  ;;  %v10267_v37 = vld [vmem:[#allocation2 + $0x1268] sm:$0xf0]  ;;  %v10725_v40 = vld [vmem:[#allocation2 + $0x7ac] sm:$0xf0] }
 0x455   :  { %7333 = vmatpush.bf16.msrb.mxu2 %v10046_v2  ;;  %7342 = vmatpush.bf16.msrb.mxu3 %v10430_v48  ;;  %v10653_v2 = vld [vmem:[#allocation2 + $0x56c] sm:$0xf0]  ;;  %v10265_v48 = vld [vmem:[#allocation2 + $0x1248] sm:$0xf]  ;;  %v8571_v56 = vld [vmem:[#allocation2 + $0x528] sm:$0xf0]  ;;  %v10270_v31 = vor.u32 %v11064_v22, %v10267_v37 }
 0x456   :  { %v8610_v27 = vor.u32 %v10653_v2, %v8609_v35  ;;  %v10266_v51 = vor.u32 %v11068_v6, %v10265_v48  ;;  %v10233_v53 = vld [vmem:[#allocation2 + $0x1208] sm:$0xf]  ;;  %v10728_v44 = vld [vmem:[#allocation2 + $0x7cc] sm:$0xf]  ;;  %v8898_v48 = vor.u32 %v10725_v40, %v8897_v49  ;;  %v8865_v22 = vld [vmem:[#allocation2 + $0x750] sm:$0xf] }
 0x457   :  { %7213 = vmatpush.bf16.msrb.mxu1 %v10394_v47  ;;  %7204 = vmatpush.bf16.msrb.mxu0 %v10010_v1  ;;  %v10640_v47 = vld [vmem:[#allocation2 + $0x50c] sm:$0xf]  ;;  %v11060_v43 = vld [vmem:[#allocation2 + $0x1224] sm:$0xf0]  ;;  %v10717_v37 = vld [vmem:[#allocation2 + $0x76c] sm:$0xf0] }
 0x458   :  { %v8923_v7 = vld [vmem:[#allocation2 + $0x7e8] sm:$0xf0]  ;;  %v8574_v30 = vor.u32 %v10640_v47, %v8571_v56 }
 0x459   :  { %7334 = vmatpush.bf16.msrb.mxu2 %v10014_v8  ;;  %7343 = vmatpush.bf16.msrb.mxu3 %v10398_v52  ;;  %v10645_v8 = vld [vmem:[#allocation2 + $0x52c] sm:$0xf0]  ;;  %v11056_v21 = vld [vmem:[#allocation2 + $0x120c] sm:$0xf] }
 0x45a   :  { %v10235_v59 = vld [vmem:[#allocation2 + $0x1228] sm:$0xf0] }
 0x45b   :  { %7214 = vmatpush.bf16.msrb.mxu1 %v10362_v12  ;;  %7205 = vmatpush.bf16.msrb.mxu0 %v9978_v41  ;;  %v6947_v1 = vpop.f32.mrf.mxu0  ;;  %v8578_v12 = vor.u32 %v10645_v8, %v8577_v45  ;;  %v10632_v32 = vld [vmem:[#allocation2 + $0x4cc] sm:$0xf]  ;;  %v10234_v41 = vor.u32 %v11060_v43, %v10233_v53  ;;  %v10238_v46 = vor.u32 %v11056_v21, %v10235_v59  ;;  %v8449_v43 = vld [vmem:[#allocation2 + $0x410] sm:$0xf] }
 0x45c   :  { %v14837_v52 = vadd.f32 %v6947_v1, %v14815_v20  ;;  %v8539_v55 = vld [vmem:[#allocation2 + $0x4e8] sm:$0xf0]  ;;  %v8926_v20 = vor.u32 %v10728_v44, %v8923_v7  ;;  %v10709_v21 = vld [vmem:[#allocation2 + $0x72c] sm:$0xf0] }
 0x45d   :  { %7335 = vmatpush.bf16.msrb.mxu2 %v9982_v61  ;;  %7344 = vmatpush.bf16.msrb.mxu3 %v10366_v0  ;;  %v10637_v61 = vld [vmem:[#allocation2 + $0x4ec] sm:$0xf0]  ;;  %v10720_v42 = vld [vmem:[#allocation2 + $0x78c] sm:$0xf] }
 0x45e   :  { %7206 = vmatmul.bf16.vlgmr.msrb.gmra.mxu0 %v14763_v24  ;;  %v8929_v0 = vld [vmem:[#allocation2 + $0x7d0] sm:$0xf]  ;;  %v8891_v36 = vld [vmem:[#allocation2 + $0x7a8] sm:$0xf0]  ;;  %v8546_v39 = vor.u32 %v10637_v61, %v8545_v23 }
 0x45f   :  { %7250 = vmatpush.bf16.msra.mxu0 %v8670_v58  ;;  %7215 = vmatpush.bf16.msrb.mxu1 %v10330_v38  ;;  %v10733_v58 = vld [vmem:[#allocation2 + $0x7ec] sm:$0xf0]  ;;  %v8542_v38 = vor.u32 %v10632_v32, %v8539_v55  ;;  %v10624_v62 = vld [vmem:[#allocation2 + $0x48c] sm:$0xf] }
 0x460   :  { %7336 = vmatmul.bf16.vlgmr.msrb.gmra.mxu2 %v14763_v24  ;;  %v8930_v10 = vor.u32 %v10733_v58, %v8929_v0  ;;  %v8507_v16 = vld [vmem:[#allocation2 + $0x4a8] sm:$0xf0]  ;;  %v9697_v61 = vld [vmem:[#allocation2 + $0xdd0] sm:$0xf] }
 0x461   :  { %7380 = vmatpush.bf16.msra.mxu2 %v8674_v50  ;;  %7345 = vmatpush.bf16.msrb.mxu3 %v10334_v3  ;;  %v14839_v50 = vpop.f32.mrf.mxu2  ;;  %v8513_v3 = vld [vmem:[#allocation2 + $0x490] sm:$0xf]  ;;  %v10712_v17 = vld [vmem:[#allocation2 + $0x74c] sm:$0xf]  ;;  %v8510_v25 = vor.u32 %v10624_v62, %v8507_v16 }
 0x462   :  { %v10616_v2 = vld [vmem:[#allocation2 + $0x44c] sm:$0xf]  ;;  %v9665_v16 = vld [vmem:[#allocation2 + $0xd90] sm:$0xf] }
 0x463   :  { %7251 = vmatpush.bf16.msra.mxu0 %v8638_v18  ;;  %7216 = vmatpush.bf16.msrb.mxu1 %v10298_v29  ;;  %v6949_v34 = vpop.f32.mrf.mxu0  ;;  %v10629_v18 = vld [vmem:[#allocation2 + $0x4ac] sm:$0xf0]  ;;  %v8859_v29 = vld [vmem:[#allocation2 + $0x768] sm:$0xf0] }
 0x464   :  { %v8514_v35 = vor.u32 %v10629_v18, %v8513_v3  ;;  %v8475_v6 = vld [vmem:[#allocation2 + $0x468] sm:$0xf0]  ;;  %v10917_v3 = vld [vmem:[#allocation2 + $0xdac] sm:$0xf0] }
 0x465   :  { %7381 = vmatpush.bf16.msra.mxu2 %v8642_v14  ;;  %7346 = vmatpush.bf16.msrb.mxu3 %v10302_v63  ;;  %v8894_v14 = vor.u32 %v10720_v42, %v8891_v36  ;;  %v8481_v63 = vld [vmem:[#allocation2 + $0x450] sm:$0xf]  ;;  %v10704_v1 = vld [vmem:[#allocation2 + $0x70c] sm:$0xf]  ;;  %v8478_v56 = vor.u32 %v10616_v2, %v8475_v6  ;;  %v9666_v6 = vor.u32 %v10917_v3, %v9665_v16 }
 0x466   :  { %v10608_v8 = vld [vmem:[#allocation2 + $0x40c] sm:$0xf]  ;;  %v10893_v16 = vld [vmem:[#allocation2 + $0xcec] sm:$0xf0] }
 0x467   :  { %7252 = vmatpush.bf16.msra.mxu0 %v8606_v28  ;;  %7217 = vmatpush.bf16.msrb.mxu1 %v10266_v51  ;;  %v10621_v28 = vld [vmem:[#allocation2 + $0x46c] sm:$0xf0]  ;;  %v8827_v51 = vld [vmem:[#allocation2 + $0x728] sm:$0xf0] }
 0x468   :  { %v8482_v45 = vor.u32 %v10621_v28, %v8481_v63  ;;  %v8443_v53 = vld [vmem:[#allocation2 + $0x428] sm:$0xf0]  ;;  %v9953_v3 = vld [vmem:[#allocation2 + $0xfd0] sm:$0xf] }
 0x469   :  { %7382 = vmatpush.bf16.msra.mxu2 %v8610_v27  ;;  %7347 = vmatpush.bf16.msrb.mxu3 %v10270_v31  ;;  %v8862_v27 = vor.u32 %v10712_v17, %v8859_v29  ;;  %v7079_v47 = vpop.f32.mrf.mxu2  ;;  %v8866_v31 = vor.u32 %v10717_v37, %v8865_v22  ;;  %v10920_v55 = vld [vmem:[#allocation2 + $0xdcc] sm:$0xf]  ;;  %v9633_v22 = vld [vmem:[#allocation2 + $0xd50] sm:$0xf] }
 0x46a   :  { %v9691_v23 = vld [vmem:[#allocation2 + $0xde8] sm:$0xf0]  ;;  %v10909_v37 = vld [vmem:[#allocation2 + $0xd6c] sm:$0xf0] }
 0x46b   :  { %7253 = vmatpush.bf16.msra.mxu0 %v8574_v30  ;;  %7218 = vmatpush.bf16.msrb.mxu1 %v10234_v41  ;;  %v6960_v44 = vpop.f32.mrf.mxu1  ;;  %v6999_v7 = vpop.f32.mrf.mxu0  ;;  %v10613_v30 = vld [vmem:[#allocation2 + $0x42c] sm:$0xf0]  ;;  %v8830_v41 = vor.u32 %v10704_v1, %v8827_v51  ;;  %v10696_v0 = vld [vmem:[#allocation2 + $0x6cc] sm:$0xf] }
 0x46c   :  { %v14844_v59 = vadd.f32 %v6960_v44, %v14837_v52  ;;  %v14847_v32 = vadd.f32 %v6999_v7, %v14818_v57  ;;  %v8795_v58 = vld [vmem:[#allocation2 + $0x6e8] sm:$0xf0]  ;;  %v8450_v42 = vor.u32 %v10613_v30, %v8449_v43  ;;  %v10701_v52 = vld [vmem:[#allocation2 + $0x6ec] sm:$0xf0] }
 0x46d   :  { %7383 = vmatpush.bf16.msra.mxu2 %v8578_v12  ;;  %7348 = vmatpush.bf16.msrb.mxu3 %v10238_v46  ;;  %v8833_v12 = vld [vmem:[#allocation2 + $0x710] sm:$0xf]  ;;  %v8446_v46 = vor.u32 %v10608_v8, %v8443_v53  ;;  %v8798_v57 = vor.u32 %v10696_v0, %v8795_v58  ;;  %v9659_v34 = vld [vmem:[#allocation2 + $0xda8] sm:$0xf0]  ;;  %v9634_v53 = vor.u32 %v10909_v37, %v9633_v22 }
 0x46e   :  { %7219 = vmatmul.bf16.vlgmr.msrb.gmra.mxu1 %v14798_v33  ;;  %v8834_v36 = vor.u32 %v10709_v21, %v8833_v12  ;;  %v10688_v18 = vld [vmem:[#allocation2 + $0x68c] sm:$0xf]  ;;  %v10685_v8 = vld [vmem:[#allocation2 + $0x66c] sm:$0xf0] }
 0x46f   :  { %7263 = vmatpush.bf16.msra.mxu1 %v8926_v20  ;;  %7254 = vmatpush.bf16.msra.mxu0 %v8542_v38  ;;  %v10925_v20 = vld [vmem:[#allocation2 + $0xdec] sm:$0xf0]  ;;  %v9694_v38 = vor.u32 %v10920_v55, %v9691_v23  ;;  %v10904_v28 = vld [vmem:[#allocation2 + $0xd4c] sm:$0xf] }
 0x470   :  { %7349 = vmatmul.bf16.vlgmr.msrb.gmra.mxu3 %v14798_v33  ;;  %v9698_v62 = vor.u32 %v10925_v20, %v9697_v61  ;;  %v10680_v47 = vld [vmem:[#allocation2 + $0x64c] sm:$0xf]  ;;  %v9601_v7 = vld [vmem:[#allocation2 + $0xd10] sm:$0xf] }
 0x471   :  { %7384 = vmatpush.bf16.msra.mxu2 %v8546_v39  ;;  %7393 = vmatpush.bf16.msra.mxu3 %v8930_v10  ;;  %v8801_v39 = vld [vmem:[#allocation2 + $0x6d0] sm:$0xf]  ;;  %v10912_v10 = vld [vmem:[#allocation2 + $0xd8c] sm:$0xf] }
 0x472   :  { %v8802_v17 = vor.u32 %v10701_v52, %v8801_v39  ;;  %v9662_v29 = vor.u32 %v10912_v10, %v9659_v34  ;;  %v8731_v1 = vld [vmem:[#allocation2 + $0x668] sm:$0xf0]  ;;  %v10901_v30 = vld [vmem:[#allocation2 + $0xd2c] sm:$0xf0] }
 0x473   :  { %7264 = vmatpush.bf16.msra.mxu1 %v8894_v14  ;;  %7255 = vmatpush.bf16.msra.mxu0 %v8510_v25  ;;  %v8763_v14 = vld [vmem:[#allocation2 + $0x6a8] sm:$0xf0]  ;;  %v14849_v49 = vpop.f32.mrf.mxu3  ;;  %v14851_v40 = vpop.f32.mrf.mxu2  ;;  %v8769_v25 = vld [vmem:[#allocation2 + $0x690] sm:$0xf]  ;;  %v8734_v43 = vor.u32 %v10680_v47, %v8731_v1 }
 0x474   :  { %v6962_v2 = vpop.f32.mrf.mxu1  ;;  %v8766_v63 = vor.u32 %v10688_v18, %v8763_v14  ;;  %v9595_v44 = vld [vmem:[#allocation2 + $0xd28] sm:$0xf0]  ;;  %v8705_v58 = vld [vmem:[#allocation2 + $0x610] sm:$0xf] }
 0x475   :  { %7385 = vmatpush.bf16.msra.mxu2 %v8514_v35  ;;  %7394 = vmatpush.bf16.msra.mxu3 %v8898_v48  ;;  %v10693_v35 = vld [vmem:[#allocation2 + $0x6ac] sm:$0xf0]  ;;  %v7001_v48 = vpop.f32.mrf.mxu0  ;;  %v10672_v12 = vld [vmem:[#allocation2 + $0x60c] sm:$0xf] }
 0x476   :  { %v8770_v51 = vor.u32 %v10693_v35, %v8769_v25  ;;  %v8699_v21 = vld [vmem:[#allocation2 + $0x628] sm:$0xf0]  ;;  %v10989_v18 = vld [vmem:[#allocation2 + $0xfec] sm:$0xf0] }
 0x477   :  { %7265 = vmatpush.bf16.msra.mxu1 %v8862_v27  ;;  %7256 = vmatpush.bf16.msra.mxu0 %v8478_v56  ;;  %v9627_v27 = vld [vmem:[#allocation2 + $0xd68] sm:$0xf0]  ;;  %v8702_v39 = vor.u32 %v10672_v12, %v8699_v21  ;;  %v9954_v48 = vor.u32 %v10989_v18, %v9953_v3  ;;  %v9921_v22 = vld [vmem:[#allocation2 + $0xf90] sm:$0xf] }
 0x478   :  { %v9630_v56 = vor.u32 %v10904_v28, %v9627_v27  ;;  %v9947_v55 = vld [vmem:[#allocation2 + $0xfe8] sm:$0xf0]  ;;  %v9537_v28 = vld [vmem:[#allocation2 + $0xc90] sm:$0xf] }
 0x479   :  { %7386 = vmatpush.bf16.msra.mxu2 %v8482_v45  ;;  %7395 = vmatpush.bf16.msra.mxu3 %v8866_v31  ;;  %v8737_v45 = vld [vmem:[#allocation2 + $0x650] sm:$0xf]  ;;  %v10896_v31 = vld [vmem:[#allocation2 + $0xd0c] sm:$0xf] }
 0x47a   :  { %v8738_v20 = vor.u32 %v10685_v8, %v8737_v45  ;;  %v9598_v0 = vor.u32 %v10896_v31, %v9595_v44  ;;  %v10888_v52 = vld [vmem:[#allocation2 + $0xccc] sm:$0xf]  ;;  %v10885_v27 = vld [vmem:[#allocation2 + $0xcac] sm:$0xf0] }
 0x47b   :  { %7266 = vmatpush.bf16.msra.mxu1 %v8830_v41  ;;  %7257 = vmatpush.bf16.msra.mxu0 %v8446_v46  ;;  %v10984_v41 = vld [vmem:[#allocation2 + $0xfcc] sm:$0xf]  ;;  %v7092_v23 = vpop.f32.mrf.mxu3  ;;  %v7131_v61 = vpop.f32.mrf.mxu2  ;;  %v10677_v46 = vld [vmem:[#allocation2 + $0x62c] sm:$0xf0] }
 0x47c   :  { %v9950_v34 = vor.u32 %v10984_v41, %v9947_v55  ;;  %v10976_v25 = vld [vmem:[#allocation2 + $0xf8c] sm:$0xf]  ;;  %v10981_v37 = vld [vmem:[#allocation2 + $0xfac] sm:$0xf0] }
 0x47d   :  { %7387 = vmatpush.bf16.msra.mxu2 %v8450_v42  ;;  %7396 = vmatpush.bf16.msra.mxu3 %v8834_v36  ;;  %v7012_v42 = vpop.f32.mrf.mxu1  ;;  %v7051_v36 = vpop.f32.mrf.mxu0  ;;  %v9915_v35 = vld [vmem:[#allocation2 + $0xfa8] sm:$0xf0]  ;;  %v9922_v31 = vor.u32 %v10981_v37, %v9921_v22  ;;  %v10877_v12 = vld [vmem:[#allocation2 + $0xc6c] sm:$0xf0] }
 0x47e   :  { %7258 = vmatmul.bf16.vlgmr.msra.gmra.mxu0 %v15360_v19  ;;  %v7013_v10 = vadd.f32 %v7012_v42, %v14847_v32  ;;  %v9918_v47 = vor.u32 %v10976_v25, %v9915_v35  ;;  %v10968_v45 = vld [vmem:[#allocation2 + $0xf4c] sm:$0xf]  ;;  %v9889_v21 = vld [vmem:[#allocation2 + $0xf50] sm:$0xf] }
 0x47f   :  { %7302 = vmatpush.bf16.msrb.mxu0 %v9694_v38  ;;  %7267 = vmatpush.bf16.msra.mxu1 %v8798_v57  ;;  %v9602_v38 = vor.u32 %v10901_v30, %v9601_v7  ;;  %v9569_v57 = vld [vmem:[#allocation2 + $0xcd0] sm:$0xf]  ;;  %v9883_v8 = vld [vmem:[#allocation2 + $0xf68] sm:$0xf0] }
 0x480   :  { %7388 = vmatmul.bf16.vlgmr.msra.gmra.mxu2 %v15360_v19  ;;  %v7026_v14 = vadd.f32 %v14820_v26, %v7013_v10  ;;  %v9570_v2 = vor.u32 %v10893_v16, %v9569_v57  ;;  %v10872_v44 = vld [vmem:[#allocation2 + $0xc4c] sm:$0xf]  ;;  %v9505_v30 = vld [vmem:[#allocation2 + $0xc50] sm:$0xf]  ;;  %v9886_v55 = vor.u32 %v10968_v45, %v9883_v8  ;;  %v8163_v16 = vld [vmem:[#allocation2 + $0x1f0] sm:$0xf0] }
 0x481   :  { %7432 = vmatpush.bf16.msrb.mxu2 %v9698_v62  ;;  %7397 = vmatpush.bf16.msra.mxu3 %v8802_v17  ;;  %v9563_v62 = vld [vmem:[#allocation2 + $0xce8] sm:$0xf0]  ;;  %v8706_v17 = vor.u32 %v10677_v46, %v8705_v58  ;;  %v10973_v41 = vld [vmem:[#allocation2 + $0xf6c] sm:$0xf0]  ;;  %v9506_v58 = vor.u32 %v10877_v12, %v9505_v30 }
 0x482   :  { %v7039_v32 = vadd.f32 %v14824_v4, %v7026_v14  ;;  %v9538_v4 = vor.u32 %v10885_v27, %v9537_v28  ;;  %v9499_v7 = vld [vmem:[#allocation2 + $0xc68] sm:$0xf0]  ;;  %v9890_v46 = vor.u32 %v10973_v41, %v9889_v21  ;;  %v10541_v10 = vld [vmem:[#allocation2 + $0x1ec] sm:$0xf0]  ;;  %v10521_v21 = vld [vmem:[#allocation2 + $0x154] sm:$0xf] }
 0x483   :  { %7303 = vmatpush.bf16.msrb.mxu0 %v9662_v29  ;;  %7268 = vmatpush.bf16.msra.mxu1 %v8766_v63  ;;  %v9566_v29 = vor.u32 %v10888_v52, %v9563_v62  ;;  %v9531_v63 = vld [vmem:[#allocation2 + $0xca8] sm:$0xf0]  ;;  %v14858_v1 = vpop.f32.mrf.mxu3  ;;  %v9502_v23 = vor.u32 %v10872_v44, %v9499_v7  ;;  %v10965_v52 = vld [vmem:[#allocation2 + $0xf2c] sm:$0xf0]  ;;  %v8099_v41 = vld [vmem:[#allocation2 + $0x170] sm:$0xf0] }
 0x484   :  { %v7052_v26 = vadd.f32 %v7051_v36, %v7039_v32  ;;  %v10864_v61 = vld [vmem:[#allocation2 + $0xc0c] sm:$0xf]  ;;  %v9473_v36 = vld [vmem:[#allocation2 + $0xc10] sm:$0xf] }
 0x485   :  { %7433 = vmatpush.bf16.msrb.mxu2 %v9666_v6  ;;  %7398 = vmatpush.bf16.msra.mxu3 %v8770_v51  ;;  %v10880_v6 = vld [vmem:[#allocation2 + $0xc8c] sm:$0xf]  ;;  %v14860_v51 = vpop.f32.mrf.mxu2  ;;  %v8161_v62 = vld [vmem:[#allocation2 + $0x1d0] sm:$0xf] }
 0x486   :  { %v9467_v42 = vld [vmem:[#allocation2 + $0xc28] sm:$0xf0]  ;;  %v9825_v28 = vld [vmem:[#allocation2 + $0xed0] sm:$0xf] }
 0x487   :  { %7304 = vmatpush.bf16.msrb.mxu0 %v9630_v56  ;;  %7269 = vmatpush.bf16.msra.mxu1 %v8734_v43  ;;  %v9534_v56 = vor.u32 %v10880_v6, %v9531_v63  ;;  %v7053_v43 = vpop.f32.mrf.mxu0  ;;  %v9470_v14 = vor.u32 %v10864_v61, %v9467_v42  ;;  %v8162_v6 = vor.u32 %v10541_v10, %v8161_v62  ;;  %v10957_v32 = vld [vmem:[#allocation2 + $0xeec] sm:$0xf0]  ;;  %v10944_v8 = vld [vmem:[#allocation2 + $0xe8c] sm:$0xf]  ;;  %v8067_v10 = vld [vmem:[#allocation2 + $0x130] sm:$0xf0] }
 0x488   :  { %v8129_v27 = vld [vmem:[#allocation2 + $0x190] sm:$0xf]  ;;  %v9826_v43 = vor.u32 %v10957_v32, %v9825_v28  ;;  %v9755_v61 = vld [vmem:[#allocation2 + $0xe68] sm:$0xf0]  ;;  %v8035_v28 = vld [vmem:[#allocation2 + $0xf0] sm:$0xf0] }
 0x489   :  { %7434 = vmatpush.bf16.msrb.mxu2 %v9634_v53  ;;  %7399 = vmatpush.bf16.msra.mxu3 %v8738_v20  ;;  %v7014_v53 = vpop.f32.mrf.mxu1  ;;  %v10960_v20 = vld [vmem:[#allocation2 + $0xf0c] sm:$0xf]  ;;  %v10533_v37 = vld [vmem:[#allocation2 + $0x1ac] sm:$0xf0] }
 0x48a   :  { %v9787_v53 = vld [vmem:[#allocation2 + $0xea8] sm:$0xf0]  ;;  %v10949_v7 = vld [vmem:[#allocation2 + $0xeac] sm:$0xf0] }
 0x48b   :  { %7305 = vmatpush.bf16.msrb.mxu0 %v9598_v0  ;;  %7270 = vmatpush.bf16.msra.mxu1 %v8702_v39  ;;  %v9851_v0 = vld [vmem:[#allocation2 + $0xf28] sm:$0xf0]  ;;  %v9857_v39 = vld [vmem:[#allocation2 + $0xf10] sm:$0xf]  ;;  %v7144_v3 = vpop.f32.mrf.mxu3 }
 0x48c   :  { %v9854_v57 = vor.u32 %v10960_v20, %v9851_v0  ;;  %v8097_v30 = vld [vmem:[#allocation2 + $0x150] sm:$0xf] }
 0x48d   :  { %7435 = vmatpush.bf16.msrb.mxu2 %v9602_v38  ;;  %7400 = vmatpush.bf16.msra.mxu3 %v8706_v17  ;;  %v10869_v38 = vld [vmem:[#allocation2 + $0xc2c] sm:$0xf0]  ;;  %v7183_v18 = vpop.f32.mrf.mxu2  ;;  %v10952_v17 = vld [vmem:[#allocation2 + $0xecc] sm:$0xf] }
 0x48e   :  { %7271 = vmatmul.bf16.vlgmr.msra.gmra.mxu1 %v15361_v13  ;;  %v9474_v35 = vor.u32 %v10869_v38, %v9473_v36  ;;  %v10525_v12 = vld [vmem:[#allocation2 + $0x16c] sm:$0xf0] }
 0x48f   :  { %7315 = vmatpush.bf16.msrb.mxu1 %v9950_v34  ;;  %7306 = vmatpush.bf16.msrb.mxu0 %v9566_v29  ;;  %v10537_v34 = vld [vmem:[#allocation2 + $0x1d4] sm:$0xf]  ;;  %v9819_v29 = vld [vmem:[#allocation2 + $0xee8] sm:$0xf0]  ;;  %v9761_v42 = vld [vmem:[#allocation2 + $0xe50] sm:$0xf] }
 0x490   :  { %7401 = vmatmul.bf16.vlgmr.msra.gmra.mxu3 %v15361_v13  ;;  %v8166_v63 = vor.u32 %v10537_v34, %v8163_v16  ;;  %v9822_v22 = vor.u32 %v10952_v17, %v9819_v29  ;;  %v10941_v36 = vld [vmem:[#allocation2 + $0xe6c] sm:$0xf0]  ;;  %v10928_v34 = vld [vmem:[#allocation2 + $0xe0c] sm:$0xf] }
 0x491   :  { %7436 = vmatpush.bf16.msrb.mxu2 %v9570_v2  ;;  %7445 = vmatpush.bf16.msrb.mxu3 %v9954_v48  ;;  %v7064_v25 = vpop.f32.mrf.mxu1  ;;  %v9858_v2 = vor.u32 %v10965_v52, %v9857_v39  ;;  %v8065_v38 = vld [vmem:[#allocation2 + $0x110] sm:$0xf]  ;;  %v9723_v16 = vld [vmem:[#allocation2 + $0xe28] sm:$0xf0]  ;;  %v9762_v3 = vor.u32 %v10941_v36, %v9761_v42  ;;  %v7971_v42 = vld [vmem:[#allocation2 + $0x70] sm:$0xf0] }
 0x492   :  { %v7065_v48 = vadd.f32 %v7064_v25, %v7052_v26  ;;  %v10517_v62 = vld [vmem:[#allocation2 + $0x12c] sm:$0xf0] }
 0x493   :  { %7316 = vmatpush.bf16.msrb.mxu1 %v9918_v47  ;;  %7307 = vmatpush.bf16.msrb.mxu0 %v9534_v56  ;;  %v10529_v47 = vld [vmem:[#allocation2 + $0x194] sm:$0xf]  ;;  %v8417_v18 = vld [vmem:[#allocation2 + $0x3d0] sm:$0xf]  ;;  %v8066_v29 = vor.u32 %v10517_v62, %v8065_v38  ;;  %v11128_v62 = vld [vmem:[#allocation5] sm:$0xff] }
 0x494   :  { %v8131_v56 = vld [vmem:[#allocation2 + $0x1b0] sm:$0xf0]  ;;  %v7078_v45 = vadd.f32 %v14839_v50, %v7065_v48  ;;  %v9790_v50 = vor.u32 %v10944_v8, %v9787_v53  ;;  %v9726_v48 = vor.u32 %v10928_v34, %v9723_v16  ;;  %v10581_v34 = vld [vmem:[#allocation2 + $0x32c] sm:$0xf0] }
 0x495   :  { %7437 = vmatpush.bf16.msrb.mxu2 %v9538_v4  ;;  %7446 = vmatpush.bf16.msrb.mxu3 %v9922_v31  ;;  %v9793_v4 = vld [vmem:[#allocation2 + $0xe90] sm:$0xf]  ;;  %v8130_v31 = vor.u32 %v10533_v37, %v8129_v27  ;;  %v8134_v44 = vor.u32 %v10529_v47, %v8131_v56  ;;  %v8419_v37 = vld [vmem:[#allocation2 + $0x3f0] sm:$0xf0] }
 0x496   :  { %v7091_v26 = vadd.f32 %v14849_v49, %v7078_v45  ;;  %v10936_v49 = vld [vmem:[#allocation2 + $0xe4c] sm:$0xf]  ;;  %v9794_v0 = vor.u32 %v10949_v7, %v9793_v4  ;;  %v8385_v56 = vld [vmem:[#allocation2 + $0x390] sm:$0xf]  ;;  %v10585_v38 = vld [vmem:[#allocation2 + $0x354] sm:$0xf] }
 0x497   :  { %7317 = vmatpush.bf16.msrb.mxu1 %v9886_v55  ;;  %7308 = vmatpush.bf16.msrb.mxu0 %v9502_v23  ;;  %v14868_v23 = vpop.f32.mrf.mxu3  ;;  %v9758_v52 = vor.u32 %v10936_v49, %v9755_v61  ;;  %v10597_v45 = vld [vmem:[#allocation2 + $0x3ac] sm:$0xf0] }
 0x498   :  { %v7882_v55 = vrot.slane %v7091_v26, 6  ;;  %v10501_v26 = vld [vmem:[#allocation2 + $0xac] sm:$0xf0]  ;;  %v8386_v7 = vor.u32 %v10597_v45, %v8385_v56 }
 0x499   :  { %7438 = vmatpush.bf16.msrb.mxu2 %v9506_v58  ;;  %7447 = vmatpush.bf16.msrb.mxu3 %v9890_v46  ;;  %v7066_v20 = vpop.f32.mrf.mxu1  ;;  %v8098_v58 = vor.u32 %v10525_v12, %v8097_v30  ;;  %v8102_v46 = vor.u32 %v10521_v21, %v8099_v41  ;;  %v10593_v30 = vld [vmem:[#allocation2 + $0x394] sm:$0xf]  ;;  %v8353_v21 = vld [vmem:[#allocation2 + $0x350] sm:$0xf] }
 0x49a   :  { %v14872_v39 = vsel %vm7888_vm6, %v14844_v59, %v7882_v55  ;;  %v10933_v59 = vld [vmem:[#allocation2 + $0xe2c] sm:$0xf0]  ;;  %v8387_v12 = vld [vmem:[#allocation2 + $0x3b0] sm:$0xf0] }
 0x49b   :  { %7318 = vmatpush.bf16.msrb.mxu1 %v9854_v57  ;;  %7309 = vmatpush.bf16.msrb.mxu0 %v9470_v14  ;;  %v10513_v57 = vld [vmem:[#allocation2 + $0x114] sm:$0xf]  ;;  %v10605_v14 = vld [vmem:[#allocation2 + $0x3ec] sm:$0xf0]  ;;  %v14874_v17 = vpop.f32.mrf.mxu0 }
 0x49c   :  { %v8070_v25 = vor.u32 %v10513_v57, %v8067_v10  ;;  %v8418_v27 = vor.u32 %v10605_v14, %v8417_v18  ;;  %v10589_v41 = vld [vmem:[#allocation2 + $0x36c] sm:$0xf0]  ;;  %v2457_v57 = vperm.slane %v11128_v62, 2 }
 0x49d   :  { %7439 = vmatpush.bf16.msrb.mxu2 %v9474_v35  ;;  %7448 = vmatpush.bf16.msrb.mxu3 %v9858_v2  ;;  %v9729_v35 = vld [vmem:[#allocation2 + $0xe10] sm:$0xf]  ;;  %v8354_v36 = vor.u32 %v10589_v41, %v8353_v21  ;;  %v10785_v21 = vld [vmem:[#allocation2 + $0x994] sm:$0xf] }
 0x49e   :  { %7310 = vmatmul.bf16.vlgmr.msrb.gmra.mxu0 %v15362_v60  ;;  %v8033_v2 = vld [vmem:[#allocation2 + $0xd0] sm:$0xf]  ;;  %v9730_v47 = vor.u32 %v10933_v59, %v9729_v35  ;;  %v7939_v35 = vld [vmem:[#allocation2 + $0x30] sm:$0xf0] }
 0x49f   :  { %7354 = vmatpush.bf16.msra.mxu0 %v8162_v6  ;;  %7319 = vmatpush.bf16.msrb.mxu1 %v9822_v22  ;;  %v10509_v6 = vld [vmem:[#allocation2 + $0xec] sm:$0xf0]  ;;  %v7196_v32 = vpop.f32.mrf.mxu3  ;;  %v10601_v22 = vld [vmem:[#allocation2 + $0x3d4] sm:$0xf] }
 0x4a0   :  { %7440 = vmatmul.bf16.vlgmr.msrb.gmra.mxu2 %v15362_v60  ;;  %v8034_v8 = vor.u32 %v10509_v6, %v8033_v2  ;;  %v8422_v4 = vor.u32 %v10601_v22, %v8419_v37  ;;  %v7969_v20 = vld [vmem:[#allocation2 + $0x50] sm:$0xf]  ;;  %v10577_v59 = vld [vmem:[#allocation2 + $0x314] sm:$0xf]  ;;  %v7104_v32 = vadd.f32 %v14874_v17, %v2457_v57 }
 0x4a1   :  { %7484 = vmatpush.bf16.msra.mxu2 %v8166_v63  ;;  %7449 = vmatpush.bf16.msrb.mxu3 %v9826_v43  ;;  %v10505_v63 = vld [vmem:[#allocation2 + $0xd4] sm:$0xf]  ;;  %v8001_v43 = vld [vmem:[#allocation2 + $0x90] sm:$0xf] }
 0x4a2   :  { %v8038_v53 = vor.u32 %v10505_v63, %v8035_v28  ;;  %v8002_v49 = vor.u32 %v10501_v26, %v8001_v43  ;;  %v8321_v10 = vld [vmem:[#allocation2 + $0x310] sm:$0xf]  ;;  %v8323_v2 = vld [vmem:[#allocation2 + $0x330] sm:$0xf0] }
 0x4a3   :  { %7355 = vmatpush.bf16.msra.mxu0 %v8130_v31  ;;  %7320 = vmatpush.bf16.msrb.mxu1 %v9790_v50  ;;  %v10497_v31 = vld [vmem:[#allocation2 + $0x94] sm:$0xf]  ;;  %v14876_v50 = vpop.f32.mrf.mxu2  ;;  %v7105_v55 = vpop.f32.mrf.mxu0  ;;  %v7937_v18 = vld [vmem:[#allocation2 + $0x10] sm:$0xf] }
 0x4a4   :  { %v10485_v14 = vld [vmem:[#allocation2 + $0x2c] sm:$0xf0]  ;;  %v10793_v28 = vld [vmem:[#allocation2 + $0x9d4] sm:$0xf] }
 0x4a5   :  { %7485 = vmatpush.bf16.msra.mxu2 %v8134_v44  ;;  %7450 = vmatpush.bf16.msrb.mxu3 %v9794_v0  ;;  %v8003_v44 = vld [vmem:[#allocation2 + $0xb0] sm:$0xf0]  ;;  %v8390_v0 = vor.u32 %v10593_v30, %v8387_v12  ;;  %v9185_v6 = vld [vmem:[#allocation2 + $0x9d0] sm:$0xf]  ;;  %v7938_v45 = vor.u32 %v10485_v14, %v7937_v18 }
 0x4a6   :  { %v8006_v61 = vor.u32 %v10497_v31, %v8003_v44  ;;  %v10797_v63 = vld [vmem:[#allocation2 + $0x9ec] sm:$0xf0]  ;;  %v9187_v22 = vld [vmem:[#allocation2 + $0x9f0] sm:$0xf0] }
 0x4a7   :  { %7356 = vmatpush.bf16.msra.mxu0 %v8098_v58  ;;  %7321 = vmatpush.bf16.msrb.mxu1 %v9758_v52  ;;  %v10493_v58 = vld [vmem:[#allocation2 + $0x6c] sm:$0xf0]  ;;  %v8355_v52 = vld [vmem:[#allocation2 + $0x370] sm:$0xf0]  ;;  %v9186_v26 = vor.u32 %v10797_v63, %v9185_v6 }
 0x4a8   :  { %v7970_v16 = vor.u32 %v10493_v58, %v7969_v20  ;;  %v8289_v37 = vld [vmem:[#allocation2 + $0x2d0] sm:$0xf]  ;;  %v10569_v31 = vld [vmem:[#allocation2 + $0x2d4] sm:$0xf] }
 0x4a9   :  { %7486 = vmatpush.bf16.msra.mxu2 %v8102_v46  ;;  %7451 = vmatpush.bf16.msrb.mxu3 %v9762_v3  ;;  %v10489_v46 = vld [vmem:[#allocation2 + $0x54] sm:$0xf]  ;;  %v9153_v17 = vld [vmem:[#allocation2 + $0x990] sm:$0xf] }
 0x4aa   :  { %v7974_v3 = vor.u32 %v10489_v46, %v7971_v42  ;;  %v8291_v44 = vld [vmem:[#allocation2 + $0x2f0] sm:$0xf0]  ;;  %v10789_v12 = vld [vmem:[#allocation2 + $0x9ac] sm:$0xf0] }
 0x4ab   :  { %7357 = vmatpush.bf16.msra.mxu0 %v8066_v29  ;;  %7322 = vmatpush.bf16.msrb.mxu1 %v9726_v48  ;;  %v10481_v29 = vld [vmem:[#allocation2 + $0x14] sm:$0xf]  ;;  %v8322_v48 = vor.u32 %v10581_v34, %v8321_v10  ;;  %v7116_v56 = vpop.f32.mrf.mxu1  ;;  %v8294_v20 = vor.u32 %v10569_v31, %v8291_v44 }
 0x4ac   :  { %v7117_v43 = vadd.f32 %v7116_v56, %v7104_v32  ;;  %v9155_v55 = vld [vmem:[#allocation2 + $0x9b0] sm:$0xf0]  ;;  %v10549_v32 = vld [vmem:[#allocation2 + $0x22c] sm:$0xf0] }
 0x4ad   :  { %7487 = vmatpush.bf16.msra.mxu2 %v8070_v25  ;;  %7452 = vmatpush.bf16.msrb.mxu3 %v9730_v47  ;;  %v8358_v25 = vor.u32 %v10585_v38, %v8355_v52  ;;  %v10573_v47 = vld [vmem:[#allocation2 + $0x2ec] sm:$0xf0]  ;;  %v10561_v58 = vld [vmem:[#allocation2 + $0x294] sm:$0xf]  ;;  %v9158_v38 = vor.u32 %v10785_v21, %v9155_v55 }
 0x4ae   :  { %7323 = vmatmul.bf16.vlgmr.msrb.gmra.mxu1 %v15363_v15  ;;  %v8290_v30 = vor.u32 %v10573_v47, %v8289_v37  ;;  %v7130_v41 = vadd.f32 %v14851_v40, %v7117_v43  ;;  %v8259_v46 = vld [vmem:[#allocation2 + $0x2b0] sm:$0xf0]  ;;  %v9121_v40 = vld [vmem:[#allocation2 + $0x950] sm:$0xf] }
 0x4af   :  { %7367 = vmatpush.bf16.msra.mxu1 %v8418_v27  ;;  %7358 = vmatpush.bf16.msra.mxu0 %v8034_v8  ;;  %v7235_v27 = vpop.f32.mrf.mxu2  ;;  %v7942_v8 = vor.u32 %v10481_v29, %v7939_v35  ;;  %v10777_v57 = vld [vmem:[#allocation2 + $0x954] sm:$0xf] }
 0x4b0   :  { %7453 = vmatmul.bf16.vlgmr.msrb.gmra.mxu3 %v15363_v15  ;;  %v7143_v42 = vadd.f32 %v14858_v1, %v7130_v41  ;;  %v9123_v34 = vld [vmem:[#allocation2 + $0x970] sm:$0xf0]  ;;  %v9441_v27 = vld [vmem:[#allocation2 + $0xbd0] sm:$0xf] }
 0x4b1   :  { %7488 = vmatpush.bf16.msra.mxu2 %v8038_v53  ;;  %7497 = vmatpush.bf16.msra.mxu3 %v8422_v4  ;;  %v2458_v53 = vperm.slane %v11128_v62, 3  ;;  %v8326_v4 = vor.u32 %v10577_v59, %v8323_v2  ;;  %v10781_v62 = vld [vmem:[#allocation2 + $0x96c] sm:$0xf0]  ;;  %v10553_v29 = vld [vmem:[#allocation2 + $0x254] sm:$0xf]  ;;  %v9126_v35 = vor.u32 %v10777_v57, %v9123_v34 }
 0x4b2   :  { %v9122_v14 = vor.u32 %v10781_v62, %v9121_v40  ;;  %v9089_v2 = vld [vmem:[#allocation2 + $0x910] sm:$0xf]  ;;  %v10769_v6 = vld [vmem:[#allocation2 + $0x914] sm:$0xf] }
 0x4b3   :  { %7368 = vmatpush.bf16.msra.mxu1 %v8386_v7  ;;  %7359 = vmatpush.bf16.msra.mxu0 %v8002_v49  ;;  %v9190_v7 = vor.u32 %v10793_v28, %v9187_v22  ;;  %v8257_v49 = vld [vmem:[#allocation2 + $0x290] sm:$0xf]  ;;  %v7246_v10 = vpop.f32.mrf.mxu3  ;;  %v7118_v1 = vpop.f32.mrf.mxu1  ;;  %v9091_v63 = vld [vmem:[#allocation2 + $0x930] sm:$0xf0] }
 0x4b4   :  { %v8193_v28 = vld [vmem:[#allocation2 + $0x210] sm:$0xf]  ;;  %v10545_v56 = vld [vmem:[#allocation2 + $0x214] sm:$0xf] }
 0x4b5   :  { %7489 = vmatpush.bf16.msra.mxu2 %v8006_v61  ;;  %7498 = vmatpush.bf16.msra.mxu3 %v8390_v0  ;;  %v10565_v61 = vld [vmem:[#allocation2 + $0x2ac] sm:$0xf0]  ;;  %v9154_v0 = vor.u32 %v10789_v12, %v9153_v17  ;;  %v8194_v43 = vor.u32 %v10549_v32, %v8193_v28  ;;  %v10761_v31 = vld [vmem:[#allocation2 + $0x8d4] sm:$0xf] }
 0x4b6   :  { %v8258_v52 = vor.u32 %v10565_v61, %v8257_v49  ;;  %v10861_v22 = vld [vmem:[#allocation2 + $0xbec] sm:$0xf0]  ;;  %v9059_v17 = vld [vmem:[#allocation2 + $0x8f0] sm:$0xf0] }
 0x4b7   :  { %7369 = vmatpush.bf16.msra.mxu1 %v8354_v36  ;;  %7360 = vmatpush.bf16.msra.mxu0 %v7970_v16  ;;  %v7234_v36 = vadd.f32 %v14876_v50, %v2458_v53  ;;  %v8225_v16 = vld [vmem:[#allocation2 + $0x250] sm:$0xf]  ;;  %v8262_v50 = vor.u32 %v10561_v58, %v8259_v46  ;;  %v9094_v53 = vor.u32 %v10769_v6, %v9091_v63  ;;  %v10857_v12 = vld [vmem:[#allocation2 + $0xbd4] sm:$0xf] }
 0x4b8   :  { %v9443_v21 = vld [vmem:[#allocation2 + $0xbf0] sm:$0xf0]  ;;  %v9409_v49 = vld [vmem:[#allocation2 + $0xb90] sm:$0xf] }
 0x4b9   :  { %7490 = vmatpush.bf16.msra.mxu2 %v7974_v3  ;;  %7499 = vmatpush.bf16.msra.mxu3 %v8358_v25  ;;  %v10557_v3 = vld [vmem:[#allocation2 + $0x26c] sm:$0xf0]  ;;  %v14886_v18 = vadd.f32 %v7246_v10, %v7234_v36  ;;  %v8227_v25 = vld [vmem:[#allocation2 + $0x270] sm:$0xf0] }
 0x4ba   :  { %v8226_v59 = vor.u32 %v10557_v3, %v8225_v16  ;;  %v8230_v37 = vor.u32 %v10553_v29, %v8227_v25  ;;  %v10853_v61 = vld [vmem:[#allocation2 + $0xbac] sm:$0xf0]  ;;  %v10753_v36 = vld [vmem:[#allocation2 + $0x894] sm:$0xf] }
 0x4bb   :  { %7370 = vmatpush.bf16.msra.mxu1 %v8322_v48  ;;  %7361 = vmatpush.bf16.msra.mxu0 %v7938_v45  ;;  %v10773_v48 = vld [vmem:[#allocation2 + $0x92c] sm:$0xf0]  ;;  %v8195_v45 = vld [vmem:[#allocation2 + $0x230] sm:$0xf0]  ;;  %v9410_v62 = vor.u32 %v10853_v61, %v9409_v49 }
 0x4bc   :  { %v9090_v47 = vor.u32 %v10773_v48, %v9089_v2  ;;  %v8198_v41 = vor.u32 %v10545_v56, %v8195_v45  ;;  %v9025_v58 = vld [vmem:[#allocation2 + $0x890] sm:$0xf]  ;;  %v10745_v29 = vld [vmem:[#allocation2 + $0x854] sm:$0xf] }
 0x4bd   :  { %7491 = vmatpush.bf16.msra.mxu2 %v7942_v8  ;;  %7500 = vmatpush.bf16.msra.mxu3 %v8326_v4  ;;  %v7155_v8 = vpop.f32.mrf.mxu0  ;;  %v9057_v4 = vld [vmem:[#allocation2 + $0x8d0] sm:$0xf]  ;;  %v8995_v25 = vld [vmem:[#allocation2 + $0x870] sm:$0xf0] }
 0x4be   :  { %7362 = vmatmul.bf16.vlgmr.msra.gmra.mxu0 %v15364_v5  ;;  %v14888_v44 = vadd.f32 %v7155_v8, %v7143_v42  ;;  %v10757_v46 = vld [vmem:[#allocation2 + $0x8ac] sm:$0xf0]  ;;  %v9027_v42 = vld [vmem:[#allocation2 + $0x8b0] sm:$0xf0]  ;;  %v8998_v32 = vor.u32 %v10745_v29, %v8995_v25 }
 0x4bf   :  { %7406 = vmatpush.bf16.msrb.mxu0 %v9186_v26  ;;  %7371 = vmatpush.bf16.msra.mxu1 %v8290_v30  ;;  %v10765_v26 = vld [vmem:[#allocation2 + $0x8ec] sm:$0xf0]  ;;  %v9442_v30 = vor.u32 %v10861_v22, %v9441_v27  ;;  %v9026_v57 = vor.u32 %v10757_v46, %v9025_v58  ;;  %v9030_v3 = vor.u32 %v10753_v36, %v9027_v42  ;;  %v10833_v56 = vld [vmem:[#allocation2 + $0xb14] sm:$0xf] }
 0x4c0   :  { %7492 = vmatmul.bf16.vlgmr.msra.gmra.mxu2 %v15364_v5  ;;  %v9058_v55 = vor.u32 %v10765_v26, %v9057_v4  ;;  %v9377_v10 = vld [vmem:[#allocation2 + $0xb50] sm:$0xf]  ;;  %v9347_v45 = vld [vmem:[#allocation2 + $0xb30] sm:$0xf0] }
 0x4c1   :  { %7536 = vmatpush.bf16.msrb.mxu2 %v9190_v7  ;;  %7501 = vmatpush.bf16.msra.mxu3 %v8294_v20  ;;  %v7248_v7 = vpop.f32.mrf.mxu3  ;;  %v9062_v20 = vor.u32 %v10761_v31, %v9059_v17  ;;  %v10845_v34 = vld [vmem:[#allocation2 + $0xb6c] sm:$0xf0]  ;;  %v11049_v26 = vld [vmem:[#allocation2 + $0x11d4] sm:$0xf] }
 0x4c2   :  { %v9378_v2 = vor.u32 %v10845_v34, %v9377_v10  ;;  %v8961_v6 = vld [vmem:[#allocation2 + $0x810] sm:$0xf]  ;;  %v10211_v31 = vld [vmem:[#allocation2 + $0x11f0] sm:$0xf0] }
 0x4c3   :  { %7407 = vmatpush.bf16.msrb.mxu0 %v9154_v0  ;;  %7372 = vmatpush.bf16.msra.mxu1 %v8258_v52  ;;  %v9446_v0 = vor.u32 %v10857_v12, %v9443_v21  ;;  %v9411_v52 = vld [vmem:[#allocation2 + $0xbb0] sm:$0xf0]  ;;  %v14890_v40 = vpop.f32.mrf.mxu2  ;;  %v9345_v63 = vld [vmem:[#allocation2 + $0xb10] sm:$0xf]  ;;  %v10214_v61 = vor.u32 %v11049_v26, %v10211_v31 }
 0x4c4   :  { %v10837_v28 = vld [vmem:[#allocation2 + $0xb2c] sm:$0xf0]  ;;  %v11041_v42 = vld [vmem:[#allocation2 + $0x1194] sm:$0xf] }
 0x4c5   :  { %7537 = vmatpush.bf16.msrb.mxu2 %v9158_v38  ;;  %7502 = vmatpush.bf16.msra.mxu3 %v8262_v50  ;;  %v10849_v38 = vld [vmem:[#allocation2 + $0xb94] sm:$0xf]  ;;  %v7157_v16 = vpop.f32.mrf.mxu0  ;;  %v8993_v50 = vld [vmem:[#allocation2 + $0x850] sm:$0xf] }
 0x4c6   :  { %v9414_v1 = vor.u32 %v10849_v38, %v9411_v52  ;;  %v10741_v22 = vld [vmem:[#allocation2 + $0x82c] sm:$0xf0]  ;;  %v10179_v38 = vld [vmem:[#allocation2 + $0x11b0] sm:$0xf0] }
 0x4c7   :  { %7408 = vmatpush.bf16.msrb.mxu0 %v9122_v14  ;;  %7373 = vmatpush.bf16.msra.mxu1 %v8226_v59  ;;  %v10749_v14 = vld [vmem:[#allocation2 + $0x86c] sm:$0xf0]  ;;  %v9379_v59 = vld [vmem:[#allocation2 + $0xb70] sm:$0xf0]  ;;  %v8962_v7 = vor.u32 %v10741_v22, %v8961_v6  ;;  %v10182_v34 = vor.u32 %v11041_v42, %v10179_v38 }
 0x4c8   :  { %v8994_v48 = vor.u32 %v10749_v14, %v8993_v50  ;;  %v10209_v8 = vld [vmem:[#allocation2 + $0x11d0] sm:$0xf]  ;;  %v10817_v16 = vld [vmem:[#allocation2 + $0xa94] sm:$0xf] }
 0x4c9   :  { %7538 = vmatpush.bf16.msrb.mxu2 %v9126_v35  ;;  %7503 = vmatpush.bf16.msra.mxu3 %v8230_v37  ;;  %v10841_v35 = vld [vmem:[#allocation2 + $0xb54] sm:$0xf]  ;;  %v11053_v4 = vld [vmem:[#allocation2 + $0x11ec] sm:$0xf0] }
 0x4ca   :  { %v9382_v27 = vor.u32 %v10841_v35, %v9379_v59  ;;  %v10737_v37 = vld [vmem:[#allocation2 + $0x814] sm:$0xf]  ;;  %v10829_v17 = vld [vmem:[#allocation2 + $0xaec] sm:$0xf0]  ;;  %v10210_v49 = vor.u32 %v11053_v4, %v10209_v8 }
 0x4cb   :  { %7409 = vmatpush.bf16.msrb.mxu0 %v9090_v47  ;;  %7374 = vmatpush.bf16.msra.mxu1 %v8194_v43  ;;  %v8963_v47 = vld [vmem:[#allocation2 + $0x830] sm:$0xf0]  ;;  %v9346_v43 = vor.u32 %v10837_v28, %v9345_v63  ;;  %v7168_v12 = vpop.f32.mrf.mxu1  ;;  %v10177_v58 = vld [vmem:[#allocation2 + $0x1190] sm:$0xf] }
 0x4cc   :  { %v8966_v21 = vor.u32 %v10737_v37, %v8963_v47  ;;  %v11045_v36 = vld [vmem:[#allocation2 + $0x11ac] sm:$0xf0]  ;;  %v11033_v29 = vld [vmem:[#allocation2 + $0x1154] sm:$0xf] }
 0x4cd   :  { %7539 = vmatpush.bf16.msrb.mxu2 %v9094_v53  ;;  %7504 = vmatpush.bf16.msra.mxu3 %v8198_v41  ;;  %v7287_v53 = vpop.f32.mrf.mxu2  ;;  %v9350_v41 = vor.u32 %v10833_v56, %v9347_v45  ;;  %v10147_v25 = vld [vmem:[#allocation2 + $0x1170] sm:$0xf0]  ;;  %v9249_v59 = vld [vmem:[#allocation2 + $0xa50] sm:$0xf] }
 0x4ce   :  { %7375 = vmatmul.bf16.vlgmr.msra.gmra.mxu1 %v15365_v54  ;;  %v10809_v28 = vld [vmem:[#allocation2 + $0xa54] sm:$0xf]  ;;  %v11029_v37 = vld [vmem:[#allocation2 + $0x112c] sm:$0xf0] }
 0x4cf   :  { %7419 = vmatpush.bf16.msrb.mxu1 %v9442_v30  ;;  %7410 = vmatpush.bf16.msrb.mxu0 %v9058_v55  ;;  %v9313_v30 = vld [vmem:[#allocation2 + $0xad0] sm:$0xf]  ;;  %v7169_v55 = vadd.f32 %v7168_v12, %v14888_v44  ;;  %v10178_v44 = vor.u32 %v11045_v36, %v10177_v58  ;;  %v11025_v47 = vld [vmem:[#allocation2 + $0x1114] sm:$0xf] }
 0x4d0   :  { %7505 = vmatmul.bf16.vlgmr.msra.gmra.mxu3 %v15365_v54  ;;  %v9314_v46 = vor.u32 %v10829_v17, %v9313_v30  ;;  %v10115_v56 = vld [vmem:[#allocation2 + $0x1130] sm:$0xf0]  ;;  %v9217_v45 = vld [vmem:[#allocation2 + $0xa10] sm:$0xf] }
 0x4d1   :  { %7540 = vmatpush.bf16.msrb.mxu2 %v9062_v20  ;;  %7549 = vmatpush.bf16.msrb.mxu3 %v9446_v0  ;;  %v10825_v20 = vld [vmem:[#allocation2 + $0xad4] sm:$0xf]  ;;  %v7182_v52 = vadd.f32 %v14860_v51, %v7169_v55  ;;  %v11037_v51 = vld [vmem:[#allocation2 + $0x116c] sm:$0xf0] }
 0x4d2   :  { %v9315_v0 = vld [vmem:[#allocation2 + $0xaf0] sm:$0xf0]  ;;  %v10805_v8 = vld [vmem:[#allocation2 + $0xa2c] sm:$0xf0] }
 0x4d3   :  { %7420 = vmatpush.bf16.msrb.mxu1 %v9410_v62  ;;  %7411 = vmatpush.bf16.msrb.mxu0 %v9026_v57  ;;  %v9281_v62 = vld [vmem:[#allocation2 + $0xa90] sm:$0xf]  ;;  %v9318_v10 = vor.u32 %v10825_v20, %v9315_v0  ;;  %v7195_v50 = vadd.f32 %v14868_v23, %v7182_v52  ;;  %v14899_v35 = vpop.f32.mrf.mxu3  ;;  %v10150_v23 = vor.u32 %v11033_v29, %v10147_v25  ;;  %v10801_v30 = vld [vmem:[#allocation2 + $0xa14] sm:$0xf] }
 0x4d4   :  { %v10821_v57 = vld [vmem:[#allocation2 + $0xaac] sm:$0xf0]  ;;  %v9219_v17 = vld [vmem:[#allocation2 + $0xa30] sm:$0xf0] }
 0x4d5   :  { %7541 = vmatpush.bf16.msrb.mxu2 %v9030_v3  ;;  %7550 = vmatpush.bf16.msrb.mxu3 %v9414_v1  ;;  %v9283_v3 = vld [vmem:[#allocation2 + $0xab0] sm:$0xf0]  ;;  %v10145_v1 = vld [vmem:[#allocation2 + $0x1150] sm:$0xf]  ;;  %v9282_v14 = vor.u32 %v10821_v57, %v9281_v62  ;;  %v9222_v36 = vor.u32 %v10801_v30, %v9219_v17 }
 0x4d6   :  { %v9286_v6 = vor.u32 %v10817_v16, %v9283_v3  ;;  %v10146_v63 = vor.u32 %v11037_v51, %v10145_v1  ;;  %v11117_v4 = vld [vmem:[#allocation2 + $0x13ec] sm:$0xf0]  ;;  %v11113_v58 = vld [vmem:[#allocation2 + $0x13d4] sm:$0xf] }
 0x4d7   :  { %7421 = vmatpush.bf16.msrb.mxu1 %v9378_v2  ;;  %7412 = vmatpush.bf16.msrb.mxu0 %v8994_v48  ;;  %v10813_v2 = vld [vmem:[#allocation2 + $0xa6c] sm:$0xf0]  ;;  %v7170_v48 = vpop.f32.mrf.mxu1  ;;  %v10051_v16 = vld [vmem:[#allocation2 + $0x10b0] sm:$0xf0] }
 0x4d8   :  { %v9250_v22 = vor.u32 %v10813_v2, %v9249_v59  ;;  %v10081_v12 = vld [vmem:[#allocation2 + $0x10d0] sm:$0xf]  ;;  %v11105_v1 = vld [vmem:[#allocation2 + $0x1394] sm:$0xf] }
 0x4d9   :  { %7542 = vmatpush.bf16.msrb.mxu2 %v8998_v32  ;;  %7551 = vmatpush.bf16.msrb.mxu3 %v9382_v27  ;;  %v9251_v32 = vld [vmem:[#allocation2 + $0xa70] sm:$0xf0]  ;;  %v10113_v27 = vld [vmem:[#allocation2 + $0x1110] sm:$0xf] }
 0x4da   :  { %v9254_v53 = vor.u32 %v10809_v28, %v9251_v32  ;;  %v10114_v31 = vor.u32 %v11029_v37, %v10113_v27  ;;  %v11021_v55 = vld [vmem:[#allocation2 + $0x10ec] sm:$0xf0]  ;;  %v10019_v28 = vld [vmem:[#allocation2 + $0x1070] sm:$0xf0] }
 0x4db   :  { %7422 = vmatpush.bf16.msrb.mxu1 %v9346_v43  ;;  %7413 = vmatpush.bf16.msrb.mxu0 %v8962_v7  ;;  %v10465_v43 = vld [vmem:[#allocation2 + $0x13d0] sm:$0xf]  ;;  %v7207_v26 = vpop.f32.mrf.mxu0  ;;  %v10118_v7 = vor.u32 %v11025_v47, %v10115_v56  ;;  %v7300_v20 = vpop.f32.mrf.mxu3  ;;  %v10082_v52 = vor.u32 %v11021_v55, %v10081_v12  ;;  %v11097_v27 = vld [vmem:[#allocation2 + $0x1354] sm:$0xf] }
 0x4dc   :  { %v10466_v0 = vor.u32 %v11117_v4, %v10465_v43  ;;  %v10433_v42 = vld [vmem:[#allocation2 + $0x1390] sm:$0xf]  ;;  %v10993_v43 = vld [vmem:[#allocation2 + $0x1014] sm:$0xf] }
 0x4dd   :  { %7543 = vmatpush.bf16.msrb.mxu2 %v8966_v21  ;;  %7552 = vmatpush.bf16.msrb.mxu3 %v9350_v41  ;;  %v14901_v21 = vadd.f32 %v7207_v26, %v7195_v50  ;;  %v9218_v41 = vor.u32 %v10805_v8, %v9217_v45  ;;  %v11109_v38 = vld [vmem:[#allocation2 + $0x13ac] sm:$0xf0]  ;;  %v10435_v50 = vld [vmem:[#allocation2 + $0x13b0] sm:$0xf0] }
 0x4de   :  { %7414 = vmatmul.bf16.vlgmr.msrb.gmra.mxu0 %v15366_v9  ;;  %v10049_v57 = vld [vmem:[#allocation2 + $0x1090] sm:$0xf]  ;;  %v10434_v3 = vor.u32 %v11109_v38, %v10433_v42  ;;  %v9987_v26 = vld [vmem:[#allocation2 + $0x1030] sm:$0xf0] }
 0x4df   :  { %7458 = vmatpush.bf16.msra.mxu0 %v10210_v49  ;;  %7423 = vmatpush.bf16.msrb.mxu1 %v9314_v46  ;;  %v11017_v49 = vld [vmem:[#allocation2 + $0x10d4] sm:$0xf]  ;;  %v10401_v51 = vld [vmem:[#allocation2 + $0x1350] sm:$0xf] }
 0x4e0   :  { %7544 = vmatmul.bf16.vlgmr.msrb.gmra.mxu2 %v15366_v9  ;;  %v10467_v46 = vld [vmem:[#allocation2 + $0x13f0] sm:$0xf0]  ;;  %v11101_v29 = vld [vmem:[#allocation2 + $0x136c] sm:$0xf0] }
 0x4e1   :  { %7588 = vmatpush.bf16.msra.mxu2 %v10214_v61  ;;  %7553 = vmatpush.bf16.msrb.mxu3 %v9318_v10  ;;  %v10083_v61 = vld [vmem:[#allocation2 + $0x10f0] sm:$0xf0]  ;;  %v10470_v10 = vor.u32 %v11113_v58, %v10467_v46  ;;  %v10017_v48 = vld [vmem:[#allocation2 + $0x1050] sm:$0xf]  ;;  %v10402_v32 = vor.u32 %v11101_v29, %v10401_v51  ;;  %v9990_v46 = vor.u32 %v10993_v43, %v9987_v26  ;;  %v8585_v26 = vld [vmem:[#allocation2 + $0x518] sm:$0xf] }
 0x4e2   :  { %v10086_v62 = vor.u32 %v11017_v49, %v10083_v61  ;;  %v10369_v37 = vld [vmem:[#allocation2 + $0x1310] sm:$0xf]  ;;  %v10665_v17 = vld [vmem:[#allocation2 + $0x5d4] sm:$0xf]  ;;  %v10670_v49 = vld [vmem:[#allocation2 + $0x5f4] sm:$0xf0] }
 0x4e3   :  { %7459 = vmatpush.bf16.msra.mxu0 %v10178_v44  ;;  %7424 = vmatpush.bf16.msrb.mxu1 %v9282_v14  ;;  %v11013_v44 = vld [vmem:[#allocation2 + $0x10ac] sm:$0xf0]  ;;  %v14903_v14 = vpop.f32.mrf.mxu2  ;;  %v7209_v25 = vpop.f32.mrf.mxu0  ;;  %v8675_v12 = vld [vmem:[#allocation2 + $0x5f0] sm:$0xf0] }
 0x4e4   :  { %v10050_v59 = vor.u32 %v11013_v44, %v10049_v57  ;;  %v11093_v47 = vld [vmem:[#allocation2 + $0x132c] sm:$0xf0]  ;;  %v8678_v38 = vor.u32 %v10665_v17, %v8675_v12  ;;  %v10657_v44 = vld [vmem:[#allocation2 + $0x594] sm:$0xf] }
 0x4e5   :  { %7589 = vmatpush.bf16.msra.mxu2 %v10182_v34  ;;  %7554 = vmatpush.bf16.msrb.mxu3 %v9286_v6  ;;  %v11009_v34 = vld [vmem:[#allocation2 + $0x1094] sm:$0xf]  ;;  %v10438_v6 = vor.u32 %v11105_v1, %v10435_v50  ;;  %v9985_v8 = vld [vmem:[#allocation2 + $0x1010] sm:$0xf]  ;;  %v10370_v30 = vor.u32 %v11093_v47, %v10369_v37 }
 0x4e6   :  { %v10054_v2 = vor.u32 %v11009_v34, %v10051_v16  ;;  %v10337_v61 = vld [vmem:[#allocation2 + $0x12d0] sm:$0xf]  ;;  %v8643_v34 = vld [vmem:[#allocation2 + $0x5b0] sm:$0xf0]  ;;  %v8649_v16 = vld [vmem:[#allocation2 + $0x598] sm:$0xf] }
 0x4e7   :  { %7460 = vmatpush.bf16.msra.mxu0 %v10146_v63  ;;  %7425 = vmatpush.bf16.msrb.mxu1 %v9250_v22  ;;  %v11005_v63 = vld [vmem:[#allocation2 + $0x106c] sm:$0xf0]  ;;  %v10403_v22 = vld [vmem:[#allocation2 + $0x1370] sm:$0xf0] }
 0x4e8   :  { %v10018_v56 = vor.u32 %v11005_v63, %v10017_v48  ;;  %v10406_v4 = vor.u32 %v11097_v27, %v10403_v22  ;;  %v11085_v20 = vld [vmem:[#allocation2 + $0x12ec] sm:$0xf0]  ;;  %v11073_v29 = vld [vmem:[#allocation2 + $0x1294] sm:$0xf]  ;;  %v8617_v63 = vld [vmem:[#allocation2 + $0x558] sm:$0xf] }
 0x4e9   :  { %7590 = vmatpush.bf16.msra.mxu2 %v10150_v23  ;;  %7555 = vmatpush.bf16.msrb.mxu3 %v9254_v53  ;;  %v11001_v23 = vld [vmem:[#allocation2 + $0x1054] sm:$0xf]  ;;  %v10997_v53 = vld [vmem:[#allocation2 + $0x102c] sm:$0xf0] }
 0x4ea   :  { %v10022_v45 = vor.u32 %v11001_v23, %v10019_v28  ;;  %v9986_v58 = vor.u32 %v10997_v53, %v9985_v8  ;;  %v10305_v1 = vld [vmem:[#allocation2 + $0x1290] sm:$0xf]  ;;  %v10307_v25 = vld [vmem:[#allocation2 + $0x12b0] sm:$0xf0]  ;;  %v10654_v28 = vld [vmem:[#allocation2 + $0x574] sm:$0xf0] }
 0x4eb   :  { %7461 = vmatpush.bf16.msra.mxu0 %v10114_v31  ;;  %7426 = vmatpush.bf16.msrb.mxu1 %v9218_v41  ;;  %v11089_v31 = vld [vmem:[#allocation2 + $0x1314] sm:$0xf]  ;;  %v8681_v41 = vld [vmem:[#allocation2 + $0x5d8] sm:$0xf]  ;;  %v7339_v55 = vpop.f32.mrf.mxu2  ;;  %v11077_v50 = vld [vmem:[#allocation2 + $0x12ac] sm:$0xf0]  ;;  %v10310_v37 = vor.u32 %v11073_v29, %v10307_v25  ;;  %v8618_v8 = vor.u32 %v10654_v28, %v8617_v63 }
 0x4ec   :  { %v8682_v57 = vor.u32 %v10670_v49, %v8681_v41  ;;  %v10649_v48 = vld [vmem:[#allocation2 + $0x554] sm:$0xf]  ;;  %v11069_v27 = vld [vmem:[#allocation2 + $0x126c] sm:$0xf0]  ;;  %v8521_v25 = vld [vmem:[#allocation2 + $0x498] sm:$0xf] }
 0x4ed   :  { %7591 = vmatpush.bf16.msra.mxu2 %v10118_v7  ;;  %7556 = vmatpush.bf16.msrb.mxu3 %v9222_v36  ;;  %v10371_v7 = vld [vmem:[#allocation2 + $0x1330] sm:$0xf0] }
 0x4ee   :  { %7427 = vmatmul.bf16.vlgmr.msrb.gmra.mxu1 %v15367_v11  ;;  %v10374_v42 = vor.u32 %v11089_v31, %v10371_v7  ;;  %v10641_v43 = vld [vmem:[#allocation2 + $0x514] sm:$0xf]  ;;  %v10646_v31 = vld [vmem:[#allocation2 + $0x534] sm:$0xf0]  ;;  %v10241_v7 = vld [vmem:[#allocation2 + $0x1210] sm:$0xf] }
 0x4ef   :  { %7471 = vmatpush.bf16.msra.mxu1 %v10466_v0  ;;  %7462 = vmatpush.bf16.msra.mxu0 %v10082_v52  ;;  %v7220_v0 = vpop.f32.mrf.mxu1  ;;  %v11081_v52 = vld [vmem:[#allocation2 + $0x12d4] sm:$0xf] }
 0x4f0   :  { %7557 = vmatmul.bf16.vlgmr.msrb.gmra.mxu3 %v15367_v11  ;;  %v14908_v36 = vadd.f32 %v7220_v0, %v14901_v21  ;;  %v8646_v21 = vor.u32 %v10657_v44, %v8643_v34  ;;  %v10729_v17 = vld [vmem:[#allocation2 + $0x7d4] sm:$0xf]  ;;  %v8586_v0 = vor.u32 %v10646_v31, %v8585_v26  ;;  %v10734_v44 = vld [vmem:[#allocation2 + $0x7f4] sm:$0xf0] }
 0x4f1   :  { %7592 = vmatpush.bf16.msra.mxu2 %v10086_v62  ;;  %7601 = vmatpush.bf16.msra.mxu3 %v10470_v10  ;;  %v10339_v62 = vld [vmem:[#allocation2 + $0x12f0] sm:$0xf0]  ;;  %v10338_v10 = vor.u32 %v11085_v20, %v10337_v61 }
 0x4f2   :  { %v10342_v51 = vor.u32 %v11081_v52, %v10339_v62  ;;  %v8931_v12 = vld [vmem:[#allocation2 + $0x7f0] sm:$0xf0] }
 0x4f3   :  { %7472 = vmatpush.bf16.msra.mxu1 %v10434_v3  ;;  %7463 = vmatpush.bf16.msra.mxu0 %v10050_v59  ;;  %v10662_v3 = vld [vmem:[#allocation2 + $0x5b4] sm:$0xf0]  ;;  %v14912_v23 = vpop.f32.mrf.mxu3  ;;  %v11057_v49 = vld [vmem:[#allocation2 + $0x1214] sm:$0xf]  ;;  %v8934_v62 = vor.u32 %v10729_v17, %v8931_v12 }
 0x4f4   :  { %v8650_v59 = vor.u32 %v10662_v3, %v8649_v16  ;;  %v10243_v61 = vld [vmem:[#allocation2 + $0x1230] sm:$0xf0] }
 0x4f5   :  { %7593 = vmatpush.bf16.msra.mxu2 %v10054_v2  ;;  %7602 = vmatpush.bf16.msra.mxu3 %v10438_v6  ;;  %v10306_v2 = vor.u32 %v11077_v50, %v10305_v1  ;;  %v8611_v6 = vld [vmem:[#allocation2 + $0x570] sm:$0xf0]  ;;  %v10246_v34 = vor.u32 %v11057_v49, %v10243_v61  ;;  %v8457_v49 = vld [vmem:[#allocation2 + $0x418] sm:$0xf] }
 0x4f6   :  { %v8614_v47 = vor.u32 %v10649_v48, %v8611_v6  ;;  %v10721_v3 = vld [vmem:[#allocation2 + $0x794] sm:$0xf]  ;;  %v10726_v48 = vld [vmem:[#allocation2 + $0x7b4] sm:$0xf0] }
 0x4f7   :  { %7473 = vmatpush.bf16.msra.mxu1 %v10402_v32  ;;  %7464 = vmatpush.bf16.msra.mxu0 %v10018_v56  ;;  %v10273_v32 = vld [vmem:[#allocation2 + $0x1250] sm:$0xf]  ;;  %v7222_v22 = vpop.f32.mrf.mxu1  ;;  %v11065_v56 = vld [vmem:[#allocation2 + $0x1254] sm:$0xf]  ;;  %v10614_v61 = vld [vmem:[#allocation2 + $0x434] sm:$0xf0] }
 0x4f8   :  { %v10274_v53 = vor.u32 %v11069_v27, %v10273_v32  ;;  %v8899_v1 = vld [vmem:[#allocation2 + $0x7b0] sm:$0xf0] }
 0x4f9   :  { %7594 = vmatpush.bf16.msra.mxu2 %v10022_v45  ;;  %7603 = vmatpush.bf16.msra.mxu3 %v10406_v4  ;;  %v10275_v45 = vld [vmem:[#allocation2 + $0x1270] sm:$0xf0]  ;;  %v8902_v63 = vor.u32 %v10721_v3, %v8899_v1  ;;  %v8458_v1 = vor.u32 %v10614_v61, %v8457_v49  ;;  %v10686_v49 = vld [vmem:[#allocation2 + $0x674] sm:$0xf0] }
 0x4fa   :  { %v8579_v4 = vld [vmem:[#allocation2 + $0x530] sm:$0xf0]  ;;  %v10278_v41 = vor.u32 %v11065_v56, %v10275_v45 }
 0x4fb   :  { %7474 = vmatpush.bf16.msra.mxu1 %v10370_v30  ;;  %7465 = vmatpush.bf16.msra.mxu0 %v9986_v58  ;;  %v11061_v30 = vld [vmem:[#allocation2 + $0x122c] sm:$0xf0]  ;;  %v8582_v55 = vor.u32 %v10641_v43, %v8579_v4  ;;  %v14914_v20 = vpop.f32.mrf.mxu0  ;;  %v7352_v52 = vpop.f32.mrf.mxu3  ;;  %v8515_v29 = vld [vmem:[#allocation2 + $0x4b0] sm:$0xf0]  ;;  %v8873_v43 = vld [vmem:[#allocation2 + $0x758] sm:$0xf] }
 0x4fc   :  { %v10242_v58 = vor.u32 %v11061_v30, %v10241_v7  ;;  %v10713_v32 = vld [vmem:[#allocation2 + $0x754] sm:$0xf]  ;;  %v10718_v4 = vld [vmem:[#allocation2 + $0x774] sm:$0xf0] }
 0x4fd   :  { %7595 = vmatpush.bf16.msra.mxu2 %v9990_v46  ;;  %7604 = vmatpush.bf16.msra.mxu3 %v10374_v42  ;;  %v10633_v46 = vld [vmem:[#allocation2 + $0x4d4] sm:$0xf] }
 0x4fe   :  { %7466 = vmatmul.bf16.vlgmr.msra.gmra.mxu0 %v14763_v24  ;;  %v8547_v42 = vld [vmem:[#allocation2 + $0x4f0] sm:$0xf0] }
 0x4ff   :  { %7510 = vmatpush.bf16.msrb.mxu0 %v8678_v38  ;;  %7475 = vmatpush.bf16.msra.mxu1 %v10338_v10  ;;  %v8553_v38 = vld [vmem:[#allocation2 + $0x4d8] sm:$0xf]  ;;  %v8550_v16 = vor.u32 %v10633_v46, %v8547_v42  ;;  %v8867_v27 = vld [vmem:[#allocation2 + $0x770] sm:$0xf0] }
 0x500   :  { %7596 = vmatmul.bf16.vlgmr.msra.gmra.mxu2 %v14763_v24  ;;  %v8937_v10 = vld [vmem:[#allocation2 + $0x7d8] sm:$0xf]  ;;  %v10617_v56 = vld [vmem:[#allocation2 + $0x454] sm:$0xf]  ;;  %v8870_v26 = vor.u32 %v10713_v32, %v8867_v27 }
 0x501   :  { %7640 = vmatpush.bf16.msrb.mxu2 %v8682_v57  ;;  %7605 = vmatpush.bf16.msra.mxu3 %v10342_v51  ;;  %v10638_v57 = vld [vmem:[#allocation2 + $0x4f4] sm:$0xf0]  ;;  %v8938_v51 = vor.u32 %v10734_v44, %v8937_v10  ;;  %v8483_v45 = vld [vmem:[#allocation2 + $0x470] sm:$0xf0]  ;;  %v7260_v10 = vadd.f32 %v14914_v20, %v14886_v18 }
 0x502   :  { %v8554_v50 = vor.u32 %v10638_v57, %v8553_v38  ;;  %v8486_v31 = vor.u32 %v10617_v56, %v8483_v45  ;;  %v10609_v7 = vld [vmem:[#allocation2 + $0x414] sm:$0xf]  ;;  %v10926_v57 = vld [vmem:[#allocation2 + $0xdf4] sm:$0xf0] }
 0x503   :  { %7511 = vmatpush.bf16.msrb.mxu0 %v8646_v21  ;;  %7476 = vmatpush.bf16.msra.mxu1 %v10306_v2  ;;  %v10625_v21 = vld [vmem:[#allocation2 + $0x494] sm:$0xf]  ;;  %v8905_v2 = vld [vmem:[#allocation2 + $0x798] sm:$0xf]  ;;  %v14916_v6 = vpop.f32.mrf.mxu2  ;;  %v7261_v22 = vpop.f32.mrf.mxu0 }
 0x504   :  { %v8518_v28 = vor.u32 %v10625_v21, %v8515_v29  ;;  %v10705_v30 = vld [vmem:[#allocation2 + $0x714] sm:$0xf]  ;;  %v10918_v18 = vld [vmem:[#allocation2 + $0xdb4] sm:$0xf0] }
 0x505   :  { %7641 = vmatpush.bf16.msrb.mxu2 %v8650_v59  ;;  %7606 = vmatpush.bf16.msra.mxu3 %v10310_v37  ;;  %v10630_v59 = vld [vmem:[#allocation2 + $0x4b4] sm:$0xf0]  ;;  %v8835_v17 = vld [vmem:[#allocation2 + $0x730] sm:$0xf0] }
 0x506   :  { %v8522_v37 = vor.u32 %v10630_v59, %v8521_v25  ;;  %v10921_v46 = vld [vmem:[#allocation2 + $0xdd4] sm:$0xf]  ;;  %v8838_v38 = vor.u32 %v10705_v30, %v8835_v17  ;;  %v8809_v25 = vld [vmem:[#allocation2 + $0x6d8] sm:$0xf] }
 0x507   :  { %7512 = vmatpush.bf16.msrb.mxu0 %v8614_v47  ;;  %7477 = vmatpush.bf16.msra.mxu1 %v10274_v53  ;;  %v8906_v47 = vor.u32 %v10726_v48, %v8905_v2  ;;  %v10622_v53 = vld [vmem:[#allocation2 + $0x474] sm:$0xf0]  ;;  %v9699_v52 = vld [vmem:[#allocation2 + $0xdf0] sm:$0xf0] }
 0x508   :  { %v9702_v21 = vor.u32 %v10921_v46, %v9699_v52  ;;  %v10702_v59 = vld [vmem:[#allocation2 + $0x6f4] sm:$0xf0]  ;;  %v10913_v2 = vld [vmem:[#allocation2 + $0xd94] sm:$0xf] }
 0x509   :  { %7642 = vmatpush.bf16.msrb.mxu2 %v8618_v8  ;;  %7607 = vmatpush.bf16.msra.mxu3 %v10278_v41  ;;  %v8489_v8 = vld [vmem:[#allocation2 + $0x458] sm:$0xf]  ;;  %v8874_v41 = vor.u32 %v10718_v4, %v8873_v43  ;;  %v10689_v32 = vld [vmem:[#allocation2 + $0x694] sm:$0xf]  ;;  %v8810_v22 = vor.u32 %v10702_v59, %v8809_v25 }
 0x50a   :  { %v8490_v12 = vor.u32 %v10622_v53, %v8489_v8  ;;  %v8771_v27 = vld [vmem:[#allocation2 + $0x6b0] sm:$0xf0]  ;;  %v8777_v56 = vld [vmem:[#allocation2 + $0x698] sm:$0xf] }
 0x50b   :  { %7513 = vmatpush.bf16.msrb.mxu0 %v8582_v55  ;;  %7478 = vmatpush.bf16.msra.mxu1 %v10242_v58  ;;  %v8451_v55 = vld [vmem:[#allocation2 + $0x430] sm:$0xf0]  ;;  %v10710_v58 = vld [vmem:[#allocation2 + $0x734] sm:$0xf0]  ;;  %v7391_v42 = vpop.f32.mrf.mxu2  ;;  %v7272_v3 = vpop.f32.mrf.mxu1 }
 0x50c   :  { %v8454_v44 = vor.u32 %v10609_v7, %v8451_v55  ;;  %v10694_v45 = vld [vmem:[#allocation2 + $0x6b4] sm:$0xf0]  ;;  %v10905_v8 = vld [vmem:[#allocation2 + $0xd54] sm:$0xf] }
 0x50d   :  { %7643 = vmatpush.bf16.msrb.mxu2 %v8586_v0  ;;  %7608 = vmatpush.bf16.msra.mxu3 %v10246_v34  ;;  %v8841_v0 = vld [vmem:[#allocation2 + $0x718] sm:$0xf]  ;;  %v10697_v34 = vld [vmem:[#allocation2 + $0x6d4] sm:$0xf] }
 0x50e   :  { %7479 = vmatmul.bf16.vlgmr.msra.gmra.mxu1 %v14798_v33  ;;  %v9635_v43 = vld [vmem:[#allocation2 + $0xd70] sm:$0xf0]  ;;  %v9641_v4 = vld [vmem:[#allocation2 + $0xd58] sm:$0xf] }
 0x50f   :  { %7523 = vmatpush.bf16.msrb.mxu1 %v8934_v62  ;;  %7514 = vmatpush.bf16.msrb.mxu0 %v8550_v16  ;;  %v9705_v62 = vld [vmem:[#allocation2 + $0xdd8] sm:$0xf]  ;;  %v8803_v16 = vld [vmem:[#allocation2 + $0x6f0] sm:$0xf0] }
 0x510   :  { %7609 = vmatmul.bf16.vlgmr.msra.gmra.mxu3 %v14798_v33  ;;  %v9706_v29 = vor.u32 %v10926_v57, %v9705_v62  ;;  %v8806_v48 = vor.u32 %v10697_v34, %v8803_v16  ;;  %v10681_v7 = vld [vmem:[#allocation2 + $0x654] sm:$0xf]  ;;  %v8745_v55 = vld [vmem:[#allocation2 + $0x658] sm:$0xf] }
 0x511   :  { %7644 = vmatpush.bf16.msrb.mxu2 %v8554_v50  ;;  %7653 = vmatpush.bf16.msrb.mxu3 %v8938_v51  ;;  %v8842_v50 = vor.u32 %v10710_v58, %v8841_v0  ;;  %v7273_v51 = vadd.f32 %v7272_v3, %v7260_v10  ;;  %v8739_v30 = vld [vmem:[#allocation2 + $0x670] sm:$0xf0]  ;;  %v9609_v46 = vld [vmem:[#allocation2 + $0xd18] sm:$0xf]  ;;  %v8746_v62 = vor.u32 %v10686_v49, %v8745_v55 }
 0x512   :  { %v10897_v61 = vld [vmem:[#allocation2 + $0xd14] sm:$0xf]  ;;  %v8742_v0 = vor.u32 %v10681_v7, %v8739_v30  ;;  %v10902_v42 = vld [vmem:[#allocation2 + $0xd34] sm:$0xf0] }
 0x513   :  { %7524 = vmatpush.bf16.msrb.mxu1 %v8902_v63  ;;  %7515 = vmatpush.bf16.msrb.mxu0 %v8518_v28  ;;  %v9667_v63 = vld [vmem:[#allocation2 + $0xdb0] sm:$0xf0]  ;;  %v9673_v28 = vld [vmem:[#allocation2 + $0xd98] sm:$0xf]  ;;  %v7286_v20 = vadd.f32 %v14890_v40, %v7273_v51  ;;  %v8774_v40 = vor.u32 %v10689_v32, %v8771_v27  ;;  %v7274_v17 = vpop.f32.mrf.mxu1  ;;  %v9610_v16 = vor.u32 %v10902_v42, %v9609_v46 }
 0x514   :  { %v9603_v58 = vld [vmem:[#allocation2 + $0xd30] sm:$0xf0]  ;;  %v8713_v3 = vld [vmem:[#allocation2 + $0x618] sm:$0xf] }
 0x515   :  { %7645 = vmatpush.bf16.msrb.mxu2 %v8522_v37  ;;  %7654 = vmatpush.bf16.msrb.mxu3 %v8906_v47  ;;  %v9670_v37 = vor.u32 %v10913_v2, %v9667_v63  ;;  %v9674_v47 = vor.u32 %v10918_v18, %v9673_v28  ;;  %v14924_v53 = vadd.f32 %v14899_v35, %v7286_v20  ;;  %v8707_v52 = vld [vmem:[#allocation2 + $0x630] sm:$0xf0]  ;;  %v10894_v25 = vld [vmem:[#allocation2 + $0xcf4] sm:$0xf0] }
 0x516   :  { %v9638_v35 = vor.u32 %v10905_v8, %v9635_v43  ;;  %v10985_v57 = vld [vmem:[#allocation2 + $0xfd4] sm:$0xf]  ;;  %v9606_v34 = vor.u32 %v10897_v61, %v9603_v58  ;;  %v10990_v63 = vld [vmem:[#allocation2 + $0xff4] sm:$0xf0] }
 0x517   :  { %7525 = vmatpush.bf16.msrb.mxu1 %v8870_v26  ;;  %7516 = vmatpush.bf16.msrb.mxu0 %v8486_v31  ;;  %v10910_v26 = vld [vmem:[#allocation2 + $0xd74] sm:$0xf0]  ;;  %v14928_v31 = vpop.f32.mrf.mxu3  ;;  %v9955_v10 = vld [vmem:[#allocation2 + $0xff0] sm:$0xf0] }
 0x518   :  { %v9958_v2 = vor.u32 %v10985_v57, %v9955_v10  ;;  %v10977_v18 = vld [vmem:[#allocation2 + $0xf94] sm:$0xf]  ;;  %v10982_v43 = vld [vmem:[#allocation2 + $0xfb4] sm:$0xf0] }
 0x519   :  { %7646 = vmatpush.bf16.msrb.mxu2 %v8490_v12  ;;  %7655 = vmatpush.bf16.msrb.mxu3 %v8874_v41  ;;  %v8778_v12 = vor.u32 %v10694_v45, %v8777_v56  ;;  %v9642_v41 = vor.u32 %v10910_v26, %v9641_v4  ;;  %v9923_v20 = vld [vmem:[#allocation2 + $0xfb0] sm:$0xf0]  ;;  %v9545_v56 = vld [vmem:[#allocation2 + $0xc98] sm:$0xf] }
 0x51a   :  { %v10886_v45 = vld [vmem:[#allocation2 + $0xcb4] sm:$0xf0]  ;;  %v9926_v8 = vor.u32 %v10977_v18, %v9923_v20  ;;  %v10969_v26 = vld [vmem:[#allocation2 + $0xf54] sm:$0xf] }
 0x51b   :  { %7526 = vmatpush.bf16.msrb.mxu1 %v8838_v38  ;;  %7517 = vmatpush.bf16.msrb.mxu0 %v8454_v44  ;;  %v10673_v38 = vld [vmem:[#allocation2 + $0x614] sm:$0xf]  ;;  %v14930_v44 = vpop.f32.mrf.mxu0  ;;  %v9513_v49 = vld [vmem:[#allocation2 + $0xc58] sm:$0xf] }
 0x51c   :  { %v8710_v51 = vor.u32 %v10673_v38, %v8707_v52  ;;  %v9891_v7 = vld [vmem:[#allocation2 + $0xf70] sm:$0xf0]  ;;  %v10878_v61 = vld [vmem:[#allocation2 + $0xc74] sm:$0xf0] }
 0x51d   :  { %7647 = vmatpush.bf16.msrb.mxu2 %v8458_v1  ;;  %7656 = vmatpush.bf16.msrb.mxu3 %v8842_v50  ;;  %v10678_v1 = vld [vmem:[#allocation2 + $0x634] sm:$0xf0]  ;;  %v10889_v50 = vld [vmem:[#allocation2 + $0xcd4] sm:$0xf] }
 0x51e   :  { %7518 = vmatmul.bf16.vlgmr.msrb.gmra.mxu0 %v15360_v19  ;;  %v8714_v28 = vor.u32 %v10678_v1, %v8713_v3  ;;  %v9507_v55 = vld [vmem:[#allocation2 + $0xc70] sm:$0xf0]  ;;  %v9897_v58 = vld [vmem:[#allocation2 + $0xf58] sm:$0xf] }
 0x51f   :  { %7562 = vmatpush.bf16.msra.mxu0 %v9702_v21  ;;  %7527 = vmatpush.bf16.msrb.mxu1 %v8806_v48  ;;  %v9571_v21 = vld [vmem:[#allocation2 + $0xcf0] sm:$0xf0]  ;;  %v7404_v59 = vpop.f32.mrf.mxu3  ;;  %v9961_v48 = vld [vmem:[#allocation2 + $0xfd8] sm:$0xf] }
 0x520   :  { %7648 = vmatmul.bf16.vlgmr.msrb.gmra.mxu2 %v15360_v19  ;;  %v9574_v32 = vor.u32 %v10889_v50, %v9571_v21  ;;  %v10974_v46 = vld [vmem:[#allocation2 + $0xf74] sm:$0xf0]  ;;  %v10961_v42 = vld [vmem:[#allocation2 + $0xf14] sm:$0xf]  ;;  %v7312_v59 = vadd.f32 %v14930_v44, %v14924_v53  ;;  %v10530_v44 = vld [vmem:[#allocation2 + $0x19c] sm:$0xf] }
 0x521   :  { %7692 = vmatpush.bf16.msra.mxu2 %v9706_v29  ;;  %7657 = vmatpush.bf16.msrb.mxu3 %v8810_v22  ;;  %v9577_v29 = vld [vmem:[#allocation2 + $0xcd8] sm:$0xf]  ;;  %v10881_v22 = vld [vmem:[#allocation2 + $0xc94] sm:$0xf] }
 0x522   :  { %v9578_v27 = vor.u32 %v10894_v25, %v9577_v29  ;;  %v9859_v38 = vld [vmem:[#allocation2 + $0xf30] sm:$0xf0]  ;;  %v10870_v3 = vld [vmem:[#allocation2 + $0xc34] sm:$0xf0]  ;;  %v10538_v25 = vld [vmem:[#allocation2 + $0x1dc] sm:$0xf] }
 0x523   :  { %7563 = vmatpush.bf16.msra.mxu0 %v9670_v37  ;;  %7528 = vmatpush.bf16.msrb.mxu1 %v8774_v40  ;;  %v9962_v37 = vor.u32 %v10990_v63, %v9961_v48  ;;  %v9929_v40 = vld [vmem:[#allocation2 + $0xf98] sm:$0xf]  ;;  %v14932_v4 = vpop.f32.mrf.mxu2  ;;  %v7313_v30 = vpop.f32.mrf.mxu0  ;;  %v10865_v57 = vld [vmem:[#allocation2 + $0xc14] sm:$0xf]  ;;  %v8171_v48 = vld [vmem:[#allocation2 + $0x1f8] sm:$0xf0] }
 0x524   :  { %v9475_v10 = vld [vmem:[#allocation2 + $0xc30] sm:$0xf0]  ;;  %v9865_v1 = vld [vmem:[#allocation2 + $0xf18] sm:$0xf] }
 0x525   :  { %7693 = vmatpush.bf16.msra.mxu2 %v9674_v47  ;;  %7658 = vmatpush.bf16.msrb.mxu3 %v8778_v12  ;;  %v9539_v47 = vld [vmem:[#allocation2 + $0xcb0] sm:$0xf0]  ;;  %v9546_v12 = vor.u32 %v10886_v45, %v9545_v56  ;;  %v10966_v50 = vld [vmem:[#allocation2 + $0xf34] sm:$0xf0]  ;;  %v9478_v20 = vor.u32 %v10865_v57, %v9475_v10  ;;  %v8174_v45 = vor.u32 %v10538_v25, %v8171_v48 }
 0x526   :  { %v9542_v17 = vor.u32 %v10881_v22, %v9539_v47  ;;  %v8169_v21 = vld [vmem:[#allocation2 + $0x1d8] sm:$0xf]  ;;  %v10953_v63 = vld [vmem:[#allocation2 + $0xed4] sm:$0xf]  ;;  %v9866_v22 = vor.u32 %v10966_v50, %v9865_v1 }
 0x527   :  { %7564 = vmatpush.bf16.msra.mxu0 %v9638_v35  ;;  %7529 = vmatpush.bf16.msrb.mxu1 %v8742_v0  ;;  %v10873_v35 = vld [vmem:[#allocation2 + $0xc54] sm:$0xf]  ;;  %v9894_v0 = vor.u32 %v10969_v26, %v9891_v7  ;;  %v10542_v29 = vld [vmem:[#allocation2 + $0x1f4] sm:$0xf0]  ;;  %v8139_v26 = vld [vmem:[#allocation2 + $0x1b8] sm:$0xf0] }
 0x528   :  { %v9510_v52 = vor.u32 %v10873_v35, %v9507_v55  ;;  %v9833_v47 = vld [vmem:[#allocation2 + $0xed8] sm:$0xf]  ;;  %v10945_v7 = vld [vmem:[#allocation2 + $0xe94] sm:$0xf] }
 0x529   :  { %7694 = vmatpush.bf16.msra.mxu2 %v9642_v41  ;;  %7659 = vmatpush.bf16.msrb.mxu3 %v8746_v62  ;;  %v9930_v41 = vor.u32 %v10982_v43, %v9929_v40  ;;  %v9514_v62 = vor.u32 %v10878_v61, %v9513_v49  ;;  %v10958_v56 = vld [vmem:[#allocation2 + $0xef4] sm:$0xf0]  ;;  %v9795_v30 = vld [vmem:[#allocation2 + $0xeb0] sm:$0xf0] }
 0x52a   :  { %v8137_v40 = vld [vmem:[#allocation2 + $0x198] sm:$0xf]  ;;  %v9834_v35 = vor.u32 %v10958_v56, %v9833_v47  ;;  %v9731_v48 = vld [vmem:[#allocation2 + $0xe30] sm:$0xf0] }
 0x52b   :  { %7565 = vmatpush.bf16.msra.mxu0 %v9606_v34  ;;  %7530 = vmatpush.bf16.msrb.mxu1 %v8710_v51  ;;  %v9481_v34 = vld [vmem:[#allocation2 + $0xc18] sm:$0xf]  ;;  %v9862_v51 = vor.u32 %v10961_v42, %v9859_v38  ;;  %v7324_v18 = vpop.f32.mrf.mxu1  ;;  %v8107_v42 = vld [vmem:[#allocation2 + $0x178] sm:$0xf0] }
 0x52c   :  { %v10534_v53 = vld [vmem:[#allocation2 + $0x1b4] sm:$0xf0] }
 0x52d   :  { %7695 = vmatpush.bf16.msra.mxu2 %v9610_v16  ;;  %7660 = vmatpush.bf16.msrb.mxu3 %v8714_v28  ;;  %v9898_v16 = vor.u32 %v10974_v46, %v9897_v58  ;;  %v9827_v28 = vld [vmem:[#allocation2 + $0xef0] sm:$0xf0]  ;;  %v10950_v55 = vld [vmem:[#allocation2 + $0xeb4] sm:$0xf0]  ;;  %v9798_v58 = vor.u32 %v10945_v7, %v9795_v30  ;;  %v10522_v46 = vld [vmem:[#allocation2 + $0x15c] sm:$0xf] }
 0x52e   :  { %7531 = vmatmul.bf16.vlgmr.msrb.gmra.mxu1 %v15361_v13  ;;  %v8105_v49 = vld [vmem:[#allocation2 + $0x158] sm:$0xf]  ;;  %v8110_v1 = vor.u32 %v10522_v46, %v8107_v42 }
 0x52f   :  { %7575 = vmatpush.bf16.msra.mxu1 %v9958_v2  ;;  %7566 = vmatpush.bf16.msra.mxu0 %v9574_v32  ;;  %v7443_v2 = vpop.f32.mrf.mxu2  ;;  %v9482_v32 = vor.u32 %v10870_v3, %v9481_v34  ;;  %v10526_v61 = vld [vmem:[#allocation2 + $0x174] sm:$0xf0] }
 0x530   :  { %7661 = vmatmul.bf16.vlgmr.msrb.gmra.mxu3 %v15361_v13  ;;  %v8106_v10 = vor.u32 %v10526_v61, %v8105_v49  ;;  %v9769_v34 = vld [vmem:[#allocation2 + $0xe58] sm:$0xf]  ;;  %v10929_v2 = vld [vmem:[#allocation2 + $0xe14] sm:$0xf]  ;;  %v10498_v49 = vld [vmem:[#allocation2 + $0x9c] sm:$0xf] }
 0x531   :  { %7696 = vmatpush.bf16.msra.mxu2 %v9578_v27  ;;  %7705 = vmatpush.bf16.msra.mxu3 %v9962_v37  ;;  %v7325_v27 = vadd.f32 %v7324_v18, %v7312_v59  ;;  %v8170_v37 = vor.u32 %v10542_v29, %v8169_v21  ;;  %v10518_v21 = vld [vmem:[#allocation2 + $0x134] sm:$0xf0]  ;;  %v10514_v29 = vld [vmem:[#allocation2 + $0x11c] sm:$0xf]  ;;  %v9734_v47 = vor.u32 %v10929_v2, %v9731_v48 }
 0x532   :  { %v8075_v59 = vld [vmem:[#allocation2 + $0x138] sm:$0xf0]  ;;  %v8041_v56 = vld [vmem:[#allocation2 + $0xd8] sm:$0xf] }
 0x533   :  { %7576 = vmatpush.bf16.msra.mxu1 %v9926_v8  ;;  %7567 = vmatpush.bf16.msra.mxu0 %v9542_v17  ;;  %v9830_v8 = vor.u32 %v10953_v63, %v9827_v28  ;;  %v7338_v43 = vadd.f32 %v14903_v14, %v7325_v27  ;;  %v9801_v17 = vld [vmem:[#allocation2 + $0xe98] sm:$0xf]  ;;  %v8142_v14 = vor.u32 %v10530_v44, %v8139_v26  ;;  %v7326_v57 = vpop.f32.mrf.mxu1  ;;  %v10602_v44 = vld [vmem:[#allocation2 + $0x3dc] sm:$0xf] }
 0x534   :  { %v8425_v63 = vld [vmem:[#allocation2 + $0x3d8] sm:$0xf]  ;;  %v8011_v61 = vld [vmem:[#allocation2 + $0xb8] sm:$0xf0] }
 0x535   :  { %7697 = vmatpush.bf16.msra.mxu2 %v9546_v12  ;;  %7706 = vmatpush.bf16.msra.mxu3 %v9930_v41  ;;  %v7351_v12 = vadd.f32 %v14912_v23, %v7338_v43  ;;  %v8138_v41 = vor.u32 %v10534_v53, %v8137_v40  ;;  %v14943_v23 = vpop.f32.mrf.mxu3  ;;  %v10606_v28 = vld [vmem:[#allocation2 + $0x3f4] sm:$0xf0]  ;;  %v8043_v53 = vld [vmem:[#allocation2 + $0xf8] sm:$0xf0]  ;;  %v8014_v57 = vor.u32 %v10498_v49, %v8011_v61 }
 0x536   :  { %v10934_v27 = vld [vmem:[#allocation2 + $0xe34] sm:$0xf0]  ;;  %v8426_v40 = vor.u32 %v10606_v28, %v8425_v63  ;;  %v8427_v43 = vld [vmem:[#allocation2 + $0x3f8] sm:$0xf0] }
 0x537   :  { %7577 = vmatpush.bf16.msra.mxu1 %v9894_v0  ;;  %7568 = vmatpush.bf16.msra.mxu0 %v9510_v52  ;;  %v7883_v0 = vrot.slane %v14908_v36, 4  ;;  %v7884_v38 = vrot.slane %v7351_v12, 2  ;;  %v10937_v52 = vld [vmem:[#allocation2 + $0xe54] sm:$0xf]  ;;  %v9802_v36 = vor.u32 %v10950_v55, %v9801_v17  ;;  %v8393_v30 = vld [vmem:[#allocation2 + $0x398] sm:$0xf] }
 0x538   :  { %v10598_v17 = vld [vmem:[#allocation2 + $0x3b4] sm:$0xf0]  ;;  %v10570_v49 = vld [vmem:[#allocation2 + $0x2dc] sm:$0xf] }
 0x539   :  { %7698 = vmatpush.bf16.msra.mxu2 %v9514_v62  ;;  %7707 = vmatpush.bf16.msra.mxu3 %v9898_v16  ;;  %v9763_v62 = vld [vmem:[#allocation2 + $0xe70] sm:$0xf0]  ;;  %v10942_v16 = vld [vmem:[#allocation2 + $0xe74] sm:$0xf0]  ;;  %v7891_v3 = vsel %vm7890_vm7, %v7883_v0, %v7884_v38  ;;  %v10594_v0 = vld [vmem:[#allocation2 + $0x39c] sm:$0xf]  ;;  %v8394_v46 = vor.u32 %v10598_v17, %v8393_v30 }
 0x53a   :  { %v9766_v50 = vor.u32 %v10937_v52, %v9763_v62  ;;  %v7893_v25 = vsel %vm7892_vm8, %v14872_v39, %v7891_v3  ;;  %v9770_v18 = vor.u32 %v10942_v16, %v9769_v34  ;;  %v10510_v39 = vld [vmem:[#allocation2 + $0xf4] sm:$0xf0]  ;;  %v10490_v16 = vld [vmem:[#allocation2 + $0x5c] sm:$0xf] }
 0x53b   :  { %7578 = vmatpush.bf16.msra.mxu1 %v9862_v51  ;;  %7569 = vmatpush.bf16.msra.mxu0 %v9478_v20  ;;  %v8073_v51 = vld [vmem:[#allocation2 + $0x118] sm:$0xf]  ;;  %7899 = vst [vmem:[#allocation7] sm:$0xff] %v7893_v25  ;;  %v8042_v7 = vor.u32 %v10510_v39, %v8041_v56  ;;  %v7979_v3 = vld [vmem:[#allocation2 + $0x78] sm:$0xf0] }
 0x53c   :  { %v8074_v20 = vor.u32 %v10518_v21, %v8073_v51  ;;  %v10502_v55 = vld [vmem:[#allocation2 + $0xb4] sm:$0xf0]  ;;  %v14953_v51 = vld [vmem:[#allocation5] sm:$0xff]  ;;  %v7982_v63 = vor.u32 %v10490_v16, %v7979_v3  ;;  %v8299_v61 = vld [vmem:[#allocation2 + $0x2f8] sm:$0xf0] }
 0x53d   :  { %7699 = vmatpush.bf16.msra.mxu2 %v9482_v32  ;;  %7708 = vmatpush.bf16.msra.mxu3 %v9866_v22  ;;  %v9737_v32 = vld [vmem:[#allocation2 + $0xe18] sm:$0xf]  ;;  %v14948_v22 = vpop.f32.mrf.mxu0  ;;  %v2459_v21 = vperm.slane %v14953_v51, 4  ;;  %v8267_v16 = vld [vmem:[#allocation2 + $0x2b8] sm:$0xf0] }
 0x53e   :  { %7570 = vmatmul.bf16.vlgmr.msra.gmra.mxu0 %v15362_v60  ;;  %v9738_v26 = vor.u32 %v10934_v27, %v9737_v32  ;;  %v8361_v38 = vld [vmem:[#allocation2 + $0x358] sm:$0xf]  ;;  %v7947_v32 = vld [vmem:[#allocation2 + $0x38] sm:$0xf0] }
 0x53f   :  { %7614 = vmatpush.bf16.msrb.mxu0 %v8170_v37  ;;  %7579 = vmatpush.bf16.msra.mxu1 %v9830_v8  ;;  %v8078_v37 = vor.u32 %v10514_v29, %v8075_v59  ;;  %v7456_v8 = vpop.f32.mrf.mxu3  ;;  %v10590_v52 = vld [vmem:[#allocation2 + $0x374] sm:$0xf0]  ;;  %v10578_v27 = vld [vmem:[#allocation2 + $0x31c] sm:$0xf] }
 0x540   :  { %7700 = vmatmul.bf16.vlgmr.msra.gmra.mxu2 %v15362_v60  ;;  %v10494_v34 = vld [vmem:[#allocation2 + $0x74] sm:$0xf0]  ;;  %v8362_v29 = vor.u32 %v10590_v52, %v8361_v38  ;;  %v10794_v8 = vld [vmem:[#allocation2 + $0x9dc] sm:$0xf] }
 0x541   :  { %7744 = vmatpush.bf16.msrb.mxu2 %v8174_v45  ;;  %7709 = vmatpush.bf16.msra.mxu3 %v9834_v35  ;;  %v10506_v45 = vld [vmem:[#allocation2 + $0xdc] sm:$0xf]  ;;  %v8430_v35 = vor.u32 %v10602_v44, %v8427_v43  ;;  %v7945_v59 = vld [vmem:[#allocation2 + $0x18] sm:$0xf] }
 0x542   :  { %v8046_v12 = vor.u32 %v10506_v45, %v8043_v53  ;;  %v8329_v2 = vld [vmem:[#allocation2 + $0x318] sm:$0xf]  ;;  %v7364_v53 = vadd.f32 %v14948_v22, %v2459_v21  ;;  %v10778_v21 = vld [vmem:[#allocation2 + $0x95c] sm:$0xf] }
 0x543   :  { %7615 = vmatpush.bf16.msrb.mxu0 %v8138_v41  ;;  %7580 = vmatpush.bf16.msra.mxu1 %v9798_v58  ;;  %v8009_v41 = vld [vmem:[#allocation2 + $0x98] sm:$0xf]  ;;  %v14950_v58 = vpop.f32.mrf.mxu2 }
 0x544   :  { %v8010_v42 = vor.u32 %v10502_v55, %v8009_v41  ;;  %v10582_v48 = vld [vmem:[#allocation2 + $0x334] sm:$0xf0] }
 0x545   :  { %7745 = vmatpush.bf16.msrb.mxu2 %v8142_v14  ;;  %7710 = vmatpush.bf16.msra.mxu3 %v9802_v36  ;;  %v8395_v14 = vld [vmem:[#allocation2 + $0x3b8] sm:$0xf0]  ;;  %v7365_v62 = vpop.f32.mrf.mxu0  ;;  %v8330_v39 = vor.u32 %v10582_v48, %v8329_v2  ;;  %v10798_v45 = vld [vmem:[#allocation2 + $0x9f4] sm:$0xf0] }
 0x546   :  { %v8398_v36 = vor.u32 %v10594_v0, %v8395_v14  ;;  %v8297_v43 = vld [vmem:[#allocation2 + $0x2d8] sm:$0xf] }
 0x547   :  { %7616 = vmatpush.bf16.msrb.mxu0 %v8106_v10  ;;  %7581 = vmatpush.bf16.msra.mxu1 %v9766_v50  ;;  %v7977_v10 = vld [vmem:[#allocation2 + $0x58] sm:$0xf]  ;;  %v8363_v50 = vld [vmem:[#allocation2 + $0x378] sm:$0xf0] }
 0x548   :  { %v7978_v25 = vor.u32 %v10494_v34, %v7977_v10  ;;  %v9161_v0 = vld [vmem:[#allocation2 + $0x998] sm:$0xf]  ;;  %v10562_v34 = vld [vmem:[#allocation2 + $0x29c] sm:$0xf] }
 0x549   :  { %7746 = vmatpush.bf16.msrb.mxu2 %v8110_v1  ;;  %7711 = vmatpush.bf16.msra.mxu3 %v9770_v18  ;;  %v10586_v1 = vld [vmem:[#allocation2 + $0x35c] sm:$0xf]  ;;  %v10486_v18 = vld [vmem:[#allocation2 + $0x34] sm:$0xf0] }
 0x54a   :  { %v8366_v28 = vor.u32 %v10586_v1, %v8363_v50  ;;  %v7946_v44 = vor.u32 %v10486_v18, %v7945_v59  ;;  %v10790_v22 = vld [vmem:[#allocation2 + $0x9b4] sm:$0xf0]  ;;  %v10554_v18 = vld [vmem:[#allocation2 + $0x25c] sm:$0xf] }
 0x54b   :  { %7617 = vmatpush.bf16.msrb.mxu0 %v8074_v20  ;;  %7582 = vmatpush.bf16.msra.mxu1 %v9734_v47  ;;  %v10482_v20 = vld [vmem:[#allocation2 + $0x1c] sm:$0xf]  ;;  %v9193_v47 = vld [vmem:[#allocation2 + $0x9d8] sm:$0xf]  ;;  %v7495_v56 = vpop.f32.mrf.mxu2  ;;  %v7376_v30 = vpop.f32.mrf.mxu1 }
 0x54c   :  { %v7950_v17 = vor.u32 %v10482_v20, %v7947_v32  ;;  %v9194_v41 = vor.u32 %v10798_v45, %v9193_v47  ;;  %v8265_v52 = vld [vmem:[#allocation2 + $0x298] sm:$0xf]  ;;  %v8235_v20 = vld [vmem:[#allocation2 + $0x278] sm:$0xf0] }
 0x54d   :  { %7747 = vmatpush.bf16.msrb.mxu2 %v8078_v37  ;;  %7712 = vmatpush.bf16.msra.mxu3 %v9738_v26  ;;  %v8331_v37 = vld [vmem:[#allocation2 + $0x338] sm:$0xf0]  ;;  %v10574_v26 = vld [vmem:[#allocation2 + $0x2f4] sm:$0xf0]  ;;  %v8238_v45 = vor.u32 %v10554_v18, %v8235_v20 }
 0x54e   :  { %7583 = vmatmul.bf16.vlgmr.msra.gmra.mxu1 %v15363_v15  ;;  %v8298_v14 = vor.u32 %v10574_v26, %v8297_v43  ;;  %v10566_v62 = vld [vmem:[#allocation2 + $0x2b4] sm:$0xf0]  ;;  %v10770_v47 = vld [vmem:[#allocation2 + $0x91c] sm:$0xf] }
 0x54f   :  { %7627 = vmatpush.bf16.msrb.mxu1 %v8426_v40  ;;  %7618 = vmatpush.bf16.msrb.mxu0 %v8042_v7  ;;  %v9195_v40 = vld [vmem:[#allocation2 + $0x9f8] sm:$0xf0]  ;;  %v2460_v7 = vperm.slane %v14953_v51, 5  ;;  %v9129_v3 = vld [vmem:[#allocation2 + $0x958] sm:$0xf] }
 0x550   :  { %7713 = vmatmul.bf16.vlgmr.msra.gmra.mxu3 %v15363_v15  ;;  %v9198_v55 = vor.u32 %v10794_v8, %v9195_v40  ;;  %v10782_v51 = vld [vmem:[#allocation2 + $0x974] sm:$0xf0]  ;;  %v10546_v26 = vld [vmem:[#allocation2 + $0x21c] sm:$0xf] }
 0x551   :  { %7748 = vmatpush.bf16.msrb.mxu2 %v8046_v12  ;;  %7757 = vmatpush.bf16.msrb.mxu3 %v8430_v35  ;;  %v8334_v12 = vor.u32 %v10578_v27, %v8331_v37  ;;  %v7377_v35 = vadd.f32 %v7376_v30, %v7364_v53  ;;  %v7494_v50 = vadd.f32 %v14950_v58, %v2460_v7  ;;  %v8233_v59 = vld [vmem:[#allocation2 + $0x258] sm:$0xf]  ;;  %v8203_v7 = vld [vmem:[#allocation2 + $0x238] sm:$0xf0] }
 0x552   :  { %v10558_v2 = vld [vmem:[#allocation2 + $0x274] sm:$0xf0]  ;;  %v10842_v18 = vld [vmem:[#allocation2 + $0xb5c] sm:$0xf] }
 0x553   :  { %7628 = vmatpush.bf16.msrb.mxu1 %v8394_v46  ;;  %7619 = vmatpush.bf16.msrb.mxu0 %v8010_v42  ;;  %v10786_v46 = vld [vmem:[#allocation2 + $0x99c] sm:$0xf]  ;;  %v7390_v38 = vadd.f32 %v14916_v6, %v7377_v35  ;;  %v8266_v6 = vor.u32 %v10566_v62, %v8265_v52  ;;  %v9097_v32 = vld [vmem:[#allocation2 + $0x918] sm:$0xf]  ;;  %v8234_v27 = vor.u32 %v10558_v2, %v8233_v59 }
 0x554   :  { %v9163_v42 = vld [vmem:[#allocation2 + $0x9b8] sm:$0xf0]  ;;  %v10774_v37 = vld [vmem:[#allocation2 + $0x934] sm:$0xf0] }
 0x555   :  { %7749 = vmatpush.bf16.msrb.mxu2 %v8014_v57  ;;  %7758 = vmatpush.bf16.msrb.mxu3 %v8398_v36  ;;  %v8302_v57 = vor.u32 %v10570_v49, %v8299_v61  ;;  %v9162_v36 = vor.u32 %v10790_v22, %v9161_v0  ;;  %v9166_v10 = vor.u32 %v10786_v46, %v9163_v42  ;;  %v8201_v56 = vld [vmem:[#allocation2 + $0x218] sm:$0xf]  ;;  %v10858_v0 = vld [vmem:[#allocation2 + $0xbdc] sm:$0xf] }
 0x556   :  { %v7403_v1 = vadd.f32 %v14928_v31, %v7390_v38  ;;  %v9130_v31 = vor.u32 %v10782_v51, %v9129_v3  ;;  %v9449_v8 = vld [vmem:[#allocation2 + $0xbd8] sm:$0xf]  ;;  %v8206_v22 = vor.u32 %v10546_v26, %v8203_v7  ;;  %v10850_v3 = vld [vmem:[#allocation2 + $0xb9c] sm:$0xf] }
 0x557   :  { %7629 = vmatpush.bf16.msrb.mxu1 %v8362_v29  ;;  %7620 = vmatpush.bf16.msrb.mxu0 %v7978_v25  ;;  %v9131_v29 = vld [vmem:[#allocation2 + $0x978] sm:$0xf0]  ;;  %v7506_v25 = vpop.f32.mrf.mxu3  ;;  %v10862_v40 = vld [vmem:[#allocation2 + $0xbf4] sm:$0xf0] }
 0x558   :  { %v14964_v48 = vadd.f32 %v7506_v25, %v7494_v50  ;;  %v9134_v58 = vor.u32 %v10778_v21, %v9131_v29  ;;  %v9065_v30 = vld [vmem:[#allocation2 + $0x8d8] sm:$0xf]  ;;  %v9450_v61 = vor.u32 %v10862_v40, %v9449_v8  ;;  %v9387_v20 = vld [vmem:[#allocation2 + $0xb78] sm:$0xf0] }
 0x559   :  { %7750 = vmatpush.bf16.msrb.mxu2 %v7982_v63  ;;  %7759 = vmatpush.bf16.msrb.mxu3 %v8366_v28  ;;  %v7378_v63 = vpop.f32.mrf.mxu1  ;;  %v8270_v28 = vor.u32 %v10562_v34, %v8267_v16  ;;  %v10766_v35 = vld [vmem:[#allocation2 + $0x8f4] sm:$0xf0]  ;;  %v9035_v34 = vld [vmem:[#allocation2 + $0x8b8] sm:$0xf0] }
 0x55a   :  { %v9417_v46 = vld [vmem:[#allocation2 + $0xb98] sm:$0xf]  ;;  %v9066_v38 = vor.u32 %v10766_v35, %v9065_v30  ;;  %v8971_v8 = vld [vmem:[#allocation2 + $0x838] sm:$0xf0] }
 0x55b   :  { %7630 = vmatpush.bf16.msrb.mxu1 %v8330_v39  ;;  %7621 = vmatpush.bf16.msrb.mxu0 %v7946_v44  ;;  %v10550_v39 = vld [vmem:[#allocation2 + $0x234] sm:$0xf0]  ;;  %v7415_v53 = vpop.f32.mrf.mxu0  ;;  %v9098_v44 = vor.u32 %v10774_v37, %v9097_v32  ;;  %v10834_v40 = vld [vmem:[#allocation2 + $0xb1c] sm:$0xf] }
 0x55c   :  { %v10854_v42 = vld [vmem:[#allocation2 + $0xbb4] sm:$0xf0]  ;;  %v11050_v26 = vld [vmem:[#allocation2 + $0x11dc] sm:$0xf] }
 0x55d   :  { %7751 = vmatpush.bf16.msrb.mxu2 %v7950_v17  ;;  %7760 = vmatpush.bf16.msrb.mxu3 %v8334_v12  ;;  %v14966_v17 = vadd.f32 %v7415_v53, %v7403_v1  ;;  %v8202_v12 = vor.u32 %v10550_v39, %v8201_v56  ;;  %v9033_v62 = vld [vmem:[#allocation2 + $0x898] sm:$0xf]  ;;  %v9418_v16 = vor.u32 %v10854_v42, %v9417_v46  ;;  %v9419_v1 = vld [vmem:[#allocation2 + $0xbb8] sm:$0xf0] }
 0x55e   :  { %7622 = vmatmul.bf16.vlgmr.msrb.gmra.mxu0 %v15364_v5  ;;  %v10846_v51 = vld [vmem:[#allocation2 + $0xb74] sm:$0xf0]  ;;  %v9422_v2 = vor.u32 %v10850_v3, %v9419_v1  ;;  %v10738_v39 = vld [vmem:[#allocation2 + $0x81c] sm:$0xf] }
 0x55f   :  { %7666 = vmatpush.bf16.msra.mxu0 %v9194_v41  ;;  %7631 = vmatpush.bf16.msrb.mxu1 %v8298_v14  ;;  %v10762_v41 = vld [vmem:[#allocation2 + $0x8dc] sm:$0xf]  ;;  %v7508_v49 = vpop.f32.mrf.mxu3  ;;  %v9001_v59 = vld [vmem:[#allocation2 + $0x858] sm:$0xf] }
 0x560   :  { %7752 = vmatmul.bf16.vlgmr.msrb.gmra.mxu2 %v15364_v5  ;;  %v9099_v5 = vld [vmem:[#allocation2 + $0x938] sm:$0xf0]  ;;  %v10750_v63 = vld [vmem:[#allocation2 + $0x874] sm:$0xf0]  ;;  %v8974_v49 = vor.u32 %v10738_v39, %v8971_v8 }
 0x561   :  { %7796 = vmatpush.bf16.msra.mxu2 %v9198_v55  ;;  %7761 = vmatpush.bf16.msrb.mxu3 %v8302_v57  ;;  %v9102_v43 = vor.u32 %v10770_v47, %v9099_v5  ;;  %v9067_v55 = vld [vmem:[#allocation2 + $0x8f8] sm:$0xf0]  ;;  %v9353_v32 = vld [vmem:[#allocation2 + $0xb18] sm:$0xf]  ;;  %v9002_v37 = vor.u32 %v10750_v63, %v9001_v59 }
 0x562   :  { %v9451_v14 = vld [vmem:[#allocation2 + $0xbf8] sm:$0xf0]  ;;  %v9070_v52 = vor.u32 %v10762_v41, %v9067_v55  ;;  %v8969_v5 = vld [vmem:[#allocation2 + $0x818] sm:$0xf] }
 0x563   :  { %7667 = vmatpush.bf16.msra.mxu0 %v9162_v36  ;;  %7632 = vmatpush.bf16.msrb.mxu1 %v8266_v6  ;;  %v9454_v57 = vor.u32 %v10858_v0, %v9451_v14  ;;  %v10758_v36 = vld [vmem:[#allocation2 + $0x8b4] sm:$0xf0]  ;;  %v14968_v50 = vpop.f32.mrf.mxu2  ;;  %v7417_v21 = vpop.f32.mrf.mxu0  ;;  %v9355_v53 = vld [vmem:[#allocation2 + $0xb38] sm:$0xf0] }
 0x564   :  { %v9385_v6 = vld [vmem:[#allocation2 + $0xb58] sm:$0xf]  ;;  %v9034_v29 = vor.u32 %v10758_v36, %v9033_v62  ;;  %v10219_v30 = vld [vmem:[#allocation2 + $0x11f8] sm:$0xf0]  ;;  %v9358_v0 = vor.u32 %v10834_v40, %v9355_v53 }
 0x565   :  { %7797 = vmatpush.bf16.msra.mxu2 %v9166_v10  ;;  %7762 = vmatpush.bf16.msrb.mxu3 %v8270_v28  ;;  %v10754_v10 = vld [vmem:[#allocation2 + $0x89c] sm:$0xf]  ;;  %v10742_v56 = vld [vmem:[#allocation2 + $0x834] sm:$0xf0]  ;;  %v10222_v42 = vor.u32 %v11050_v26, %v10219_v30 }
 0x566   :  { %v9038_v25 = vor.u32 %v10754_v10, %v9035_v34  ;;  %v10746_v28 = vld [vmem:[#allocation2 + $0x85c] sm:$0xf]  ;;  %v10830_v35 = vld [vmem:[#allocation2 + $0xaf4] sm:$0xf0]  ;;  %v8970_v55 = vor.u32 %v10742_v56, %v8969_v5 }
 0x567   :  { %7668 = vmatpush.bf16.msra.mxu0 %v9130_v31  ;;  %7633 = vmatpush.bf16.msrb.mxu1 %v8234_v27  ;;  %v9003_v31 = vld [vmem:[#allocation2 + $0x878] sm:$0xf0]  ;;  %v10838_v27 = vld [vmem:[#allocation2 + $0xb34] sm:$0xf0] }
 0x568   :  { %v9006_v47 = vor.u32 %v10746_v28, %v9003_v31  ;;  %v9323_v46 = vld [vmem:[#allocation2 + $0xaf8] sm:$0xf0]  ;;  %v11046_v62 = vld [vmem:[#allocation2 + $0x11b4] sm:$0xf0] }
 0x569   :  { %7798 = vmatpush.bf16.msra.mxu2 %v9134_v58  ;;  %7763 = vmatpush.bf16.msrb.mxu3 %v8238_v45  ;;  %v9386_v58 = vor.u32 %v10846_v51, %v9385_v6  ;;  %v9390_v45 = vor.u32 %v10842_v18, %v9387_v20  ;;  %v10187_v10 = vld [vmem:[#allocation2 + $0x11b8] sm:$0xf0]  ;;  %v9289_v34 = vld [vmem:[#allocation2 + $0xa98] sm:$0xf] }
 0x56a   :  { %v10818_v1 = vld [vmem:[#allocation2 + $0xa9c] sm:$0xf]  ;;  %v11038_v59 = vld [vmem:[#allocation2 + $0x1174] sm:$0xf0] }
 0x56b   :  { %7669 = vmatpush.bf16.msra.mxu0 %v9098_v44  ;;  %7634 = vmatpush.bf16.msrb.mxu1 %v8202_v12  ;;  %v10217_v44 = vld [vmem:[#allocation2 + $0x11d8] sm:$0xf]  ;;  %v7547_v7 = vpop.f32.mrf.mxu2  ;;  %v7428_v41 = vpop.f32.mrf.mxu1  ;;  %v9291_v6 = vld [vmem:[#allocation2 + $0xab8] sm:$0xf0] }
 0x56c   :  { %v9321_v12 = vld [vmem:[#allocation2 + $0xad8] sm:$0xf]  ;;  %v10155_v63 = vld [vmem:[#allocation2 + $0x1178] sm:$0xf0] }
 0x56d   :  { %7799 = vmatpush.bf16.msra.mxu2 %v9102_v43  ;;  %7764 = vmatpush.bf16.msrb.mxu3 %v8206_v22  ;;  %v11054_v43 = vld [vmem:[#allocation2 + $0x11f4] sm:$0xf0]  ;;  %v10826_v22 = vld [vmem:[#allocation2 + $0xadc] sm:$0xf] }
 0x56e   :  { %7635 = vmatmul.bf16.vlgmr.msrb.gmra.mxu1 %v15365_v54  ;;  %v10218_v14 = vor.u32 %v11054_v43, %v10217_v44  ;;  %v9257_v28 = vld [vmem:[#allocation2 + $0xa58] sm:$0xf]  ;;  %v10810_v20 = vld [vmem:[#allocation2 + $0xa5c] sm:$0xf] }
 0x56f   :  { %7679 = vmatpush.bf16.msra.mxu1 %v9450_v61  ;;  %7670 = vmatpush.bf16.msra.mxu0 %v9066_v38  ;;  %v7429_v61 = vadd.f32 %v7428_v41, %v14966_v17  ;;  %v9322_v38 = vor.u32 %v10830_v35, %v9321_v12  ;;  %v9326_v17 = vor.u32 %v10826_v22, %v9323_v46  ;;  %v10814_v31 = vld [vmem:[#allocation2 + $0xa74] sm:$0xf0]  ;;  %v11026_v56 = vld [vmem:[#allocation2 + $0x111c] sm:$0xf] }
 0x570   :  { %7765 = vmatmul.bf16.vlgmr.msrb.gmra.mxu3 %v15365_v54  ;;  %v9354_v54 = vor.u32 %v10838_v27, %v9353_v32  ;;  %v9259_v32 = vld [vmem:[#allocation2 + $0xa78] sm:$0xf0]  ;;  %v11030_v5 = vld [vmem:[#allocation2 + $0x1134] sm:$0xf0] }
 0x571   :  { %7800 = vmatpush.bf16.msra.mxu2 %v9070_v52  ;;  %7809 = vmatpush.bf16.msra.mxu3 %v9454_v57  ;;  %v10185_v52 = vld [vmem:[#allocation2 + $0x1198] sm:$0xf]  ;;  %v11042_v57 = vld [vmem:[#allocation2 + $0x119c] sm:$0xf]  ;;  %v7442_v36 = vadd.f32 %v14932_v4, %v7429_v61  ;;  %v9262_v53 = vor.u32 %v10810_v20, %v9259_v32 }
 0x572   :  { %v10186_v3 = vor.u32 %v11046_v62, %v10185_v52  ;;  %v10190_v21 = vor.u32 %v11042_v57, %v10187_v10  ;;  %v11034_v4 = vld [vmem:[#allocation2 + $0x115c] sm:$0xf]  ;;  %v9225_v39 = vld [vmem:[#allocation2 + $0xa18] sm:$0xf] }
 0x573   :  { %7680 = vmatpush.bf16.msra.mxu1 %v9418_v16  ;;  %7671 = vmatpush.bf16.msra.mxu0 %v9034_v29  ;;  %v10822_v16 = vld [vmem:[#allocation2 + $0xab4] sm:$0xf0]  ;;  %v7455_v51 = vadd.f32 %v14943_v23, %v7442_v36  ;;  %v9294_v23 = vor.u32 %v10818_v1, %v9291_v6  ;;  %v10158_v27 = vor.u32 %v11034_v4, %v10155_v63  ;;  %v10802_v44 = vld [vmem:[#allocation2 + $0xa1c] sm:$0xf] }
 0x574   :  { %v9290_v29 = vor.u32 %v10822_v16, %v9289_v34  ;;  %v10473_v8 = vld [vmem:[#allocation2 + $0x13d8] sm:$0xf]  ;;  %v9227_v43 = vld [vmem:[#allocation2 + $0xa38] sm:$0xf0] }
 0x575   :  { %7801 = vmatpush.bf16.msra.mxu2 %v9038_v25  ;;  %7810 = vmatpush.bf16.msra.mxu3 %v9422_v2  ;;  %v10153_v25 = vld [vmem:[#allocation2 + $0x1158] sm:$0xf]  ;;  %v14977_v2 = vpop.f32.mrf.mxu3  ;;  %v11018_v41 = vld [vmem:[#allocation2 + $0x10dc] sm:$0xf]  ;;  %v9230_v46 = vor.u32 %v10802_v44, %v9227_v43 }
 0x576   :  { %v10154_v18 = vor.u32 %v11038_v59, %v10153_v25  ;;  %v11118_v40 = vld [vmem:[#allocation2 + $0x13f4] sm:$0xf0]  ;;  %v10475_v22 = vld [vmem:[#allocation2 + $0x13f8] sm:$0xf0] }
 0x577   :  { %7681 = vmatpush.bf16.msra.mxu1 %v9386_v58  ;;  %7672 = vmatpush.bf16.msra.mxu0 %v9002_v37  ;;  %v7430_v58 = vpop.f32.mrf.mxu1  ;;  %v9258_v37 = vor.u32 %v10814_v31, %v9257_v28  ;;  %v10089_v12 = vld [vmem:[#allocation2 + $0x10d8] sm:$0xf]  ;;  %v10474_v61 = vor.u32 %v11118_v40, %v10473_v8  ;;  %v11010_v34 = vld [vmem:[#allocation2 + $0x109c] sm:$0xf] }
 0x578   :  { %v11022_v35 = vld [vmem:[#allocation2 + $0x10f4] sm:$0xf0]  ;;  %v10059_v16 = vld [vmem:[#allocation2 + $0x10b8] sm:$0xf0] }
 0x579   :  { %7802 = vmatpush.bf16.msra.mxu2 %v9006_v47  ;;  %7811 = vmatpush.bf16.msra.mxu3 %v9390_v45  ;;  %v10121_v47 = vld [vmem:[#allocation2 + $0x1118] sm:$0xf]  ;;  %v10062_v59 = vor.u32 %v11010_v34, %v10059_v16  ;;  %v11002_v31 = vld [vmem:[#allocation2 + $0x105c] sm:$0xf] }
 0x57a   :  { %v10806_v45 = vld [vmem:[#allocation2 + $0xa34] sm:$0xf0]  ;;  %v10027_v58 = vld [vmem:[#allocation2 + $0x1078] sm:$0xf0] }
 0x57b   :  { %7682 = vmatpush.bf16.msra.mxu1 %v9354_v54  ;;  %7673 = vmatpush.bf16.msra.mxu0 %v8970_v55  ;;  %v10122_v54 = vor.u32 %v11030_v5, %v10121_v47  ;;  %v7467_v26 = vpop.f32.mrf.mxu0  ;;  %v9226_v30 = vor.u32 %v10806_v45, %v9225_v39  ;;  %v11110_v52 = vld [vmem:[#allocation2 + $0x13b4] sm:$0xf0]  ;;  %v10030_v47 = vor.u32 %v11002_v31, %v10027_v58  ;;  %v10994_v39 = vld [vmem:[#allocation2 + $0x101c] sm:$0xf] }
 0x57c   :  { %v14979_v55 = vadd.f32 %v7467_v26, %v7455_v51  ;;  %v10057_v36 = vld [vmem:[#allocation2 + $0x1098] sm:$0xf]  ;;  %v9995_v45 = vld [vmem:[#allocation2 + $0x1038] sm:$0xf0] }
 0x57d   :  { %7803 = vmatpush.bf16.msra.mxu2 %v8974_v49  ;;  %7812 = vmatpush.bf16.msra.mxu3 %v9358_v0  ;;  %v7560_v49 = vpop.f32.mrf.mxu3  ;;  %v10091_v0 = vld [vmem:[#allocation2 + $0x10f8] sm:$0xf0]  ;;  %v11014_v10 = vld [vmem:[#allocation2 + $0x10b4] sm:$0xf0] }
 0x57e   :  { %7674 = vmatmul.bf16.vlgmr.msra.gmra.mxu0 %v15366_v9  ;;  %v10094_v62 = vor.u32 %v11018_v41, %v10091_v0  ;;  %v10058_v51 = vor.u32 %v11014_v10, %v10057_v36  ;;  %v10025_v63 = vld [vmem:[#allocation2 + $0x1058] sm:$0xf]  ;;  %v11090_v8 = vld [vmem:[#allocation2 + $0x131c] sm:$0xf] }
 0x57f   :  { %7718 = vmatpush.bf16.msrb.mxu0 %v10218_v14  ;;  %7683 = vmatpush.bf16.msra.mxu1 %v9322_v38  ;;  %v11114_v14 = vld [vmem:[#allocation2 + $0x13dc] sm:$0xf]  ;;  %v10441_v38 = vld [vmem:[#allocation2 + $0x1398] sm:$0xf] }
 0x580   :  { %7804 = vmatmul.bf16.vlgmr.msra.gmra.mxu2 %v15366_v9  ;;  %v10123_v9 = vld [vmem:[#allocation2 + $0x1138] sm:$0xf0]  ;;  %v10478_v57 = vor.u32 %v11114_v14, %v10475_v22  ;;  %v10442_v6 = vor.u32 %v11110_v52, %v10441_v38  ;;  %v11006_v28 = vld [vmem:[#allocation2 + $0x1074] sm:$0xf0] }
 0x581   :  { %7848 = vmatpush.bf16.msrb.mxu2 %v10222_v42  ;;  %7813 = vmatpush.bf16.msra.mxu3 %v9326_v17  ;;  %v10126_v7 = vor.u32 %v11026_v56, %v10123_v9  ;;  %v10090_v42 = vor.u32 %v11022_v35, %v10089_v12  ;;  %v11106_v17 = vld [vmem:[#allocation2 + $0x139c] sm:$0xf]  ;;  %v10026_v32 = vor.u32 %v11006_v28, %v10025_v63  ;;  %v9993_v56 = vld [vmem:[#allocation2 + $0x1018] sm:$0xf] }
 0x582   :  { %v10998_v9 = vld [vmem:[#allocation2 + $0x1034] sm:$0xf0]  ;;  %v10379_v40 = vld [vmem:[#allocation2 + $0x1338] sm:$0xf0]  ;;  %v9998_v12 = vor.u32 %v10994_v39, %v9995_v45 }
 0x583   :  { %7719 = vmatpush.bf16.msrb.mxu0 %v10186_v3  ;;  %7684 = vmatpush.bf16.msra.mxu1 %v9290_v29  ;;  %v10443_v3 = vld [vmem:[#allocation2 + $0x13b8] sm:$0xf0]  ;;  %v14981_v1 = vpop.f32.mrf.mxu2  ;;  %v11102_v29 = vld [vmem:[#allocation2 + $0x1374] sm:$0xf0]  ;;  %v7469_v25 = vpop.f32.mrf.mxu0  ;;  %v9994_v43 = vor.u32 %v10998_v9, %v9993_v56  ;;  %v10382_v35 = vor.u32 %v11090_v8, %v10379_v40 }
 0x584   :  { %v10446_v4 = vor.u32 %v11106_v17, %v10443_v3  ;;  %v8683_v44 = vld [vmem:[#allocation2 + $0x5f8] sm:$0xf0]  ;;  %v10345_v26 = vld [vmem:[#allocation2 + $0x12d8] sm:$0xf] }
 0x585   :  { %7849 = vmatpush.bf16.msrb.mxu2 %v10190_v21  ;;  %7814 = vmatpush.bf16.msra.mxu3 %v9294_v23  ;;  %v10409_v21 = vld [vmem:[#allocation2 + $0x1358] sm:$0xf]  ;;  %v11098_v23 = vld [vmem:[#allocation2 + $0x135c] sm:$0xf] }
 0x586   :  { %v10410_v20 = vor.u32 %v11102_v29, %v10409_v21  ;;  %v10347_v0 = vld [vmem:[#allocation2 + $0x12f8] sm:$0xf0]  ;;  %v11078_v38 = vld [vmem:[#allocation2 + $0x12b4] sm:$0xf0] }
 0x587   :  { %7720 = vmatpush.bf16.msrb.mxu0 %v10154_v18  ;;  %7685 = vmatpush.bf16.msra.mxu1 %v9258_v37  ;;  %v10411_v18 = vld [vmem:[#allocation2 + $0x1378] sm:$0xf0]  ;;  %v11094_v37 = vld [vmem:[#allocation2 + $0x1334] sm:$0xf0] }
 0x588   :  { %v10414_v5 = vor.u32 %v11098_v23, %v10411_v18  ;;  %v10658_v22 = vld [vmem:[#allocation2 + $0x59c] sm:$0xf]  ;;  %v10281_v17 = vld [vmem:[#allocation2 + $0x1258] sm:$0xf] }
 0x589   :  { %7850 = vmatpush.bf16.msrb.mxu2 %v10158_v27  ;;  %7815 = vmatpush.bf16.msra.mxu3 %v9262_v53  ;;  %v10377_v27 = vld [vmem:[#allocation2 + $0x1318] sm:$0xf]  ;;  %v10315_v36 = vld [vmem:[#allocation2 + $0x12b8] sm:$0xf0] }
 0x58a   :  { %v10650_v10 = vld [vmem:[#allocation2 + $0x55c] sm:$0xf]  ;;  %v11070_v3 = vld [vmem:[#allocation2 + $0x1274] sm:$0xf0] }
 0x58b   :  { %7721 = vmatpush.bf16.msrb.mxu0 %v10122_v54  ;;  %7686 = vmatpush.bf16.msra.mxu1 %v9226_v30  ;;  %v7599_v53 = vpop.f32.mrf.mxu2  ;;  %v10378_v54 = vor.u32 %v11094_v37, %v10377_v27  ;;  %v7480_v30 = vpop.f32.mrf.mxu1  ;;  %v8619_v34 = vld [vmem:[#allocation2 + $0x578] sm:$0xf0]  ;;  %v10249_v28 = vld [vmem:[#allocation2 + $0x1218] sm:$0xf] }
 0x58c   :  { %v14986_v41 = vadd.f32 %v7480_v30, %v14979_v55  ;;  %v8622_v21 = vor.u32 %v10650_v10, %v8619_v34  ;;  %v11066_v29 = vld [vmem:[#allocation2 + $0x125c] sm:$0xf]  ;;  %v11062_v31 = vld [vmem:[#allocation2 + $0x1234] sm:$0xf0] }
 0x58d   :  { %7851 = vmatpush.bf16.msrb.mxu2 %v10126_v7  ;;  %7816 = vmatpush.bf16.msra.mxu3 %v9230_v46  ;;  %v11086_v7 = vld [vmem:[#allocation2 + $0x12f4] sm:$0xf0]  ;;  %v8651_v46 = vld [vmem:[#allocation2 + $0x5b8] sm:$0xf0] }
 0x58e   :  { %7687 = vmatmul.bf16.vlgmr.msra.gmra.mxu1 %v15367_v11  ;;  %v10346_v14 = vor.u32 %v11086_v7, %v10345_v26  ;;  %v10283_v25 = vld [vmem:[#allocation2 + $0x1278] sm:$0xf0] }
 0x58f   :  { %7731 = vmatpush.bf16.msrb.mxu1 %v10474_v61  ;;  %7722 = vmatpush.bf16.msrb.mxu0 %v10090_v42  ;;  %v11082_v61 = vld [vmem:[#allocation2 + $0x12dc] sm:$0xf]  ;;  %v10313_v42 = vld [vmem:[#allocation2 + $0x1298] sm:$0xf]  ;;  %v10286_v58 = vor.u32 %v11066_v29, %v10283_v25 }
 0x590   :  { %7817 = vmatmul.bf16.vlgmr.msra.gmra.mxu3 %v15367_v11  ;;  %v10666_v11 = vld [vmem:[#allocation2 + $0x5dc] sm:$0xf]  ;;  %v10350_v52 = vor.u32 %v11082_v61, %v10347_v0  ;;  %v10314_v55 = vor.u32 %v11078_v38, %v10313_v42 }
 0x591   :  { %7852 = vmatpush.bf16.msrb.mxu2 %v10094_v62  ;;  %7861 = vmatpush.bf16.msrb.mxu3 %v10478_v57  ;;  %v8686_v49 = vor.u32 %v10666_v11, %v8683_v44  ;;  %v8654_v62 = vor.u32 %v10658_v22, %v8651_v46  ;;  %v11074_v57 = vld [vmem:[#allocation2 + $0x129c] sm:$0xf] }
 0x592   :  { %v8587_v63 = vld [vmem:[#allocation2 + $0x538] sm:$0xf0] }
 0x593   :  { %7732 = vmatpush.bf16.msrb.mxu1 %v10442_v6  ;;  %7723 = vmatpush.bf16.msrb.mxu0 %v10058_v51  ;;  %v14990_v16 = vpop.f32.mrf.mxu3  ;;  %v7482_v6 = vpop.f32.mrf.mxu1  ;;  %v10318_v51 = vor.u32 %v11074_v57, %v10315_v36  ;;  %v8939_v23 = vld [vmem:[#allocation2 + $0x7f8] sm:$0xf0] }
 0x594   :  { %v10251_v27 = vld [vmem:[#allocation2 + $0x1238] sm:$0xf0] }
 0x595   :  { %7853 = vmatpush.bf16.msrb.mxu2 %v10062_v59  ;;  %7862 = vmatpush.bf16.msrb.mxu3 %v10446_v4  ;;  %v10282_v59 = vor.u32 %v11070_v3, %v10281_v17  ;;  %v10642_v4 = vld [vmem:[#allocation2 + $0x51c] sm:$0xf] }
 0x596   :  { %v8555_v56 = vld [vmem:[#allocation2 + $0x4f8] sm:$0xf0] }
 0x597   :  { %7733 = vmatpush.bf16.msrb.mxu1 %v10410_v20  ;;  %7724 = vmatpush.bf16.msrb.mxu0 %v10026_v32  ;;  %v8590_v20 = vor.u32 %v10642_v4, %v8587_v63  ;;  %v11058_v32 = vld [vmem:[#allocation2 + $0x121c] sm:$0xf] }
 0x598   :  { %v10254_v45 = vor.u32 %v11058_v32, %v10251_v27  ;;  %v10722_v8 = vld [vmem:[#allocation2 + $0x79c] sm:$0xf] }
 0x599   :  { %7854 = vmatpush.bf16.msrb.mxu2 %v10030_v47  ;;  %7863 = vmatpush.bf16.msrb.mxu3 %v10414_v5  ;;  %v10250_v47 = vor.u32 %v11062_v31, %v10249_v28  ;;  %v10634_v5 = vld [vmem:[#allocation2 + $0x4dc] sm:$0xf] }
 0x59a   :  { %v8907_v40 = vld [vmem:[#allocation2 + $0x7b8] sm:$0xf0]  ;;  %v8558_v53 = vor.u32 %v10634_v5, %v8555_v56 }
 0x59b   :  { %7734 = vmatpush.bf16.msrb.mxu1 %v10378_v54  ;;  %7725 = vmatpush.bf16.msrb.mxu0 %v9994_v43  ;;  %v7519_v18 = vpop.f32.mrf.mxu0  ;;  %v7612_v9 = vpop.f32.mrf.mxu3  ;;  %v10626_v54 = vld [vmem:[#allocation2 + $0x49c] sm:$0xf]  ;;  %v8910_v44 = vor.u32 %v10722_v8, %v8907_v40 }
 0x59c   :  { %v7520_v37 = vadd.f32 %v7519_v18, %v14964_v48  ;;  %v8523_v11 = vld [vmem:[#allocation2 + $0x4b8] sm:$0xf0] }
 0x59d   :  { %7855 = vmatpush.bf16.msrb.mxu2 %v9998_v12  ;;  %7864 = vmatpush.bf16.msrb.mxu3 %v10382_v35  ;;  %v10714_v48 = vld [vmem:[#allocation2 + $0x75c] sm:$0xf]  ;;  %v8526_v30 = vor.u32 %v10626_v54, %v8523_v11 }
 0x59e   :  { %7726 = vmatmul.bf16.vlgmr.msrb.gmra.mxu0 %v14763_v24  ;;  %v8875_v26 = vld [vmem:[#allocation2 + $0x778] sm:$0xf0] }
 0x59f   :  { %7770 = vmatpush.bf16.msra.mxu0 %v8686_v49  ;;  %7735 = vmatpush.bf16.msrb.mxu1 %v10346_v14  ;;  %v10618_v12 = vld [vmem:[#allocation2 + $0x45c] sm:$0xf]  ;;  %v8878_v49 = vor.u32 %v10714_v48, %v8875_v26 }
 0x5a0   :  { %7856 = vmatmul.bf16.vlgmr.msrb.gmra.mxu2 %v14763_v24  ;;  %v10730_v24 = vld [vmem:[#allocation2 + $0x7dc] sm:$0xf] }
 0x5a1   :  { %7865 = vmatpush.bf16.msrb.mxu3 %v10350_v52  ;;  %v8942_v39 = vor.u32 %v10730_v24, %v8939_v23  ;;  %v8491_v35 = vld [vmem:[#allocation2 + $0x478] sm:$0xf0] }
 0x5a2   :  { %v10706_v61 = vld [vmem:[#allocation2 + $0x71c] sm:$0xf]  ;;  %v8494_v14 = vor.u32 %v10618_v12, %v8491_v35 }
 0x5a3   :  { %7771 = vmatpush.bf16.msra.mxu0 %v8654_v62  ;;  %7736 = vmatpush.bf16.msrb.mxu1 %v10314_v55  ;;  %v14993_v43 = vpop.f32.mrf.mxu2  ;;  %v7521_v7 = vpop.f32.mrf.mxu0  ;;  %v8843_v0 = vld [vmem:[#allocation2 + $0x738] sm:$0xf0] }
 0x5a4   :  { %v10610_v22 = vld [vmem:[#allocation2 + $0x41c] sm:$0xf]  ;;  %v8846_v42 = vor.u32 %v10706_v61, %v8843_v0 }
 0x5a5   :  { %7866 = vmatpush.bf16.msrb.mxu3 %v10318_v51  ;;  %v8459_v46 = vld [vmem:[#allocation2 + $0x438] sm:$0xf0] }
 0x5a6   :  { %v10922_v38 = vld [vmem:[#allocation2 + $0xddc] sm:$0xf]  ;;  %v8462_v10 = vor.u32 %v10610_v22, %v8459_v46 }
 0x5a7   :  { %7772 = vmatpush.bf16.msra.mxu0 %v8622_v21  ;;  %7737 = vmatpush.bf16.msrb.mxu1 %v10282_v59  ;;  %v9707_v52 = vld [vmem:[#allocation2 + $0xdf8] sm:$0xf0] }
 0x5a8   :  { %v10698_v57 = vld [vmem:[#allocation2 + $0x6dc] sm:$0xf] }
 0x5a9   :  { %7867 = vmatpush.bf16.msrb.mxu3 %v10286_v58  ;;  %v8811_v36 = vld [vmem:[#allocation2 + $0x6f8] sm:$0xf0] }
 0x5aa   :  { %v8814_v17 = vor.u32 %v10698_v57, %v8811_v36  ;;  %v10914_v3 = vld [vmem:[#allocation2 + $0xd9c] sm:$0xf] }
 0x5ab   :  { %7773 = vmatpush.bf16.msra.mxu0 %v8590_v20  ;;  %7738 = vmatpush.bf16.msrb.mxu1 %v10250_v47  ;;  %v7651_v62 = vpop.f32.mrf.mxu2  ;;  %v7532_v55 = vpop.f32.mrf.mxu1  ;;  %v9675_v6 = vld [vmem:[#allocation2 + $0xdb8] sm:$0xf0] }
 0x5ac   :  { %v7533_v34 = vadd.f32 %v7532_v55, %v7520_v37  ;;  %v10690_v21 = vld [vmem:[#allocation2 + $0x69c] sm:$0xf]  ;;  %v9678_v25 = vor.u32 %v10914_v3, %v9675_v6 }
 0x5ad   :  { %7868 = vmatpush.bf16.msrb.mxu3 %v10254_v45  ;;  %v8779_v29 = vld [vmem:[#allocation2 + $0x6b8] sm:$0xf0] }
 0x5ae   :  { %7739 = vmatmul.bf16.vlgmr.msrb.gmra.mxu1 %v14798_v33  ;;  %v7546_v51 = vadd.f32 %v14968_v50, %v7533_v34  ;;  %v8782_v4 = vor.u32 %v10690_v21, %v8779_v29  ;;  %v10906_v63 = vld [vmem:[#allocation2 + $0xd5c] sm:$0xf] }
 0x5af   :  { %7783 = vmatpush.bf16.msra.mxu1 %v8942_v39  ;;  %7774 = vmatpush.bf16.msra.mxu0 %v8558_v53  ;;  %v9643_v28 = vld [vmem:[#allocation2 + $0xd78] sm:$0xf0] }
 0x5b0   :  { %7869 = vmatmul.bf16.vlgmr.msrb.gmra.mxu3 %v14798_v33  ;;  %v9710_v33 = vor.u32 %v10922_v38, %v9707_v52  ;;  %v7559_v59 = vadd.f32 %v14977_v2, %v7546_v51  ;;  %v10682_v58 = vld [vmem:[#allocation2 + $0x65c] sm:$0xf]  ;;  %v9646_v50 = vor.u32 %v10906_v63, %v9643_v28 }
 0x5b1   :  { %v8747_v24 = vld [vmem:[#allocation2 + $0x678] sm:$0xf0] }
 0x5b2   :  { %v8750_v18 = vor.u32 %v10682_v58, %v8747_v24  ;;  %v10898_v20 = vld [vmem:[#allocation2 + $0xd1c] sm:$0xf] }
 0x5b3   :  { %7784 = vmatpush.bf16.msra.mxu1 %v8910_v44  ;;  %7775 = vmatpush.bf16.msra.mxu0 %v8526_v30  ;;  %v15000_v31 = vpop.f32.mrf.mxu3  ;;  %v7534_v23 = vpop.f32.mrf.mxu1  ;;  %v9611_v32 = vld [vmem:[#allocation2 + $0xd38] sm:$0xf0] }
 0x5b4   :  { %v10674_v27 = vld [vmem:[#allocation2 + $0x61c] sm:$0xf]  ;;  %v9614_v5 = vor.u32 %v10898_v20, %v9611_v32  ;;  %v11130_v20 = vld [vmem:[#allocation5] sm:$0xff] }
 0x5b5   :  { %v8715_v37 = vld [vmem:[#allocation2 + $0x638] sm:$0xf0]  ;;  %v2461_v32 = vperm.slane %v11130_v20, 6 }
 0x5b6   :  { %v10986_v2 = vld [vmem:[#allocation2 + $0xfdc] sm:$0xf] }
 0x5b7   :  { %7785 = vmatpush.bf16.msra.mxu1 %v8878_v49  ;;  %7776 = vmatpush.bf16.msra.mxu0 %v8494_v14  ;;  %v9963_v47 = vld [vmem:[#allocation2 + $0xff8] sm:$0xf0] }
 0x5b8   :  { %v10890_v9 = vld [vmem:[#allocation2 + $0xcdc] sm:$0xf]  ;;  %v9966_v40 = vor.u32 %v10986_v2, %v9963_v47 }
 0x5b9   :  { %v9579_v39 = vld [vmem:[#allocation2 + $0xcf8] sm:$0xf0] }
 0x5ba   :  { %v10978_v53 = vld [vmem:[#allocation2 + $0xf9c] sm:$0xf]  ;;  %v9582_v11 = vor.u32 %v10890_v9, %v9579_v39 }
 0x5bb   :  { %7786 = vmatpush.bf16.msra.mxu1 %v8846_v42  ;;  %7777 = vmatpush.bf16.msra.mxu0 %v8462_v10  ;;  %v7571_v56 = vpop.f32.mrf.mxu0  ;;  %v7664_v8 = vpop.f32.mrf.mxu3  ;;  %v9931_v54 = vld [vmem:[#allocation2 + $0xfb8] sm:$0xf0] }
 0x5bc   :  { %v7572_v45 = vadd.f32 %v7571_v56, %v7559_v59  ;;  %v10882_v44 = vld [vmem:[#allocation2 + $0xc9c] sm:$0xf]  ;;  %v9934_v26 = vor.u32 %v10978_v53, %v9931_v54 }
 0x5bd   :  { %v9547_v48 = vld [vmem:[#allocation2 + $0xcb8] sm:$0xf0] }
 0x5be   :  { %7778 = vmatmul.bf16.vlgmr.msra.gmra.mxu0 %v15360_v19  ;;  %v8718_v19 = vor.u32 %v10674_v27, %v8715_v37  ;;  %v10970_v30 = vld [vmem:[#allocation2 + $0xf5c] sm:$0xf]  ;;  %v9550_v35 = vor.u32 %v10882_v44, %v9547_v48 }
 0x5bf   :  { %7822 = vmatpush.bf16.msrb.mxu0 %v9710_v33  ;;  %7787 = vmatpush.bf16.msra.mxu1 %v8814_v17  ;;  %v9899_v12 = vld [vmem:[#allocation2 + $0xf78] sm:$0xf0] }
 0x5c0   :  { %v10874_v61 = vld [vmem:[#allocation2 + $0xc5c] sm:$0xf]  ;;  %v9902_v14 = vor.u32 %v10970_v30, %v9899_v12 }
 0x5c1   :  { %v9515_v0 = vld [vmem:[#allocation2 + $0xc78] sm:$0xf0] }
 0x5c2   :  { %v10962_v22 = vld [vmem:[#allocation2 + $0xf1c] sm:$0xf]  ;;  %v9518_v42 = vor.u32 %v10874_v61, %v9515_v0 }
 0x5c3   :  { %7823 = vmatpush.bf16.msrb.mxu0 %v9678_v25  ;;  %7788 = vmatpush.bf16.msra.mxu1 %v8782_v4  ;;  %v15002_v7 = vpop.f32.mrf.mxu2  ;;  %v7573_v49 = vpop.f32.mrf.mxu0  ;;  %v9867_v46 = vld [vmem:[#allocation2 + $0xf38] sm:$0xf0] }
 0x5c4   :  { %v10866_v38 = vld [vmem:[#allocation2 + $0xc1c] sm:$0xf]  ;;  %v9870_v62 = vor.u32 %v10962_v22, %v9867_v46 }
 0x5c5   :  { %v9483_v52 = vld [vmem:[#allocation2 + $0xc38] sm:$0xf0] }
 0x5c6   :  { %v10954_v36 = vld [vmem:[#allocation2 + $0xedc] sm:$0xf]  ;;  %v9486_v10 = vor.u32 %v10866_v38, %v9483_v52 }
 0x5c7   :  { %7824 = vmatpush.bf16.msrb.mxu0 %v9646_v50  ;;  %7789 = vmatpush.bf16.msra.mxu1 %v8750_v18  ;;  %v9835_v55 = vld [vmem:[#allocation2 + $0xef8] sm:$0xf0] }
 0x5c8   :  { %v9838_v33 = vor.u32 %v10954_v36, %v9835_v55  ;;  %v10946_v17 = vld [vmem:[#allocation2 + $0xe9c] sm:$0xf] }
 0x5c9   :  { %v9803_v3 = vld [vmem:[#allocation2 + $0xeb8] sm:$0xf0] }
 0x5ca   :  { %v9806_v21 = vor.u32 %v10946_v17, %v9803_v3  ;;  %v10938_v29 = vld [vmem:[#allocation2 + $0xe5c] sm:$0xf] }
 0x5cb   :  { %7825 = vmatpush.bf16.msrb.mxu0 %v9614_v5  ;;  %7790 = vmatpush.bf16.msra.mxu1 %v8718_v19  ;;  %v7703_v57 = vpop.f32.mrf.mxu2  ;;  %v9771_v25 = vld [vmem:[#allocation2 + $0xe78] sm:$0xf0]  ;;  %v2462_v5 = vperm.slane %v11130_v20, 7 }
 0x5cc   :  { %v9774_v28 = vor.u32 %v10938_v29, %v9771_v25  ;;  %v10930_v24 = vld [vmem:[#allocation2 + $0xe1c] sm:$0xf] }
 0x5ce   :  { %7791 = vmatmul.bf16.vlgmr.msra.gmra.mxu1 %v15361_v13  ;;  %v7584_v13 = vpop.f32.mrf.mxu1 }
 0x5cf   :  { %7835 = vmatpush.bf16.msrb.mxu1 %v9966_v40  ;;  %7826 = vmatpush.bf16.msrb.mxu0 %v9582_v11  ;;  %v7585_v34 = vadd.f32 %v7584_v13, %v7572_v45 }
 0x5d1   :  { %v7598_v6 = vadd.f32 %v14981_v1, %v7585_v34  ;;  %v9739_v1 = vld [vmem:[#allocation2 + $0xe38] sm:$0xf0] }
 0x5d3   :  { %7836 = vmatpush.bf16.msrb.mxu1 %v9934_v26  ;;  %7827 = vmatpush.bf16.msrb.mxu0 %v9550_v35  ;;  %v7611_v51 = vadd.f32 %v14990_v16, %v7598_v6  ;;  %v7714_v4 = vpop.f32.mrf.mxu3  ;;  %v9742_v16 = vor.u32 %v10930_v24, %v9739_v1 }
 0x5d5   :  { %v7885_v59 = vrot.slane %v7611_v51, 6 }
 0x5d6   :  { %v7586_v63 = vpop.f32.mrf.mxu1 }
 0x5d7   :  { %7837 = vmatpush.bf16.msrb.mxu1 %v9902_v14  ;;  %7828 = vmatpush.bf16.msrb.mxu0 %v9518_v42  ;;  %v15010_v58 = vsel %vm7888_vm6, %v14986_v41, %v7885_v59 }
 0x5db   :  { %7838 = vmatpush.bf16.msrb.mxu1 %v9870_v62  ;;  %7829 = vmatpush.bf16.msrb.mxu0 %v9486_v10  ;;  %v7623_v23 = vpop.f32.mrf.mxu0  ;;  %v7716_v50 = vpop.f32.mrf.mxu3 }
 0x5dc   :  { %v7624_v27 = vadd.f32 %v7623_v23, %v2461_v32 }
 0x5de   :  { %7830 = vmatmul.bf16.vlgmr.msrb.gmra.mxu0 %v15362_v60 }
 0x5df   :  { %7839 = vmatpush.bf16.msrb.mxu1 %v9838_v33 }
 0x5e3   :  { %7840 = vmatpush.bf16.msrb.mxu1 %v9806_v21  ;;  %v7753_v18 = vpop.f32.mrf.mxu2  ;;  %v7625_v60 = vpop.f32.mrf.mxu0 }
 0x5e4   :  { %v7754_v19 = vadd.f32 %v7753_v18, %v2462_v5 }
 0x5e7   :  { %7841 = vmatpush.bf16.msrb.mxu1 %v9774_v28 }
 0x5eb   :  { %7842 = vmatpush.bf16.msrb.mxu1 %v9742_v16  ;;  %v7755_v37 = vpop.f32.mrf.mxu2  ;;  %v7636_v2 = vpop.f32.mrf.mxu1 }
 0x5ec   :  { %v7637_v47 = vadd.f32 %v7636_v2, %v7624_v27 }
 0x5ee   :  { %7843 = vmatmul.bf16.vlgmr.msrb.gmra.mxu1 %v15363_v15  ;;  %v7650_v41 = vadd.f32 %v14993_v43, %v7637_v47 }
 0x5f0   :  { %v7663_v56 = vadd.f32 %v15000_v31, %v7650_v41 }
 0x5f3   :  { %v7766_v9 = vpop.f32.mrf.mxu3  ;;  %v7638_v45 = vpop.f32.mrf.mxu1 }
 0x5f4   :  { %v7767_v39 = vadd.f32 %v7766_v9, %v7754_v19 }
 0x5fb   :  { %v7675_v8 = vpop.f32.mrf.mxu0  ;;  %v7768_v53 = vpop.f32.mrf.mxu3 }
 0x5fc   :  { %v7676_v40 = vadd.f32 %v7675_v8, %v7663_v56 }
 0x603   :  { %v7805_v15 = vpop.f32.mrf.mxu2  ;;  %v7677_v54 = vpop.f32.mrf.mxu0 }
 0x60b   :  { %v7807_v11 = vpop.f32.mrf.mxu2  ;;  %v7688_v44 = vpop.f32.mrf.mxu1 }
 0x60c   :  { %v7689_v48 = vadd.f32 %v7688_v44, %v7676_v40 }
 0x60e   :  { %v7702_v26 = vadd.f32 %v15002_v7, %v7689_v48 }
 0x610   :  { %v7715_v30 = vadd.f32 %v7714_v4, %v7702_v26 }
 0x613   :  { %v7818_v12 = vpop.f32.mrf.mxu3  ;;  %v7690_v35 = vpop.f32.mrf.mxu1 }
 0x61b   :  { %v7727_v43 = vpop.f32.mrf.mxu0  ;;  %v7820_v31 = vpop.f32.mrf.mxu3 }
 0x61c   :  { %v7728_v49 = vadd.f32 %v7727_v43, %v7715_v30 }
 0x623   :  { %v7857_v61 = vpop.f32.mrf.mxu2  ;;  %v7729_v0 = vpop.f32.mrf.mxu0 }
 0x62b   :  { %v7859_v14 = vpop.f32.mrf.mxu2  ;;  %v7740_v22 = vpop.f32.mrf.mxu1 }
 0x62c   :  { %v7741_v51 = vadd.f32 %v7740_v22, %v7728_v49 }
 0x62e   :  { %v7886_v25 = vrot.slane %v7741_v51, 4 }
 0x633   :  { %v7870_v46 = vpop.f32.mrf.mxu3  ;;  %v7742_v42 = vpop.f32.mrf.mxu1 }
 0x63b   :  { %v7779_v38 = vpop.f32.mrf.mxu0  ;;  %v7872_v52 = vpop.f32.mrf.mxu3 }
 0x63c   :  { %v7780_v57 = vadd.f32 %v7779_v38, %v7767_v39 }
 0x643   :  { %v7781_v62 = vpop.f32.mrf.mxu0 }
 0x64b   :  { %v7792_v36 = vpop.f32.mrf.mxu1 }
 0x64c   :  { %v7793_v55 = vadd.f32 %v7792_v36, %v7780_v57 }
 0x64e   :  { %v7806_v10 = vadd.f32 %v7805_v15, %v7793_v55 }
 0x650   :  { %v7819_v7 = vadd.f32 %v7818_v12, %v7806_v10 }
 0x653   :  { %v7794_v13 = vpop.f32.mrf.mxu1 }
 0x65b   :  { %v7831_v34 = vpop.f32.mrf.mxu0 }
 0x65c   :  { %v7832_v17 = vadd.f32 %v7831_v34, %v7819_v7 }
 0x663   :  { %v7833_v33 = vpop.f32.mrf.mxu0 }
 0x66b   :  { %v7844_v3 = vpop.f32.mrf.mxu1 }
 0x66c   :  { %v7845_v6 = vadd.f32 %v7844_v3, %v7832_v17 }
 0x66e   :  { %v7858_v21 = vadd.f32 %v7857_v61, %v7845_v6 }
 0x670   :  { %v7871_v29 = vadd.f32 %v7870_v46, %v7858_v21 }
 0x672   :  { %v7887_v59 = vrot.slane %v7871_v29, 2 }
 0x673   :  { %v7846_v4 = vpop.f32.mrf.mxu1 }
 0x674   :  { %v7895_v63 = vsel %vm7890_vm7, %v7886_v25, %v7887_v59 }
 0x675   :  { %v7896_v28 = vsel %vm7892_vm8, %v15010_v58, %v7895_v63 }
 0x676   :  { %7900 = vst [vmem:[#allocation7 + $0x8] sm:$0xff] %v7896_v28 }
 0x677   :  { %7911 = dma.vmem_to_hbm [thread:$0]  %s7907_s25, 256, %s7909_s27, [#allocation4]  }
 0x678   :  { %11207 = dma.done.wait [#allocation4], 256  }
 0x679   :  { %11208 = vsyncadd [#allocation4], 4294967040 }
 0x67a   :  { %7916 = vsyncpa [#allocation3], 1 }
 0x67b   :  { %7917 = vsyncpa [#allocation6], 1 }
 0x67c   :  { %7918 = vsyncpa [#allocation4], 1 }

</bundles_post_ra>
